<compile_context>
chip_gen: v5e
topology: v5e:2x2
jax: 0.10.0
libtpu: 0.0.40
codegen_flags: <defaults>
</compile_context>

<pallas_src>
import math

import numpy as np

import jax
import jax.numpy as jnp
from jax.experimental import pallas as pl
from jax.experimental.pallas import tpu as pltpu

_EPS = 1e-5
_SQRT1_2 = 1.0 / math.sqrt(2.0)


# ----------------------------------------------------------------------------
# Pallas kernels
# ----------------------------------------------------------------------------

def _conv1x1_gn_kernel(x_ref, w_ref, b_ref, m_ref, g_ref, beta_ref, o_ref):
    """Fused 1x1 conv (channel matmul) + bias + GroupNorm for one image.

    x_ref   : (1, HW, Cin)   activations, channels on lanes
    w_ref   : (Cin, Cout)    weight
    b_ref   : (1, Cout)      bias
    m_ref   : (Cout, Cout)   group-membership matrix scaled by 1/(cg*HW)
    g_ref   : (1, Cout)      GroupNorm gamma
    beta_ref: (1, Cout)      GroupNorm beta
    o_ref   : (1, HW, Cout)
    """
    x = x_ref[0]                                                    # (HW, Cin)
    y = jnp.dot(x, w_ref[...], preferred_element_type=jnp.float32)
    y = y + b_ref[...]

    # GroupNorm over (group channels x HW) of this image, fused in the epilogue.
    s = jnp.sum(y, axis=0, keepdims=True)                           # (1, C)
    q = jnp.sum(y * y, axis=0, keepdims=True)                       # (1, C)
    mean = jnp.dot(s, m_ref[...], preferred_element_type=jnp.float32)
    ex2 = jnp.dot(q, m_ref[...], preferred_element_type=jnp.float32)
    var = ex2 - mean * mean
    y = (y - mean) * jax.lax.rsqrt(var + _EPS)
    y = y * g_ref[...] + beta_ref[...]

    o_ref[0] = y


def _gconv3x3_gn_gelu_kernel(x_ref, w_ref, b_ref, m_ref, g_ref, beta_ref,
                             o_ref):
    """Fused grouped 3x3 conv + bias + GroupNorm + exact GELU for one image.

    x_ref : (1, H+2, W+2, C)  zero-padded NHWC image
    w_ref : (9, C, C)         block-diagonal per-tap weights, [tap, cin, cout]
    others as in _conv1x1_gn_kernel.
    """
    xp = x_ref[0]                                                   # (H+2, W+2, C)
    hp2, wp2, c = xp.shape
    h, w = hp2 - 2, wp2 - 2

    acc = jnp.zeros((h * w, c), jnp.float32)
    for kh in range(3):                                             # 9 shifted taps
        for kw in range(3):
            tap = xp[kh:kh + h, kw:kw + w, :].reshape(h * w, c)
            acc = acc + jnp.dot(tap, w_ref[kh * 3 + kw],
                                preferred_element_type=jnp.float32)
    y = acc + b_ref[...]

    # GroupNorm
    s = jnp.sum(y, axis=0, keepdims=True)
    q = jnp.sum(y * y, axis=0, keepdims=True)
    mean = jnp.dot(s, m_ref[...], preferred_element_type=jnp.float32)
    ex2 = jnp.dot(q, m_ref[...], preferred_element_type=jnp.float32)
    var = ex2 - mean * mean
    y = (y - mean) * jax.lax.rsqrt(var + _EPS)
    y = y * g_ref[...] + beta_ref[...]

    # Exact (erf) GELU to match nn.GELU default.
    y = 0.5 * y * (1.0 + jax.lax.erf(y * _SQRT1_2))

    o_ref[0] = y


# ----------------------------------------------------------------------------
# pallas_call wrappers
# ----------------------------------------------------------------------------

def conv1x1_gn(x_rows, w, b, mn, gamma, beta):
    """x_rows: (B, HW, Cin) -> (B, HW, Cout). Channels kept at full extent."""
    bsz, hw, cin = x_rows.shape
    cout = w.shape[1]
    return pl.pallas_call(
        _conv1x1_gn_kernel,
        out_shape=jax.ShapeDtypeStruct((bsz, hw, cout), jnp.float32),
        grid=(bsz,),
        in_specs=[
            pl.BlockSpec((1, hw, cin), lambda i: (i, 0, 0)),
            pl.BlockSpec((cin, cout), lambda i: (0, 0)),
            pl.BlockSpec((1, cout), lambda i: (0, 0)),
            pl.BlockSpec((cout, cout), lambda i: (0, 0)),
            pl.BlockSpec((1, cout), lambda i: (0, 0)),
            pl.BlockSpec((1, cout), lambda i: (0, 0)),
        ],
        out_specs=pl.BlockSpec((1, hw, cout), lambda i: (i, 0, 0)),
        compiler_params=pltpu.CompilerParams(
            dimension_semantics=("parallel",)),
    )(x_rows, w, b, mn, gamma, beta)


def gconv3x3_gn_gelu(x_rows, h, w, tap_w, b, mn, gamma, beta):
    """x_rows: (B, HW, C) -> (B, HW, C) via grouped 3x3 conv + GN + GELU."""
    bsz, hw, c = x_rows.shape
    x_img = x_rows.reshape(bsz, h, w, c)
    # Small border pad only (not the old 9x im2col / 128-pad blowups).
    xpad = jnp.pad(x_img, ((0, 0), (1, 1), (1, 1), (0, 0)))
    return pl.pallas_call(
        _gconv3x3_gn_gelu_kernel,
        out_shape=jax.ShapeDtypeStruct((bsz, hw, c), jnp.float32),
        grid=(bsz,),
        in_specs=[
            pl.BlockSpec((1, h + 2, w + 2, c), lambda i: (i, 0, 0, 0)),
            pl.BlockSpec((9, c, c), lambda i: (0, 0, 0)),
            pl.BlockSpec((1, c), lambda i: (0, 0)),
            pl.BlockSpec((c, c), lambda i: (0, 0)),
            pl.BlockSpec((1, c), lambda i: (0, 0)),
            pl.BlockSpec((1, c), lambda i: (0, 0)),
        ],
        out_specs=pl.BlockSpec((1, hw, c), lambda i: (i, 0, 0)),
        compiler_params=pltpu.CompilerParams(
            dimension_semantics=("parallel",)),
    )(xpad, tap_w, b, mn, gamma, beta)


def mlp_forward(params, x_nchw):
    """Forward pass of Mlp.  Input/output NCHW (PyTorch layout); all internal
    work is NHWC (channels on the lane axis)."""
    bsz, cin, h, w = x_nchw.shape
    x = jnp.transpose(x_nchw, (0, 2, 3, 1)).reshape(bsz, h * w, cin)

    p = params
    hdn = conv1x1_gn(x, p["w1"], p["b1"], p["mn1"], p["g1"], p["beta1"])
    hdn = gconv3x3_gn_gelu(hdn, h, w, p["wdw"], p["bdw"], p["mn2"],
                           p["g2"], p["beta2"])
    y = conv1x1_gn(hdn, p["w2"], p["b2"], p["mn3"], p["g3"], p["beta3"])

    cout = p["w2"].shape[1]
    return jnp.transpose(y.reshape(bsz, h, w, cout), (0, 3, 1, 2))


# ----------------------------------------------------------------------------
# Parameter construction (deterministic, synthetic) + plain-JAX reference
# ----------------------------------------------------------------------------

def make_mlp_params(in_features, out_features, hw, seed=0):
    rng = np.random.RandomState(seed)
    hidden = out_features // 4
    g_conv = hidden // 4          # DWConv groups (group_num = 4)
    cg = 4                        # channels per GroupNorm group (C // (C//4))

    def normal(shape, std):
        return rng.normal(0.0, std, size=shape).astype(np.float32)

    # torch-layout params (used by the plain-JAX reference)
    tp = {
        "hidden": hidden, "out": out_features,
        "fc1_w": normal((hidden, in_features), 0.1),
        "fc1_b": normal((hidden,), 0.05),
        "dw_w": normal((hidden, hidden // g_conv, 3, 3), 0.1),
        "dw_b": normal((hidden,), 0.05),
        "fc2_w": normal((out_features, hidden), 0.1),
        "fc2_b": normal((out_features,), 0.05),
        "gn1_g": 1.0 + normal((hidden,), 0.1), "gn1_b": normal((hidden,), 0.1),
        "gn2_g": 1.0 + normal((hidden,), 0.1), "gn2_b": normal((hidden,), 0.1),
        "gn3_g": 1.0 + normal((out_features,), 0.1),
        "gn3_b": normal((out_features,), 0.1),
    }

    def group_mean_mat(c):
        idx = np.arange(c) // cg
        return ((idx[:, None] == idx[None, :]).astype(np.float32)
                / float(cg * hw))

    # Block-diagonal per-tap weights for the grouped 3x3 conv: [tap, cin, cout]
    in_g = hidden // g_conv
    tap_w = np.zeros((9, hidden, hidden), np.float32)
    for kh in range(3):
        for kw in range(3):
            t = kh * 3 + kw
            for g in range(g_conv):
                blk = tp["dw_w"][g * in_g:(g + 1) * in_g, :, kh, kw]  # (out_g, in_g)
                tap_w[t, g * in_g:(g + 1) * in_g,
                      g * in_g:(g + 1) * in_g] = blk.T

    pp = {
        "w1": jnp.asarray(tp["fc1_w"].T), "b1": jnp.asarray(tp["fc1_b"][None]),
        "mn1": jnp.asarray(group_mean_mat(hidden)),
        "g1": jnp.asarray(tp["gn1_g"][None]),
        "beta1": jnp.asarray(tp["gn1_b"][None]),
        "wdw": jnp.asarray(tap_w), "bdw": jnp.asarray(tp["dw_b"][None]),
        "mn2": jnp.asarray(group_mean_mat(hidden)),
        "g2": jnp.asarray(tp["gn2_g"][None]),
        "beta2": jnp.asarray(tp["gn2_b"][None]),
        "w2": jnp.asarray(tp["fc2_w"].T), "b2": jnp.asarray(tp["fc2_b"][None]),
        "mn3": jnp.asarray(group_mean_mat(out_features)),
        "g3": jnp.asarray(tp["gn3_g"][None]),
        "beta3": jnp.asarray(tp["gn3_b"][None]),
    }
    return pp, tp


def mlp_reference(tp, x):
    """Plain-JAX (XLA) reference matching the PyTorch module in eval mode."""
    def conv1x1(x, w, b):
        return jnp.einsum("bihw,oi->bohw", x, w) + b[None, :, None, None]

    def gn(x, gamma, beta, groups):
        bsz, c, h, w = x.shape
        xr = x.reshape(bsz, groups, -1)
        m = xr.mean(-1, keepdims=True)
        v = ((xr - m) ** 2).mean(-1, keepdims=True)
        xr = (xr - m) / jnp.sqrt(v + _EPS)
        x = xr.reshape(bsz, c, h, w)
        return x * gamma[None, :, None, None] + beta[None, :, None, None]

    hdn = conv1x1(x, tp["fc1_w"], tp["fc1_b"])
    hdn = gn(hdn, tp["gn1_g"], tp["gn1_b"], tp["hidden"] // 4)
    hdn = jax.lax.conv_general_dilated(
        hdn, tp["dw_w"], window_strides=(1, 1), padding=((1, 1), (1, 1)),
        dimension_numbers=("NCHW", "OIHW", "NCHW"),
        feature_group_count=tp["hidden"] // 4)
    hdn = hdn + tp["dw_b"][None, :, None, None]
    hdn = gn(hdn, tp["gn2_g"], tp["gn2_b"], tp["hidden"] // 4)
    hdn = jax.nn.gelu(hdn, approximate=False)
    y = conv1x1(hdn, tp["fc2_w"], tp["fc2_b"])
    y = gn(y, tp["gn3_g"], tp["gn3_b"], tp["out"] // 4)
    return y


# ----------------------------------------------------------------------------
# Main
# ----------------------------------------------------------------------------

if __name__ == "__main__":
    BATCH, IN_F, OUT_F, H, W = 2, 32, 64, 16, 16   # hidden = 16, groups = 4

    pallas_params, torch_params = make_mlp_params(IN_F, OUT_F, H * W, seed=0)

    key = jax.random.PRNGKey(0)
    x = jax.random.normal(key, (BATCH, IN_F, H, W), dtype=jnp.float32)

    fwd = jax.jit(mlp_forward)
    out = jax.block_until_ready(fwd(pallas_params, x))

    assert out.shape == (BATCH, OUT_F, H, W), out.shape
    assert bool(jnp.all(jnp.isfinite(out)))

    ref = mlp_reference(torch_params, x)
    np.testing.assert_allclose(np.asarray(out), np.asarray(ref),
                               rtol=2e-3, atol=2e-3)
    print("KERNEL_OK")
</pallas_src>

<mosaic_0001>
module attributes {stable_mosaic.version = 11 : i64} {
  func.func @_gconv3x3_gn_gelu_kernel(%arg0: i32, %arg1: memref<1x18x18x16xf32, #tpu.memory_space<vmem>>, %arg2: memref<9x16x16xf32, #tpu.memory_space<vmem>>, %arg3: memref<1x16xf32, #tpu.memory_space<vmem>>, %arg4: memref<16x16xf32, #tpu.memory_space<vmem>>, %arg5: memref<1x16xf32, #tpu.memory_space<vmem>>, %arg6: memref<1x16xf32, #tpu.memory_space<vmem>>, %arg7: memref<1x256x16xf32, #tpu.memory_space<vmem>>) attributes {dimension_semantics = [#tpu.dimension_semantics<parallel>], iteration_bounds = array<i64: 2>, scalar_prefetch = 0 : i64, scratch_operands = 0 : i64, tpu.core_type = #tpu.core_type<tc>, window_params = [{transform_indices = @transform_0, window_bounds = array<i64: 1, 18, 18, 16>}, {pipeline_mode = #tpu.pipeline_mode<synchronous>, transform_indices = @transform_1, window_bounds = array<i64: 9, 16, 16>}, {pipeline_mode = #tpu.pipeline_mode<synchronous>, transform_indices = @transform_2, window_bounds = array<i64: 1, 16>}, {pipeline_mode = #tpu.pipeline_mode<synchronous>, transform_indices = @transform_3, window_bounds = array<i64: 16, 16>}, {pipeline_mode = #tpu.pipeline_mode<synchronous>, transform_indices = @transform_4, window_bounds = array<i64: 1, 16>}, {pipeline_mode = #tpu.pipeline_mode<synchronous>, transform_indices = @transform_5, window_bounds = array<i64: 1, 16>}, {transform_indices = @transform_6, window_bounds = array<i64: 1, 256, 16>}]} {
    %c0 = arith.constant 0 : index
    %c0_0 = arith.constant 0 : index
    %c0_1 = arith.constant 0 : index
    %c0_2 = arith.constant 0 : index
    %0 = vector.load %arg1[%c0, %c0_0, %c0_1, %c0_2] : memref<1x18x18x16xf32, #tpu.memory_space<vmem>>, vector<1x18x18x16xf32>
    %1 = vector.shape_cast %0 : vector<1x18x18x16xf32> to vector<18x18x16xf32>
    %cst = arith.constant 0.000000e+00 : f32
    %2 = vector.broadcast %cst : f32 to vector<256x16xf32>
    %3 = vector.extract_strided_slice %1 {offsets = [0, 0, 0], sizes = [16, 16, 16], strides = [1, 1, 1]} : vector<18x18x16xf32> to vector<16x16x16xf32>
    %4 = vector.shape_cast %3 : vector<16x16x16xf32> to vector<256x16xf32>
    %c0_3 = arith.constant 0 : index
    %c0_4 = arith.constant 0 : index
    %c0_5 = arith.constant 0 : index
    %5 = vector.load %arg2[%c0_3, %c0_4, %c0_5] : memref<9x16x16xf32, #tpu.memory_space<vmem>>, vector<1x16x16xf32>
    %6 = vector.shape_cast %5 : vector<1x16x16xf32> to vector<16x16xf32>
    %cst_6 = arith.constant dense<0.000000e+00> : vector<256x16xf32>
    %7 = tpu.matmul %4, %6, %cst_6 {dimension_numbers = #tpu.dot_dimension_numbers<[1], [0], [0], [1], [0, 0, 1, 1], [], []>} : vector<256x16xf32>, vector<16x16xf32>, vector<256x16xf32> -> vector<256x16xf32>
    %8 = arith.addf %2, %7 : vector<256x16xf32>
    %9 = vector.extract_strided_slice %1 {offsets = [0, 1, 0], sizes = [16, 16, 16], strides = [1, 1, 1]} : vector<18x18x16xf32> to vector<16x16x16xf32>
    %10 = vector.shape_cast %9 : vector<16x16x16xf32> to vector<256x16xf32>
    %c1 = arith.constant 1 : index
    %c0_7 = arith.constant 0 : index
    %c0_8 = arith.constant 0 : index
    %11 = vector.load %arg2[%c1, %c0_7, %c0_8] : memref<9x16x16xf32, #tpu.memory_space<vmem>>, vector<1x16x16xf32>
    %12 = vector.shape_cast %11 : vector<1x16x16xf32> to vector<16x16xf32>
    %cst_9 = arith.constant dense<0.000000e+00> : vector<256x16xf32>
    %13 = tpu.matmul %10, %12, %cst_9 {dimension_numbers = #tpu.dot_dimension_numbers<[1], [0], [0], [1], [0, 0, 1, 1], [], []>} : vector<256x16xf32>, vector<16x16xf32>, vector<256x16xf32> -> vector<256x16xf32>
    %14 = arith.addf %8, %13 : vector<256x16xf32>
    %15 = vector.extract_strided_slice %1 {offsets = [0, 2, 0], sizes = [16, 16, 16], strides = [1, 1, 1]} : vector<18x18x16xf32> to vector<16x16x16xf32>
    %16 = vector.shape_cast %15 : vector<16x16x16xf32> to vector<256x16xf32>
    %c2 = arith.constant 2 : index
    %c0_10 = arith.constant 0 : index
    %c0_11 = arith.constant 0 : index
    %17 = vector.load %arg2[%c2, %c0_10, %c0_11] : memref<9x16x16xf32, #tpu.memory_space<vmem>>, vector<1x16x16xf32>
    %18 = vector.shape_cast %17 : vector<1x16x16xf32> to vector<16x16xf32>
    %cst_12 = arith.constant dense<0.000000e+00> : vector<256x16xf32>
    %19 = tpu.matmul %16, %18, %cst_12 {dimension_numbers = #tpu.dot_dimension_numbers<[1], [0], [0], [1], [0, 0, 1, 1], [], []>} : vector<256x16xf32>, vector<16x16xf32>, vector<256x16xf32> -> vector<256x16xf32>
    %20 = arith.addf %14, %19 : vector<256x16xf32>
    %21 = vector.extract_strided_slice %1 {offsets = [1, 0, 0], sizes = [16, 16, 16], strides = [1, 1, 1]} : vector<18x18x16xf32> to vector<16x16x16xf32>
    %22 = vector.shape_cast %21 : vector<16x16x16xf32> to vector<256x16xf32>
    %c3 = arith.constant 3 : index
    %c0_13 = arith.constant 0 : index
    %c0_14 = arith.constant 0 : index
    %23 = vector.load %arg2[%c3, %c0_13, %c0_14] : memref<9x16x16xf32, #tpu.memory_space<vmem>>, vector<1x16x16xf32>
    %24 = vector.shape_cast %23 : vector<1x16x16xf32> to vector<16x16xf32>
    %cst_15 = arith.constant dense<0.000000e+00> : vector<256x16xf32>
    %25 = tpu.matmul %22, %24, %cst_15 {dimension_numbers = #tpu.dot_dimension_numbers<[1], [0], [0], [1], [0, 0, 1, 1], [], []>} : vector<256x16xf32>, vector<16x16xf32>, vector<256x16xf32> -> vector<256x16xf32>
    %26 = arith.addf %20, %25 : vector<256x16xf32>
    %27 = vector.extract_strided_slice %1 {offsets = [1, 1, 0], sizes = [16, 16, 16], strides = [1, 1, 1]} : vector<18x18x16xf32> to vector<16x16x16xf32>
    %28 = vector.shape_cast %27 : vector<16x16x16xf32> to vector<256x16xf32>
    %c4 = arith.constant 4 : index
    %c0_16 = arith.constant 0 : index
    %c0_17 = arith.constant 0 : index
    %29 = vector.load %arg2[%c4, %c0_16, %c0_17] : memref<9x16x16xf32, #tpu.memory_space<vmem>>, vector<1x16x16xf32>
    %30 = vector.shape_cast %29 : vector<1x16x16xf32> to vector<16x16xf32>
    %cst_18 = arith.constant dense<0.000000e+00> : vector<256x16xf32>
    %31 = tpu.matmul %28, %30, %cst_18 {dimension_numbers = #tpu.dot_dimension_numbers<[1], [0], [0], [1], [0, 0, 1, 1], [], []>} : vector<256x16xf32>, vector<16x16xf32>, vector<256x16xf32> -> vector<256x16xf32>
    %32 = arith.addf %26, %31 : vector<256x16xf32>
    %33 = vector.extract_strided_slice %1 {offsets = [1, 2, 0], sizes = [16, 16, 16], strides = [1, 1, 1]} : vector<18x18x16xf32> to vector<16x16x16xf32>
    %34 = vector.shape_cast %33 : vector<16x16x16xf32> to vector<256x16xf32>
    %c5 = arith.constant 5 : index
    %c0_19 = arith.constant 0 : index
    %c0_20 = arith.constant 0 : index
    %35 = vector.load %arg2[%c5, %c0_19, %c0_20] : memref<9x16x16xf32, #tpu.memory_space<vmem>>, vector<1x16x16xf32>
    %36 = vector.shape_cast %35 : vector<1x16x16xf32> to vector<16x16xf32>
    %cst_21 = arith.constant dense<0.000000e+00> : vector<256x16xf32>
    %37 = tpu.matmul %34, %36, %cst_21 {dimension_numbers = #tpu.dot_dimension_numbers<[1], [0], [0], [1], [0, 0, 1, 1], [], []>} : vector<256x16xf32>, vector<16x16xf32>, vector<256x16xf32> -> vector<256x16xf32>
    %38 = arith.addf %32, %37 : vector<256x16xf32>
    %39 = vector.extract_strided_slice %1 {offsets = [2, 0, 0], sizes = [16, 16, 16], strides = [1, 1, 1]} : vector<18x18x16xf32> to vector<16x16x16xf32>
    %40 = vector.shape_cast %39 : vector<16x16x16xf32> to vector<256x16xf32>
    %c6 = arith.constant 6 : index
    %c0_22 = arith.constant 0 : index
    %c0_23 = arith.constant 0 : index
    %41 = vector.load %arg2[%c6, %c0_22, %c0_23] : memref<9x16x16xf32, #tpu.memory_space<vmem>>, vector<1x16x16xf32>
    %42 = vector.shape_cast %41 : vector<1x16x16xf32> to vector<16x16xf32>
    %cst_24 = arith.constant dense<0.000000e+00> : vector<256x16xf32>
    %43 = tpu.matmul %40, %42, %cst_24 {dimension_numbers = #tpu.dot_dimension_numbers<[1], [0], [0], [1], [0, 0, 1, 1], [], []>} : vector<256x16xf32>, vector<16x16xf32>, vector<256x16xf32> -> vector<256x16xf32>
    %44 = arith.addf %38, %43 : vector<256x16xf32>
    %45 = vector.extract_strided_slice %1 {offsets = [2, 1, 0], sizes = [16, 16, 16], strides = [1, 1, 1]} : vector<18x18x16xf32> to vector<16x16x16xf32>
    %46 = vector.shape_cast %45 : vector<16x16x16xf32> to vector<256x16xf32>
    %c7 = arith.constant 7 : index
    %c0_25 = arith.constant 0 : index
    %c0_26 = arith.constant 0 : index
    %47 = vector.load %arg2[%c7, %c0_25, %c0_26] : memref<9x16x16xf32, #tpu.memory_space<vmem>>, vector<1x16x16xf32>
    %48 = vector.shape_cast %47 : vector<1x16x16xf32> to vector<16x16xf32>
    %cst_27 = arith.constant dense<0.000000e+00> : vector<256x16xf32>
    %49 = tpu.matmul %46, %48, %cst_27 {dimension_numbers = #tpu.dot_dimension_numbers<[1], [0], [0], [1], [0, 0, 1, 1], [], []>} : vector<256x16xf32>, vector<16x16xf32>, vector<256x16xf32> -> vector<256x16xf32>
    %50 = arith.addf %44, %49 : vector<256x16xf32>
    %51 = vector.extract_strided_slice %1 {offsets = [2, 2, 0], sizes = [16, 16, 16], strides = [1, 1, 1]} : vector<18x18x16xf32> to vector<16x16x16xf32>
    %52 = vector.shape_cast %51 : vector<16x16x16xf32> to vector<256x16xf32>
    %c8 = arith.constant 8 : index
    %c0_28 = arith.constant 0 : index
    %c0_29 = arith.constant 0 : index
    %53 = vector.load %arg2[%c8, %c0_28, %c0_29] : memref<9x16x16xf32, #tpu.memory_space<vmem>>, vector<1x16x16xf32>
    %54 = vector.shape_cast %53 : vector<1x16x16xf32> to vector<16x16xf32>
    %cst_30 = arith.constant dense<0.000000e+00> : vector<256x16xf32>
    %55 = tpu.matmul %52, %54, %cst_30 {dimension_numbers = #tpu.dot_dimension_numbers<[1], [0], [0], [1], [0, 0, 1, 1], [], []>} : vector<256x16xf32>, vector<16x16xf32>, vector<256x16xf32> -> vector<256x16xf32>
    %56 = arith.addf %50, %55 : vector<256x16xf32>
    %c0_31 = arith.constant 0 : index
    %c0_32 = arith.constant 0 : index
    %57 = vector.load %arg3[%c0_31, %c0_32] : memref<1x16xf32, #tpu.memory_space<vmem>>, vector<1x16xf32>
    %58 = vector.broadcast %57 : vector<1x16xf32> to vector<256x16xf32>
    %59 = arith.addf %56, %58 : vector<256x16xf32>
    %cst_33 = arith.constant dense<0.000000e+00> : vector<16xf32>
    %60 = vector.multi_reduction <add>, %59, %cst_33 [0] : vector<256x16xf32> to vector<16xf32>
    %61 = vector.shape_cast %60 : vector<16xf32> to vector<1x16xf32>
    %62 = arith.mulf %59, %59 : vector<256x16xf32>
    %cst_34 = arith.constant dense<0.000000e+00> : vector<16xf32>
    %63 = vector.multi_reduction <add>, %62, %cst_34 [0] : vector<256x16xf32> to vector<16xf32>
    %64 = vector.shape_cast %63 : vector<16xf32> to vector<1x16xf32>
    %c0_35 = arith.constant 0 : index
    %c0_36 = arith.constant 0 : index
    %65 = vector.load %arg4[%c0_35, %c0_36] : memref<16x16xf32, #tpu.memory_space<vmem>>, vector<16x16xf32>
    %cst_37 = arith.constant dense<0.000000e+00> : vector<1x16xf32>
    %66 = tpu.matmul %61, %65, %cst_37 {dimension_numbers = #tpu.dot_dimension_numbers<[1], [0], [0], [1], [0, 0, 1, 1], [], []>} : vector<1x16xf32>, vector<16x16xf32>, vector<1x16xf32> -> vector<1x16xf32>
    %c0_38 = arith.constant 0 : index
    %c0_39 = arith.constant 0 : index
    %67 = vector.load %arg4[%c0_38, %c0_39] : memref<16x16xf32, #tpu.memory_space<vmem>>, vector<16x16xf32>
    %cst_40 = arith.constant dense<0.000000e+00> : vector<1x16xf32>
    %68 = tpu.matmul %64, %67, %cst_40 {dimension_numbers = #tpu.dot_dimension_numbers<[1], [0], [0], [1], [0, 0, 1, 1], [], []>} : vector<1x16xf32>, vector<16x16xf32>, vector<1x16xf32> -> vector<1x16xf32>
    %69 = arith.mulf %66, %66 : vector<1x16xf32>
    %70 = arith.subf %68, %69 : vector<1x16xf32>
    %71 = vector.broadcast %66 : vector<1x16xf32> to vector<256x16xf32>
    %72 = arith.subf %59, %71 : vector<256x16xf32>
    %cst_41 = arith.constant 9.99999974E-6 : f32
    %73 = vector.broadcast %cst_41 : f32 to vector<1x16xf32>
    %74 = arith.addf %70, %73 : vector<1x16xf32>
    %75 = math.rsqrt %74 : vector<1x16xf32>
    %76 = vector.broadcast %75 : vector<1x16xf32> to vector<256x16xf32>
    %77 = arith.mulf %72, %76 : vector<256x16xf32>
    %c0_42 = arith.constant 0 : index
    %c0_43 = arith.constant 0 : index
    %78 = vector.load %arg5[%c0_42, %c0_43] : memref<1x16xf32, #tpu.memory_space<vmem>>, vector<1x16xf32>
    %79 = vector.broadcast %78 : vector<1x16xf32> to vector<256x16xf32>
    %80 = arith.mulf %77, %79 : vector<256x16xf32>
    %c0_44 = arith.constant 0 : index
    %c0_45 = arith.constant 0 : index
    %81 = vector.load %arg6[%c0_44, %c0_45] : memref<1x16xf32, #tpu.memory_space<vmem>>, vector<1x16xf32>
    %82 = vector.broadcast %81 : vector<1x16xf32> to vector<256x16xf32>
    %83 = arith.addf %80, %82 : vector<256x16xf32>
    %cst_46 = arith.constant 5.000000e-01 : f32
    %84 = vector.broadcast %cst_46 : f32 to vector<256x16xf32>
    %85 = arith.mulf %84, %83 : vector<256x16xf32>
    %cst_47 = arith.constant 0.707106769 : f32
    %86 = vector.broadcast %cst_47 : f32 to vector<256x16xf32>
    %87 = arith.mulf %83, %86 : vector<256x16xf32>
    %88 = math.erf %87 : vector<256x16xf32>
    %cst_48 = arith.constant 1.000000e+00 : f32
    %89 = vector.broadcast %cst_48 : f32 to vector<256x16xf32>
    %90 = arith.addf %89, %88 : vector<256x16xf32>
    %91 = arith.mulf %85, %90 : vector<256x16xf32>
    %c0_49 = arith.constant 0 : index
    %c0_50 = arith.constant 0 : index
    %c0_51 = arith.constant 0 : index
    %92 = vector.load %arg7[%c0_49, %c0_50, %c0_51] : memref<1x256x16xf32, #tpu.memory_space<vmem>>, vector<1x256x16xf32>
    %93 = vector.shape_cast %92 : vector<1x256x16xf32> to vector<256x16xf32>
    %94 = vector.shape_cast %91 : vector<256x16xf32> to vector<1x256x16xf32>
    tpu.vector_store %arg7[%c0_49, %c0_50, %c0_51], %94 {strides = array<i32>} : memref<1x256x16xf32, #tpu.memory_space<vmem>>, vector<1x256x16xf32>,
    return
  }
  func.func @transform_0(%arg0: i32) -> (i32, i32, i32, i32) {
    %c0_i32 = arith.constant 0 : i32
    %c0_i32_0 = arith.constant 0 : i32
    %c0_i32_1 = arith.constant 0 : i32
    %c0_i32_2 = arith.constant 0 : i32
    return %arg0, %c0_i32, %c0_i32_0, %c0_i32_1 : i32, i32, i32, i32
  }
  func.func @transform_1(%arg0: i32) -> (i32, i32, i32) {
    %c0_i32 = arith.constant 0 : i32
    %c0_i32_0 = arith.constant 0 : i32
    %c0_i32_1 = arith.constant 0 : i32
    %c0_i32_2 = arith.constant 0 : i32
    return %c0_i32, %c0_i32_0, %c0_i32_1 : i32, i32, i32
  }
  func.func @transform_2(%arg0: i32) -> (i32, i32) {
    %c0_i32 = arith.constant 0 : i32
    %c0_i32_0 = arith.constant 0 : i32
    %c0_i32_1 = arith.constant 0 : i32
    return %c0_i32, %c0_i32_0 : i32, i32
  }
  func.func @transform_3(%arg0: i32) -> (i32, i32) {
    %c0_i32 = arith.constant 0 : i32
    %c0_i32_0 = arith.constant 0 : i32
    %c0_i32_1 = arith.constant 0 : i32
    return %c0_i32, %c0_i32_0 : i32, i32
  }
  func.func @transform_4(%arg0: i32) -> (i32, i32) {
    %c0_i32 = arith.constant 0 : i32
    %c0_i32_0 = arith.constant 0 : i32
    %c0_i32_1 = arith.constant 0 : i32
    return %c0_i32, %c0_i32_0 : i32, i32
  }
  func.func @transform_5(%arg0: i32) -> (i32, i32) {
    %c0_i32 = arith.constant 0 : i32
    %c0_i32_0 = arith.constant 0 : i32
    %c0_i32_1 = arith.constant 0 : i32
    return %c0_i32, %c0_i32_0 : i32, i32
  }
  func.func @transform_6(%arg0: i32) -> (i32, i32, i32) {
    %c0_i32 = arith.constant 0 : i32
    %c0_i32_0 = arith.constant 0 : i32
    %c0_i32_1 = arith.constant 0 : i32
    return %arg0, %c0_i32, %c0_i32_0 : i32, i32, i32
  }
}

module attributes {stable_mosaic.version = 11 : i64} {
  func.func @_conv1x1_gn_kernel(%arg0: i32, %arg1: memref<1x256x32xf32, #tpu.memory_space<vmem>>, %arg2: memref<32x16xf32, #tpu.memory_space<vmem>>, %arg3: memref<1x16xf32, #tpu.memory_space<vmem>>, %arg4: memref<16x16xf32, #tpu.memory_space<vmem>>, %arg5: memref<1x16xf32, #tpu.memory_space<vmem>>, %arg6: memref<1x16xf32, #tpu.memory_space<vmem>>, %arg7: memref<1x256x16xf32, #tpu.memory_space<vmem>>) attributes {dimension_semantics = [#tpu.dimension_semantics<parallel>], iteration_bounds = array<i64: 2>, scalar_prefetch = 0 : i64, scratch_operands = 0 : i64, tpu.core_type = #tpu.core_type<tc>, window_params = [{transform_indices = @transform_0, window_bounds = array<i64: 1, 256, 32>}, {pipeline_mode = #tpu.pipeline_mode<synchronous>, transform_indices = @transform_1, window_bounds = array<i64: 32, 16>}, {pipeline_mode = #tpu.pipeline_mode<synchronous>, transform_indices = @transform_2, window_bounds = array<i64: 1, 16>}, {pipeline_mode = #tpu.pipeline_mode<synchronous>, transform_indices = @transform_3, window_bounds = array<i64: 16, 16>}, {pipeline_mode = #tpu.pipeline_mode<synchronous>, transform_indices = @transform_4, window_bounds = array<i64: 1, 16>}, {pipeline_mode = #tpu.pipeline_mode<synchronous>, transform_indices = @transform_5, window_bounds = array<i64: 1, 16>}, {transform_indices = @transform_6, window_bounds = array<i64: 1, 256, 16>}]} {
    %c0 = arith.constant 0 : index
    %c0_0 = arith.constant 0 : index
    %c0_1 = arith.constant 0 : index
    %0 = vector.load %arg1[%c0, %c0_0, %c0_1] : memref<1x256x32xf32, #tpu.memory_space<vmem>>, vector<1x256x32xf32>
    %1 = vector.shape_cast %0 : vector<1x256x32xf32> to vector<256x32xf32>
    %c0_2 = arith.constant 0 : index
    %c0_3 = arith.constant 0 : index
    %2 = vector.load %arg2[%c0_2, %c0_3] : memref<32x16xf32, #tpu.memory_space<vmem>>, vector<32x16xf32>
    %cst = arith.constant dense<0.000000e+00> : vector<256x16xf32>
    %3 = tpu.matmul %1, %2, %cst {dimension_numbers = #tpu.dot_dimension_numbers<[1], [0], [0], [1], [0, 0, 1, 1], [], []>} : vector<256x32xf32>, vector<32x16xf32>, vector<256x16xf32> -> vector<256x16xf32>
    %c0_4 = arith.constant 0 : index
    %c0_5 = arith.constant 0 : index
    %4 = vector.load %arg3[%c0_4, %c0_5] : memref<1x16xf32, #tpu.memory_space<vmem>>, vector<1x16xf32>
    %5 = vector.broadcast %4 : vector<1x16xf32> to vector<256x16xf32>
    %6 = arith.addf %3, %5 : vector<256x16xf32>
    %cst_6 = arith.constant dense<0.000000e+00> : vector<16xf32>
    %7 = vector.multi_reduction <add>, %6, %cst_6 [0] : vector<256x16xf32> to vector<16xf32>
    %8 = vector.shape_cast %7 : vector<16xf32> to vector<1x16xf32>
    %9 = arith.mulf %6, %6 : vector<256x16xf32>
    %cst_7 = arith.constant dense<0.000000e+00> : vector<16xf32>
    %10 = vector.multi_reduction <add>, %9, %cst_7 [0] : vector<256x16xf32> to vector<16xf32>
    %11 = vector.shape_cast %10 : vector<16xf32> to vector<1x16xf32>
    %c0_8 = arith.constant 0 : index
    %c0_9 = arith.constant 0 : index
    %12 = vector.load %arg4[%c0_8, %c0_9] : memref<16x16xf32, #tpu.memory_space<vmem>>, vector<16x16xf32>
    %cst_10 = arith.constant dense<0.000000e+00> : vector<1x16xf32>
    %13 = tpu.matmul %8, %12, %cst_10 {dimension_numbers = #tpu.dot_dimension_numbers<[1], [0], [0], [1], [0, 0, 1, 1], [], []>} : vector<1x16xf32>, vector<16x16xf32>, vector<1x16xf32> -> vector<1x16xf32>
    %c0_11 = arith.constant 0 : index
    %c0_12 = arith.constant 0 : index
    %14 = vector.load %arg4[%c0_11, %c0_12] : memref<16x16xf32, #tpu.memory_space<vmem>>, vector<16x16xf32>
    %cst_13 = arith.constant dense<0.000000e+00> : vector<1x16xf32>
    %15 = tpu.matmul %11, %14, %cst_13 {dimension_numbers = #tpu.dot_dimension_numbers<[1], [0], [0], [1], [0, 0, 1, 1], [], []>} : vector<1x16xf32>, vector<16x16xf32>, vector<1x16xf32> -> vector<1x16xf32>
    %16 = arith.mulf %13, %13 : vector<1x16xf32>
    %17 = arith.subf %15, %16 : vector<1x16xf32>
    %18 = vector.broadcast %13 : vector<1x16xf32> to vector<256x16xf32>
    %19 = arith.subf %6, %18 : vector<256x16xf32>
    %cst_14 = arith.constant 9.99999974E-6 : f32
    %20 = vector.broadcast %cst_14 : f32 to vector<1x16xf32>
    %21 = arith.addf %17, %20 : vector<1x16xf32>
    %22 = math.rsqrt %21 : vector<1x16xf32>
    %23 = vector.broadcast %22 : vector<1x16xf32> to vector<256x16xf32>
    %24 = arith.mulf %19, %23 : vector<256x16xf32>
    %c0_15 = arith.constant 0 : index
    %c0_16 = arith.constant 0 : index
    %25 = vector.load %arg5[%c0_15, %c0_16] : memref<1x16xf32, #tpu.memory_space<vmem>>, vector<1x16xf32>
    %26 = vector.broadcast %25 : vector<1x16xf32> to vector<256x16xf32>
    %27 = arith.mulf %24, %26 : vector<256x16xf32>
    %c0_17 = arith.constant 0 : index
    %c0_18 = arith.constant 0 : index
    %28 = vector.load %arg6[%c0_17, %c0_18] : memref<1x16xf32, #tpu.memory_space<vmem>>, vector<1x16xf32>
    %29 = vector.broadcast %28 : vector<1x16xf32> to vector<256x16xf32>
    %30 = arith.addf %27, %29 : vector<256x16xf32>
    %c0_19 = arith.constant 0 : index
    %c0_20 = arith.constant 0 : index
    %c0_21 = arith.constant 0 : index
    %31 = vector.load %arg7[%c0_19, %c0_20, %c0_21] : memref<1x256x16xf32, #tpu.memory_space<vmem>>, vector<1x256x16xf32>
    %32 = vector.shape_cast %31 : vector<1x256x16xf32> to vector<256x16xf32>
    %33 = vector.shape_cast %30 : vector<256x16xf32> to vector<1x256x16xf32>
    tpu.vector_store %arg7[%c0_19, %c0_20, %c0_21], %33 {strides = array<i32>} : memref<1x256x16xf32, #tpu.memory_space<vmem>>, vector<1x256x16xf32>,
    return
  }
  func.func @transform_0(%arg0: i32) -> (i32, i32, i32) {
    %c0_i32 = arith.constant 0 : i32
    %c0_i32_0 = arith.constant 0 : i32
    %c0_i32_1 = arith.constant 0 : i32
    return %arg0, %c0_i32, %c0_i32_0 : i32, i32, i32
  }
  func.func @transform_1(%arg0: i32) -> (i32, i32) {
    %c0_i32 = arith.constant 0 : i32
    %c0_i32_0 = arith.constant 0 : i32
    %c0_i32_1 = arith.constant 0 : i32
    return %c0_i32, %c0_i32_0 : i32, i32
  }
  func.func @transform_2(%arg0: i32) -> (i32, i32) {
    %c0_i32 = arith.constant 0 : i32
    %c0_i32_0 = arith.constant 0 : i32
    %c0_i32_1 = arith.constant 0 : i32
    return %c0_i32, %c0_i32_0 : i32, i32
  }
  func.func @transform_3(%arg0: i32) -> (i32, i32) {
    %c0_i32 = arith.constant 0 : i32
    %c0_i32_0 = arith.constant 0 : i32
    %c0_i32_1 = arith.constant 0 : i32
    return %c0_i32, %c0_i32_0 : i32, i32
  }
  func.func @transform_4(%arg0: i32) -> (i32, i32) {
    %c0_i32 = arith.constant 0 : i32
    %c0_i32_0 = arith.constant 0 : i32
    %c0_i32_1 = arith.constant 0 : i32
    return %c0_i32, %c0_i32_0 : i32, i32
  }
  func.func @transform_5(%arg0: i32) -> (i32, i32) {
    %c0_i32 = arith.constant 0 : i32
    %c0_i32_0 = arith.constant 0 : i32
    %c0_i32_1 = arith.constant 0 : i32
    return %c0_i32, %c0_i32_0 : i32, i32
  }
  func.func @transform_6(%arg0: i32) -> (i32, i32, i32) {
    %c0_i32 = arith.constant 0 : i32
    %c0_i32_0 = arith.constant 0 : i32
    %c0_i32_1 = arith.constant 0 : i32
    return %arg0, %c0_i32, %c0_i32_0 : i32, i32, i32
  }
}

module attributes {stable_mosaic.version = 11 : i64} {
  func.func @_conv1x1_gn_kernel(%arg0: i32, %arg1: memref<1x256x16xf32, #tpu.memory_space<vmem>>, %arg2: memref<16x64xf32, #tpu.memory_space<vmem>>, %arg3: memref<1x64xf32, #tpu.memory_space<vmem>>, %arg4: memref<64x64xf32, #tpu.memory_space<vmem>>, %arg5: memref<1x64xf32, #tpu.memory_space<vmem>>, %arg6: memref<1x64xf32, #tpu.memory_space<vmem>>, %arg7: memref<1x256x64xf32, #tpu.memory_space<vmem>>) attributes {dimension_semantics = [#tpu.dimension_semantics<parallel>], iteration_bounds = array<i64: 2>, scalar_prefetch = 0 : i64, scratch_operands = 0 : i64, tpu.core_type = #tpu.core_type<tc>, window_params = [{transform_indices = @transform_0, window_bounds = array<i64: 1, 256, 16>}, {pipeline_mode = #tpu.pipeline_mode<synchronous>, transform_indices = @transform_1, window_bounds = array<i64: 16, 64>}, {pipeline_mode = #tpu.pipeline_mode<synchronous>, transform_indices = @transform_2, window_bounds = array<i64: 1, 64>}, {pipeline_mode = #tpu.pipeline_mode<synchronous>, transform_indices = @transform_3, window_bounds = array<i64: 64, 64>}, {pipeline_mode = #tpu.pipeline_mode<synchronous>, transform_indices = @transform_4, window_bounds = array<i64: 1, 64>}, {pipeline_mode = #tpu.pipeline_mode<synchronous>, transform_indices = @transform_5, window_bounds = array<i64: 1, 64>}, {transform_indices = @transform_6, window_bounds = array<i64: 1, 256, 64>}]} {
    %c0 = arith.constant 0 : index
    %c0_0 = arith.constant 0 : index
    %c0_1 = arith.constant 0 : index
    %0 = vector.load %arg1[%c0, %c0_0, %c0_1] : memref<1x256x16xf32, #tpu.memory_space<vmem>>, vector<1x256x16xf32>
    %1 = vector.shape_cast %0 : vector<1x256x16xf32> to vector<256x16xf32>
    %c0_2 = arith.constant 0 : index
    %c0_3 = arith.constant 0 : index
    %2 = vector.load %arg2[%c0_2, %c0_3] : memref<16x64xf32, #tpu.memory_space<vmem>>, vector<16x64xf32>
    %cst = arith.constant dense<0.000000e+00> : vector<256x64xf32>
    %3 = tpu.matmul %1, %2, %cst {dimension_numbers = #tpu.dot_dimension_numbers<[1], [0], [0], [1], [0, 0, 1, 1], [], []>} : vector<256x16xf32>, vector<16x64xf32>, vector<256x64xf32> -> vector<256x64xf32>
    %c0_4 = arith.constant 0 : index
    %c0_5 = arith.constant 0 : index
    %4 = vector.load %arg3[%c0_4, %c0_5] : memref<1x64xf32, #tpu.memory_space<vmem>>, vector<1x64xf32>
    %5 = vector.broadcast %4 : vector<1x64xf32> to vector<256x64xf32>
    %6 = arith.addf %3, %5 : vector<256x64xf32>
    %cst_6 = arith.constant dense<0.000000e+00> : vector<64xf32>
    %7 = vector.multi_reduction <add>, %6, %cst_6 [0] : vector<256x64xf32> to vector<64xf32>
    %8 = vector.shape_cast %7 : vector<64xf32> to vector<1x64xf32>
    %9 = arith.mulf %6, %6 : vector<256x64xf32>
    %cst_7 = arith.constant dense<0.000000e+00> : vector<64xf32>
    %10 = vector.multi_reduction <add>, %9, %cst_7 [0] : vector<256x64xf32> to vector<64xf32>
    %11 = vector.shape_cast %10 : vector<64xf32> to vector<1x64xf32>
    %c0_8 = arith.constant 0 : index
    %c0_9 = arith.constant 0 : index
    %12 = vector.load %arg4[%c0_8, %c0_9] : memref<64x64xf32, #tpu.memory_space<vmem>>, vector<64x64xf32>
    %cst_10 = arith.constant dense<0.000000e+00> : vector<1x64xf32>
    %13 = tpu.matmul %8, %12, %cst_10 {dimension_numbers = #tpu.dot_dimension_numbers<[1], [0], [0], [1], [0, 0, 1, 1], [], []>} : vector<1x64xf32>, vector<64x64xf32>, vector<1x64xf32> -> vector<1x64xf32>
    %c0_11 = arith.constant 0 : index
    %c0_12 = arith.constant 0 : index
    %14 = vector.load %arg4[%c0_11, %c0_12] : memref<64x64xf32, #tpu.memory_space<vmem>>, vector<64x64xf32>
    %cst_13 = arith.constant dense<0.000000e+00> : vector<1x64xf32>
    %15 = tpu.matmul %11, %14, %cst_13 {dimension_numbers = #tpu.dot_dimension_numbers<[1], [0], [0], [1], [0, 0, 1, 1], [], []>} : vector<1x64xf32>, vector<64x64xf32>, vector<1x64xf32> -> vector<1x64xf32>
    %16 = arith.mulf %13, %13 : vector<1x64xf32>
    %17 = arith.subf %15, %16 : vector<1x64xf32>
    %18 = vector.broadcast %13 : vector<1x64xf32> to vector<256x64xf32>
    %19 = arith.subf %6, %18 : vector<256x64xf32>
    %cst_14 = arith.constant 9.99999974E-6 : f32
    %20 = vector.broadcast %cst_14 : f32 to vector<1x64xf32>
    %21 = arith.addf %17, %20 : vector<1x64xf32>
    %22 = math.rsqrt %21 : vector<1x64xf32>
    %23 = vector.broadcast %22 : vector<1x64xf32> to vector<256x64xf32>
    %24 = arith.mulf %19, %23 : vector<256x64xf32>
    %c0_15 = arith.constant 0 : index
    %c0_16 = arith.constant 0 : index
    %25 = vector.load %arg5[%c0_15, %c0_16] : memref<1x64xf32, #tpu.memory_space<vmem>>, vector<1x64xf32>
    %26 = vector.broadcast %25 : vector<1x64xf32> to vector<256x64xf32>
    %27 = arith.mulf %24, %26 : vector<256x64xf32>
    %c0_17 = arith.constant 0 : index
    %c0_18 = arith.constant 0 : index
    %28 = vector.load %arg6[%c0_17, %c0_18] : memref<1x64xf32, #tpu.memory_space<vmem>>, vector<1x64xf32>
    %29 = vector.broadcast %28 : vector<1x64xf32> to vector<256x64xf32>
    %30 = arith.addf %27, %29 : vector<256x64xf32>
    %c0_19 = arith.constant 0 : index
    %c0_20 = arith.constant 0 : index
    %c0_21 = arith.constant 0 : index
    %31 = vector.load %arg7[%c0_19, %c0_20, %c0_21] : memref<1x256x64xf32, #tpu.memory_space<vmem>>, vector<1x256x64xf32>
    %32 = vector.shape_cast %31 : vector<1x256x64xf32> to vector<256x64xf32>
    %33 = vector.shape_cast %30 : vector<256x64xf32> to vector<1x256x64xf32>
    tpu.vector_store %arg7[%c0_19, %c0_20, %c0_21], %33 {strides = array<i32>} : memref<1x256x64xf32, #tpu.memory_space<vmem>>, vector<1x256x64xf32>,
    return
  }
  func.func @transform_0(%arg0: i32) -> (i32, i32, i32) {
    %c0_i32 = arith.constant 0 : i32
    %c0_i32_0 = arith.constant 0 : i32
    %c0_i32_1 = arith.constant 0 : i32
    return %arg0, %c0_i32, %c0_i32_0 : i32, i32, i32
  }
  func.func @transform_1(%arg0: i32) -> (i32, i32) {
    %c0_i32 = arith.constant 0 : i32
    %c0_i32_0 = arith.constant 0 : i32
    %c0_i32_1 = arith.constant 0 : i32
    return %c0_i32, %c0_i32_0 : i32, i32
  }
  func.func @transform_2(%arg0: i32) -> (i32, i32) {
    %c0_i32 = arith.constant 0 : i32
    %c0_i32_0 = arith.constant 0 : i32
    %c0_i32_1 = arith.constant 0 : i32
    return %c0_i32, %c0_i32_0 : i32, i32
  }
  func.func @transform_3(%arg0: i32) -> (i32, i32) {
    %c0_i32 = arith.constant 0 : i32
    %c0_i32_0 = arith.constant 0 : i32
    %c0_i32_1 = arith.constant 0 : i32
    return %c0_i32, %c0_i32_0 : i32, i32
  }
  func.func @transform_4(%arg0: i32) -> (i32, i32) {
    %c0_i32 = arith.constant 0 : i32
    %c0_i32_0 = arith.constant 0 : i32
    %c0_i32_1 = arith.constant 0 : i32
    return %c0_i32, %c0_i32_0 : i32, i32
  }
  func.func @transform_5(%arg0: i32) -> (i32, i32) {
    %c0_i32 = arith.constant 0 : i32
    %c0_i32_0 = arith.constant 0 : i32
    %c0_i32_1 = arith.constant 0 : i32
    return %c0_i32, %c0_i32_0 : i32, i32
  }
  func.func @transform_6(%arg0: i32) -> (i32, i32, i32) {
    %c0_i32 = arith.constant 0 : i32
    %c0_i32_0 = arith.constant 0 : i32
    %c0_i32_1 = arith.constant 0 : i32
    return %arg0, %c0_i32, %c0_i32_0 : i32, i32, i32
  }
}

</mosaic_0001>

<bundles_post_ra>
// kernel: mlp_forward.3
= control target key start
LH: loop header
LB: loop body
LE: loop exit
PB: predicated region body
PF: predicated region fallthrough
CT: control target
= control target key end

     0   :  { %11 = vsyncpa [#allocation3], 0  ;;  %s1932_s0 = inlined_call_operand.hbm [shape: f32[2,256,32], index: 0, kind: input, shape index: {}]   ;;  %s1933_s1 = inlined_call_operand.vmem [shape: f32[32,16], index: 1, kind: input, shape index: {}]   ;;  %s1934_s2 = inlined_call_operand.vmem [shape: f32[1,16], index: 2, kind: input, shape index: {}]   ;;  %s1935_s3 = inlined_call_operand.vmem [shape: f32[16,16], index: 3, kind: input, shape index: {}]   ;;  %s1936_s4 = inlined_call_operand.vmem [shape: f32[1,16], index: 4, kind: input, shape index: {}]   ;;  %s1937_s5 = inlined_call_operand.vmem [shape: f32[1,16], index: 5, kind: input, shape index: {}]   ;;  %s1938_s6 = inlined_call_operand.vmem [shape: f32[2,256,16], index: 6, kind: output, shape index: {}]  }
   0x1   :  { %13 = vsyncpa [#allocation3 + $0x1], 0  ;;  %s1202_s21 = smov 0   ;;  %s1204_s22 = smov 0  }
   0x2   :  { %s1206_s23 = smov 0   ;;  %s1208_s24 = smov 0  }
   0x3 LB: > { %s1221_s25 = sadd.s32 4294967295, %s1163_s24   ;;  %s1224_s26 = sadd.s32 1, %s1163_s24   ;;  %s1163_s24 = sphi %s1208_s24, %s1945_s24   ;;  %s1159_s23 = sphi %s1206_s23, %s1944_s23   ;;  %s1155_s22 = sphi %s1204_s22, %s1943_s22   ;;  %s1151_s21 = sphi %s1202_s21, %s1942_s21  }
   0x4   : > { %s23_s27 = ssub.s32 %s1163_s24, %s1224_s26  ;;  %s26_s28 = sadd.s32 1, %s1159_s23 }
   0x5   : > { %p24_p0 = scmp.eq.s32.totalorder %s23_s27, 0  ;;  %p33_p1 = scmp.ne.s32.totalorder %s1159_s23, %s1155_s22 }
   0x6   : > { %p34_p2 = scmp.eq.s32.totalorder %s1163_s24, 0  ;;  %p39_p3 = scmp.ne.s32.totalorder %s1155_s22, %s1151_s21 }
   0x7   : > { %s1234_s29 = scalar_select %p24_p0, %s1159_s23, %s26_s28  }
   0x8   : > { %p1236_p4 = por %p34_p2, %p33_p1  ;;  %p40_p5 = scmp.eq.s32.totalorder %s1221_s25, 0 }
   0x9   : > { %p1059_p6 = scmp.lt.s32.totalorder %s1163_s24, 2  ;;  %s209_s8 = sand.u32 1, %s1159_s23  }
   0xa   : > { %p1242_p7 = por %p40_p5, %p39_p3  ;;  %s996_s9 = sshll.u32 %s209_s8, 8 }
   0xb   : > { %s1039_s10 = sshll.u32 %s1163_s24, 8  ;;  %s213_s14 = scalar_lea.vmem [#allocation2], %s996_s9 }
   0xc   : > { %s218_s13 = scalar_lea.hbm %s1932_s0, %s1039_s10  ;;  %s221_s15 = sshll.u32 %s213_s14, 4  ;;  %s222_s15 = int_to_ptr.vmem [resolvable:$true] %s221_s15 }
   0xd   : > { %s219_s16 = sshll.u32 %s218_s13, 4  ;;  %p1253_p8 = pnand %p1059_p6, %p1236_p4  ;;  %s220_s16 = int_to_ptr.hbm [resolvable:$true] %s219_s16 }
   0xe   : > { %p999_p9 = scmp.ge.s32.totalorder %s1163_s24, 1  ;;  %s210_s18 = scalar_lea.sflag [#allocation3], %s209_s8 }
   0xf   : > { %s1099_s19 = sshra.s32 %s220_s16, 4  ;;  %p1103_p11 = pneg %p1253_p8  ;;  %s1100_s19 = int_to_ptr.hbm [resolvable:$true] %s1099_s19 }
  0x10   : > { %s1101_s20 = scalar_lea.hbm %s1100_s19, 256  ;;  %s1106_s28 = scalar_lea.hbm %s1932_s0, 512 }
  0x11   : > { %p1102_p10 = scmp.ne.s32.totalorder %s1100_s19, %s1101_s20  ;;  %p1107_p0 = scmp.lt.s32.totalorder %s1100_s19, %s1932_s0 }
  0x12   : > { %p1108_p1 = scmp.lt.s32.totalorder %s1106_s28, %s1101_s20 }
  0x13   : > { %p1104_p12 = pnand %p1103_p11, %p1102_p10 }
  0x14   : > { %p1109_p2 = por %p1108_p1, %p1107_p0 }
  0x15   : > { %p1105_p13 = pneg %p1104_p12 }
  0x17   : > { %p1110_p3 = pnand %p1109_p2, %p1105_p13 }
  0x19   : > { %1113 = shalt.err (!%p1110_p3)
}
  0x1a   : > { %s1165_s8 = smov 128   ;;  %s1166_s10 = smov 8  }
  0x1b   : > { %1058 = dma.hbm_to_vmem [thread:$0]  (!%p1253_p8), %s220_s16, 4096, %s222_s15, %s210_s18, %s1165_s8, %s1165_s8, %s1166_s10  }
  0x1c   : > { %p229_p4 = scmp.lt.s32.totalorder %s1163_s24, 3 }
  0x1e   : > { %p230_p5 = pnand %p999_p9, %p229_p4 }
  0x1f   : > { %s235_s11 = sand.u32 (!%p230_p5), 1, %s1155_s22  }
  0x20   : > { %233 = sbr.rel (%p230_p5) target bundleno = 495 (0x1ef), region = 44  ;;  %s1000_s12 = sshll.u32 (!%p230_p5), %s235_s11, 8 }
  0x21   : > { %s236_s13 = scalar_lea.sflag (!%p230_p5), [#allocation3], %s235_s11  ;;  %s1272_s14 = scalar_lea.vmem (!%p230_p5), [#allocation2], %s1000_s12 }
  0x25   : > { %1146 = dma.done.wait (%p1242_p7), %s236_s13, 4096  }
  0x26   : > { %1148 = vsyncadd (%p1242_p7), %s236_s13, 4294963200  ;;  %v309_v0 = vld [vmem:[%s1933_s1 + $0x18] sm:$0xff]  ;;  %v308_v1 = vld [vmem:[%s1933_s1 + $0x10] sm:$0xff]  ;;  %vm314_vm0 = vcmask 261120   ;;  %vm524_vm1 = vcmask 130048   ;;  %p269_p6 = scmp.lt.s32.totalorder %s1221_s25, 1 }
  0x27   : > { %423 = vmatpush.msra.mxu0 %v309_v0  ;;  %1041 = vmatpush.msra.mxu1 %v309_v0  ;;  %v307_v2 = vld [vmem:[%s1933_s1 + $0x8] sm:$0xff]  ;;  %v306_v3 = vld [vmem:[%s1933_s1] sm:$0xff]  ;;  %v284_v7 = vld [vmem:[%s1272_s14 + $0x50] sm:$0xff] }
  0x28   : > { %1043 = vmatpush.msra.mxu3 %v309_v0  ;;  %1042 = vmatpush.msra.mxu2 %v309_v0  ;;  %v274_v4 = vld [vmem:[%s1272_s14] sm:$0xff]  ;;  %v283_v5 = vld [vmem:[%s1272_s14 + $0x48] sm:$0xff]  ;;  %v297_v8 = vld [vmem:[%s1272_s14 + $0xb8] sm:$0xff]  ;;  %s1947_s25 = smov (!%p269_p6, %s1221_s25), 1 }
  0x29   : > { %424 = vmatpush.msra.mxu0 %v308_v1  ;;  %1044 = vmatpush.msra.mxu1 %v308_v1  ;;  %v275_v6 = vld [vmem:[%s1272_s14 + $0x8] sm:$0xff]  ;;  %v276_v10 = vld [vmem:[%s1272_s14 + $0x10] sm:$0xff]  ;;  %v285_v11 = vld [vmem:[%s1272_s14 + $0x58] sm:$0xff]  ;;  %s1040_s12 = sshll.u32 %s1947_s25, 8 }
  0x2a   : > { %1046 = vmatpush.msra.mxu3 %v308_v1  ;;  %1045 = vmatpush.msra.mxu2 %v308_v1  ;;  %v291_v9 = vld [vmem:[%s1272_s14 + $0x88] sm:$0xff]  ;;  %v298_v12 = vld [vmem:[%s1272_s14 + $0xc0] sm:$0xff]  ;;  %v292_v13 = vld [vmem:[%s1272_s14 + $0x90] sm:$0xff]  ;;  %s1733_s20 = scalar_lea.vmem %s1938_s6, %s1040_s12 }
  0x2b   : > { %425 = vmatpush.msra.mxu0 %v307_v2  ;;  %1047 = vmatpush.msra.mxu1 %v307_v2  ;;  %v277_v14 = vld [vmem:[%s1272_s14 + $0x18] sm:$0xff]  ;;  %v286_v15 = vld [vmem:[%s1272_s14 + $0x60] sm:$0xff]  ;;  %v299_v16 = vld [vmem:[%s1272_s14 + $0xc8] sm:$0xff] }
  0x2c   : > { %1049 = vmatpush.msra.mxu3 %v307_v2  ;;  %1048 = vmatpush.msra.mxu2 %v307_v2  ;;  %v293_v17 = vld [vmem:[%s1272_s14 + $0x98] sm:$0xff]  ;;  %v278_v18 = vld [vmem:[%s1272_s14 + $0x20] sm:$0xff]  ;;  %v287_v19 = vld [vmem:[%s1272_s14 + $0x68] sm:$0xff] }
  0x2d   : > { %426 = vmatpush.msra.mxu0 %v306_v3  ;;  %1050 = vmatpush.msra.mxu1 %v306_v3  ;;  %v300_v20 = vld [vmem:[%s1272_s14 + $0xd0] sm:$0xff]  ;;  %v294_v21 = vld [vmem:[%s1272_s14 + $0xa0] sm:$0xff]  ;;  %v279_v22 = vld [vmem:[%s1272_s14 + $0x28] sm:$0xff] }
  0x2e   : > { %1003 = vmatmul.msk.f32.vlgmr.msra.gmra.mxu0 %vm314_vm0, %v274_v4  ;;  %1012 = vmatmul.msk.f32.vlgmr.msra.gmra.mxu1 %vm314_vm0, %v283_v5  ;;  %v288_v23 = vld [vmem:[%s1272_s14 + $0x70] sm:$0xff]  ;;  %v301_v24 = vld [vmem:[%s1272_s14 + $0xd8] sm:$0xff]  ;;  %v295_v25 = vld [vmem:[%s1272_s14 + $0xa8] sm:$0xff] }
  0x2f   : > { %1052 = vmatpush.msra.mxu3 %v306_v3  ;;  %1051 = vmatpush.msra.mxu2 %v306_v3  ;;  %v280_v26 = vld [vmem:[%s1272_s14 + $0x30] sm:$0xff]  ;;  %v289_v27 = vld [vmem:[%s1272_s14 + $0x78] sm:$0xff]  ;;  %v302_v28 = vld [vmem:[%s1272_s14 + $0xe0] sm:$0xff] }
  0x30   : > { %1026 = vmatmul.msk.f32.vlgmr.msra.gmra.mxu3 %vm314_vm0, %v297_v8  ;;  %1020 = vmatmul.msk.f32.vlgmr.msra.gmra.mxu2 %vm314_vm0, %v291_v9  ;;  %v296_v29 = vld [vmem:[%s1272_s14 + $0xb0] sm:$0xff]  ;;  %v281_v30 = vld [vmem:[%s1272_s14 + $0x38] sm:$0xff]  ;;  %v290_v31 = vld [vmem:[%s1272_s14 + $0x80] sm:$0xff] }
  0x31   : > { %v303_v32 = vld [vmem:[%s1272_s14 + $0xe8] sm:$0xff]  ;;  %v282_v33 = vld [vmem:[%s1272_s14 + $0x40] sm:$0xff]  ;;  %v304_v34 = vld [vmem:[%s1272_s14 + $0xf0] sm:$0xff] }
  0x32   : > { %v305_v35 = vld [vmem:[%s1272_s14 + $0xf8] sm:$0xff]  ;;  %v1371_v49 = vld [vmem:[%s1934_s2] ss:$0 sm:$0xff]  ;;  %v696_v60 = vld [vmem:[%s1935_s3 + $0x8] sm:$0xff] }
  0x33   : > { %714 = vmatpush.msrb.mxu1 %v696_v60  ;;  %737 = vmatpush.msrb.mxu2 %v696_v60 }
  0x36   : > { %1004 = vmatmul.msk.f32.gmra.mxu0 %vm314_vm0, %v275_v6  ;;  %1013 = vmatmul.msk.f32.gmra.mxu1 %vm314_vm0, %v284_v7 }
  0x38   : > { %1027 = vmatmul.msk.f32.gmra.mxu3 %vm314_vm0, %v298_v12  ;;  %1021 = vmatmul.msk.f32.gmra.mxu2 %vm314_vm0, %v292_v13 }
  0x3e   : > { %1005 = vmatmul.msk.f32.gmra.mxu0 %vm314_vm0, %v276_v10  ;;  %1014 = vmatmul.msk.f32.gmra.mxu1 %vm314_vm0, %v285_v11 }
  0x40   : > { %1028 = vmatmul.msk.f32.gmra.mxu3 %vm314_vm0, %v299_v16  ;;  %1022 = vmatmul.msk.f32.gmra.mxu2 %vm314_vm0, %v293_v17 }
  0x46   : > { %1006 = vmatmul.msk.f32.gmra.mxu0 %vm314_vm0, %v277_v14  ;;  %1015 = vmatmul.msk.f32.gmra.mxu1 %vm314_vm0, %v286_v15 }
  0x48   : > { %1029 = vmatmul.msk.f32.gmra.mxu3 %vm314_vm0, %v300_v20  ;;  %1023 = vmatmul.msk.f32.gmra.mxu2 %vm314_vm0, %v294_v21 }
  0x4e   : > { %1007 = vmatmul.msk.f32.gmra.mxu0 %vm314_vm0, %v278_v18  ;;  %1016 = vmatmul.msk.f32.gmra.mxu1 %vm314_vm0, %v287_v19 }
  0x50   : > { %1030 = vmatmul.msk.f32.gmra.mxu3 %vm314_vm0, %v301_v24  ;;  %1024 = vmatmul.msk.f32.gmra.mxu2 %vm314_vm0, %v295_v25 }
  0x56   : > { %1008 = vmatmul.msk.f32.gmra.mxu0 %vm314_vm0, %v279_v22  ;;  %1017 = vmatmul.msk.f32.gmra.mxu1 %vm314_vm0, %v288_v23 }
  0x58   : > { %1031 = vmatmul.msk.f32.gmra.mxu3 %vm314_vm0, %v302_v28  ;;  %1025 = vmatmul.msk.f32.gmra.mxu2 %vm314_vm0, %v296_v29 }
  0x5e   : > { %1009 = vmatmul.msk.f32.gmra.mxu0 %vm314_vm0, %v280_v26  ;;  %1018 = vmatmul.msk.f32.gmra.mxu1 %vm314_vm0, %v289_v27 }
  0x60   : > { %1032 = vmatmul.msk.f32.gmra.mxu3 %vm314_vm0, %v303_v32 }
  0x66   : > { %1010 = vmatmul.msk.f32.gmra.mxu0 %vm314_vm0, %v281_v30  ;;  %1019 = vmatmul.msk.f32.gmra.mxu1 %vm314_vm0, %v290_v31 }
  0x68   : > { %1033 = vmatmul.msk.f32.gmra.mxu3 %vm314_vm0, %v304_v34 }
  0x6e   : > { %1011 = vmatmul.msk.f32.gmra.mxu0 %vm314_vm0, %v282_v33 }
  0x70   : > { %1034 = vmatmul.msk.f32.gmra.mxu3 %vm314_vm0, %v305_v35 }
  0xab   : > { %v428_v36 = vpop.f32.mrf.mxu0  ;;  %v1354_v37 = vpop.f32.mrf.mxu1 }
  0xac   : > { %v1383_v54 = vadd.f32 %v1371_v49, %v428_v36  ;;  %v1452_v35 = vadd.f32 %v1371_v49, %v1354_v37 }
  0xae   : > { %v594_v59 = vmul.f32 %v1383_v54, %v1383_v54  ;;  %v525_v0 = vsel %vm524_vm1, %v1383_v54, 0.0 }
  0xb0   : > { %v626_v7 = vsel %vm524_vm1, %v594_v59, 0.0 }
  0xb3   : > { %v431_v38 = vpop.f32.mrf.mxu0  ;;  %v1356_v39 = vpop.f32.mrf.mxu1 }
  0xb4   : > { %v1358_v41 = vpop.f32.mrf.mxu3  ;;  %v1366_v47 = vpop.f32.mrf.mxu2  ;;  %v1380_v53 = vadd.f32 %v1371_v49, %v431_v38 }
  0xb6   : > { %v595_v57 = vmul.f32 %v1380_v53, %v1380_v53  ;;  %v526_v61 = vsel %vm524_vm1, %v1380_v53, 0.0 }
  0xb7   : > { %v527_v8 = vadd.f32 %v526_v61, %v525_v0 }
  0xb8   : > { %v627_v3 = vsel %vm524_vm1, %v595_v57, 0.0 }
  0xb9   : > { %v628_v14 = vadd.f32 %v627_v3, %v626_v7 }
  0xbb   : > { %v434_v40 = vpop.f32.mrf.mxu0  ;;  %v1360_v42 = vpop.f32.mrf.mxu1 }
  0xbc   : > { %v1362_v44 = vpop.f32.mrf.mxu3  ;;  %v1377_v52 = vpop.f32.mrf.mxu2  ;;  %v1386_v55 = vadd.f32 %v1371_v49, %v434_v40  ;;  %v1469_v37 = vadd.f32 %v1371_v49, %v1360_v42 }
  0xbe   : > { %v596_v62 = vmul.f32 %v1386_v55, %v1386_v55  ;;  %v528_v4 = vsel %vm524_vm1, %v1386_v55, 0.0 }
  0xbf   : > { %v529_v15 = vadd.f32 %v528_v4, %v527_v8 }
  0xc0   : > { %v629_v10 = vsel %vm524_vm1, %v596_v62, 0.0  ;;  %v603_v62 = vmul.f32 %v1452_v35, %v1452_v35 }
  0xc1   : > { %v630_v21 = vadd.f32 %v629_v10, %v628_v14  ;;  %v605_v10 = vmul.f32 %v1469_v37, %v1469_v37 }
  0xc2   : > { %v643_v14 = vsel %vm524_vm1, %v603_v62, 0.0 }
  0xc3   : > { %v437_v43 = vpop.f32.mrf.mxu0  ;;  %v1364_v46 = vpop.f32.mrf.mxu1 }
  0xc4   : > { %v1375_v51 = vpop.f32.mrf.mxu3  ;;  %v1391_v58 = vadd.f32 %v1371_v49, %v437_v43  ;;  %v1420_v9 = vpop.f32.mrf.mxu2  ;;  %v1483_v7 = vadd.f32 %v1371_v49, %v1364_v46 }
  0xc6   : > { %v597_v5 = vmul.f32 %v1391_v58, %v1391_v58  ;;  %v530_v11 = vsel %vm524_vm1, %v1391_v58, 0.0 }
  0xc7   : > { %v531_v22 = vadd.f32 %v530_v11, %v529_v15 }
  0xc8   : > { %v631_v17 = vsel %vm524_vm1, %v597_v5, 0.0  ;;  %v542_v5 = vsel %vm524_vm1, %v1452_v35, 0.0 }
  0xc9   : > { %v632_v26 = vadd.f32 %v631_v17, %v630_v21 }
  0xcb   : > { %v440_v45 = vpop.f32.mrf.mxu0  ;;  %v1373_v50 = vpop.f32.mrf.mxu1 }
  0xcc   : > { %v1403_v63 = vadd.f32 %v1371_v49, %v440_v45  ;;  %v1409_v2 = vpop.f32.mrf.mxu3 }
  0xce   : > { %v598_v12 = vmul.f32 %v1403_v63, %v1403_v63  ;;  %v532_v18 = vsel %vm524_vm1, %v1403_v63, 0.0 }
  0xcf   : > { %v533_v27 = vadd.f32 %v532_v18, %v531_v22  ;;  %v546_v22 = vsel %vm524_vm1, %v1469_v37, 0.0 }
  0xd0   : > { %v633_v23 = vsel %vm524_vm1, %v598_v12, 0.0 }
  0xd1   : > { %v634_v31 = vadd.f32 %v633_v23, %v632_v26  ;;  %v606_v23 = vmul.f32 %v1483_v7, %v1483_v7 }
  0xd3   : > { %v443_v48 = vpop.f32.mrf.mxu0  ;;  %v1407_v1 = vpop.f32.mrf.mxu1 }
  0xd4   : > { %v1417_v6 = vadd.f32 %v1371_v49, %v443_v48  ;;  %v1448_v34 = vpop.f32.mrf.mxu3  ;;  %v1457_v48 = vpop.f32.mrf.mxu2 }
  0xd6   : > { %v599_v19 = vmul.f32 %v1417_v6, %v1417_v6  ;;  %v534_v24 = vsel %vm524_vm1, %v1417_v6, 0.0 }
  0xd7   : > { %v535_v32 = vadd.f32 %v534_v24, %v533_v27  ;;  %v1504_v24 = vadd.f32 %v1371_v49, %v1407_v1 }
  0xd8   : > { %v635_v28 = vsel %vm524_vm1, %v599_v19, 0.0 }
  0xd9   : > { %v636_v40 = vadd.f32 %v635_v28, %v634_v31  ;;  %v548_v28 = vsel %vm524_vm1, %v1483_v7, 0.0 }
  0xdb   : > { %v446_v56 = vpop.f32.mrf.mxu0  ;;  %v473_v33 = vpop.f32.mrf.mxu1 }
  0xdc   : > { %v1428_v13 = vadd.f32 %v1371_v49, %v446_v56  ;;  %v1461_v56 = vadd.f32 %v1371_v49, %v1356_v39  ;;  %v1495_v19 = vpop.f32.mrf.mxu3  ;;  %v491_v27 = vpop.f32.mrf.mxu2 }
  0xde   : > { %v600_v25 = vmul.f32 %v1428_v13, %v1428_v13  ;;  %v536_v29 = vsel %vm524_vm1, %v1428_v13, 0.0  ;;  %v604_v42 = vmul.f32 %v1461_v56, %v1461_v56  ;;  %v544_v15 = vsel %vm524_vm1, %v1461_v56, 0.0 }
  0xdf   : > { %v537_v43 = vadd.f32 %v536_v29, %v535_v32 }
  0xe0   : > { %v637_v36 = vsel %vm524_vm1, %v600_v25, 0.0  ;;  %v645_v21 = vsel %vm524_vm1, %v604_v42, 0.0 }
  0xe1   : > { %v638_v60 = vadd.f32 %v637_v36, %v636_v40  ;;  %v649_v36 = vsel %vm524_vm1, %v606_v23, 0.0  ;;  %v608_v40 = vmul.f32 %v1504_v24, %v1504_v24  ;;  %v1561_v23 = vadd.f32 %v1371_v49, %v1457_v48 }
  0xe3   : > { %v449_v16 = vpop.f32.mrf.mxu0  ;;  %v476_v46 = vpop.f32.mrf.mxu1 }
  0xe4   : > { %v1436_v20 = vadd.f32 %v1371_v49, %v449_v16  ;;  %v1493_v16 = vadd.f32 %v1371_v49, %v1373_v50  ;;  %v647_v50 = vsel %vm524_vm1, %v605_v10, 0.0  ;;  %v1515_v31 = vadd.f32 %v1371_v49, %v476_v46  ;;  %v494_v46 = vpop.f32.mrf.mxu2 }
  0xe6   : > { %v601_v30 = vmul.f32 %v1436_v20, %v1436_v20  ;;  %v538_v38 = vsel %vm524_vm1, %v1436_v20, 0.0  ;;  %v607_v29 = vmul.f32 %v1493_v16, %v1493_v16  ;;  %v610_v62 = vmul.f32 %v1515_v31, %v1515_v31 }
  0xe7   : > { %v539_v61 = vadd.f32 %v538_v38, %v537_v43  ;;  %v550_v38 = vsel %vm524_vm1, %v1493_v16, 0.0  ;;  %v1524_v43 = vadd.f32 %v1371_v49, %v1366_v47  ;;  %v653_v47 = vsel %vm524_vm1, %v608_v40, 0.0 }
  0xe8   : > { %v639_v57 = vsel %vm524_vm1, %v601_v30, 0.0  ;;  %v1512_v30 = vadd.f32 %v1371_v49, %v473_v33  ;;  %v614_v40 = vmul.f32 %v1561_v23, %v1561_v23 }
  0xe9   : > { %v640_v3 = vadd.f32 %v639_v57, %v638_v60  ;;  %v651_v57 = vsel %vm524_vm1, %v607_v29, 0.0  ;;  %v552_v60 = vsel %vm524_vm1, %v1504_v24, 0.0  ;;  %v611_v42 = vmul.f32 %v1524_v43, %v1524_v43 }
  0xea   : > { %v1569_v29 = vadd.f32 %v1371_v49, %v491_v27 }
  0xeb   : > { %v452_v45 = vpop.f32.mrf.mxu0 }
  0xec   : > { %v1465_v59 = vadd.f32 %v1371_v49, %v452_v45 }
  0xee   : > { %v540_v0 = vsel %vm524_vm1, %v1465_v59, 0.0  ;;  %v602_v39 = vmul.f32 %v1465_v59, %v1465_v59 }
  0xef   : > { %v541_v4 = vadd.f32 %v540_v0, %v539_v61  ;;  %v609_v61 = vmul.f32 %v1512_v30, %v1512_v30 }
  0xf0   : > { %v641_v8 = vsel %vm524_vm1, %v602_v39, 0.0 }
  0xf1   : > { %v543_v11 = vadd.f32 %v542_v5, %v541_v4  ;;  %v642_v12 = vadd.f32 %v641_v8, %v640_v3  ;;  %v1535_v3 = vadd.f32 %v1371_v49, %v1377_v52  ;;  %v554_v4 = vsel %vm524_vm1, %v1512_v30, 0.0  ;;  %v695_v52 = vld [vmem:[%s1935_s3] sm:$0xff] }
  0xf2   : > { %v556_v5 = vsel %vm524_vm1, %v1515_v31, 0.0  ;;  %715 = vmatpush.msrb.mxu1 %v695_v52  ;;  %738 = vmatpush.msrb.mxu2 %v695_v52 }
  0xf3   : > { %v545_v17 = vadd.f32 %v544_v15, %v543_v11  ;;  %v644_v18 = vadd.f32 %v643_v14, %v642_v12  ;;  %v1544_v11 = vpop.f32.mrf.mxu3  ;;  %v1551_v12 = vadd.f32 %v1371_v49, %v1420_v9  ;;  %v655_v14 = vsel %vm524_vm1, %v609_v61, 0.0 }
  0xf4   : > { %v657_v15 = vsel %vm524_vm1, %v610_v62, 0.0  ;;  %v659_v9 = vsel %vm524_vm1, %v611_v42, 0.0  ;;  %v615_v61 = vmul.f32 %v1569_v29, %v1569_v29 }
  0xf5   : > { %v646_v25 = vadd.f32 %v645_v21, %v644_v18  ;;  %v547_v26 = vadd.f32 %v546_v22, %v545_v17  ;;  %v558_v21 = vsel %vm524_vm1, %v1524_v43, 0.0  ;;  %v612_v22 = vmul.f32 %v1535_v3, %v1535_v3 }
  0xf7   : > { %v549_v32 = vadd.f32 %v548_v28, %v547_v26  ;;  %v648_v1 = vadd.f32 %v647_v50, %v646_v25  ;;  %v560_v26 = vsel %vm524_vm1, %v1535_v3, 0.0  ;;  %v613_v28 = vmul.f32 %v1551_v12, %v1551_v12 }
  0xf8   : > { %v661_v48 = vsel %vm524_vm1, %v612_v22, 0.0 }
  0xf9   : > { %v551_v45 = vadd.f32 %v550_v38, %v549_v32  ;;  %v650_v33 = vadd.f32 %v649_v36, %v648_v1  ;;  %v1572_v32 = vadd.f32 %v1371_v49, %v494_v46  ;;  %v562_v38 = vsel %vm524_vm1, %v1551_v12, 0.0 }
  0xfb   : > { %v553_v0 = vadd.f32 %v552_v60, %v551_v45  ;;  %v652_v39 = vadd.f32 %v651_v57, %v650_v33  ;;  %v1581_v45 = vadd.f32 %v1371_v49, %v1358_v41  ;;  %v663_v57 = vsel %vm524_vm1, %v613_v28, 0.0 }
  0xfc   : > { %v564_v60 = vsel %vm524_vm1, %v1561_v23, 0.0  ;;  %v616_v62 = vmul.f32 %v1572_v32, %v1572_v32  ;;  %v1592_v41 = vadd.f32 %v1371_v49, %v1362_v44  ;;  %v568_v42 = vsel %vm524_vm1, %v1572_v32, 0.0 }
  0xfd   : > { %v654_v8 = vadd.f32 %v653_v47, %v652_v39  ;;  %v555_v10 = vadd.f32 %v554_v4, %v553_v0  ;;  %v518_v47 = vpop.f32.mrf.mxu3  ;;  %v665_v4 = vsel %vm524_vm1, %v614_v40, 0.0  ;;  %v617_v52 = vmul.f32 %v1581_v45, %v1581_v45 }
  0xfe   : > { %v667_v44 = vsel %vm524_vm1, %v615_v61, 0.0  ;;  %v618_v22 = vmul.f32 %v1592_v41, %v1592_v41  ;;  %v1631_v40 = vadd.f32 %v1371_v49, %v1495_v19 }
  0xff   : > { %v656_v17 = vadd.f32 %v655_v14, %v654_v8  ;;  %v557_v18 = vadd.f32 %v556_v5, %v555_v10  ;;  %v566_v5 = vsel %vm524_vm1, %v1569_v29, 0.0  ;;  %v1603_v14 = vadd.f32 %v1371_v49, %v1375_v51 }
 0x100   : > { %v671_v51 = vsel %vm524_vm1, %v617_v52, 0.0 }
 0x101   : > { %v559_v50 = vadd.f32 %v558_v21, %v557_v18  ;;  %v658_v25 = vadd.f32 %v657_v15, %v656_v17  ;;  %v669_v15 = vsel %vm524_vm1, %v616_v62, 0.0  ;;  %v1609_v17 = vadd.f32 %v1371_v49, %v1409_v2 }
 0x102   : > { %v570_v21 = vsel %vm524_vm1, %v1581_v45, 0.0  ;;  %v1622_v2 = vadd.f32 %v1371_v49, %v1448_v34  ;;  %v1640_v62 = vadd.f32 %v1371_v49, %v1544_v11 }
 0x103   : > { %v561_v1 = vadd.f32 %v560_v26, %v559_v50  ;;  %v660_v36 = vadd.f32 %v659_v9, %v658_v25  ;;  %v572_v25 = vsel %vm524_vm1, %v1592_v41, 0.0  ;;  %v619_v26 = vmul.f32 %v1603_v14, %v1603_v14 }
 0x104   : > { %v620_v28 = vmul.f32 %v1609_v17, %v1609_v17  ;;  %v621_v61 = vmul.f32 %v1622_v2, %v1622_v2 }
 0x105   : > { %v662_v33 = vadd.f32 %v661_v48, %v660_v36  ;;  %v563_v27 = vadd.f32 %v562_v38, %v561_v1  ;;  %v673_v48 = vsel %vm524_vm1, %v618_v22, 0.0  ;;  %v574_v38 = vsel %vm524_vm1, %v1603_v14, 0.0 }
 0x106   : > { %v675_v34 = vsel %vm524_vm1, %v619_v26, 0.0  ;;  %v679_v11 = vsel %vm524_vm1, %v621_v61, 0.0 }
 0x107   : > { %v565_v0 = vadd.f32 %v564_v60, %v563_v27  ;;  %v664_v39 = vadd.f32 %v663_v57, %v662_v33  ;;  %v521_v57 = vpop.f32.mrf.mxu3  ;;  %v576_v60 = vsel %vm524_vm1, %v1609_v17, 0.0 }
 0x109   : > { %v567_v8 = vadd.f32 %v566_v5, %v565_v0  ;;  %v666_v10 = vadd.f32 %v665_v4, %v664_v39  ;;  %v677_v0 = vsel %vm524_vm1, %v620_v28, 0.0  ;;  %v578_v4 = vsel %vm524_vm1, %v1622_v2, 0.0 }
 0x10a   : > { %v622_v5 = vmul.f32 %v1631_v40, %v1631_v40 }
 0x10b   : > { %v668_v18 = vadd.f32 %v667_v44, %v666_v10  ;;  %v569_v46 = vadd.f32 %v568_v42, %v567_v8  ;;  %v1648_v42 = vadd.f32 %v1371_v49, %v518_v47  ;;  %v1651_v8 = vadd.f32 %v1371_v49, %v521_v57 }
 0x10c   : > { %v580_v44 = vsel %vm524_vm1, %v1631_v40, 0.0  ;;  %v582_v47 = vsel %vm524_vm1, %v1640_v62, 0.0 }
 0x10d   : > { %v571_v9 = vadd.f32 %v570_v21, %v569_v46  ;;  %v670_v50 = vadd.f32 %v669_v15, %v668_v18  ;;  %v623_v15 = vmul.f32 %v1640_v62, %v1640_v62  ;;  %v681_v21 = vsel %vm524_vm1, %v622_v5, 0.0 }
 0x10e   : > { %v624_v49 = vmul.f32 %v1648_v42, %v1648_v42  ;;  %v625_v22 = vmul.f32 %v1651_v8, %v1651_v8  ;;  %v586_v26 = vsel %vm524_vm1, %v1651_v8, 0.0 }
 0x10f   : > { %v573_v1 = vadd.f32 %v572_v25, %v571_v9  ;;  %v672_v36 = vadd.f32 %v671_v51, %v670_v50  ;;  %v683_v51 = vsel %vm524_vm1, %v623_v15, 0.0  ;;  %v584_v25 = vsel %vm524_vm1, %v1648_v42, 0.0 }
 0x111   : > { %v575_v33 = vadd.f32 %v574_v38, %v573_v1  ;;  %v674_v27 = vadd.f32 %v673_v48, %v672_v36  ;;  %v685_v36 = vsel %vm524_vm1, %v624_v49, 0.0  ;;  %v687_v48 = vsel %vm524_vm1, %v625_v22, 0.0 }
 0x113   : > { %v676_v39 = vadd.f32 %v675_v34, %v674_v27  ;;  %v577_v19 = vadd.f32 %v576_v60, %v575_v33 }
 0x115   : > { %v579_v10 = vadd.f32 %v578_v4, %v577_v19  ;;  %v678_v52 = vadd.f32 %v677_v0, %v676_v39 }
 0x117   : > { %v581_v18 = vadd.f32 %v580_v44, %v579_v10  ;;  %v680_v46 = vadd.f32 %v679_v11, %v678_v52 }
 0x119   : > { %v583_v9 = vadd.f32 %v582_v47, %v581_v18  ;;  %v682_v50 = vadd.f32 %v681_v21, %v680_v46 }
 0x11b   : > { %v684_v28 = vadd.f32 %v683_v51, %v682_v50  ;;  %v585_v1 = vadd.f32 %v584_v25, %v583_v9 }
 0x11d   : > { %v686_v38 = vadd.f32 %v685_v36, %v684_v28  ;;  %v587_v33 = vadd.f32 %v586_v26, %v585_v1 }
 0x11f   : > { %v588_v27 = vrot.slane %v587_v33, 4  ;;  %v688_v57 = vadd.f32 %v687_v48, %v686_v38 }
 0x121   : > { %v589_v34 = vadd.f32 %v588_v27, %v587_v33  ;;  %v689_v60 = vrot.slane %v688_v57, 4 }
 0x123   : > { %v590_v61 = vrot.slane %v589_v34, 2  ;;  %v690_v0 = vadd.f32 %v689_v60, %v688_v57 }
 0x125   : > { %v591_v39 = vadd.f32 %v590_v61, %v589_v34  ;;  %v691_v19 = vrot.slane %v690_v0, 2 }
 0x127   : > { %v592_v4 = vrot.slane %v591_v39, 1  ;;  %v692_v5 = vadd.f32 %v691_v19, %v690_v0 }
 0x129   : > { %v593_v10 = vadd.f32 %v592_v4, %v591_v39  ;;  %v693_v52 = vrot.slane %v692_v5, 1 }
 0x12b   : > { %1035 = vmatmul.msk.f32.vlgmr.msrb.gmra.mxu1 %vm524_vm1, %v593_v10  ;;  %v694_v11 = vadd.f32 %v693_v52, %v692_v5 }
 0x12d   : > { %1036 = vmatmul.msk.f32.vlgmr.msrb.gmra.mxu2 %vm524_vm1, %v694_v11 }
 0x1a8   : > { %v717_v44 = vpop.f32.mrf.mxu1 }
 0x1a9   : > { %v743_v18 = vmul.f32 %v717_v44, %v717_v44  ;;  %v1674_v26 = vperm.slane %v717_v44, 0 }
 0x1ab   : > { %v746_v1 = vsub.f32 %v1383_v54, %v1674_v26  ;;  %v747_v36 = vsub.f32 %v1380_v53, %v1674_v26  ;;  %v748_v48 = vsub.f32 %v1386_v55, %v1674_v26  ;;  %v749_v38 = vsub.f32 %v1391_v58, %v1674_v26  ;;  %v1696_v53 = vld [vmem:[%s1936_s4] ss:$0 sm:$0xff] }
 0x1ac   : > { %v750_v33 = vsub.f32 %v1403_v63, %v1674_v26  ;;  %v751_v54 = vsub.f32 %v1417_v6, %v1674_v26  ;;  %v752_v58 = vsub.f32 %v1428_v13, %v1674_v26  ;;  %v753_v60 = vsub.f32 %v1436_v20, %v1674_v26  ;;  %v1716_v13 = vld [vmem:[%s1937_s5] ss:$0 sm:$0xff] }
 0x1ad   : > { %v754_v61 = vsub.f32 %v1465_v59, %v1674_v26  ;;  %v755_v20 = vsub.f32 %v1452_v35, %v1674_v26  ;;  %v756_v59 = vsub.f32 %v1461_v56, %v1674_v26  ;;  %v757_v52 = vsub.f32 %v1469_v37, %v1674_v26 }
 0x1b0   : > { %v740_v15 = vpop.f32.mrf.mxu2 }
 0x1b1   : > { %v744_v46 = vsub.f32 %v740_v15, %v743_v18  ;;  %v758_v15 = vsub.f32 %v1483_v7, %v1674_v26 }
 0x1b3   : > { %v778_v21 = vadd.f32 1e-05, %v744_v46 }
 0x1b5   : > { %1097 = vrsqrt.f32 %v778_v21  ;;  %vm785_vm3 = vweird.f32 %v778_v21 }
 0x1bb   : > { %v1098_v47 = vpop.eup %1097 }
 0x1bc   : > { %v780_v49 = vmul.f32 %v1098_v47, %v778_v21  ;;  %vm786_vm2 = vweird.f32 %v1098_v47 }
 0x1bd   : > { %vm787_vm4 = vmor %vm785_vm3, %vm786_vm2 }
 0x1be   : > { %v781_v22 = vmul.f32 %v1098_v47, %v780_v49 }
 0x1c0   : > { %v782_v9 = vmul.f32 0.5, %v781_v22 }
 0x1c2   : > { %v783_v50 = vsub.f32 1.5, %v782_v9 }
 0x1c4   : > { %v784_v51 = vmul.f32 %v1098_v47, %v783_v50  ;;  %v760_v50 = vsub.f32 %v1504_v24, %v1674_v26  ;;  %v762_v24 = vsub.f32 %v1515_v31, %v1674_v26  ;;  %v764_v31 = vsub.f32 %v1535_v3, %v1674_v26 }
 0x1c5   : > { %v766_v3 = vsub.f32 %v1561_v23, %v1674_v26  ;;  %v768_v23 = vsub.f32 %v1572_v32, %v1674_v26  ;;  %v770_v32 = vsub.f32 %v1592_v41, %v1674_v26  ;;  %v772_v41 = vsub.f32 %v1609_v17, %v1674_v26 }
 0x1c6   : > { %v788_v25 = vsel %vm787_vm4, %v1098_v47, %v784_v51  ;;  %v759_v47 = vsub.f32 %v1493_v16, %v1674_v26  ;;  %v761_v16 = vsub.f32 %v1512_v30, %v1674_v26  ;;  %v763_v30 = vsub.f32 %v1524_v43, %v1674_v26 }
 0x1c7   : > { %v1677_v28 = vperm.slane %v788_v25, 0  ;;  %v765_v43 = vsub.f32 %v1551_v12, %v1674_v26  ;;  %v767_v12 = vsub.f32 %v1569_v29, %v1674_v26  ;;  %v769_v29 = vsub.f32 %v1581_v45, %v1674_v26 }
 0x1c8   : > { %v771_v45 = vsub.f32 %v1603_v14, %v1674_v26  ;;  %v773_v14 = vsub.f32 %v1622_v2, %v1674_v26  ;;  %v774_v17 = vsub.f32 %v1631_v40, %v1674_v26  ;;  %v775_v2 = vsub.f32 %v1640_v62, %v1674_v26 }
 0x1c9   : > { %v790_v27 = vmul.f32 %v1677_v28, %v746_v1  ;;  %v791_v57 = vmul.f32 %v1677_v28, %v747_v36  ;;  %v792_v34 = vmul.f32 %v1677_v28, %v748_v48  ;;  %v793_v55 = vmul.f32 %v1677_v28, %v749_v38 }
 0x1ca   : > { %v794_v63 = vmul.f32 %v1677_v28, %v750_v33  ;;  %v795_v0 = vmul.f32 %v1677_v28, %v751_v54  ;;  %v796_v39 = vmul.f32 %v1677_v28, %v752_v58  ;;  %v797_v5 = vmul.f32 %v1677_v28, %v753_v60 }
 0x1cb   : > { %v826_v6 = vmul.f32 %v1696_v53, %v790_v27  ;;  %v827_v19 = vmul.f32 %v1696_v53, %v791_v57  ;;  %v828_v4 = vmul.f32 %v1696_v53, %v792_v34  ;;  %v829_v10 = vmul.f32 %v1696_v53, %v793_v55 }
 0x1cc   : > { %v798_v11 = vmul.f32 %v1677_v28, %v754_v61  ;;  %v830_v44 = vmul.f32 %v1696_v53, %v794_v63  ;;  %v799_v35 = vmul.f32 %v1677_v28, %v755_v20  ;;  %v800_v56 = vmul.f32 %v1677_v28, %v756_v59 }
 0x1cd   : > { %v831_v18 = vmul.f32 %v1696_v53, %v795_v0  ;;  %v832_v37 = vmul.f32 %v1696_v53, %v796_v39  ;;  %v862_v46 = vadd.f32 %v1716_v13, %v826_v6  ;;  %v863_v21 = vadd.f32 %v1716_v13, %v827_v19 }
 0x1ce   : > { %v864_v7 = vadd.f32 %v1716_v13, %v828_v4  ;;  %v801_v49 = vmul.f32 %v1677_v28, %v757_v52  ;;  %v833_v22 = vmul.f32 %v1696_v53, %v797_v5  ;;  %v865_v9 = vadd.f32 %v1716_v13, %v829_v10 }
 0x1cf   : > { %v802_v51 = vmul.f32 %v1677_v28, %v758_v15  ;;  %v834_v25 = vmul.f32 %v1696_v53, %v798_v11  ;;  %v866_v1 = vadd.f32 %v1716_v13, %v830_v44  ;;  %894 = vst.msk [vmem:[%s1733_s20] sm:$0xff] %vm524_vm1, %v862_v46  ;;  %v803_v36 = vmul.f32 %v1677_v28, %v759_v47 }
 0x1d0   : > { %v835_v48 = vmul.f32 %v1696_v53, %v799_v35  ;;  %v867_v38 = vadd.f32 %v1716_v13, %v831_v18  ;;  %895 = vst.msk [vmem:[%s1733_s20 + $0x8] sm:$0xff] %vm524_vm1, %v863_v21  ;;  %v804_v33 = vmul.f32 %v1677_v28, %v760_v50  ;;  %v836_v27 = vmul.f32 %v1696_v53, %v800_v56 }
 0x1d1   : > { %v868_v57 = vadd.f32 %v1716_v13, %v832_v37  ;;  %896 = vst.msk [vmem:[%s1733_s20 + $0x10] sm:$0xff] %vm524_vm1, %v864_v7  ;;  %v805_v34 = vmul.f32 %v1677_v28, %v761_v16  ;;  %v837_v54 = vmul.f32 %v1696_v53, %v801_v49  ;;  %v869_v55 = vadd.f32 %v1716_v13, %v833_v22 }
 0x1d2   : > { %897 = vst.msk [vmem:[%s1733_s20 + $0x18] sm:$0xff] %vm524_vm1, %v865_v9  ;;  %v806_v58 = vmul.f32 %v1677_v28, %v762_v24  ;;  %v838_v63 = vmul.f32 %v1696_v53, %v802_v51  ;;  %v870_v60 = vadd.f32 %v1716_v13, %v834_v25  ;;  %v807_v61 = vmul.f32 %v1677_v28, %v763_v30 }
 0x1d3   : > { %898 = vst.msk [vmem:[%s1733_s20 + $0x20] sm:$0xff] %vm524_vm1, %v866_v1  ;;  %v839_v0 = vmul.f32 %v1696_v53, %v803_v36  ;;  %v871_v39 = vadd.f32 %v1716_v13, %v835_v48  ;;  %v808_v6 = vmul.f32 %v1677_v28, %v764_v31  ;;  %v840_v19 = vmul.f32 %v1696_v53, %v804_v33 }
 0x1d4   : > { %899 = vst.msk [vmem:[%s1733_s20 + $0x28] sm:$0xff] %vm524_vm1, %v867_v38  ;;  %v872_v4 = vadd.f32 %v1716_v13, %v836_v27  ;;  %v809_v20 = vmul.f32 %v1677_v28, %v765_v43  ;;  %v841_v59 = vmul.f32 %v1696_v53, %v805_v34  ;;  %v873_v5 = vadd.f32 %v1716_v13, %v837_v54 }
 0x1d5   : > { %900 = vst.msk [vmem:[%s1733_s20 + $0x30] sm:$0xff] %vm524_vm1, %v868_v57  ;;  %v810_v10 = vmul.f32 %v1677_v28, %v766_v3  ;;  %v842_v52 = vmul.f32 %v1696_v53, %v806_v58  ;;  %v874_v11 = vadd.f32 %v1716_v13, %v838_v63  ;;  %v811_v44 = vmul.f32 %v1677_v28, %v767_v12 }
 0x1d6   : > { %901 = vst.msk [vmem:[%s1733_s20 + $0x38] sm:$0xff] %vm524_vm1, %v869_v55  ;;  %v843_v15 = vmul.f32 %v1696_v53, %v807_v61  ;;  %v875_v35 = vadd.f32 %v1716_v13, %v839_v0  ;;  %v812_v56 = vmul.f32 %v1677_v28, %v768_v23  ;;  %v844_v18 = vmul.f32 %v1696_v53, %v808_v6 }
 0x1d7   : > { %902 = vst.msk [vmem:[%s1733_s20 + $0x40] sm:$0xff] %vm524_vm1, %v870_v60  ;;  %v876_v37 = vadd.f32 %v1716_v13, %v840_v19  ;;  %v813_v46 = vmul.f32 %v1677_v28, %v769_v29  ;;  %v845_v21 = vmul.f32 %v1696_v53, %v809_v20  ;;  %v877_v7 = vadd.f32 %v1716_v13, %v841_v59 }
 0x1d8   : > { %903 = vst.msk [vmem:[%s1733_s20 + $0x48] sm:$0xff] %vm524_vm1, %v871_v39  ;;  %v814_v47 = vmul.f32 %v1677_v28, %v770_v32  ;;  %v846_v49 = vmul.f32 %v1696_v53, %v810_v10  ;;  %v878_v22 = vadd.f32 %v1716_v13, %v842_v52  ;;  %v815_v9 = vmul.f32 %v1677_v28, %v771_v45 }
 0x1d9   : > { %904 = vst.msk [vmem:[%s1733_s20 + $0x50] sm:$0xff] %vm524_vm1, %v872_v4  ;;  %v847_v50 = vmul.f32 %v1696_v53, %v811_v44  ;;  %v879_v51 = vadd.f32 %v1716_v13, %v843_v15  ;;  %v816_v25 = vmul.f32 %v1677_v28, %v772_v41  ;;  %v848_v1 = vmul.f32 %v1696_v53, %v812_v56 }
 0x1da   : > { %905 = vst.msk [vmem:[%s1733_s20 + $0x58] sm:$0xff] %vm524_vm1, %v873_v5  ;;  %v880_v16 = vadd.f32 %v1716_v13, %v844_v18  ;;  %v817_v36 = vmul.f32 %v1677_v28, %v773_v14  ;;  %v849_v48 = vmul.f32 %v1696_v53, %v813_v46  ;;  %v881_v38 = vadd.f32 %v1716_v13, %v845_v21 }
 0x1db   : > { %906 = vst.msk [vmem:[%s1733_s20 + $0x60] sm:$0xff] %vm524_vm1, %v874_v11  ;;  %v776_v40 = vsub.f32 %v1648_v42, %v1674_v26  ;;  %v818_v24 = vmul.f32 %v1677_v28, %v774_v17  ;;  %v850_v33 = vmul.f32 %v1696_v53, %v814_v47  ;;  %v882_v27 = vadd.f32 %v1716_v13, %v846_v49 }
 0x1dc   : > { %907 = vst.msk [vmem:[%s1733_s20 + $0x68] sm:$0xff] %vm524_vm1, %v875_v35  ;;  %v777_v62 = vsub.f32 %v1651_v8, %v1674_v26  ;;  %v819_v57 = vmul.f32 %v1677_v28, %v775_v2  ;;  %v851_v30 = vmul.f32 %v1696_v53, %v815_v9  ;;  %v883_v42 = vadd.f32 %v1716_v13, %v847_v50 }
 0x1dd   : > { %908 = vst.msk [vmem:[%s1733_s20 + $0x70] sm:$0xff] %vm524_vm1, %v876_v37  ;;  %v820_v34 = vmul.f32 %v1677_v28, %v776_v40  ;;  %v852_v54 = vmul.f32 %v1696_v53, %v816_v25  ;;  %v884_v55 = vadd.f32 %v1716_v13, %v848_v1  ;;  %v853_v26 = vmul.f32 %v1696_v53, %v817_v36 }
 0x1de   : > { %909 = vst.msk [vmem:[%s1733_s20 + $0x78] sm:$0xff] %vm524_vm1, %v877_v7  ;;  %v821_v8 = vmul.f32 %v1677_v28, %v777_v62  ;;  %v885_v31 = vadd.f32 %v1716_v13, %v849_v48  ;;  %v854_v58 = vmul.f32 %v1696_v53, %v818_v24  ;;  %v886_v63 = vadd.f32 %v1716_v13, %v850_v33 }
 0x1df   : > { %910 = vst.msk [vmem:[%s1733_s20 + $0x80] sm:$0xff] %vm524_vm1, %v878_v22  ;;  %v855_v60 = vmul.f32 %v1696_v53, %v819_v57  ;;  %v887_v28 = vadd.f32 %v1716_v13, %v851_v30  ;;  %v856_v43 = vmul.f32 %v1696_v53, %v820_v34  ;;  %v888_v61 = vadd.f32 %v1716_v13, %v852_v54 }
 0x1e0   : > { %911 = vst.msk [vmem:[%s1733_s20 + $0x88] sm:$0xff] %vm524_vm1, %v879_v51  ;;  %v857_v0 = vmul.f32 %v1696_v53, %v821_v8  ;;  %v889_v39 = vadd.f32 %v1716_v13, %v853_v26  ;;  %v890_v3 = vadd.f32 %v1716_v13, %v854_v58 }
 0x1e1   : > { %912 = vst.msk [vmem:[%s1733_s20 + $0x90] sm:$0xff] %vm524_vm1, %v880_v16  ;;  %v891_v6 = vadd.f32 %v1716_v13, %v855_v60  ;;  %v892_v19 = vadd.f32 %v1716_v13, %v856_v43 }
 0x1e2   : > { %913 = vst.msk [vmem:[%s1733_s20 + $0x98] sm:$0xff] %vm524_vm1, %v881_v38  ;;  %v893_v4 = vadd.f32 %v1716_v13, %v857_v0 }
 0x1e3   : > { %914 = vst.msk [vmem:[%s1733_s20 + $0xa0] sm:$0xff] %vm524_vm1, %v882_v27 }
 0x1e4   : > { %915 = vst.msk [vmem:[%s1733_s20 + $0xa8] sm:$0xff] %vm524_vm1, %v883_v42 }
 0x1e5   : > { %916 = vst.msk [vmem:[%s1733_s20 + $0xb0] sm:$0xff] %vm524_vm1, %v884_v55 }
 0x1e6   : > { %917 = vst.msk [vmem:[%s1733_s20 + $0xb8] sm:$0xff] %vm524_vm1, %v885_v31 }
 0x1e7   : > { %918 = vst.msk [vmem:[%s1733_s20 + $0xc0] sm:$0xff] %vm524_vm1, %v886_v63 }
 0x1e8   : > { %919 = vst.msk [vmem:[%s1733_s20 + $0xc8] sm:$0xff] %vm524_vm1, %v887_v28 }
 0x1e9   : > { %920 = vst.msk [vmem:[%s1733_s20 + $0xd0] sm:$0xff] %vm524_vm1, %v888_v61 }
 0x1ea   : > { %921 = vst.msk [vmem:[%s1733_s20 + $0xd8] sm:$0xff] %vm524_vm1, %v889_v39 }
 0x1eb   : > { %922 = vst.msk [vmem:[%s1733_s20 + $0xe0] sm:$0xff] %vm524_vm1, %v890_v3 }
 0x1ec   : > { %923 = vst.msk [vmem:[%s1733_s20 + $0xe8] sm:$0xff] %vm524_vm1, %v891_v6 }
 0x1ed   : > { %924 = vst.msk [vmem:[%s1733_s20 + $0xf0] sm:$0xff] %vm524_vm1, %v892_v19 }
 0x1ee   : > { %925 = vst.msk [vmem:[%s1733_s20 + $0xf8] sm:$0xff] %vm524_vm1, %v893_v4 }
 0x1ef PF: > { %p16_p7 = scmp.ge.s32.totalorder %s1224_s26, 4   ;;  %s1942_s21 = smov %s1155_s22 }
 0x1f0   : > { %s1943_s22 = smov %s1159_s23  ;;  %s1944_s23 = smov %s1234_s29 }
 0x1f1   : > { %s1945_s24 = smov %s1224_s26  ;;  %18 = sbr.rel (!%p16_p7) target bundleno = 3 (0x3), region = 84 }
 0x1f6   :  { %947 = vsyncpa [#allocation3], 1 }
 0x1f7   :  { %949 = vsyncpa [#allocation3 + $0x1], 1 }

// kernel: mlp_forward.5
= control target key start
LH: loop header
LB: loop body
LE: loop exit
PB: predicated region body
PF: predicated region fallthrough
CT: control target
= control target key end

     0   :  { %11 = vsyncpa [#allocation3], 0  ;;  %s1922_s0 = inlined_call_operand.vmem [shape: f32[2,256,16], index: 0, kind: input, shape index: {}]   ;;  %s1923_s1 = inlined_call_operand.vmem [shape: f32[16,64], index: 1, kind: input, shape index: {}]   ;;  %s1924_s2 = inlined_call_operand.vmem [shape: f32[1,64], index: 2, kind: input, shape index: {}]   ;;  %s1925_s3 = inlined_call_operand.vmem [shape: f32[64,64], index: 3, kind: input, shape index: {}]   ;;  %s1926_s4 = inlined_call_operand.vmem [shape: f32[1,64], index: 4, kind: input, shape index: {}]   ;;  %s1927_s5 = inlined_call_operand.vmem [shape: f32[1,64], index: 5, kind: input, shape index: {}]   ;;  %s1928_s6 = inlined_call_operand.hbm [shape: f32[2,256,64], index: 6, kind: output, shape index: {}]  }
   0x1   :  { %13 = vsyncpa [#allocation3 + $0x1], 0  ;;  %s1185_s21 = smov 0   ;;  %s1187_s22 = smov 0  }
   0x2   :  { %s1189_s23 = smov 0   ;;  %s1191_s24 = smov 0  }
   0x3 LB: > { %s1206_s25 = sadd.s32 4294967295, %s1146_s24   ;;  %s984_s26 = sadd.s32 4294967294, %s1146_s24   ;;  %s1146_s24 = sphi %s1191_s24, %s1934_s24   ;;  %s1142_s23 = sphi %s1189_s23, %s1933_s23   ;;  %s1138_s22 = sphi %s1187_s22, %s1932_s22   ;;  %s1134_s21 = sphi %s1185_s21, %s1931_s21  }
   0x4   : > { %s1210_s27 = sadd.s32 1, %s1146_s24   ;;  %s157_s28 = sadd.s32 1, %s1142_s23 }
   0x5   : > { %s154_s29 = ssub.s32 %s1146_s24, %s1210_s27  ;;  %p167_p0 = scmp.ne.s32.totalorder %s1142_s23, %s1138_s22 }
   0x6   : > { %p155_p1 = scmp.eq.s32.totalorder %s154_s29, 0  ;;  %p168_p2 = scmp.eq.s32.totalorder %s1206_s25, 1 }
   0x7   : > { %p173_p3 = scmp.ne.s32.totalorder %s1138_s22, %s1134_s21  ;;  %p174_p4 = scmp.eq.s32.totalorder %s984_s26, 1 }
   0x8   : > { %s1221_s30 = scalar_select %p155_p1, %s1142_s23, %s157_s28  }
   0x9   : > { %p1223_p5 = por %p168_p2, %p167_p0  ;;  %p1227_p6 = por %p174_p4, %p173_p3 }
   0xa   : > { %p987_p7 = scmp.ge.s32.totalorder %s1146_s24, 1  ;;  %p215_p8 = scmp.lt.s32.totalorder %s1146_s24, 3 }
   0xc   : > { %p216_p9 = pnand %p987_p7, %p215_p8 }
   0xd   : > { %p245_p10 = scmp.lt.s32.totalorder (!%p216_p9), %s1206_s25, 1  ;;  %s242_s29 = sand.u32 (!%p216_p9), 1, %s1138_s22  }
   0xe   : > { %219 = sbr.rel (%p216_p9) target bundleno = 482 (0x1e2), region = 44  ;;  %s988_s9 = sshll.u32 (!%p216_p9), %s242_s29, 8 }
   0xf   : > { %s1719_s12 = scalar_lea.vmem (!%p216_p9), [#allocation2], %s988_s9  ;;  %s907_s18 = scalar_lea.sflag (!%p216_p9), [#allocation3], %s242_s29 }
  0x10   : > { %s919_s16 = sshll.u32 (!%p216_p9), %s1719_s12, 4  ;;  %s1104_s9 = scalar_lea.hbm (!%p216_p9), %s1928_s6, 512  ;;  %s920_s16 = int_to_ptr.vmem [resolvable:$true] %s919_s16 }
  0x13   : > { %v283_v0 = vld [vmem:[%s1923_s1 + $0x8] sm:$0xff]  ;;  %v282_v1 = vld [vmem:[%s1923_s1] sm:$0xff]  ;;  %s246_s13 = scalar_select %p245_p10, %s1206_s25, 1  ;;  %vm288_vm0 = vcmask 130048   ;;  %vm498_vm1 = vcmask 523264   ;;  %v676_v63 = vld [vmem:[%s1925_s3 + $0x38] sm:$0xff] }
  0x14   : > { %399 = vmatpush.msra.mxu0 %v283_v0  ;;  %1032 = vmatpush.msra.mxu1 %v283_v0  ;;  %v1325_v46 = vld [vmem:[%s1924_s2] ss:$0 sm:$0xff] }
  0x15   : > { %1034 = vmatpush.msra.mxu3 %v283_v0  ;;  %1033 = vmatpush.msra.mxu2 %v283_v0  ;;  %s1030_s14 = sshll.u32 %s246_s13, 8  ;;  %s1031_s13 = sshll.u32 %s1206_s25, 8 }
  0x16   : > { %400 = vmatpush.msra.mxu0 %v282_v1  ;;  %1035 = vmatpush.msra.mxu1 %v282_v1  ;;  %s1244_s17 = scalar_lea.vmem %s1922_s0, %s1030_s14  ;;  %s918_s15 = scalar_lea.hbm %s1928_s6, %s1031_s13 }
  0x17   : > { %1037 = vmatpush.msra.mxu3 %v282_v1  ;;  %1036 = vmatpush.msra.mxu2 %v282_v1  ;;  %v250_v2 = vld [vmem:[%s1244_s17] sm:$0xff]  ;;  %v260_v3 = vld [vmem:[%s1244_s17 + $0x50] sm:$0xff]  ;;  %v251_v4 = vld [vmem:[%s1244_s17 + $0x8] sm:$0xff] }
  0x18   : > { %991 = vmatmul.msk.f32.vlgmr.msra.gmra.mxu0 %vm288_vm0, %v250_v2  ;;  %1001 = vmatmul.msk.f32.vlgmr.msra.gmra.mxu1 %vm288_vm0, %v260_v3  ;;  %v261_v5 = vld [vmem:[%s1244_s17 + $0x58] sm:$0xff]  ;;  %v252_v7 = vld [vmem:[%s1244_s17 + $0x10] sm:$0xff]  ;;  %v262_v8 = vld [vmem:[%s1244_s17 + $0x60] sm:$0xff] }
  0x19   : > { %v273_v6 = vld [vmem:[%s1244_s17 + $0xb8] sm:$0xff]  ;;  %v274_v9 = vld [vmem:[%s1244_s17 + $0xc0] sm:$0xff]  ;;  %v263_v11 = vld [vmem:[%s1244_s17 + $0x68] sm:$0xff]  ;;  %688 = vmatpush.msrb.mxu1 %v676_v63  ;;  %711 = vmatpush.msrb.mxu2 %v676_v63 }
  0x1a   : > { %1014 = vmatmul.msk.f32.vlgmr.msra.gmra.mxu3 %vm288_vm0, %v273_v6  ;;  %v253_v10 = vld [vmem:[%s1244_s17 + $0x18] sm:$0xff]  ;;  %v268_v12 = vld [vmem:[%s1244_s17 + $0x90] sm:$0xff]  ;;  %v275_v13 = vld [vmem:[%s1244_s17 + $0xc8] sm:$0xff] }
  0x1b   : > { %1009 = vmatmul.msk.f32.vlgmr.msra.gmra.mxu2 %vm288_vm0, %v268_v12  ;;  %v254_v14 = vld [vmem:[%s1244_s17 + $0x20] sm:$0xff]  ;;  %v264_v15 = vld [vmem:[%s1244_s17 + $0x70] sm:$0xff]  ;;  %v269_v16 = vld [vmem:[%s1244_s17 + $0x98] sm:$0xff] }
  0x1c   : > { %v276_v17 = vld [vmem:[%s1244_s17 + $0xd0] sm:$0xff]  ;;  %v255_v18 = vld [vmem:[%s1244_s17 + $0x28] sm:$0xff]  ;;  %v265_v19 = vld [vmem:[%s1244_s17 + $0x78] sm:$0xff] }
  0x1d   : > { %v270_v20 = vld [vmem:[%s1244_s17 + $0xa0] sm:$0xff]  ;;  %v277_v21 = vld [vmem:[%s1244_s17 + $0xd8] sm:$0xff]  ;;  %v256_v22 = vld [vmem:[%s1244_s17 + $0x30] sm:$0xff] }
  0x1e   : > { %v266_v23 = vld [vmem:[%s1244_s17 + $0x80] sm:$0xff]  ;;  %v271_v24 = vld [vmem:[%s1244_s17 + $0xa8] sm:$0xff]  ;;  %v257_v26 = vld [vmem:[%s1244_s17 + $0x38] sm:$0xff] }
  0x1f   : > { %v278_v25 = vld [vmem:[%s1244_s17 + $0xe0] sm:$0xff]  ;;  %v267_v27 = vld [vmem:[%s1244_s17 + $0x88] sm:$0xff]  ;;  %v272_v28 = vld [vmem:[%s1244_s17 + $0xb0] sm:$0xff] }
  0x20   : > { %992 = vmatmul.msk.f32.gmra.mxu0 %vm288_vm0, %v251_v4  ;;  %1002 = vmatmul.msk.f32.gmra.mxu1 %vm288_vm0, %v261_v5  ;;  %v279_v29 = vld [vmem:[%s1244_s17 + $0xe8] sm:$0xff]  ;;  %v258_v30 = vld [vmem:[%s1244_s17 + $0x40] sm:$0xff]  ;;  %v280_v31 = vld [vmem:[%s1244_s17 + $0xf0] sm:$0xff] }
  0x21   : > { %v259_v32 = vld [vmem:[%s1244_s17 + $0x48] sm:$0xff]  ;;  %v281_v33 = vld [vmem:[%s1244_s17 + $0xf8] sm:$0xff]  ;;  %s921_s17 = sshll.u32 %s918_s15, 4  ;;  %s922_s17 = int_to_ptr.hbm [resolvable:$true] %s921_s17 }
  0x22   : > { %1015 = vmatmul.msk.f32.gmra.mxu3 %vm288_vm0, %v274_v9  ;;  %s1098_s19 = sshra.s32 %s922_s17, 4  ;;  %s1099_s19 = int_to_ptr.hbm [resolvable:$true] %s1098_s19 }
  0x23   : > { %1010 = vmatmul.msk.f32.gmra.mxu2 %vm288_vm0, %v269_v16  ;;  %s1100_s20 = scalar_lea.hbm %s1099_s19, 256  ;;  %p1105_p0 = scmp.lt.s32.totalorder %s1099_s19, %s1928_s6 }
  0x24   : > { %p1101_p11 = scmp.ne.s32.totalorder %s1099_s19, %s1100_s20  ;;  %p1106_p1 = scmp.lt.s32.totalorder %s1104_s9, %s1100_s20 }
  0x26   : > { %p1102_p12 = pnand %p1101_p11, %p1223_p5  ;;  %p1107_p2 = por %p1106_p1, %p1105_p0 }
  0x28   : > { %993 = vmatmul.msk.f32.gmra.mxu0 %vm288_vm0, %v252_v7  ;;  %1003 = vmatmul.msk.f32.gmra.mxu1 %vm288_vm0, %v262_v8  ;;  %v675_v8 = vld [vmem:[%s1925_s3 + $0x30] sm:$0xff]  ;;  %p1103_p13 = pneg %p1102_p12 }
  0x29   : > { %689 = vmatpush.msrb.mxu1 %v675_v8  ;;  %712 = vmatpush.msrb.mxu2 %v675_v8 }
  0x2a   : > { %1016 = vmatmul.msk.f32.gmra.mxu3 %vm288_vm0, %v275_v13  ;;  %p1108_p3 = pnand %p1107_p2, %p1103_p13 }
  0x2b   : > { %1011 = vmatmul.msk.f32.gmra.mxu2 %vm288_vm0, %v270_v20 }
  0x30   : > { %994 = vmatmul.msk.f32.gmra.mxu0 %vm288_vm0, %v253_v10  ;;  %1004 = vmatmul.msk.f32.gmra.mxu1 %vm288_vm0, %v263_v11 }
  0x32   : > { %1017 = vmatmul.msk.f32.gmra.mxu3 %vm288_vm0, %v276_v17 }
  0x33   : > { %1012 = vmatmul.msk.f32.gmra.mxu2 %vm288_vm0, %v271_v24 }
  0x38   : > { %995 = vmatmul.msk.f32.gmra.mxu0 %vm288_vm0, %v254_v14  ;;  %1005 = vmatmul.msk.f32.gmra.mxu1 %vm288_vm0, %v264_v15 }
  0x3a   : > { %1018 = vmatmul.msk.f32.gmra.mxu3 %vm288_vm0, %v277_v21 }
  0x3b   : > { %1013 = vmatmul.msk.f32.gmra.mxu2 %vm288_vm0, %v272_v28 }
  0x40   : > { %996 = vmatmul.msk.f32.gmra.mxu0 %vm288_vm0, %v255_v18  ;;  %1006 = vmatmul.msk.f32.gmra.mxu1 %vm288_vm0, %v265_v19 }
  0x42   : > { %1019 = vmatmul.msk.f32.gmra.mxu3 %vm288_vm0, %v278_v25 }
  0x48   : > { %997 = vmatmul.msk.f32.gmra.mxu0 %vm288_vm0, %v256_v22  ;;  %1007 = vmatmul.msk.f32.gmra.mxu1 %vm288_vm0, %v266_v23 }
  0x4a   : > { %1020 = vmatmul.msk.f32.gmra.mxu3 %vm288_vm0, %v279_v29 }
  0x50   : > { %998 = vmatmul.msk.f32.gmra.mxu0 %vm288_vm0, %v257_v26  ;;  %1008 = vmatmul.msk.f32.gmra.mxu1 %vm288_vm0, %v267_v27 }
  0x52   : > { %1021 = vmatmul.msk.f32.gmra.mxu3 %vm288_vm0, %v280_v31 }
  0x58   : > { %999 = vmatmul.msk.f32.gmra.mxu0 %vm288_vm0, %v258_v30 }
  0x5a   : > { %1022 = vmatmul.msk.f32.gmra.mxu3 %vm288_vm0, %v281_v33 }
  0x60   : > { %1000 = vmatmul.msk.f32.gmra.mxu0 %vm288_vm0, %v259_v32 }
  0x95   : > { %v402_v34 = vpop.f32.mrf.mxu0  ;;  %v1310_v36 = vpop.f32.mrf.mxu1 }
  0x96   : > { %v1337_v52 = vadd.f32 %v1325_v46, %v402_v34 }
  0x98   : > { %v568_v56 = vmul.f32 %v1337_v52, %v1337_v52  ;;  %v499_v61 = vsel %vm498_vm1, %v1337_v52, 0.0 }
  0x9a   : > { %v600_v4 = vsel %vm498_vm1, %v568_v56, 0.0  ;;  %v1422_v56 = vadd.f32 %v1325_v46, %v1310_v36 }
  0x9c   : > { %v578_v8 = vmul.f32 %v1422_v56, %v1422_v56 }
  0x9d   : > { %v405_v35 = vpop.f32.mrf.mxu0  ;;  %v1312_v38 = vpop.f32.mrf.mxu1 }
  0x9e   : > { %v1314_v40 = vpop.f32.mrf.mxu3  ;;  %v1331_v50 = vpop.f32.mrf.mxu2  ;;  %v1334_v51 = vadd.f32 %v1325_v46, %v405_v35 }
  0xa0   : > { %v569_v54 = vmul.f32 %v1334_v51, %v1334_v51  ;;  %v500_v58 = vsel %vm498_vm1, %v1334_v51, 0.0 }
  0xa1   : > { %v501_v5 = vadd.f32 %v500_v58, %v499_v61 }
  0xa2   : > { %v601_v0 = vsel %vm498_vm1, %v569_v54, 0.0  ;;  %v674_v54 = vld [vmem:[%s1925_s3 + $0x28] sm:$0xff] }
  0xa3   : > { %v602_v13 = vadd.f32 %v601_v0, %v600_v4  ;;  %690 = vmatpush.msrb.mxu1 %v674_v54  ;;  %713 = vmatpush.msrb.mxu2 %v674_v54  ;;  %v1429_v0 = vadd.f32 %v1325_v46, %v1312_v38 }
  0xa5   : > { %v408_v37 = vpop.f32.mrf.mxu0  ;;  %v1316_v41 = vpop.f32.mrf.mxu1 }
  0xa6   : > { %v1318_v43 = vpop.f32.mrf.mxu3  ;;  %v1340_v53 = vadd.f32 %v1325_v46, %v408_v37  ;;  %v1374_v7 = vpop.f32.mrf.mxu2  ;;  %v1437_v36 = vadd.f32 %v1325_v46, %v1316_v41  ;;  %v579_v41 = vmul.f32 %v1429_v0, %v1429_v0 }
  0xa8   : > { %v570_v59 = vmul.f32 %v1340_v53, %v1340_v53  ;;  %v502_v1 = vsel %vm498_vm1, %v1340_v53, 0.0 }
  0xa9   : > { %v503_v14 = vadd.f32 %v502_v1, %v501_v5 }
  0xaa   : > { %v603_v9 = vsel %vm498_vm1, %v570_v59, 0.0 }
  0xab   : > { %v604_v19 = vadd.f32 %v603_v9, %v602_v13  ;;  %v518_v13 = vsel %vm498_vm1, %v1422_v56, 0.0 }
  0xad   : > { %v411_v39 = vpop.f32.mrf.mxu0  ;;  %v1320_v45 = vpop.f32.mrf.mxu1 }
  0xae   : > { %v1327_v48 = vpop.f32.mrf.mxu3  ;;  %v1345_v55 = vadd.f32 %v1325_v46, %v411_v39 }
  0xb0   : > { %v571_v2 = vmul.f32 %v1345_v55, %v1345_v55  ;;  %v504_v10 = vsel %vm498_vm1, %v1345_v55, 0.0 }
  0xb1   : > { %v505_v20 = vadd.f32 %v504_v10, %v503_v14  ;;  %v1451_v14 = vadd.f32 %v1325_v46, %v1320_v45 }
  0xb2   : > { %v605_v15 = vsel %vm498_vm1, %v571_v2, 0.0 }
  0xb3   : > { %v606_v26 = vadd.f32 %v605_v15, %v604_v19 }
  0xb5   : > { %v414_v42 = vpop.f32.mrf.mxu0  ;;  %v1329_v49 = vpop.f32.mrf.mxu1 }
  0xb6   : > { %v1354_v60 = vadd.f32 %v1325_v46, %v414_v42  ;;  %v1358_v62 = vpop.f32.mrf.mxu3 }
  0xb8   : > { %v572_v11 = vmul.f32 %v1354_v60, %v1354_v60  ;;  %v506_v16 = vsel %vm498_vm1, %v1354_v60, 0.0 }
  0xb9   : > { %v507_v27 = vadd.f32 %v506_v16, %v505_v20  ;;  %v580_v16 = vmul.f32 %v1437_v36, %v1437_v36 }
  0xba   : > { %v607_v22 = vsel %vm498_vm1, %v572_v11, 0.0 }
  0xbb   : > { %v608_v31 = vadd.f32 %v607_v22, %v606_v26  ;;  %v520_v22 = vsel %vm498_vm1, %v1429_v0, 0.0 }
  0xbd   : > { %v417_v44 = vpop.f32.mrf.mxu0  ;;  %v1372_v6 = vpop.f32.mrf.mxu1 }
  0xbe   : > { %v1369_v3 = vadd.f32 %v1325_v46, %v417_v44  ;;  %v1408_v33 = vpop.f32.mrf.mxu3 }
  0xc0   : > { %v573_v17 = vmul.f32 %v1369_v3, %v1369_v3  ;;  %v508_v23 = vsel %vm498_vm1, %v1369_v3, 0.0 }
  0xc1   : > { %v509_v32 = vadd.f32 %v508_v23, %v507_v27  ;;  %v1463_v23 = vadd.f32 %v1325_v46, %v1329_v49 }
  0xc2   : > { %v609_v28 = vsel %vm498_vm1, %v573_v17, 0.0 }
  0xc3   : > { %v610_v39 = vadd.f32 %v609_v28, %v608_v31  ;;  %v621_v28 = vsel %vm498_vm1, %v579_v41, 0.0  ;;  %v1472_v31 = vadd.f32 %v1325_v46, %v1372_v6  ;;  %v1512_v41 = vadd.f32 %v1325_v46, %v1374_v7 }
  0xc5   : > { %v420_v47 = vpop.f32.mrf.mxu0  ;;  %v450_v44 = vpop.f32.mrf.mxu1 }
  0xc6   : > { %v1385_v12 = vadd.f32 %v1325_v46, %v420_v47  ;;  %v1415_v47 = vpop.f32.mrf.mxu2  ;;  %v1456_v20 = vpop.f32.mrf.mxu3 }
  0xc7   : > { %v1523_v7 = vadd.f32 %v1325_v46, %v1415_v47  ;;  %v671_v47 = vld [vmem:[%s1925_s3 + $0x10] sm:$0xff] }
  0xc8   : > { %v574_v24 = vmul.f32 %v1385_v12, %v1385_v12  ;;  %v510_v29 = vsel %vm498_vm1, %v1385_v12, 0.0 }
  0xc9   : > { %v511_v42 = vadd.f32 %v510_v29, %v509_v32  ;;  %v522_v29 = vsel %vm498_vm1, %v1437_v36, 0.0  ;;  %v623_v32 = vsel %vm498_vm1, %v580_v16, 0.0 }
  0xca   : > { %v611_v34 = vsel %vm498_vm1, %v574_v24, 0.0 }
  0xcb   : > { %v612_v59 = vadd.f32 %v611_v34, %v610_v39  ;;  %v1480_v39 = vadd.f32 %v1325_v46, %v450_v44 }
  0xcd   : > { %v423_v57 = vpop.f32.mrf.mxu0  ;;  %v453_v26 = vpop.f32.mrf.mxu1 }
  0xce   : > { %v1393_v18 = vadd.f32 %v1325_v46, %v423_v57  ;;  %v465_v27 = vpop.f32.mrf.mxu2 }
  0xd0   : > { %v575_v30 = vmul.f32 %v1393_v18, %v1393_v18  ;;  %v512_v35 = vsel %vm498_vm1, %v1393_v18, 0.0 }
  0xd1   : > { %v513_v61 = vadd.f32 %v512_v35, %v511_v42  ;;  %v524_v35 = vsel %vm498_vm1, %v1451_v14, 0.0  ;;  %v1483_v42 = vadd.f32 %v1325_v46, %v453_v26 }
  0xd2   : > { %v613_v57 = vsel %vm498_vm1, %v575_v30, 0.0  ;;  %v581_v30 = vmul.f32 %v1451_v14, %v1451_v14 }
  0xd3   : > { %v614_v4 = vadd.f32 %v613_v57, %v612_v59  ;;  %v583_v59 = vmul.f32 %v1472_v31, %v1472_v31  ;;  %v532_v16 = vsel %vm498_vm1, %v1483_v42, 0.0 }
  0xd4   : > { %v625_v6 = vsel %vm498_vm1, %v581_v30, 0.0  ;;  %v587_v30 = vmul.f32 %v1512_v41, %v1512_v41 }
  0xd5   : > { %v426_v21 = vpop.f32.mrf.mxu0 }
  0xd6   : > { %v1401_v25 = vadd.f32 %v1325_v46, %v426_v21  ;;  %v619_v21 = vsel %vm498_vm1, %v578_v8, 0.0  ;;  %v584_v8 = vmul.f32 %v1480_v39, %v1480_v39 }
  0xd8   : > { %v576_v37 = vmul.f32 %v1401_v25, %v1401_v25  ;;  %v514_v58 = vsel %vm498_vm1, %v1401_v25, 0.0 }
  0xd9   : > { %v515_v5 = vadd.f32 %v514_v58, %v513_v61  ;;  %v526_v58 = vsel %vm498_vm1, %v1463_v23, 0.0  ;;  %v1492_v61 = vadd.f32 %v1325_v46, %v1331_v50 }
  0xda   : > { %v615_v1 = vsel %vm498_vm1, %v576_v37, 0.0  ;;  %v582_v37 = vmul.f32 %v1463_v23, %v1463_v23 }
  0xdb   : > { %v616_v10 = vadd.f32 %v615_v1, %v614_v4  ;;  %v673_v1 = vld [vmem:[%s1925_s3 + $0x20] sm:$0xff] }
  0xdc   : > { %v627_v4 = vsel %vm498_vm1, %v582_v37, 0.0  ;;  %691 = vmatpush.msrb.mxu1 %v673_v1  ;;  %714 = vmatpush.msrb.mxu2 %v673_v1  ;;  %v670_v37 = vld [vmem:[%s1925_s3 + $0x8] sm:$0xff]  ;;  %v538_v1 = vsel %vm498_vm1, %v1523_v7, 0.0 }
  0xdd   : > { %v429_v63 = vpop.f32.mrf.mxu0 }
  0xde   : > { %v1433_v2 = vadd.f32 %v1325_v46, %v429_v63 }
  0xe0   : > { %v516_v9 = vsel %vm498_vm1, %v1433_v2, 0.0  ;;  %v577_v38 = vmul.f32 %v1433_v2, %v1433_v2 }
  0xe1   : > { %v517_v11 = vadd.f32 %v516_v9, %v515_v5  ;;  %v528_v5 = vsel %vm498_vm1, %v1472_v31, 0.0  ;;  %v585_v9 = vmul.f32 %v1483_v42, %v1483_v42 }
  0xe2   : > { %v617_v15 = vsel %vm498_vm1, %v577_v38, 0.0 }
  0xe3   : > { %v519_v17 = vadd.f32 %v518_v13, %v517_v11  ;;  %v618_v19 = vadd.f32 %v617_v15, %v616_v10  ;;  %v1504_v10 = vpop.f32.mrf.mxu3  ;;  %v672_v11 = vld [vmem:[%s1925_s3 + $0x18] sm:$0xff]  ;;  %v629_v13 = vsel %vm498_vm1, %v583_v59, 0.0  ;;  %v530_v15 = vsel %vm498_vm1, %v1480_v39, 0.0 }
  0xe4   : > { %692 = vmatpush.msrb.mxu1 %v672_v11  ;;  %715 = vmatpush.msrb.mxu2 %v672_v11 }
  0xe5   : > { %v521_v45 = vadd.f32 %v520_v22, %v519_v17  ;;  %v620_v24 = vadd.f32 %v619_v21, %v618_v19  ;;  %v468_v21 = vpop.f32.mrf.mxu2  ;;  %v586_v22 = vmul.f32 %v1492_v61, %v1492_v61 }
  0xe6   : > { %693 = vmatpush.msrb.mxu1 %v671_v47  ;;  %716 = vmatpush.msrb.mxu2 %v671_v47 }
  0xe7   : > { %v622_v49 = vadd.f32 %v621_v28, %v620_v24  ;;  %v523_v34 = vadd.f32 %v522_v29, %v521_v45  ;;  %v631_v45 = vsel %vm498_vm1, %v584_v8, 0.0  ;;  %v633_v24 = vsel %vm498_vm1, %v585_v9, 0.0 }
  0xe8   : > { %v534_v29 = vsel %vm498_vm1, %v1492_v61, 0.0  ;;  %694 = vmatpush.msrb.mxu1 %v670_v37  ;;  %717 = vmatpush.msrb.mxu2 %v670_v37 }
  0xe9   : > { %v525_v54 = vadd.f32 %v524_v35, %v523_v34  ;;  %v624_v57 = vadd.f32 %v623_v32, %v622_v49  ;;  %v1531_v32 = vadd.f32 %v1325_v46, %v465_v27  ;;  %v1534_v49 = vadd.f32 %v1325_v46, %v468_v21 }
  0xea   : > { %v588_v27 = vmul.f32 %v1523_v7, %v1523_v7 }
  0xeb   : > { %v527_v63 = vadd.f32 %v526_v58, %v525_v54  ;;  %v626_v44 = vadd.f32 %v625_v6, %v624_v57  ;;  %v635_v54 = vsel %vm498_vm1, %v586_v22, 0.0  ;;  %v536_v57 = vsel %vm498_vm1, %v1512_v41, 0.0  ;;  %v492_v9 = vpop.f32.mrf.mxu3 }
  0xec   : > { %v1549_v6 = vadd.f32 %v1325_v46, %v1314_v40  ;;  %v540_v11 = vsel %vm498_vm1, %v1531_v32, 0.0  ;;  %v1580_v22 = vadd.f32 %v1325_v46, %v1358_v62  ;;  %v1593_v62 = vadd.f32 %v1325_v46, %v1408_v33 }
  0xed   : > { %v529_v50 = vadd.f32 %v528_v5, %v527_v63  ;;  %v628_v38 = vadd.f32 %v627_v4, %v626_v44  ;;  %v669_v63 = vld [vmem:[%s1925_s3] sm:$0xff]  ;;  %v637_v44 = vsel %vm498_vm1, %v587_v30, 0.0  ;;  %v589_v4 = vmul.f32 %v1531_v32, %v1531_v32 }
  0xee   : > { %v590_v5 = vmul.f32 %v1534_v49, %v1534_v49  ;;  %718 = vmatpush.msrb.mxu2 %v669_v63  ;;  %695 = vmatpush.msrb.mxu1 %v669_v63  ;;  %v594_v47 = vmul.f32 %v1580_v22, %v1580_v22 }
  0xef   : > { %v630_v17 = vadd.f32 %v629_v13, %v628_v38  ;;  %v531_v19 = vadd.f32 %v530_v15, %v529_v50  ;;  %v1563_v50 = vadd.f32 %v1325_v46, %v1318_v43  ;;  %v639_v38 = vsel %vm498_vm1, %v588_v27, 0.0 }
  0xf0   : > { %v542_v13 = vsel %vm498_vm1, %v1534_v49, 0.0  ;;  %v641_v43 = vsel %vm498_vm1, %v589_v4, 0.0  ;;  %v643_v21 = vsel %vm498_vm1, %v590_v5, 0.0  ;;  %v595_v4 = vmul.f32 %v1593_v62, %v1593_v62 }
  0xf1   : > { %v632_v26 = vadd.f32 %v631_v45, %v630_v17  ;;  %v533_v28 = vadd.f32 %v532_v16, %v531_v19  ;;  %v591_v17 = vmul.f32 %v1549_v6, %v1549_v6  ;;  %v1574_v19 = vadd.f32 %v1325_v46, %v1327_v48 }
  0xf2   : > { %v1611_v5 = vadd.f32 %v1325_v46, %v1504_v10  ;;  %v653_v10 = vsel %vm498_vm1, %v595_v4, 0.0 }
  0xf3   : > { %v535_v34 = vadd.f32 %v534_v29, %v533_v28  ;;  %v634_v35 = vadd.f32 %v633_v24, %v632_v26  ;;  %v544_v26 = vsel %vm498_vm1, %v1549_v6, 0.0  ;;  %v592_v28 = vmul.f32 %v1563_v50, %v1563_v50 }
  0xf4   : > { %v645_v48 = vsel %vm498_vm1, %v591_v17, 0.0  ;;  %v548_v27 = vsel %vm498_vm1, %v1574_v19, 0.0 }
  0xf5   : > { %v636_v58 = vadd.f32 %v635_v54, %v634_v35  ;;  %v537_v59 = vadd.f32 %v536_v57, %v535_v34  ;;  %v546_v34 = vsel %vm498_vm1, %v1563_v50, 0.0  ;;  %v593_v35 = vmul.f32 %v1574_v19, %v1574_v19 }
  0xf6   : > { %v647_v57 = vsel %vm498_vm1, %v592_v28, 0.0 }
  0xf7   : > { %v539_v40 = vadd.f32 %v538_v1, %v537_v59  ;;  %v638_v8 = vadd.f32 %v637_v44, %v636_v58  ;;  %v1602_v58 = vadd.f32 %v1325_v46, %v1456_v20  ;;  %v495_v44 = vpop.f32.mrf.mxu3  ;;  %v649_v33 = vsel %vm498_vm1, %v593_v35, 0.0 }
  0xf8   : > { %v550_v1 = vsel %vm498_vm1, %v1580_v22, 0.0 }
  0xf9   : > { %v541_v15 = vadd.f32 %v540_v11, %v539_v40  ;;  %v640_v16 = vadd.f32 %v639_v38, %v638_v8  ;;  %v651_v40 = vsel %vm498_vm1, %v594_v47, 0.0  ;;  %v552_v38 = vsel %vm498_vm1, %v1593_v62, 0.0 }
  0xfa   : > { %v596_v11 = vmul.f32 %v1602_v58, %v1602_v58 }
  0xfb   : > { %v642_v45 = vadd.f32 %v641_v43, %v640_v16  ;;  %v543_v24 = vadd.f32 %v542_v13, %v541_v15  ;;  %v1619_v13 = vadd.f32 %v1325_v46, %v492_v9  ;;  %v1622_v15 = vadd.f32 %v1325_v46, %v495_v44 }
  0xfc   : > { %v554_v43 = vsel %vm498_vm1, %v1602_v58, 0.0  ;;  %v556_v9 = vsel %vm498_vm1, %v1611_v5, 0.0 }
  0xfd   : > { %v545_v29 = vadd.f32 %v544_v26, %v543_v24  ;;  %v644_v30 = vadd.f32 %v643_v21, %v642_v45  ;;  %v597_v21 = vmul.f32 %v1611_v5, %v1611_v5  ;;  %v655_v26 = vsel %vm498_vm1, %v596_v11, 0.0 }
  0xfe   : > { %v598_v46 = vmul.f32 %v1619_v13, %v1619_v13  ;;  %v599_v28 = vmul.f32 %v1622_v15, %v1622_v15  ;;  %v560_v35 = vsel %vm498_vm1, %v1622_v15, 0.0 }
  0xff   : > { %v547_v37 = vadd.f32 %v546_v34, %v545_v29  ;;  %v646_v54 = vadd.f32 %v645_v48, %v644_v30  ;;  %v657_v48 = vsel %vm498_vm1, %v597_v21, 0.0  ;;  %v558_v34 = vsel %vm498_vm1, %v1619_v13, 0.0 }
 0x101   : > { %v549_v59 = vadd.f32 %v548_v27, %v547_v37  ;;  %v648_v63 = vadd.f32 %v647_v57, %v646_v54  ;;  %v659_v54 = vsel %vm498_vm1, %v598_v46, 0.0  ;;  %v661_v57 = vsel %vm498_vm1, %v599_v28, 0.0 }
 0x103   : > { %v650_v8 = vadd.f32 %v649_v33, %v648_v63  ;;  %v551_v20 = vadd.f32 %v550_v1, %v549_v59 }
 0x105   : > { %v553_v16 = vadd.f32 %v552_v38, %v551_v20  ;;  %v652_v17 = vadd.f32 %v651_v40, %v650_v8 }
 0x107   : > { %v555_v45 = vadd.f32 %v554_v43, %v553_v16  ;;  %v654_v24 = vadd.f32 %v653_v10, %v652_v17 }
 0x109   : > { %v557_v29 = vadd.f32 %v556_v9, %v555_v45  ;;  %v656_v30 = vadd.f32 %v655_v26, %v654_v24 }
 0x10b   : > { %v658_v47 = vadd.f32 %v657_v48, %v656_v30  ;;  %v559_v37 = vadd.f32 %v558_v34, %v557_v29 }
 0x10d   : > { %v660_v27 = vadd.f32 %v659_v54, %v658_v47  ;;  %v561_v59 = vadd.f32 %v560_v35, %v559_v37 }
 0x10f   : > { %v562_v63 = vrot.slane %v561_v59, 4  ;;  %v662_v44 = vadd.f32 %v661_v57, %v660_v27 }
 0x111   : > { %v563_v33 = vadd.f32 %v562_v63, %v561_v59  ;;  %v663_v1 = vrot.slane %v662_v44, 4  ;;  %v1660_v59 = vld [vmem:[%s1926_s4] ss:$0 sm:$0xff] }
 0x113   : > { %v564_v4 = vrot.slane %v563_v33, 2  ;;  %v664_v40 = vadd.f32 %v663_v1, %v662_v44 }
 0x115   : > { %v565_v8 = vadd.f32 %v564_v4, %v563_v33  ;;  %v665_v20 = vrot.slane %v664_v40, 2 }
 0x117   : > { %v566_v38 = vrot.slane %v565_v8, 1  ;;  %v666_v11 = vadd.f32 %v665_v20, %v664_v40 }
 0x119   : > { %v567_v16 = vadd.f32 %v566_v38, %v565_v8  ;;  %v667_v17 = vrot.slane %v666_v11, 1 }
 0x11b   : > { %1023 = vmatmul.msk.f32.vlgmr.msrb.gmra.mxu1 %vm498_vm1, %v567_v16  ;;  %v668_v10 = vadd.f32 %v667_v17, %v666_v11 }
 0x11d   : > { %1024 = vmatmul.msk.f32.vlgmr.msrb.gmra.mxu2 %vm498_vm1, %v668_v10 }
 0x198   : > { %v697_v43 = vpop.f32.mrf.mxu1 }
 0x199   : > { %v723_v45 = vmul.f32 %v697_v43, %v697_v43  ;;  %v1645_v35 = vperm.slane %v697_v43, 0 }
 0x19b   : > { %v726_v37 = vsub.f32 %v1337_v52, %v1645_v35  ;;  %v727_v54 = vsub.f32 %v1334_v51, %v1645_v35  ;;  %v728_v57 = vsub.f32 %v1340_v53, %v1645_v35  ;;  %v729_v27 = vsub.f32 %v1345_v55, %v1645_v35 }
 0x19c   : > { %v730_v63 = vsub.f32 %v1354_v60, %v1645_v35  ;;  %v731_v53 = vsub.f32 %v1369_v3, %v1645_v35  ;;  %v732_v33 = vsub.f32 %v1385_v12, %v1645_v35  ;;  %v733_v60 = vsub.f32 %v1393_v18, %v1645_v35  ;;  %v1684_v3 = vld [vmem:[%s1927_s5] ss:$0 sm:$0xff] }
 0x19d   : > { %v734_v4 = vsub.f32 %v1401_v25, %v1645_v35  ;;  %v735_v25 = vsub.f32 %v1433_v2, %v1645_v35  ;;  %v736_v38 = vsub.f32 %v1422_v56, %v1645_v35  ;;  %v737_v17 = vsub.f32 %v1429_v0, %v1645_v35 }
 0x1a0   : > { %v720_v21 = vpop.f32.mrf.mxu2 }
 0x1a1   : > { %v724_v24 = vsub.f32 %v720_v21, %v723_v45  ;;  %v738_v21 = vsub.f32 %v1437_v36, %v1645_v35 }
 0x1a3   : > { %v758_v26 = vadd.f32 1e-05, %v724_v24 }
 0x1a5   : > { %1082 = vrsqrt.f32 %v758_v26  ;;  %vm765_vm3 = vweird.f32 %v758_v26 }
 0x1ab   : > { %v1083_v9 = vpop.eup %1082 }
 0x1ac   : > { %v760_v46 = vmul.f32 %v1083_v9, %v758_v26  ;;  %vm766_vm2 = vweird.f32 %v1083_v9 }
 0x1ad   : > { %vm767_vm4 = vmor %vm765_vm3, %vm766_vm2 }
 0x1ae   : > { %v761_v28 = vmul.f32 %v1083_v9, %v760_v46  ;;  %v739_v46 = vsub.f32 %v1451_v14, %v1645_v35  ;;  %v741_v14 = vsub.f32 %v1472_v31, %v1645_v35  ;;  %v743_v31 = vsub.f32 %v1483_v42, %v1645_v35 }
 0x1af   : > { %v745_v42 = vsub.f32 %v1512_v41, %v1645_v35  ;;  %v747_v41 = vsub.f32 %v1531_v32, %v1645_v35  ;;  %v749_v32 = vsub.f32 %v1549_v6, %v1645_v35  ;;  %v751_v6 = vsub.f32 %v1574_v19, %v1645_v35 }
 0x1b0   : > { %v762_v29 = vmul.f32 0.5, %v761_v28  ;;  %v753_v19 = vsub.f32 %v1593_v62, %v1645_v35  ;;  %v755_v62 = vsub.f32 %v1611_v5, %v1645_v35 }
 0x1b2   : > { %v763_v30 = vsub.f32 1.5, %v762_v29 }
 0x1b4   : > { %v764_v48 = vmul.f32 %v1083_v9, %v763_v30  ;;  %v740_v30 = vsub.f32 %v1463_v23, %v1645_v35 }
 0x1b6   : > { %v768_v34 = vsel %vm767_vm4, %v1083_v9, %v764_v48 }
 0x1b7   : > { %v1647_v47 = vperm.slane %v768_v34, 0 }
 0x1b9   : > { %v770_v52 = vmul.f32 %v1647_v47, %v726_v37  ;;  %v771_v44 = vmul.f32 %v1647_v47, %v727_v54  ;;  %v772_v51 = vmul.f32 %v1647_v47, %v728_v57  ;;  %v773_v55 = vmul.f32 %v1647_v47, %v729_v27 }
 0x1ba   : > { %v774_v1 = vmul.f32 %v1647_v47, %v730_v63  ;;  %v775_v40 = vmul.f32 %v1647_v47, %v731_v53  ;;  %v776_v8 = vmul.f32 %v1647_v47, %v732_v33  ;;  %v777_v11 = vmul.f32 %v1647_v47, %v733_v60 }
 0x1bb   : > { %v806_v12 = vmul.f32 %v1660_v59, %v770_v52  ;;  %v807_v20 = vmul.f32 %v1660_v59, %v771_v44  ;;  %v808_v18 = vmul.f32 %v1660_v59, %v772_v51  ;;  %v809_v16 = vmul.f32 %v1660_v59, %v773_v55 }
 0x1bc   : > { %v778_v10 = vmul.f32 %v1647_v47, %v734_v4  ;;  %v810_v43 = vmul.f32 %v1660_v59, %v774_v1  ;;  %v779_v45 = vmul.f32 %v1647_v47, %v735_v25  ;;  %v780_v2 = vmul.f32 %v1647_v47, %v736_v38 }
 0x1bd   : > { %v811_v56 = vmul.f32 %v1660_v59, %v775_v40  ;;  %v812_v24 = vmul.f32 %v1660_v59, %v776_v8  ;;  %v842_v26 = vadd.f32 %v1684_v3, %v806_v12  ;;  %v843_v9 = vadd.f32 %v1684_v3, %v807_v20 }
 0x1be   : > { %v844_v0 = vadd.f32 %v1684_v3, %v808_v18  ;;  %v781_v28 = vmul.f32 %v1647_v47, %v737_v17  ;;  %v813_v36 = vmul.f32 %v1660_v59, %v777_v11  ;;  %v845_v29 = vadd.f32 %v1684_v3, %v809_v16 }
 0x1bf   : > { %v782_v48 = vmul.f32 %v1647_v47, %v738_v21  ;;  %v814_v34 = vmul.f32 %v1660_v59, %v778_v10  ;;  %v846_v37 = vadd.f32 %v1684_v3, %v810_v43  ;;  %874 = vst.msk [vmem:[%s1719_s12] sm:$0xff] %vm498_vm1, %v842_v26  ;;  %v783_v54 = vmul.f32 %v1647_v47, %v739_v46 }
 0x1c0   : > { %v815_v23 = vmul.f32 %v1660_v59, %v779_v45  ;;  %v847_v57 = vadd.f32 %v1684_v3, %v811_v56  ;;  %875 = vst.msk [vmem:[%s1719_s12 + $0x8] sm:$0xff] %vm498_vm1, %v843_v9  ;;  %v742_v27 = vsub.f32 %v1480_v39, %v1645_v35  ;;  %v784_v63 = vmul.f32 %v1647_v47, %v740_v30 }
 0x1c1   : > { %v816_v52 = vmul.f32 %v1660_v59, %v780_v2  ;;  %v848_v44 = vadd.f32 %v1684_v3, %v812_v24  ;;  %876 = vst.msk [vmem:[%s1719_s12 + $0x10] sm:$0xff] %vm498_vm1, %v844_v0  ;;  %v785_v51 = vmul.f32 %v1647_v47, %v741_v14  ;;  %v817_v53 = vmul.f32 %v1660_v59, %v781_v28 }
 0x1c2   : > { %v849_v55 = vadd.f32 %v1684_v3, %v813_v36  ;;  %877 = vst.msk [vmem:[%s1719_s12 + $0x18] sm:$0xff] %vm498_vm1, %v845_v29  ;;  %v744_v39 = vsub.f32 %v1492_v61, %v1645_v35  ;;  %v786_v33 = vmul.f32 %v1647_v47, %v742_v27  ;;  %v818_v1 = vmul.f32 %v1660_v59, %v782_v48 }
 0x1c3   : > { %v850_v60 = vadd.f32 %v1684_v3, %v814_v34  ;;  %878 = vst.msk [vmem:[%s1719_s12 + $0x20] sm:$0xff] %vm498_vm1, %v846_v37  ;;  %v787_v4 = vmul.f32 %v1647_v47, %v743_v31  ;;  %v819_v40 = vmul.f32 %v1660_v59, %v783_v54  ;;  %v851_v8 = vadd.f32 %v1684_v3, %v815_v23 }
 0x1c4   : > { %879 = vst.msk [vmem:[%s1719_s12 + $0x28] sm:$0xff] %vm498_vm1, %v847_v57  ;;  %v746_v61 = vsub.f32 %v1523_v7, %v1645_v35  ;;  %v788_v12 = vmul.f32 %v1647_v47, %v744_v39  ;;  %v820_v20 = vmul.f32 %v1660_v59, %v784_v63  ;;  %v852_v18 = vadd.f32 %v1684_v3, %v816_v52 }
 0x1c5   : > { %880 = vst.msk [vmem:[%s1719_s12 + $0x30] sm:$0xff] %vm498_vm1, %v848_v44  ;;  %v789_v25 = vmul.f32 %v1647_v47, %v745_v42  ;;  %v821_v38 = vmul.f32 %v1660_v59, %v785_v51  ;;  %v853_v11 = vadd.f32 %v1684_v3, %v817_v53  ;;  %v748_v7 = vsub.f32 %v1534_v49, %v1645_v35 }
 0x1c6   : > { %881 = vst.msk [vmem:[%s1719_s12 + $0x38] sm:$0xff] %vm498_vm1, %v849_v55  ;;  %v790_v16 = vmul.f32 %v1647_v47, %v746_v61  ;;  %v822_v17 = vmul.f32 %v1660_v59, %v786_v33  ;;  %v854_v10 = vadd.f32 %v1684_v3, %v818_v1  ;;  %v791_v43 = vmul.f32 %v1647_v47, %v747_v41 }
 0x1c7   : > { %882 = vst.msk [vmem:[%s1719_s12 + $0x40] sm:$0xff] %vm498_vm1, %v850_v60  ;;  %v823_v21 = vmul.f32 %v1660_v59, %v787_v4  ;;  %v855_v45 = vadd.f32 %v1684_v3, %v819_v40  ;;  %v750_v49 = vsub.f32 %v1563_v50, %v1645_v35  ;;  %v792_v2 = vmul.f32 %v1647_v47, %v748_v7 }
 0x1c8   : > { %883 = vst.msk [vmem:[%s1719_s12 + $0x48] sm:$0xff] %vm498_vm1, %v851_v8  ;;  %v824_v56 = vmul.f32 %v1660_v59, %v788_v12  ;;  %v856_v24 = vadd.f32 %v1684_v3, %v820_v20  ;;  %v793_v26 = vmul.f32 %v1647_v47, %v749_v32  ;;  %v825_v9 = vmul.f32 %v1660_v59, %v789_v25 }
 0x1c9   : > { %884 = vst.msk [vmem:[%s1719_s12 + $0x50] sm:$0xff] %vm498_vm1, %v852_v18  ;;  %v857_v0 = vadd.f32 %v1684_v3, %v821_v38  ;;  %v752_v50 = vsub.f32 %v1580_v22, %v1645_v35  ;;  %v794_v46 = vmul.f32 %v1647_v47, %v750_v49  ;;  %v826_v28 = vmul.f32 %v1660_v59, %v790_v16 }
 0x1ca   : > { %885 = vst.msk [vmem:[%s1719_s12 + $0x58] sm:$0xff] %vm498_vm1, %v853_v11  ;;  %v858_v36 = vadd.f32 %v1684_v3, %v822_v17  ;;  %v795_v29 = vmul.f32 %v1647_v47, %v751_v6  ;;  %v827_v30 = vmul.f32 %v1660_v59, %v791_v43  ;;  %v859_v48 = vadd.f32 %v1684_v3, %v823_v21 }
 0x1cb   : > { %886 = vst.msk [vmem:[%s1719_s12 + $0x60] sm:$0xff] %vm498_vm1, %v854_v10  ;;  %v754_v22 = vsub.f32 %v1602_v58, %v1645_v35  ;;  %v796_v34 = vmul.f32 %v1647_v47, %v752_v50  ;;  %v828_v37 = vmul.f32 %v1660_v59, %v792_v2  ;;  %v860_v14 = vadd.f32 %v1684_v3, %v824_v56 }
 0x1cc   : > { %887 = vst.msk [vmem:[%s1719_s12 + $0x68] sm:$0xff] %vm498_vm1, %v855_v45  ;;  %v797_v54 = vmul.f32 %v1647_v47, %v753_v19  ;;  %v829_v23 = vmul.f32 %v1660_v59, %v793_v26  ;;  %v861_v57 = vadd.f32 %v1684_v3, %v825_v9  ;;  %v756_v58 = vsub.f32 %v1619_v13, %v1645_v35 }
 0x1cd   : > { %888 = vst.msk [vmem:[%s1719_s12 + $0x70] sm:$0xff] %vm498_vm1, %v856_v24  ;;  %v798_v27 = vmul.f32 %v1647_v47, %v754_v22  ;;  %v830_v63 = vmul.f32 %v1660_v59, %v794_v46  ;;  %v862_v5 = vadd.f32 %v1684_v3, %v826_v28  ;;  %v757_v52 = vsub.f32 %v1622_v15, %v1645_v35 }
 0x1ce   : > { %889 = vst.msk [vmem:[%s1719_s12 + $0x78] sm:$0xff] %vm498_vm1, %v857_v0  ;;  %v799_v44 = vmul.f32 %v1647_v47, %v755_v62  ;;  %v831_v31 = vmul.f32 %v1660_v59, %v795_v29  ;;  %v863_v13 = vadd.f32 %v1684_v3, %v827_v30  ;;  %v800_v51 = vmul.f32 %v1647_v47, %v756_v58 }
 0x1cf   : > { %890 = vst.msk [vmem:[%s1719_s12 + $0x80] sm:$0xff] %vm498_vm1, %v858_v36  ;;  %v832_v53 = vmul.f32 %v1660_v59, %v796_v34  ;;  %v864_v55 = vadd.f32 %v1684_v3, %v828_v37  ;;  %v801_v15 = vmul.f32 %v1647_v47, %v757_v52  ;;  %v833_v35 = vmul.f32 %v1660_v59, %v797_v54 }
 0x1d0   : > { %891 = vst.msk [vmem:[%s1719_s12 + $0x88] sm:$0xff] %vm498_vm1, %v859_v48  ;;  %v865_v39 = vadd.f32 %v1684_v3, %v829_v23  ;;  %v834_v33 = vmul.f32 %v1660_v59, %v798_v27  ;;  %v866_v1 = vadd.f32 %v1684_v3, %v830_v63  ;;  %v835_v60 = vmul.f32 %v1660_v59, %v799_v44 }
 0x1d1   : > { %892 = vst.msk [vmem:[%s1719_s12 + $0x90] sm:$0xff] %vm498_vm1, %v860_v14  ;;  %v867_v47 = vadd.f32 %v1684_v3, %v831_v31  ;;  %v836_v42 = vmul.f32 %v1660_v59, %v800_v51  ;;  %v868_v4 = vadd.f32 %v1684_v3, %v832_v53  ;;  %v837_v40 = vmul.f32 %v1660_v59, %v801_v15 }
 0x1d2   : > { %893 = vst.msk [vmem:[%s1719_s12 + $0x98] sm:$0xff] %vm498_vm1, %v861_v57  ;;  %v869_v8 = vadd.f32 %v1684_v3, %v833_v35  ;;  %v870_v61 = vadd.f32 %v1684_v3, %v834_v33  ;;  %v871_v12 = vadd.f32 %v1684_v3, %v835_v60 }
 0x1d3   : > { %894 = vst.msk [vmem:[%s1719_s12 + $0xa0] sm:$0xff] %vm498_vm1, %v862_v5  ;;  %v872_v59 = vadd.f32 %v1684_v3, %v836_v42  ;;  %v873_v20 = vadd.f32 %v1684_v3, %v837_v40 }
 0x1d4   : > { %895 = vst.msk [vmem:[%s1719_s12 + $0xa8] sm:$0xff] %vm498_vm1, %v863_v13 }
 0x1d5   : > { %896 = vst.msk [vmem:[%s1719_s12 + $0xb0] sm:$0xff] %vm498_vm1, %v864_v55 }
 0x1d6   : > { %897 = vst.msk [vmem:[%s1719_s12 + $0xb8] sm:$0xff] %vm498_vm1, %v865_v39 }
 0x1d7   : > { %898 = vst.msk [vmem:[%s1719_s12 + $0xc0] sm:$0xff] %vm498_vm1, %v866_v1 }
 0x1d8   : > { %899 = vst.msk [vmem:[%s1719_s12 + $0xc8] sm:$0xff] %vm498_vm1, %v867_v47 }
 0x1d9   : > { %900 = vst.msk [vmem:[%s1719_s12 + $0xd0] sm:$0xff] %vm498_vm1, %v868_v4 }
 0x1da   : > { %901 = vst.msk [vmem:[%s1719_s12 + $0xd8] sm:$0xff] %vm498_vm1, %v869_v8 }
 0x1db   : > { %902 = vst.msk [vmem:[%s1719_s12 + $0xe0] sm:$0xff] %vm498_vm1, %v870_v61 }
 0x1dc   : > { %903 = vst.msk [vmem:[%s1719_s12 + $0xe8] sm:$0xff] %vm498_vm1, %v871_v12 }
 0x1dd   : > { %904 = vst.msk [vmem:[%s1719_s12 + $0xf0] sm:$0xff] %vm498_vm1, %v872_v59 }
 0x1de   : > { %905 = vst.msk [vmem:[%s1719_s12 + $0xf8] sm:$0xff] %vm498_vm1, %v873_v20 }
 0x1df   : > { %1111 = shalt.err (!%p1108_p3)
}
 0x1e0   : > { %s1148_s29 = smov 128   ;;  %s1149_s12 = smov 8  }
 0x1e1   : > { %1038 = dma.vmem_to_hbm [thread:$0]  (%p1223_p5), %s920_s16, 4096, %s922_s17, %s907_s18, %s1148_s29, %s1148_s29, %s1149_s12  }
 0x1e2 PF: > { %p1044_p4 = scmp.ge.s32.totalorder %s1146_s24, 2  ;;  %s936_s13 = sand.u32 1, %s1134_s21  }
 0x1e3   : > { %s937_s25 = scalar_lea.sflag [#allocation3], %s936_s13 }
 0x1e4   : > { %p1041_p7 = pnand %p1044_p4, %p1227_p6 }
 0x1e6   : > { %p1042_p8 = pneg %p1041_p7 }
 0x1e8   : > { %1129 = dma.done.wait (%p1042_p8), %s937_s25, 4096  }
 0x1e9   : > { %1131 = vsyncadd (%p1042_p8), %s937_s25, 4294963200  ;;  %p16_p9 = scmp.ge.s32.totalorder %s1210_s27, 4   ;;  %s1931_s21 = smov %s1138_s22 }
 0x1ea   : > { %s1932_s22 = smov %s1142_s23  ;;  %s1933_s23 = smov %s1221_s30 }
 0x1eb   : > { %s1934_s24 = smov %s1210_s27  ;;  %18 = sbr.rel (!%p16_p9) target bundleno = 3 (0x3), region = 79 }
 0x1f0   :  { %943 = vsyncpa [#allocation3], 1 }
 0x1f1   :  { %945 = vsyncpa [#allocation3 + $0x1], 1 }

// kernel: mlp_forward.4
= control target key start
LH: loop header
LB: loop body
LE: loop exit
PB: predicated region body
PF: predicated region fallthrough
CT: control target
= control target key end

     0   :  { %s4425_s21 = smov 0   ;;  %s8230_s0 = inlined_call_operand.vmem [shape: f32[2,18,18,16], index: 0, kind: input, shape index: {}]   ;;  %s8231_s1 = inlined_call_operand.vmem [shape: f32[9,16,16], index: 1, kind: input, shape index: {}]   ;;  %s8232_s2 = inlined_call_operand.vmem [shape: f32[1,16], index: 2, kind: input, shape index: {}]   ;;  %s8233_s3 = inlined_call_operand.vmem [shape: f32[16,16], index: 3, kind: input, shape index: {}]   ;;  %s8234_s4 = inlined_call_operand.vmem [shape: f32[1,16], index: 4, kind: input, shape index: {}]   ;;  %s8235_s5 = inlined_call_operand.vmem [shape: f32[1,16], index: 5, kind: input, shape index: {}]   ;;  %s8236_s6 = inlined_call_operand.vmem [shape: f32[2,256,16], index: 6, kind: output, shape index: {}]  }
   0x1 LB: > { %s3926_s22 = sadd.s32 4294967295, %s4388_s21   ;;  %p3930_p0 = scmp.ge.s32.totalorder %s4388_s21, 1  ;;  %s4388_s21 = sphi %s4425_s21, %s16_s21  }
   0x2   : > { %p212_p1 = scmp.lt.s32.totalorder %s4388_s21, 3 }
   0x4   : > { %p213_p2 = pnand %p3930_p0, %p212_p1 }
   0x6   : > { %216 = sbr.rel (%p213_p2) target bundleno = 1283 (0x503), region = 44 }
   0xb   : > { %v3935_v0 = vld [vmem:[%s8231_s1 + $0x18] sm:$0xff]  ;;  %v3934_v1 = vld [vmem:[%s8231_s1 + $0x10] sm:$0xff]  ;;  %p242_p3 = scmp.lt.s32.totalorder %s3926_s22, 1  ;;  %v4069_v3 = vld [vmem:[%s8231_s1 + $0x48] sm:$0xff]  ;;  %vm356_vm0 = vcmask 1046528   ;;  %vm440_vm1 = vcmask 130048  }
   0xc   : > { %4275 = vmatpush.msra.mxu1 %v3935_v0  ;;  %4277 = vmatpush.msra.mxu3 %v3935_v0  ;;  %v4035_v2 = vld [vmem:[%s8231_s1 + $0x38] sm:$0xff]  ;;  %v307_v4 = vld [vmem:[%s8231_s1 + $0x8] sm:$0xff]  ;;  %v4034_v45 = vld [vmem:[%s8231_s1 + $0x30] sm:$0xff]  ;;  %vm795_vm2 = vcmask 1045504  }
   0xd   : > { %s8779_s22 = smov (!%p242_p3, %s3926_s22), 1  ;;  %519 = vmatpush.msra.mxu0 %v3935_v0  ;;  %4276 = vmatpush.msra.mxu2 %v3935_v0  ;;  %v4001_v5 = vld [vmem:[%s8231_s1 + $0x28] sm:$0xff]  ;;  %v306_v50 = vld [vmem:[%s8231_s1] sm:$0xff] }
   0xe   : > { %4278 = vmatpush.msra.mxu1 %v3934_v1  ;;  %4280 = vmatpush.msra.mxu3 %v3934_v1  ;;  %s4281_s9 = smul.u32 432, %s8779_s22  ;;  %v4068_v53 = vld [vmem:[%s8231_s1 + $0x40] sm:$0xff]  ;;  %s4274_s29 = sshll.u32 %s8779_s22, 8 }
   0xf   : > { %520 = vmatpush.msra.mxu0 %v3934_v1  ;;  %4279 = vmatpush.msra.mxu2 %v3934_v1  ;;  %v4000_v56 = vld [vmem:[%s8231_s1 + $0x20] sm:$0xff]  ;;  %s8010_s7 = scalar_lea.vmem %s8236_s6, %s4274_s29 }
  0x10   : > { %1111 = vmatpush.msrb.mxu3 %v4035_v2  ;;  %696 = vmatpush.msrb.mxu1 %v307_v4  ;;  %s4457_s14 = scalar_lea.vmem %s8230_s0, %s4281_s9 }
  0x11   : > { %1269 = vmatpush.msrb.mxu0 %v4069_v3  ;;  %v4460_v6 = vld [vmem:[%s4457_s14 + $0x68] sm:$0xff]  ;;  %v4463_v7 = vld [vmem:[%s4457_s14 + $0x70] sm:$0x3]  ;;  %957 = vmatpush.msrb.mxu2 %v4001_v5  ;;  %v4471_v11 = vld [vmem:[%s4457_s14 + $0x118] sm:$0x3] }
  0x12   : > { %v4466_v8 = vld [vmem:[%s4457_s14 + $0x110] sm:$0xff]  ;;  %v8237_v9 = vrot.slane %v4460_v6, 1  ;;  %v380_v10 = vrot.slane %v4463_v7, 1  ;;  %8368 = vst [vmem:[#allocation3_spill] sm:$0xff] %v4471_v11  ;;  %v4475_v13 = vld [vmem:[%s4457_s14] sm:$0xff]  ;;  %v415_v14 = vrot.slane %v4471_v11, 1  ;;  %1112 = vmatpush.msrb.mxu3 %v4034_v45  ;;  %697 = vmatpush.msrb.mxu1 %v306_v50 }
  0x13   : > { %8367 = vst [vmem:[#allocation2_spill] sm:$0xff] %v4466_v8  ;;  %v8239_v12 = vrot.slane %v4466_v8, 1  ;;  %v4479_v15 = vld [vmem:[%s4457_s14 + $0x8] sm:$0xff]  ;;  %v357_v16 = vrot.slane %v4475_v13, 1  ;;  %v4483_v17 = vld [vmem:[%s4457_s14 + $0x78] sm:$0xff]  ;;  %v4486_v18 = vld [vmem:[%s4457_s14 + $0x80] sm:$0xff]  ;;  %1270 = vmatpush.msrb.mxu0 %v4068_v53  ;;  %958 = vmatpush.msrb.mxu2 %v4000_v56 }
  0x14   : > { %v4491_v19 = vsel %vm356_vm0, %v8237_v9, %v380_v10  ;;  %v358_v20 = vrot.slane %v4479_v15, 1  ;;  %v4495_v21 = vld [vmem:[%s4457_s14 + $0x120] sm:$0xff]  ;;  %v4498_v22 = vld [vmem:[%s4457_s14 + $0x128] sm:$0xff]  ;;  %v4511_v25 = vld [vmem:[%s4457_s14 + $0xd0] sm:$0x3]  ;;  %v382_v28 = vrot.slane %v4483_v17, 1 }
  0x15   : > { %8369 = vst [vmem:[#allocation4_spill] sm:$0xff] %v4491_v19  ;;  %v4501_v23 = vld [vmem:[%s4457_s14 + $0xc8] sm:$0xff]  ;;  %3945 = vmatmul.msk.f32.vlgmr.msra.gmra.mxu1 %vm440_vm1, %v4491_v19  ;;  %v4508_v24 = vsel %vm356_vm0, %v8239_v12, %v415_v14  ;;  %v383_v29 = vrot.slane %v4486_v18, 1  ;;  %v400_v30 = vrot.slane %v4511_v25, 1  ;;  %v4521_v31 = vld [vmem:[%s4457_s14 + $0x10] sm:$0x3] }
  0x16   : > { %8370 = vst [vmem:[#allocation5_spill] sm:$0xff] %v4495_v21  ;;  %v8238_v26 = vrot.slane %v4501_v23, 1  ;;  %3959 = vmatmul.msk.f32.vlgmr.msra.gmra.mxu3 %vm440_vm1, %v4508_v24  ;;  %v359_v27 = vsel %vm356_vm0, %v357_v16, %v358_v20  ;;  %v417_v32 = vrot.slane %v4495_v21, 1  ;;  %v418_v33 = vrot.slane %v4498_v22, 1  ;;  %v4527_v34 = vld [vmem:[%s4457_s14 + $0xd8] sm:$0xff]  ;;  %v4530_v35 = vld [vmem:[%s4457_s14 + $0xe0] sm:$0xff] }
  0x17   : > { %8371 = vst [vmem:[#allocation6_spill] sm:$0xff] %v4498_v22  ;;  %3936 = vmatmul.msk.f32.vlgmr.msra.gmra.mxu0 %vm440_vm1, %v359_v27  ;;  %v360_v37 = vrot.slane %v4521_v31, 1  ;;  %v4541_v38 = vsel %vm356_vm0, %v382_v28, %v383_v29  ;;  %v402_v39 = vrot.slane %v4527_v34, 1  ;;  %v403_v40 = vrot.slane %v4530_v35, 1  ;;  %v4549_v42 = vld [vmem:[%s4457_s14 + $0x88] sm:$0x3] }
  0x18   : > { %8372 = vst [vmem:[#allocation7_spill] sm:$0xff] %v4508_v24  ;;  %v4535_v36 = vsel %vm356_vm0, %v8238_v26, %v400_v30  ;;  %v4546_v41 = vsel %vm356_vm0, %v417_v32, %v418_v33  ;;  %v4553_v44 = vld [vmem:[%s4457_s14 + $0x130] sm:$0x3]  ;;  %v4561_v46 = vld [vmem:[%s4457_s14 + $0x18] sm:$0xff]  ;;  %v4564_v47 = vld [vmem:[%s4457_s14 + $0x20] sm:$0xff]  ;;  %v385_v48 = vrot.slane %v4549_v42, 1 }
  0x19   : > { %3953 = vmatmul.msk.f32.vlgmr.msra.gmra.mxu2 %vm440_vm1, %v4535_v36  ;;  %8373 = vst [vmem:[#allocation8_spill] sm:$0xff] %v4541_v38  ;;  %v361_v43 = vsel %vm356_vm0, %v358_v20, %v360_v37  ;;  %v4570_v49 = vsel %vm356_vm0, %v402_v39, %v403_v40  ;;  %v420_v51 = vrot.slane %v4553_v44, 1  ;;  %v4578_v52 = vld [vmem:[%s4457_s14 + $0xe8] sm:$0x3]  ;;  %v362_v54 = vrot.slane %v4561_v46, 1  ;;  %v4598_v60 = vld [vmem:[%s4457_s14 + $0x90] sm:$0xff] }
  0x1a   : > { %8374 = vst [vmem:[#allocation9_spill] sm:$0xff] %v4546_v41  ;;  %v363_v55 = vrot.slane %v4564_v47, 1  ;;  %v4591_v57 = vsel %vm356_vm0, %v383_v29, %v385_v48  ;;  %v405_v58 = vrot.slane %v4578_v52, 1  ;;  %v4601_v61 = vld [vmem:[%s4457_s14 + $0x98] sm:$0xff]  ;;  %v4610_v0 = vld [vmem:[%s4457_s14 + $0x140] sm:$0xff]  ;;  %v387_v2 = vrot.slane %v4598_v60, 1 }
  0x1b   : > { %8375 = vst [vmem:[#allocation10_spill] sm:$0xff] %v4553_v44  ;;  %v4595_v59 = vsel %vm356_vm0, %v418_v33, %v420_v51  ;;  %v4607_v63 = vld [vmem:[%s4457_s14 + $0x138] sm:$0xff]  ;;  %v4615_v1 = vld [vmem:[%s4457_s14 + $0x28] sm:$0x3]  ;;  %v388_v3 = vrot.slane %v4601_v61, 1  ;;  %v423_v10 = vrot.slane %v4610_v0, 1 }
  0x1c   : > { %8376 = vst [vmem:[#allocation11_spill] sm:$0xff] %v4591_v57  ;;  %v4604_v62 = vsel %vm356_vm0, %v362_v54, %v363_v55  ;;  %v4622_v4 = vsel %vm356_vm0, %v403_v40, %v405_v58  ;;  %v422_v5 = vrot.slane %v4607_v63, 1  ;;  %v4629_v14 = vld [vmem:[%s4457_s14 + $0xf0] sm:$0xff]  ;;  %v4632_v16 = vld [vmem:[%s4457_s14 + $0xf8] sm:$0xff]  ;;  %v365_v20 = vrot.slane %v4615_v1, 1  ;;  %v4686_v58 = vld [vmem:[%s4457_s14 + $0xa8] sm:$0xff] }
  0x1d   : > { %3946 = vmatmul.msk.f32.gmra.mxu1 %vm440_vm1, %v4541_v38  ;;  %8377 = vst [vmem:[#allocation12_spill] sm:$0xff] %v4595_v59  ;;  %v4638_v27 = vsel %vm356_vm0, %v387_v2, %v388_v3  ;;  %v407_v28 = vrot.slane %v4629_v14, 1  ;;  %v408_v29 = vrot.slane %v4632_v16, 1  ;;  %v4646_v32 = vld [vmem:[%s4457_s14 + $0xa0] sm:$0x3]  ;;  %v4657_v39 = vld [vmem:[%s4457_s14 + $0x30] sm:$0xff] }
  0x1e   : > { %3960 = vmatmul.msk.f32.gmra.mxu3 %vm440_vm1, %v4546_v41  ;;  %8378 = vst [vmem:[#allocation13_spill] sm:$0xff] %v4607_v63  ;;  %v4643_v30 = vsel %vm356_vm0, %v422_v5, %v423_v10  ;;  %v4649_v33 = vsel %vm356_vm0, %v363_v55, %v365_v20  ;;  %v4652_v37 = vld [vmem:[%s4457_s14 + $0x148] sm:$0x3]  ;;  %v4660_v40 = vld [vmem:[%s4457_s14 + $0x38] sm:$0xff]  ;;  %v4672_v50 = vld [vmem:[%s4457_s14 + $0x100] sm:$0x3] }
  0x1f   : > { %3937 = vmatmul.msk.f32.gmra.mxu0 %vm440_vm1, %v361_v43  ;;  %8379 = vst [vmem:[#allocation14_spill] sm:$0xff] %v4610_v0  ;;  %v390_v43 = vrot.slane %v4646_v32, 1  ;;  %v4666_v45 = vsel %vm356_vm0, %v407_v28, %v408_v29  ;;  %v425_v48 = vrot.slane %v4652_v37, 1  ;;  %v367_v51 = vrot.slane %v4657_v39, 1  ;;  %v4689_v2 = vld [vmem:[%s4457_s14 + $0xb0] sm:$0xff]  ;;  %v4698_v28 = vld [vmem:[%s4457_s14 + $0x158] sm:$0xff] }
  0x20   : > { %8380 = vst [vmem:[#allocation15_spill] sm:$0xff] %v4638_v27  ;;  %v368_v53 = vrot.slane %v4660_v40, 1  ;;  %v410_v55 = vrot.slane %v4672_v50, 1  ;;  %v4695_v20 = vld [vmem:[%s4457_s14 + $0x150] sm:$0xff]  ;;  %v428_v26 = vrot.slane %v4698_v28, 1  ;;  %v4720_v12 = vld [vmem:[%s4457_s14 + $0x108] sm:$0xff] }
  0x21   : > { %3954 = vmatmul.msk.f32.gmra.mxu2 %vm440_vm1, %v4570_v49  ;;  %8381 = vst [vmem:[#allocation16_spill] sm:$0xff] %v4643_v30  ;;  %v4679_v54 = vsel %vm356_vm0, %v388_v3, %v390_v43  ;;  %v4683_v56 = vsel %vm356_vm0, %v423_v10, %v425_v48  ;;  %v4703_v3 = vld [vmem:[%s4457_s14 + $0x40] sm:$0x3]  ;;  %v392_v10 = vrot.slane %v4686_v58, 1  ;;  %v393_v43 = vrot.slane %v4689_v2, 1  ;;  %v4103_v0 = vld [vmem:[%s8231_s1 + $0x58] sm:$0xff] }
  0x22   : > { %8382 = vst [vmem:[#allocation17_spill] sm:$0xff] %v4652_v37  ;;  %v4692_v5 = vsel %vm356_vm0, %v367_v51, %v368_v53  ;;  %v4710_v48 = vsel %vm356_vm0, %v408_v29, %v410_v55  ;;  %v4137_v51 = vld [vmem:[%s8231_s1 + $0x68] sm:$0xff]  ;;  %v427_v9 = vrot.slane %v4695_v20, 1  ;;  %v412_v55 = vrot.slane %v4720_v12, 1  ;;  %v4733_v37 = vld [vmem:[%s4457_s14 + $0xb8] sm:$0x3]  ;;  %1426 = vmatpush.msra.mxu1 %v4103_v0 }
  0x23   : > { %8383 = vst [vmem:[#allocation18_spill] sm:$0xff] %v4679_v54  ;;  %1580 = vmatpush.msra.mxu2 %v4137_v51  ;;  %v4726_v29 = vsel %vm356_vm0, %v392_v10, %v393_v43  ;;  %v4744_v51 = vld [vmem:[%s4457_s14 + $0x48] sm:$0xff]  ;;  %v8391_v10 = vrot.slane %v4466_v8, 1  ;;  %v796_v41 = vrot.slane %v4475_v13, 2  ;;  %v797_v44 = vrot.slane %v4479_v15, 2  ;;  %v4788_v22 = vld [vmem:[%s4457_s14 + $0x170] sm:$0xff] }
  0x24   : > { %8384 = vst [vmem:[#allocation19_spill] sm:$0xff] %v4683_v56  ;;  %v4785_v0 = vld [vmem:[%s4457_s14 + $0x168] sm:$0xff]  ;;  %v433_v21 = vrot.slane %v4788_v22, 1  ;;  %v799_v11 = vrot.slane %v4521_v31, 2 }
  0x25   : > { %3947 = vmatmul.msk.f32.gmra.mxu1 %vm440_vm1, %v4591_v57  ;;  %8385 = vst [vmem:[#allocation20_spill] sm:$0xff] %v4695_v20  ;;  %v4739_v20 = vld [vmem:[%s4457_s14 + $0x160] sm:$0x3] }
  0x26   : > { %3961 = vmatmul.msk.f32.gmra.mxu3 %vm440_vm1, %v4595_v59  ;;  %8386 = vst [vmem:[#allocation21_spill] sm:$0xff] %v4698_v28  ;;  %v4747_v59 = vld [vmem:[%s4457_s14 + $0x50] sm:$0xff] }
  0x27   : > { %3938 = vmatmul.msk.f32.gmra.mxu0 %vm440_vm1, %v4604_v62  ;;  %8387 = vst [vmem:[#allocation22_spill] sm:$0xff] %v4710_v48 }
  0x28   : > { %8388 = vst [vmem:[#allocation23_spill] sm:$0xff] %v4726_v29 }
  0x29   : > { %3955 = vmatmul.msk.f32.gmra.mxu2 %vm440_vm1, %v4622_v4  ;;  %8390 = vst [vmem:[#allocation25_spill] sm:$0xff] %v4739_v20 }
  0x2a   : > { %8395 = vst [vmem:[#allocation29_spill] sm:$0xff] %v4785_v0 }
  0x2d   : > { %3948 = vmatmul.msk.f32.gmra.mxu1 %vm440_vm1, %v4638_v27 }
  0x2e   : > { %3962 = vmatmul.msk.f32.gmra.mxu3 %vm440_vm1, %v4643_v30  ;;  %v4730_v30 = vsel %vm356_vm0, %v427_v9, %v428_v26  ;;  %v395_v9 = vrot.slane %v4733_v37, 1 }
  0x2f   : > { %3939 = vmatmul.msk.f32.gmra.mxu0 %vm440_vm1, %v4649_v33  ;;  %8389 = vst [vmem:[#allocation24_spill] sm:$0xff] %v4730_v30 }
  0x30   : > { %v4771_v63 = vsel %vm356_vm0, %v393_v43, %v395_v9  ;;  %v4793_v43 = vld [vmem:[%s4457_s14 + $0x58] sm:$0x3]  ;;  %v4205_v9 = vld [vmem:[%s8231_s1 + $0x88] sm:$0xff] }
  0x31   : > { %3956 = vmatmul.msk.f32.gmra.mxu2 %vm440_vm1, %v4666_v45  ;;  %8393 = vst [vmem:[#allocation27_spill] sm:$0xff] %v4771_v63  ;;  %1895 = vmatpush.msra.mxu0 %v4205_v9  ;;  %v4826_v9 = vld [vmem:[%s4457_s14 + $0x60] sm:$0xff] }
  0x35   : > { %3949 = vmatmul.msk.f32.gmra.mxu1 %vm440_vm1, %v4679_v54 }
  0x36   : > { %3963 = vmatmul.msk.f32.gmra.mxu3 %vm440_vm1, %v4683_v56  ;;  %v370_v56 = vrot.slane %v4703_v3, 1 }
  0x37   : > { %3940 = vmatmul.msk.f32.gmra.mxu0 %vm440_vm1, %v4692_v5 }
  0x38   : > { %v4736_v28 = vsel %vm356_vm0, %v368_v53, %v370_v56  ;;  %v4755_v53 = vsel %vm356_vm0, %v412_v55, %v8391_v10  ;;  %v4171_v56 = vld [vmem:[%s8231_s1 + $0x78] sm:$0xff]  ;;  %v372_v55 = vrot.slane %v4744_v51, 1  ;;  %v373_v10 = vrot.slane %v4747_v59, 1 }
  0x39   : > { %3957 = vmatmul.msk.f32.gmra.mxu2 %vm440_vm1, %v4710_v48  ;;  %8392 = vst [vmem:[#allocation26_spill] sm:$0xff] %v4755_v53  ;;  %1738 = vmatpush.msra.mxu3 %v4171_v56 }
  0x3a   : > { %v4782_v56 = vsel %vm356_vm0, %v372_v55, %v373_v10  ;;  %v432_v55 = vrot.slane %v4785_v0, 1  ;;  %v4821_v0 = vld [vmem:[%s4457_s14 + $0x178] sm:$0x3] }
  0x3b   : > { %v435_v31 = vrot.slane %v4821_v0, 1 }
  0x3c   : > { %v4815_v48 = vsel %vm356_vm0, %v432_v55, %v433_v21  ;;  %v8397_v55 = vrot.slane %v4460_v6, 1 }
  0x3d   : > { %3950 = vmatmul.msk.f32.gmra.mxu1 %vm440_vm1, %v4726_v29 }
  0x3e   : > { %3964 = vmatmul.msk.f32.gmra.mxu3 %vm440_vm1, %v4730_v30  ;;  %v430_v30 = vrot.slane %v4739_v20, 1  ;;  %v4779_v20 = vld [vmem:[%s4457_s14 + $0xc0] sm:$0xff] }
  0x3f   : > { %3941 = vmatmul.msk.f32.gmra.mxu0 %vm440_vm1, %v4736_v28 }
  0x40   : > { %v4776_v24 = vsel %vm356_vm0, %v428_v26, %v430_v30  ;;  %v397_v26 = vrot.slane %v4779_v20, 1  ;;  %v798_v30 = vsel %vm795_vm2, %v796_v41, %v797_v44 }
  0x41   : > { %3958 = vmatmul.msk.f32.gmra.mxu2 %vm440_vm1, %v4755_v53  ;;  %8394 = vst [vmem:[#allocation28_spill] sm:$0xff] %v4776_v24  ;;  %v375_v53 = vrot.slane %v4793_v43, 1 }
  0x43   : > { %v4818_v8 = vsel %vm356_vm0, %v373_v10, %v375_v53  ;;  %v377_v53 = vrot.slane %v4826_v9, 1  ;;  %v801_v10 = vrot.slane %v4561_v46, 2 }
  0x45   : > { %3951 = vmatmul.msk.f32.gmra.mxu1 %vm440_vm1, %v4771_v63 }
  0x46   : > { %3965 = vmatmul.msk.f32.gmra.mxu3 %vm440_vm1, %v4776_v24  ;;  %v8396_v24 = vrot.slane %v4501_v23, 1 }
  0x47   : > { %3942 = vmatmul.msk.f32.gmra.mxu0 %vm440_vm1, %v4782_v56 }
  0x48   : > { %v4811_v41 = vsel %vm356_vm0, %v397_v26, %v8396_v24  ;;  %v800_v24 = vsel %vm795_vm2, %v797_v44, %v799_v11  ;;  %v802_v26 = vrot.slane %v4564_v47, 2  ;;  %v4844_v11 = vsel %vm356_vm0, %v377_v53, %v8397_v55 }
  0x49   : > { %4002 = vmatmul.msk.f32.vlgmr.msrb.gmra.mxu2 %vm440_vm1, %v798_v30  ;;  %v4839_v30 = vsel %vm356_vm0, %v433_v21, %v435_v31  ;;  %8398 = vst [vmem:[#allocation30_spill] sm:$0xff] %v4844_v11  ;;  %v804_v21 = vrot.slane %v4615_v1, 2  ;;  %v807_v31 = vrot.slane %v4660_v40, 2  ;;  %v811_v1 = vrot.slane %v4744_v51, 2 }
  0x4a   : > { %v4851_v44 = vsel %vm795_vm2, %v801_v10, %v802_v26  ;;  %v816_v10 = vrot.slane %v4826_v9, 2  ;;  %v819_v55 = vrot.slane %v4463_v7, 2  ;;  %v822_v7 = vrot.slane %v4486_v18, 2 }
  0x4d   : > { %3952 = vmatmul.msk.f32.gmra.mxu1 %vm440_vm1, %v4811_v41 }
  0x4e   : > { %3966 = vmatmul.msk.f32.gmra.mxu3 %vm440_vm1, %v4815_v48 }
  0x4f   : > { %3943 = vmatmul.msk.f32.gmra.mxu0 %vm440_vm1, %v4818_v8 }
  0x51   : > { %4003 = vmatmul.msk.f32.gmra.mxu2 %vm440_vm1, %v800_v24  ;;  %v806_v24 = vrot.slane %v4657_v39, 2 }
  0x55   : > { %3968 = vmatmul.msk.f32.vlgmr.msrb.gmra.mxu1 %vm440_vm1, %v4475_v13  ;;  %v4863_v13 = vsel %vm795_vm2, %v802_v26, %v804_v21  ;;  %v817_v26 = vrot.slane %v4460_v6, 2 }
  0x56   : > { %3967 = vmatmul.msk.f32.gmra.mxu3 %vm440_vm1, %v4839_v30 }
  0x57   : > { %3944 = vmatmul.msk.f32.gmra.mxu0 %vm440_vm1, %v4844_v11  ;;  %v4938_v21 = vsel %vm795_vm2, %v817_v26, %v819_v55 }
  0x58   : > { %8400 = vst [vmem:[#allocation32_spill] sm:$0xff] %v4938_v21 }
  0x59   : > { %4004 = vmatmul.msk.f32.gmra.mxu2 %vm440_vm1, %v4851_v44 }
  0x5d   : > { %3969 = vmatmul.msk.f32.gmra.mxu1 %vm440_vm1, %v4479_v15  ;;  %v4876_v15 = vsel %vm795_vm2, %v806_v24, %v807_v31 }
  0x5e   : > { %4036 = vmatmul.msk.f32.vlgmr.msrb.gmra.mxu3 %vm440_vm1, %v4561_v46 }
  0x5f   : > { %4070 = vmatmul.msk.f32.vlgmr.msrb.gmra.mxu0 %vm440_vm1, %v4604_v62  ;;  %v809_v62 = vrot.slane %v4703_v3, 2  ;;  %v814_v3 = vrot.slane %v4793_v43, 2  ;;  %v4926_v43 = vsel %vm795_vm2, %v816_v10, %v817_v26  ;;  %v824_v10 = vrot.slane %v4549_v42, 2 }
  0x60   : > { %8399 = vst [vmem:[#allocation31_spill] sm:$0xff] %v4926_v43 }
  0x61   : > { %4005 = vmatmul.msk.f32.gmra.mxu2 %vm440_vm1, %v4863_v13 }
  0x65   : > { %3970 = vmatmul.msk.f32.gmra.mxu1 %vm440_vm1, %v4561_v46  ;;  %v4888_v46 = vsel %vm795_vm2, %v807_v31, %v809_v62  ;;  %v821_v31 = vrot.slane %v4483_v17, 2 }
  0x66   : > { %4037 = vmatmul.msk.f32.gmra.mxu3 %vm440_vm1, %v4564_v47 }
  0x67   : > { %4071 = vmatmul.msk.f32.gmra.mxu0 %vm440_vm1, %v4649_v33  ;;  %v812_v33 = vrot.slane %v4747_v59, 2 }
  0x69   : > { %4006 = vmatmul.msk.f32.gmra.mxu2 %vm440_vm1, %v4876_v15  ;;  %v4913_v53 = vsel %vm795_vm2, %v812_v33, %v814_v3 }
  0x6d   : > { %3971 = vmatmul.msk.f32.gmra.mxu1 %vm440_vm1, %v4564_v47  ;;  %v4901_v47 = vsel %vm795_vm2, %v811_v1, %v812_v33  ;;  %v4955_v1 = vsel %vm795_vm2, %v821_v31, %v822_v7  ;;  %v4975_v31 = vsel %vm795_vm2, %v822_v7, %v824_v10 }
  0x6e   : > { %4038 = vmatmul.msk.f32.gmra.mxu3 %vm440_vm1, %v4657_v39  ;;  %8401 = vst [vmem:[#allocation33_spill] sm:$0xff] %v4955_v1 }
  0x6f   : > { %4072 = vmatmul.msk.f32.gmra.mxu0 %vm440_vm1, %v4692_v5  ;;  %8403 = vst [vmem:[#allocation35_spill] sm:$0xff] %v4975_v31 }
  0x71   : > { %4007 = vmatmul.msk.f32.gmra.mxu2 %vm440_vm1, %v4888_v46 }
  0x75   : > { %3972 = vmatmul.msk.f32.gmra.mxu1 %vm440_vm1, %v4657_v39 }
  0x76   : > { %4039 = vmatmul.msk.f32.gmra.mxu3 %vm440_vm1, %v4660_v40 }
  0x77   : > { %4073 = vmatmul.msk.f32.gmra.mxu0 %vm440_vm1, %v4736_v28 }
  0x79   : > { %4008 = vmatmul.msk.f32.gmra.mxu2 %vm440_vm1, %v4901_v47 }
  0x7d   : > { %3973 = vmatmul.msk.f32.gmra.mxu1 %vm440_vm1, %v4660_v40 }
  0x7e   : > { %4040 = vmatmul.msk.f32.gmra.mxu3 %vm440_vm1, %v4744_v51 }
  0x7f   : > { %4074 = vmatmul.msk.f32.gmra.mxu0 %vm440_vm1, %v4782_v56 }
  0x81   : > { %4009 = vmatmul.msk.f32.gmra.mxu2 %vm440_vm1, %v4913_v53 }
  0x85   : > { %3974 = vmatmul.msk.f32.gmra.mxu1 %vm440_vm1, %v4744_v51 }
  0x86   : > { %4041 = vmatmul.msk.f32.gmra.mxu3 %vm440_vm1, %v4747_v59 }
  0x87   : > { %4075 = vmatmul.msk.f32.gmra.mxu0 %vm440_vm1, %v4818_v8 }
  0x89   : > { %4010 = vmatmul.msk.f32.gmra.mxu2 %vm440_vm1, %v4926_v43 }
  0x8d   : > { %3975 = vmatmul.msk.f32.gmra.mxu1 %vm440_vm1, %v4747_v59 }
  0x8e   : > { %4042 = vmatmul.msk.f32.gmra.mxu3 %vm440_vm1, %v4826_v9 }
  0x8f   : > { %4076 = vmatmul.msk.f32.gmra.mxu0 %vm440_vm1, %v4844_v11 }
  0x91   : > { %4011 = vmatmul.msk.f32.gmra.mxu2 %vm440_vm1, %v4938_v21 }
  0x92   : > { %v4944_v24 = vpop.f32.mrf.mxu1 }
  0x94   : > { %v4948_v62 = vpop.f32.mrf.mxu0 }
  0x95   : > { %3976 = vmatmul.msk.f32.gmra.mxu1 %vm440_vm1, %v4826_v9 }
  0x96   : > { %4043 = vmatmul.msk.f32.gmra.mxu3 %vm440_vm1, %v4460_v6 }
  0x97   : > { %4077 = vmatmul.msk.f32.gmra.mxu0 %vm440_vm1, %v4491_v19 }
  0x99   : > { %v4959_v33 = vpop.f32.mrf.mxu3  ;;  %4012 = vmatmul.msk.f32.gmra.mxu2 %vm440_vm1, %v4955_v1  ;;  %v826_v1 = vrot.slane %v4598_v60, 2 }
  0x9a   : > { %8402 = vst [vmem:[#allocation34_spill] sm:$0xff] %v4959_v33  ;;  %v4963_v3 = vpop.f32.mrf.mxu1 }
  0x9c   : > { %v4966_v26 = vpop.f32.mrf.mxu0  ;;  %v4968_v55 = vpop.f32.mrf.mxu2 }
  0x9d   : > { %3977 = vmatmul.msk.f32.gmra.mxu1 %vm440_vm1, %v4460_v6  ;;  %v827_v6 = vrot.slane %v4601_v61, 2 }
  0x9e   : > { %4044 = vmatmul.msk.f32.gmra.mxu3 %vm440_vm1, %v4483_v17 }
  0x9f   : > { %4078 = vmatmul.msk.f32.gmra.mxu0 %vm440_vm1, %v4541_v38  ;;  %v4996_v7 = vsel %vm795_vm2, %v826_v1, %v827_v6 }
  0xa0   : > { %8405 = vst [vmem:[#allocation37_spill] sm:$0xff] %v4996_v7 }
  0xa1   : > { %v4979_v33 = vpop.f32.mrf.mxu3  ;;  %4013 = vmatmul.msk.f32.gmra.mxu2 %vm440_vm1, %v4975_v31  ;;  %v829_v31 = vrot.slane %v4646_v32, 2 }
  0xa2   : > { %8404 = vst [vmem:[#allocation36_spill] sm:$0xff] %v4979_v33  ;;  %v4983_v42 = vpop.f32.mrf.mxu1 }
  0xa3   : > { %v5016_v1 = vsel %vm795_vm2, %v827_v6, %v829_v31 }
  0xa4   : > { %v4987_v21 = vpop.f32.mrf.mxu0  ;;  %v4989_v19 = vpop.f32.mrf.mxu2  ;;  %8407 = vst [vmem:[#allocation39_spill] sm:$0xff] %v5016_v1 }
  0xa5   : > { %3978 = vmatmul.msk.f32.gmra.mxu1 %vm440_vm1, %v4483_v17 }
  0xa6   : > { %4045 = vmatmul.msk.f32.gmra.mxu3 %vm440_vm1, %v4486_v18 }
  0xa7   : > { %4079 = vmatmul.msk.f32.gmra.mxu0 %vm440_vm1, %v4591_v57 }
  0xa9   : > { %v5000_v10 = vpop.f32.mrf.mxu3  ;;  %4014 = vmatmul.msk.f32.gmra.mxu2 %vm440_vm1, %v4996_v7  ;;  %v831_v7 = vrot.slane %v4686_v58, 2 }
  0xaa   : > { %8406 = vst [vmem:[#allocation38_spill] sm:$0xff] %v5000_v10  ;;  %v5004_v33 = vpop.f32.mrf.mxu1 }
  0xac   : > { %v5007_v38 = vpop.f32.mrf.mxu0  ;;  %v5009_v17 = vpop.f32.mrf.mxu2 }
  0xad   : > { %3979 = vmatmul.msk.f32.gmra.mxu1 %vm440_vm1, %v4486_v18  ;;  %v832_v18 = vrot.slane %v4689_v2, 2 }
  0xae   : > { %4046 = vmatmul.msk.f32.gmra.mxu3 %vm440_vm1, %v4598_v60 }
  0xaf   : > { %4080 = vmatmul.msk.f32.gmra.mxu0 %vm440_vm1, %v4638_v27  ;;  %v5037_v31 = vsel %vm795_vm2, %v831_v7, %v832_v18 }
  0xb0   : > { %8409 = vst [vmem:[#allocation41_spill] sm:$0xff] %v5037_v31 }
  0xb1   : > { %v5020_v10 = vpop.f32.mrf.mxu3  ;;  %4015 = vmatmul.msk.f32.gmra.mxu2 %vm440_vm1, %v5016_v1  ;;  %v834_v1 = vrot.slane %v4733_v37, 2  ;;  %v4170_v37 = vld [vmem:[%s8231_s1 + $0x70] sm:$0xff] }
  0xb2   : > { %8408 = vst [vmem:[#allocation40_spill] sm:$0xff] %v5020_v10  ;;  %v5024_v32 = vpop.f32.mrf.mxu1  ;;  %1739 = vmatpush.msra.mxu3 %v4170_v37  ;;  %v4204_v37 = vld [vmem:[%s8231_s1 + $0x80] sm:$0xff] }
  0xb3   : > { %1896 = vmatpush.msra.mxu0 %v4204_v37 }
  0xb4   : > { %v5028_v57 = vpop.f32.mrf.mxu0  ;;  %v5030_v43 = vpop.f32.mrf.mxu2 }
  0xb5   : > { %3980 = vmatmul.msk.f32.gmra.mxu1 %vm440_vm1, %v4598_v60  ;;  %v4136_v60 = vld [vmem:[%s8231_s1 + $0x60] sm:$0xff] }
  0xb6   : > { %4047 = vmatmul.msk.f32.gmra.mxu3 %vm440_vm1, %v4601_v61  ;;  %1581 = vmatpush.msra.mxu2 %v4136_v60  ;;  %v837_v60 = vrot.slane %v4501_v23, 2 }
  0xb7   : > { %4081 = vmatmul.msk.f32.gmra.mxu0 %vm440_vm1, %v4679_v54 }
  0xb9   : > { %v5041_v6 = vpop.f32.mrf.mxu3  ;;  %4016 = vmatmul.msk.f32.gmra.mxu2 %vm440_vm1, %v5037_v31  ;;  %v4102_v31 = vld [vmem:[%s8231_s1 + $0x50] sm:$0xff] }
  0xba   : > { %8410 = vst [vmem:[#allocation42_spill] sm:$0xff] %v5041_v6  ;;  %v5045_v10 = vpop.f32.mrf.mxu1  ;;  %v5060_v6 = vsel %vm795_vm2, %v832_v18, %v834_v1  ;;  %1427 = vmatpush.msra.mxu1 %v4102_v31  ;;  %v836_v18 = vrot.slane %v4779_v20, 2 }
  0xbb   : > { %8412 = vst [vmem:[#allocation44_spill] sm:$0xff] %v5060_v6 }
  0xbc   : > { %v5051_v27 = vpop.f32.mrf.mxu0  ;;  %v5053_v7 = vpop.f32.mrf.mxu2  ;;  %v5087_v31 = vsel %vm795_vm2, %v836_v18, %v837_v60 }
  0xbd   : > { %8411 = vst [vmem:[#allocation43_spill] sm:$0xff] %v5053_v7  ;;  %3981 = vmatmul.msk.f32.gmra.mxu1 %vm440_vm1, %v4601_v61 }
  0xbe   : > { %4048 = vmatmul.msk.f32.gmra.mxu3 %vm440_vm1, %v4686_v58  ;;  %8415 = vst [vmem:[#allocation47_spill] sm:$0xff] %v5087_v31 }
  0xbf   : > { %4082 = vmatmul.msk.f32.gmra.mxu0 %vm440_vm1, %v4726_v29 }
  0xc1   : > { %v5070_v61 = vpop.f32.mrf.mxu3  ;;  %4017 = vmatmul.msk.f32.gmra.mxu2 %vm440_vm1, %v5060_v6  ;;  %v839_v6 = vrot.slane %v4511_v25, 2 }
  0xc2   : > { %8413 = vst [vmem:[#allocation45_spill] sm:$0xff] %v5070_v61  ;;  %v5074_v1 = vpop.f32.mrf.mxu1 }
  0xc3   : > { %v5108_v37 = vsel %vm795_vm2, %v837_v60, %v839_v6 }
  0xc4   : > { %v5078_v54 = vpop.f32.mrf.mxu0  ;;  %v5080_v7 = vpop.f32.mrf.mxu2  ;;  %8417 = vst [vmem:[#allocation49_spill] sm:$0xff] %v5108_v37 }
  0xc5   : > { %8414 = vst [vmem:[#allocation46_spill] sm:$0xff] %v5080_v7  ;;  %3982 = vmatmul.msk.f32.gmra.mxu1 %vm440_vm1, %v4686_v58 }
  0xc6   : > { %4049 = vmatmul.msk.f32.gmra.mxu3 %vm440_vm1, %v4689_v2 }
  0xc7   : > { %4083 = vmatmul.msk.f32.gmra.mxu0 %vm440_vm1, %v4771_v63  ;;  %v842_v63 = vrot.slane %v4530_v35, 2 }
  0xc9   : > { %v5094_v61 = vpop.f32.mrf.mxu3  ;;  %4018 = vmatmul.msk.f32.gmra.mxu2 %vm440_vm1, %v5087_v31  ;;  %v841_v31 = vrot.slane %v4527_v34, 2 }
  0xca   : > { %8416 = vst [vmem:[#allocation48_spill] sm:$0xff] %v5094_v61  ;;  %v5098_v58 = vpop.f32.mrf.mxu1 }
  0xcb   : > { %v5126_v60 = vsel %vm795_vm2, %v841_v31, %v842_v63 }
  0xcc   : > { %v5101_v29 = vpop.f32.mrf.mxu0  ;;  %v960_v18 = vpop.f32.mrf.mxu2  ;;  %8419 = vst [vmem:[#allocation51_spill] sm:$0xff] %v5126_v60 }
  0xcd   : > { %3983 = vmatmul.msk.f32.gmra.mxu1 %vm440_vm1, %v4689_v2 }
  0xce   : > { %4050 = vmatmul.msk.f32.gmra.mxu3 %vm440_vm1, %v4779_v20 }
  0xcf   : > { %4084 = vmatmul.msk.f32.gmra.mxu0 %vm440_vm1, %v4811_v41 }
  0xd1   : > { %v5112_v61 = vpop.f32.mrf.mxu3  ;;  %4019 = vmatmul.msk.f32.gmra.mxu2 %vm440_vm1, %v5108_v37 }
  0xd2   : > { %8418 = vst [vmem:[#allocation50_spill] sm:$0xff] %v5112_v61  ;;  %v699_v25 = vpop.f32.mrf.mxu1 }
  0xd3   : > { %v700_v2 = vadd.f32 %v699_v25, %v4948_v62 }
  0xd4   : > { %v5119_v7 = vpop.f32.mrf.mxu0  ;;  %v963_v11 = vpop.f32.mrf.mxu2 }
  0xd5   : > { %v1056_v6 = vadd.f32 %v960_v18, %v700_v2  ;;  %3984 = vmatmul.msk.f32.gmra.mxu1 %vm440_vm1, %v4779_v20  ;;  %v844_v18 = vrot.slane %v4578_v52, 2 }
  0xd6   : > { %4051 = vmatmul.msk.f32.gmra.mxu3 %vm440_vm1, %v4501_v23 }
  0xd7   : > { %4085 = vmatmul.msk.f32.gmra.mxu0 %vm440_vm1, %v4535_v36  ;;  %v5141_v31 = vsel %vm795_vm2, %v842_v63, %v844_v18 }
  0xd8   : > { %8421 = vst [vmem:[#allocation53_spill] sm:$0xff] %v5141_v31 }
  0xd9   : > { %v5130_v61 = vpop.f32.mrf.mxu3  ;;  %4020 = vmatmul.msk.f32.gmra.mxu2 %vm440_vm1, %v5126_v60 }
  0xda   : > { %8420 = vst [vmem:[#allocation52_spill] sm:$0xff] %v5130_v61  ;;  %v702_v62 = vpop.f32.mrf.mxu1 }
  0xdb   : > { %v703_v25 = vadd.f32 %v702_v62, %v4966_v26  ;;  %v847_v62 = vrot.slane %v4632_v16, 2 }
  0xdc   : > { %v1272_v20 = vpop.f32.mrf.mxu0  ;;  %v966_v2 = vpop.f32.mrf.mxu2 }
  0xdd   : > { %v1057_v37 = vadd.f32 %v963_v11, %v703_v25  ;;  %3985 = vmatmul.msk.f32.gmra.mxu1 %vm440_vm1, %v4501_v23  ;;  %v846_v11 = vrot.slane %v4629_v14, 2 }
  0xde   : > { %4052 = vmatmul.msk.f32.gmra.mxu3 %vm440_vm1, %v4527_v34 }
  0xdf   : > { %4086 = vmatmul.msk.f32.gmra.mxu0 %vm440_vm1, %v4570_v49 }
  0xe1   : > { %v1114_v61 = vpop.f32.mrf.mxu3  ;;  %4021 = vmatmul.msk.f32.gmra.mxu2 %vm440_vm1, %v5141_v31 }
  0xe2   : > { %v1210_v52 = vadd.f32 %v1114_v61, %v1056_v6  ;;  %v705_v26 = vpop.f32.mrf.mxu1  ;;  %v5157_v61 = vsel %vm795_vm2, %v846_v11, %v847_v62 }
  0xe3   : > { %v706_v23 = vadd.f32 %v705_v26, %v4987_v21 }
  0xe4   : > { %v5150_v25 = vadd.f32 %v1272_v20, %v1210_v52  ;;  %v1275_v60 = vpop.f32.mrf.mxu0  ;;  %v969_v63 = vpop.f32.mrf.mxu2 }
  0xe5   : > { %v1058_v18 = vadd.f32 %v966_v2, %v706_v23  ;;  %3986 = vmatmul.msk.f32.gmra.mxu1 %vm440_vm1, %v4527_v34  ;;  %v849_v2 = vrot.slane %v4672_v50, 2 }
  0xe6   : > { %4053 = vmatmul.msk.f32.gmra.mxu3 %vm440_vm1, %v4530_v35 }
  0xe7   : > { %4087 = vmatmul.msk.f32.gmra.mxu0 %vm440_vm1, %v4622_v4  ;;  %v5172_v11 = vsel %vm795_vm2, %v847_v62, %v849_v2 }
  0xe8   : > { %8422 = vst [vmem:[#allocation54_spill] sm:$0xff] %v5172_v11 }
  0xe9   : > { %v1117_v6 = vpop.f32.mrf.mxu3  ;;  %4022 = vmatmul.msk.f32.gmra.mxu2 %vm440_vm1, %v5157_v61 }
  0xea   : > { %v1211_v21 = vadd.f32 %v1117_v6, %v1057_v37  ;;  %v708_v20 = vpop.f32.mrf.mxu1 }
  0xeb   : > { %v709_v52 = vadd.f32 %v708_v20, %v5007_v38 }
  0xec   : > { %v5165_v34 = vadd.f32 %v1275_v60, %v1211_v21  ;;  %v1278_v26 = vpop.f32.mrf.mxu0  ;;  %v972_v23 = vpop.f32.mrf.mxu2  ;;  %v851_v60 = vrot.slane %v4720_v12, 2 }
  0xed   : > { %v1059_v31 = vadd.f32 %v969_v63, %v709_v52  ;;  %3987 = vmatmul.msk.f32.gmra.mxu1 %vm440_vm1, %v4530_v35  ;;  %v8423_v63 = vld [vmem:[#allocation2_spill] sm:$0xff] }
  0xee   : > { %4054 = vmatmul.msk.f32.gmra.mxu3 %vm440_vm1, %v4629_v14  ;;  %v852_v6 = vrot.slane %v8423_v63, 2  ;;  %v8426_v52 = vld [vmem:[#allocation22_spill] sm:$0xff] }
  0xef   : > { %4088 = vmatmul.msk.f32.gmra.mxu0 %vm440_vm1, %v4666_v45 }
  0xf1   : > { %v1120_v50 = vpop.f32.mrf.mxu3  ;;  %4023 = vmatmul.msk.f32.gmra.mxu2 %vm440_vm1, %v5172_v11 }
  0xf2   : > { %v1212_v38 = vadd.f32 %v1120_v50, %v1058_v18  ;;  %v711_v37 = vpop.f32.mrf.mxu1  ;;  %v5188_v18 = vsel %vm795_vm2, %v851_v60, %v852_v6 }
  0xf3   : > { %v712_v35 = vadd.f32 %v711_v37, %v5028_v57  ;;  %8425 = vst [vmem:[#allocation55_spill] sm:$0xff] %v5188_v18 }
  0xf4   : > { %v5181_v21 = vadd.f32 %v1278_v26, %v1212_v38  ;;  %v1281_v20 = vpop.f32.mrf.mxu0  ;;  %v975_v62 = vpop.f32.mrf.mxu2  ;;  %v8427_v38 = vld [vmem:[#allocation3_spill] sm:$0xff] }
  0xf5   : > { %v1060_v2 = vadd.f32 %v972_v23, %v712_v35  ;;  %3988 = vmatmul.msk.f32.gmra.mxu1 %vm440_vm1, %v4629_v14  ;;  %v854_v23 = vrot.slane %v8427_v38, 2 }
  0xf6   : > { %8424 = vst [vmem:[#allocation2_spill] sm:$0xff] %v5181_v21  ;;  %4055 = vmatmul.msk.f32.gmra.mxu3 %vm440_vm1, %v4632_v16 }
  0xf7   : > { %4089 = vmatmul.msk.f32.gmra.mxu0 %vm440_vm1, %v8426_v52  ;;  %v5203_v60 = vsel %vm795_vm2, %v852_v6, %v854_v23 }
  0xf8   : > { %8428 = vst [vmem:[#allocation22_spill] sm:$0xff] %v5203_v60 }
  0xf9   : > { %v1123_v50 = vpop.f32.mrf.mxu3  ;;  %4024 = vmatmul.msk.f32.gmra.mxu2 %vm440_vm1, %v5188_v18 }
  0xfa   : > { %v1213_v57 = vadd.f32 %v1123_v50, %v1059_v31  ;;  %v714_v26 = vpop.f32.mrf.mxu1  ;;  %v8429_v31 = vld [vmem:[#allocation26_spill] sm:$0xff] }
  0xfb   : > { %v715_v37 = vadd.f32 %v714_v26, %v5051_v27  ;;  %v8431_v26 = vld [vmem:[#allocation6_spill] sm:$0xff] }
  0xfc   : > { %v5196_v14 = vadd.f32 %v1281_v20, %v1213_v57  ;;  %v1284_v35 = vpop.f32.mrf.mxu0  ;;  %v978_v11 = vpop.f32.mrf.mxu2  ;;  %v8430_v57 = vld [vmem:[#allocation5_spill] sm:$0xff]  ;;  %v857_v38 = vrot.slane %v8431_v26, 2 }
  0xfd   : > { %v1061_v21 = vadd.f32 %v975_v62, %v715_v37  ;;  %3989 = vmatmul.msk.f32.gmra.mxu1 %vm440_vm1, %v4632_v16  ;;  %v856_v62 = vrot.slane %v8430_v57, 2 }
  0xfe   : > { %4056 = vmatmul.msk.f32.gmra.mxu3 %vm440_vm1, %v4720_v12 }
  0xff   : > { %4090 = vmatmul.msk.f32.gmra.mxu0 %vm440_vm1, %v8429_v31 }
 0x101   : > { %v1126_v50 = vpop.f32.mrf.mxu3  ;;  %4025 = vmatmul.msk.f32.gmra.mxu2 %vm440_vm1, %v5203_v60 }
 0x102   : > { %v1214_v27 = vadd.f32 %v1126_v50, %v1060_v2  ;;  %v717_v20 = vpop.f32.mrf.mxu1  ;;  %v5219_v2 = vsel %vm795_vm2, %v856_v62, %v857_v38  ;;  %v8434_v50 = vld [vmem:[#allocation7_spill] sm:$0xff] }
 0x103   : > { %v718_v16 = vadd.f32 %v717_v20, %v5078_v54  ;;  %8433 = vst [vmem:[#allocation5_spill] sm:$0xff] %v5219_v2 }
 0x104   : > { %v5212_v37 = vadd.f32 %v1284_v35, %v1214_v27  ;;  %v1287_v18 = vpop.f32.mrf.mxu0  ;;  %v981_v6 = vpop.f32.mrf.mxu2  ;;  %v8435_v27 = vld [vmem:[#allocation10_spill] sm:$0xff] }
 0x105   : > { %v1062_v23 = vadd.f32 %v978_v11, %v718_v16  ;;  %3990 = vmatmul.msk.f32.gmra.mxu1 %vm440_vm1, %v4720_v12  ;;  %v859_v11 = vrot.slane %v8435_v27, 2 }
 0x106   : > { %8432 = vst [vmem:[#allocation3_spill] sm:$0xff] %v5212_v37  ;;  %4057 = vmatmul.msk.f32.gmra.mxu3 %vm440_vm1, %v8423_v63 }
 0x107   : > { %4091 = vmatmul.msk.f32.gmra.mxu0 %vm440_vm1, %v8434_v50  ;;  %v5234_v62 = vsel %vm795_vm2, %v857_v38, %v859_v11 }
 0x108   : > { %8437 = vst [vmem:[#allocation7_spill] sm:$0xff] %v5234_v62 }
 0x109   : > { %v1129_v60 = vpop.f32.mrf.mxu3  ;;  %4026 = vmatmul.msk.f32.gmra.mxu2 %vm440_vm1, %v5219_v2 }
 0x10a   : > { %v1215_v54 = vadd.f32 %v1129_v60, %v1061_v21  ;;  %v720_v35 = vpop.f32.mrf.mxu1  ;;  %v8438_v21 = vld [vmem:[#allocation9_spill] sm:$0xff] }
 0x10b   : > { %v721_v20 = vadd.f32 %v720_v35, %v5101_v29  ;;  %v8440_v35 = vld [vmem:[#allocation14_spill] sm:$0xff] }
 0x10c   : > { %v5227_v12 = vadd.f32 %v1287_v18, %v1215_v54  ;;  %v1290_v16 = vpop.f32.mrf.mxu0  ;;  %v984_v37 = vpop.f32.mrf.mxu2  ;;  %v8439_v54 = vld [vmem:[#allocation13_spill] sm:$0xff]  ;;  %v862_v27 = vrot.slane %v8440_v35, 2 }
 0x10d   : > { %v1063_v31 = vadd.f32 %v981_v6, %v721_v20  ;;  %3991 = vmatmul.msk.f32.gmra.mxu1 %vm440_vm1, %v8423_v63  ;;  %v861_v6 = vrot.slane %v8439_v54, 2 }
 0x10e   : > { %8436 = vst [vmem:[#allocation6_spill] sm:$0xff] %v5227_v12  ;;  %4058 = vmatmul.msk.f32.gmra.mxu3 %vm440_vm1, %v8430_v57 }
 0x10f   : > { %4092 = vmatmul.msk.f32.gmra.mxu0 %vm440_vm1, %v8438_v21 }
 0x111   : > { %v1132_v60 = vpop.f32.mrf.mxu3  ;;  %4027 = vmatmul.msk.f32.gmra.mxu2 %vm440_vm1, %v5234_v62 }
 0x112   : > { %v1216_v29 = vadd.f32 %v1132_v60, %v1062_v23  ;;  %v723_v18 = vpop.f32.mrf.mxu1  ;;  %v5250_v23 = vsel %vm795_vm2, %v861_v6, %v862_v27  ;;  %v8443_v60 = vld [vmem:[#allocation12_spill] sm:$0xff] }
 0x113   : > { %v724_v63 = vadd.f32 %v723_v18, %v5119_v7  ;;  %8442 = vst [vmem:[#allocation13_spill] sm:$0xff] %v5250_v23 }
 0x114   : > { %v5243_v20 = vadd.f32 %v1290_v16, %v1216_v29  ;;  %v1293_v2 = vpop.f32.mrf.mxu0  ;;  %v987_v38 = vpop.f32.mrf.mxu2  ;;  %v8444_v29 = vld [vmem:[#allocation17_spill] sm:$0xff] }
 0x115   : > { %v1064_v11 = vadd.f32 %v984_v37, %v724_v63  ;;  %3992 = vmatmul.msk.f32.gmra.mxu1 %vm440_vm1, %v8430_v57  ;;  %v864_v37 = vrot.slane %v8444_v29, 2 }
 0x116   : > { %8441 = vst [vmem:[#allocation10_spill] sm:$0xff] %v5243_v20  ;;  %4059 = vmatmul.msk.f32.gmra.mxu3 %vm440_vm1, %v8431_v26 }
 0x117   : > { %4093 = vmatmul.msk.f32.gmra.mxu0 %vm440_vm1, %v8443_v60  ;;  %v5264_v6 = vsel %vm795_vm2, %v862_v27, %v864_v37  ;;  %v8447_v60 = vld [vmem:[#allocation16_spill] sm:$0xff] }
 0x118   : > { %8446 = vst [vmem:[#allocation17_spill] sm:$0xff] %v5264_v6 }
 0x119   : > { %v1135_v62 = vpop.f32.mrf.mxu3  ;;  %4028 = vmatmul.msk.f32.gmra.mxu2 %vm440_vm1, %v5250_v23  ;;  %v8449_v23 = vld [vmem:[#allocation21_spill] sm:$0xff] }
 0x11a   : > { %v1217_v7 = vadd.f32 %v1135_v62, %v1063_v31  ;;  %v726_v16 = vpop.f32.mrf.mxu1 }
 0x11c   : > { %v5257_v18 = vadd.f32 %v1293_v2, %v1217_v7  ;;  %v1296_v57 = vpop.f32.mrf.mxu0  ;;  %v990_v63 = vpop.f32.mrf.mxu2  ;;  %v8448_v7 = vld [vmem:[#allocation20_spill] sm:$0xff] }
 0x11d   : > { %3993 = vmatmul.msk.f32.gmra.mxu1 %vm440_vm1, %v8431_v26  ;;  %v866_v29 = vrot.slane %v8448_v7, 2  ;;  %v727_v26 = vadd.f32 %v726_v16, %v4944_v24 }
 0x11e   : > { %8445 = vst [vmem:[#allocation14_spill] sm:$0xff] %v5257_v18  ;;  %4060 = vmatmul.msk.f32.gmra.mxu3 %vm440_vm1, %v8439_v54  ;;  %v867_v18 = vrot.slane %v8449_v23, 2 }
 0x11f   : > { %4094 = vmatmul.msk.f32.gmra.mxu0 %vm440_vm1, %v8447_v60 }
 0x120   : > { %v5280_v37 = vsel %vm795_vm2, %v866_v29, %v867_v18  ;;  %v8454_v29 = vld [vmem:[#allocation24_spill] sm:$0xff] }
 0x121   : > { %v1138_v31 = vpop.f32.mrf.mxu3  ;;  %4029 = vmatmul.msk.f32.gmra.mxu2 %vm440_vm1, %v5264_v6 }
 0x122   : > { %v1218_v2 = vadd.f32 %v1138_v31, %v1064_v11  ;;  %v729_v62 = vpop.f32.mrf.mxu1  ;;  %v8451_v11 = vld [vmem:[#allocation19_spill] sm:$0xff]  ;;  %v1065_v31 = vadd.f32 %v987_v38, %v727_v26 }
 0x124   : > { %v5273_v20 = vadd.f32 %v1296_v57, %v1218_v2  ;;  %v1299_v21 = vpop.f32.mrf.mxu0  ;;  %v993_v27 = vpop.f32.mrf.mxu2  ;;  %v8452_v57 = vld [vmem:[#allocation25_spill] sm:$0xff] }
 0x125   : > { %3994 = vmatmul.msk.f32.gmra.mxu1 %vm440_vm1, %v8439_v54  ;;  %v869_v2 = vrot.slane %v8452_v57, 2  ;;  %v730_v54 = vadd.f32 %v729_v62, %v4963_v3  ;;  %v8455_v62 = vld [vmem:[#allocation29_spill] sm:$0xff] }
 0x126   : > { %8450 = vst [vmem:[#allocation20_spill] sm:$0xff] %v5273_v20  ;;  %4061 = vmatmul.msk.f32.gmra.mxu3 %vm440_vm1, %v8440_v35 }
 0x127   : > { %4095 = vmatmul.msk.f32.gmra.mxu0 %vm440_vm1, %v8451_v11  ;;  %v5295_v38 = vsel %vm795_vm2, %v867_v18, %v869_v2 }
 0x128   : > { %8453 = vst [vmem:[#allocation21_spill] sm:$0xff] %v5295_v38 }
 0x129   : > { %v1141_v6 = vpop.f32.mrf.mxu3  ;;  %4030 = vmatmul.msk.f32.gmra.mxu2 %vm440_vm1, %v5280_v37 }
 0x12a   : > { %v1219_v24 = vadd.f32 %v1141_v6, %v1065_v31  ;;  %v732_v16 = vpop.f32.mrf.mxu1  ;;  %v1066_v6 = vadd.f32 %v990_v63, %v730_v54  ;;  %v871_v31 = vrot.slane %v8455_v62, 2  ;;  %v8456_v54 = vld [vmem:[#allocation28_spill] sm:$0xff] }
 0x12c   : > { %v5288_v20 = vadd.f32 %v1299_v21, %v1219_v24  ;;  %v1302_v60 = vpop.f32.mrf.mxu0  ;;  %v996_v12 = vpop.f32.mrf.mxu2  ;;  %v733_v24 = vadd.f32 %v732_v16, %v4983_v42  ;;  %v874_v16 = vrot.slane %v4821_v0, 2 }
 0x12d   : > { %3995 = vmatmul.msk.f32.gmra.mxu1 %vm440_vm1, %v8440_v35  ;;  %v872_v35 = vrot.slane %v4788_v22, 2 }
 0x12e   : > { %4062 = vmatmul.msk.f32.gmra.mxu3 %vm440_vm1, %v8448_v7 }
 0x12f   : > { %4096 = vmatmul.msk.f32.gmra.mxu0 %vm440_vm1, %v8454_v29  ;;  %v5311_v63 = vsel %vm795_vm2, %v871_v31, %v872_v35 }
 0x131   : > { %v1144_v26 = vpop.f32.mrf.mxu3  ;;  %4031 = vmatmul.msk.f32.gmra.mxu2 %vm440_vm1, %v5295_v38 }
 0x132   : > { %v1220_v3 = vadd.f32 %v1144_v26, %v1066_v6  ;;  %v735_v21 = vpop.f32.mrf.mxu1  ;;  %v1067_v6 = vadd.f32 %v993_v27, %v733_v24  ;;  %v5326_v27 = vsel %vm795_vm2, %v872_v35, %v874_v16  ;;  %v5338_v35 = vld [vmem:[%s4457_s14 + $0x188] sm:$0xff] }
 0x133   : > { %8457 = vst [vmem:[#allocation19_spill] sm:$0xff] %v5326_v27 }
 0x134   : > { %v5304_v57 = vadd.f32 %v1302_v60, %v1220_v3  ;;  %v1305_v18 = vpop.f32.mrf.mxu0  ;;  %v999_v2 = vpop.f32.mrf.mxu2 }
 0x135   : > { %3996 = vmatmul.msk.f32.gmra.mxu1 %vm440_vm1, %v8448_v7  ;;  %v736_v7 = vadd.f32 %v735_v21, %v5004_v33 }
 0x136   : > { %4063 = vmatmul.msk.f32.gmra.mxu3 %vm440_vm1, %v8449_v23 }
 0x137   : > { %4097 = vmatmul.msk.f32.gmra.mxu0 %vm440_vm1, %v8456_v54  ;;  %v1068_v0 = vadd.f32 %v996_v12, %v736_v7  ;;  %v5343_v12 = vld [vmem:[%s4457_s14 + $0x180] sm:$0xff] }
 0x139   : > { %v1147_v26 = vpop.f32.mrf.mxu3  ;;  %4032 = vmatmul.msk.f32.gmra.mxu2 %vm440_vm1, %v5311_v63 }
 0x13a   : > { %v1221_v42 = vadd.f32 %v1147_v26, %v1067_v6  ;;  %v738_v60 = vpop.f32.mrf.mxu1 }
 0x13c   : > { %v5319_v3 = vadd.f32 %v1305_v18, %v1221_v42  ;;  %v1308_v38 = vpop.f32.mrf.mxu0  ;;  %v1002_v31 = vpop.f32.mrf.mxu2  ;;  %v739_v18 = vadd.f32 %v738_v60, %v5024_v32  ;;  %v1243_v32 = vrot.slane %v5343_v12, 1 }
 0x13d   : > { %3997 = vmatmul.msk.f32.gmra.mxu1 %vm440_vm1, %v8449_v23 }
 0x13e   : > { %4064 = vmatmul.msk.f32.gmra.mxu3 %vm440_vm1, %v8455_v62  ;;  %v1069_v42 = vadd.f32 %v999_v2, %v739_v18  ;;  %v5360_v2 = vld [vmem:[%s4457_s14 + $0x190] sm:$0x3] }
 0x13f   : > { %4098 = vmatmul.msk.f32.gmra.mxu0 %vm440_vm1, %v4815_v48 }
 0x141   : > { %v1150_v33 = vpop.f32.mrf.mxu3  ;;  %4033 = vmatmul.msk.f32.gmra.mxu2 %vm440_vm1, %v5326_v27 }
 0x142   : > { %v1222_v21 = vadd.f32 %v1150_v33, %v1068_v0  ;;  %v741_v24 = vpop.f32.mrf.mxu1 }
 0x143   : > { %v742_v7 = vadd.f32 %v741_v24, %v5045_v10  ;;  %v1246_v10 = vrot.slane %v5360_v2, 1 }
 0x144   : > { %v5333_v23 = vadd.f32 %v1308_v38, %v1222_v21  ;;  %v1311_v6 = vpop.f32.mrf.mxu0  ;;  %v1005_v26 = vpop.f32.mrf.mxu2  ;;  %v1244_v38 = vrot.slane %v5338_v35, 1 }
 0x145   : > { %3998 = vmatmul.msk.f32.gmra.mxu1 %vm440_vm1, %v8455_v62 }
 0x146   : > { %4065 = vmatmul.msk.f32.gmra.mxu3 %vm440_vm1, %v4788_v22  ;;  %v5355_v27 = vsel %vm356_vm0, %v1243_v32, %v1244_v38 }
 0x147   : > { %4099 = vmatmul.msk.f32.gmra.mxu0 %vm440_vm1, %v4839_v30 }
 0x149   : > { %v1153_v60 = vpop.f32.mrf.mxu3  ;;  %4138 = vmatmul.msk.f32.vlgmr.msra.gmra.mxu2 %vm440_vm1, %v4657_v39  ;;  %v1070_v39 = vadd.f32 %v1002_v31, %v742_v7 }
 0x14a   : > { %v1223_v62 = vadd.f32 %v1153_v60, %v1069_v42  ;;  %v744_v16 = vpop.f32.mrf.mxu1 }
 0x14b   : > { %v745_v42 = vadd.f32 %v744_v16, %v5074_v1 }
 0x14c   : > { %v5352_v0 = vadd.f32 %v1311_v6, %v1223_v62  ;;  %v1314_v33 = vpop.f32.mrf.mxu0  ;;  %v1008_v21 = vpop.f32.mrf.mxu2  ;;  %v5373_v62 = vsel %vm356_vm0, %v1244_v38, %v1246_v10 }
 0x14d   : > { %3999 = vmatmul.msk.f32.gmra.mxu1 %vm440_vm1, %v4788_v22 }
 0x14e   : > { %4066 = vmatmul.msk.f32.gmra.mxu3 %vm440_vm1, %v5343_v12 }
 0x14f   : > { %4100 = vmatmul.msk.f32.gmra.mxu0 %vm440_vm1, %v5355_v27 }
 0x151   : > { %v1156_v24 = vpop.f32.mrf.mxu3  ;;  %4139 = vmatmul.msk.f32.gmra.mxu2 %vm440_vm1, %v4660_v40  ;;  %v1071_v40 = vadd.f32 %v1005_v26, %v745_v42 }
 0x152   : > { %v1224_v18 = vadd.f32 %v1156_v24, %v1070_v39  ;;  %v747_v6 = vpop.f32.mrf.mxu1 }
 0x153   : > { %v748_v7 = vadd.f32 %v747_v6, %v5098_v58 }
 0x154   : > { %v5370_v22 = vadd.f32 %v1314_v33, %v1224_v18  ;;  %v1317_v32 = vpop.f32.mrf.mxu0  ;;  %v1011_v60 = vpop.f32.mrf.mxu2 }
 0x155   : > { %4104 = vmatmul.msk.f32.vlgmr.msra.gmra.mxu1 %vm440_vm1, %v4851_v44  ;;  %v1072_v44 = vadd.f32 %v1008_v21, %v748_v7 }
 0x156   : > { %4067 = vmatmul.msk.f32.gmra.mxu3 %vm440_vm1, %v5338_v35 }
 0x157   : > { %4101 = vmatmul.msk.f32.gmra.mxu0 %vm440_vm1, %v5373_v62 }
 0x159   : > { %v1159_v31 = vpop.f32.mrf.mxu3  ;;  %4140 = vmatmul.msk.f32.gmra.mxu2 %vm440_vm1, %v4744_v51 }
 0x15a   : > { %v1225_v1 = vadd.f32 %v1159_v31, %v1071_v40  ;;  %v750_v16 = vpop.f32.mrf.mxu1 }
 0x15b   : > { %v751_v10 = vadd.f32 %v750_v16, %v4968_v55 }
 0x15c   : > { %v5384_v38 = vadd.f32 %v1317_v32, %v1225_v1  ;;  %v1320_v33 = vpop.f32.mrf.mxu0  ;;  %v1014_v39 = vpop.f32.mrf.mxu2 }
 0x15d   : > { %4105 = vmatmul.msk.f32.gmra.mxu1 %vm440_vm1, %v4863_v13 }
 0x15e   : > { %4172 = vmatmul.msk.f32.vlgmr.msra.gmra.mxu3 %vm440_vm1, %v4692_v5  ;;  %v1073_v5 = vadd.f32 %v1011_v60, %v751_v10  ;;  %v4359_v60 = vld [vmem:[%s4457_s14 + $0x68] sm:$0xff] }
 0x15f   : > { %4206 = vmatmul.msk.f32.vlgmr.msra.gmra.mxu0 %vm440_vm1, %v4876_v15 }
 0x161   : > { %v1162_v26 = vpop.f32.mrf.mxu3  ;;  %4141 = vmatmul.msk.f32.gmra.mxu2 %vm440_vm1, %v4747_v59 }
 0x162   : > { %v1226_v51 = vadd.f32 %v1162_v26, %v1072_v44  ;;  %v753_v58 = vpop.f32.mrf.mxu1 }
 0x163   : > { %v754_v21 = vadd.f32 %v753_v58, %v4989_v19  ;;  %v8459_v58 = vld [vmem:[#allocation31_spill] sm:$0xff] }
 0x164   : > { %v5395_v24 = vadd.f32 %v1320_v33, %v1226_v51  ;;  %v1323_v18 = vpop.f32.mrf.mxu0  ;;  %v1017_v6 = vpop.f32.mrf.mxu2  ;;  %v4360_v33 = vld [vmem:[%s4457_s14 + $0x78] sm:$0xff] }
 0x165   : > { %4106 = vmatmul.msk.f32.gmra.mxu1 %vm440_vm1, %v4876_v15 }
 0x166   : > { %4173 = vmatmul.msk.f32.gmra.mxu3 %vm440_vm1, %v4736_v28  ;;  %v1074_v28 = vadd.f32 %v1014_v39, %v754_v21 }
 0x167   : > { %4207 = vmatmul.msk.f32.gmra.mxu0 %vm440_vm1, %v4888_v46 }
 0x169   : > { %v1165_v59 = vpop.f32.mrf.mxu3  ;;  %4142 = vmatmul.msk.f32.gmra.mxu2 %vm440_vm1, %v4826_v9 }
 0x16a   : > { %v1227_v13 = vadd.f32 %v1165_v59, %v1073_v5  ;;  %v756_v55 = vpop.f32.mrf.mxu1  ;;  %v8460_v59 = vld [vmem:[#allocation43_spill] sm:$0xff] }
 0x16b   : > { %v757_v31 = vadd.f32 %v756_v55, %v5009_v17 }
 0x16c   : > { %v5406_v42 = vadd.f32 %v1323_v18, %v1227_v13  ;;  %v1326_v32 = vpop.f32.mrf.mxu0  ;;  %v1020_v15 = vpop.f32.mrf.mxu2 }
 0x16d   : > { %4107 = vmatmul.msk.f32.gmra.mxu1 %vm440_vm1, %v4888_v46 }
 0x16e   : > { %4174 = vmatmul.msk.f32.gmra.mxu3 %vm440_vm1, %v4782_v56  ;;  %v1075_v56 = vadd.f32 %v1017_v6, %v757_v31  ;;  %v4361_v6 = vld [vmem:[%s4457_s14 + $0x80] sm:$0xff] }
 0x16f   : > { %4208 = vmatmul.msk.f32.gmra.mxu0 %vm440_vm1, %v4901_v47  ;;  %v8463_v31 = vld [vmem:[#allocation46_spill] sm:$0xff] }
 0x171   : > { %v1168_v9 = vpop.f32.mrf.mxu3  ;;  %4143 = vmatmul.msk.f32.gmra.mxu2 %vm440_vm1, %v4359_v60  ;;  %v4362_v60 = vld [vmem:[%s4457_s14 + $0x90] sm:$0xff] }
 0x172   : > { %v1228_v19 = vadd.f32 %v1168_v9, %v1074_v28  ;;  %v759_v40 = vpop.f32.mrf.mxu1  ;;  %v8462_v28 = vld [vmem:[#allocation32_spill] sm:$0xff] }
 0x173   : > { %v760_v44 = vadd.f32 %v759_v40, %v5030_v43 }
 0x174   : > { %v5417_v1 = vadd.f32 %v1326_v32, %v1228_v19  ;;  %v1329_v16 = vpop.f32.mrf.mxu0  ;;  %v1023_v46 = vpop.f32.mrf.mxu2  ;;  %v8461_v32 = vld [vmem:[#allocation4_spill] sm:$0xff] }
 0x175   : > { %4108 = vmatmul.msk.f32.gmra.mxu1 %vm440_vm1, %v4901_v47  ;;  %v1076_v10 = vadd.f32 %v1020_v15, %v760_v44 }
 0x176   : > { %4175 = vmatmul.msk.f32.gmra.mxu3 %vm440_vm1, %v4818_v8  ;;  %v8458_v8 = vld [vmem:[#allocation30_spill] sm:$0xff] }
 0x177   : > { %4209 = vmatmul.msk.f32.gmra.mxu0 %vm440_vm1, %v4913_v53 }
 0x179   : > { %v1171_v7 = vpop.f32.mrf.mxu3  ;;  %4144 = vmatmul.msk.f32.gmra.mxu2 %vm440_vm1, %v4360_v33 }
 0x17a   : > { %v1229_v17 = vadd.f32 %v1171_v7, %v1075_v56  ;;  %v762_v39 = vpop.f32.mrf.mxu1 }
 0x17b   : > { %v763_v13 = vadd.f32 %v762_v39, %v8460_v59  ;;  %v8465_v39 = vld [vmem:[#allocation33_spill] sm:$0xff]  ;;  %v8467_v59 = vld [vmem:[#allocation11_spill] sm:$0xff] }
 0x17c   : > { %v5428_v26 = vadd.f32 %v1329_v16, %v1229_v17  ;;  %v1332_v51 = vpop.f32.mrf.mxu0  ;;  %v1026_v47 = vpop.f32.mrf.mxu2  ;;  %v8464_v17 = vld [vmem:[#allocation8_spill] sm:$0xff] }
 0x17d   : > { %4109 = vmatmul.msk.f32.gmra.mxu1 %vm440_vm1, %v4913_v53  ;;  %v1077_v15 = vadd.f32 %v1023_v46, %v763_v13  ;;  %v8468_v13 = vld [vmem:[#allocation35_spill] sm:$0xff] }
 0x17e   : > { %4176 = vmatmul.msk.f32.gmra.mxu3 %vm440_vm1, %v8458_v8 }
 0x17f   : > { %4210 = vmatmul.msk.f32.gmra.mxu0 %vm440_vm1, %v8459_v58 }
 0x181   : > { %v1174_v18 = vpop.f32.mrf.mxu3  ;;  %4145 = vmatmul.msk.f32.gmra.mxu2 %vm440_vm1, %v4361_v6 }
 0x182   : > { %v1230_v43 = vadd.f32 %v1174_v18, %v1076_v10  ;;  %v765_v5 = vpop.f32.mrf.mxu1  ;;  %v8466_v10 = vld [vmem:[#allocation34_spill] sm:$0xff] }
 0x183   : > { %v766_v16 = vadd.f32 %v765_v5, %v8463_v31 }
 0x184   : > { %v5439_v55 = vadd.f32 %v1332_v51, %v1230_v43  ;;  %v1335_v21 = vpop.f32.mrf.mxu0  ;;  %v1029_v53 = vpop.f32.mrf.mxu2  ;;  %v4363_v51 = vld [vmem:[%s4457_s14 + $0x98] sm:$0xff] }
 0x185   : > { %4110 = vmatmul.msk.f32.gmra.mxu1 %vm440_vm1, %v8459_v58  ;;  %v1078_v46 = vadd.f32 %v1026_v47, %v766_v16  ;;  %v8470_v16 = vld [vmem:[#allocation15_spill] sm:$0xff] }
 0x186   : > { %4177 = vmatmul.msk.f32.gmra.mxu3 %vm440_vm1, %v8461_v32  ;;  %v4364_v32 = vld [vmem:[%s4457_s14 + $0xa8] sm:$0xff] }
 0x187   : > { %4211 = vmatmul.msk.f32.gmra.mxu0 %vm440_vm1, %v8462_v28 }
 0x189   : > { %v1177_v9 = vpop.f32.mrf.mxu3  ;;  %4146 = vmatmul.msk.f32.gmra.mxu2 %vm440_vm1, %v4362_v60 }
 0x18a   : > { %v1231_v19 = vadd.f32 %v1177_v9, %v1077_v15  ;;  %v768_v40 = vpop.f32.mrf.mxu1  ;;  %v8469_v9 = vld [vmem:[#allocation36_spill] sm:$0xff] }
 0x18b   : > { %v769_v18 = vadd.f32 %v768_v40, %v8466_v10 }
 0x18c   : > { %v5450_v56 = vadd.f32 %v1335_v21, %v1231_v19  ;;  %v1338_v7 = vpop.f32.mrf.mxu0  ;;  %v1032_v33 = vpop.f32.mrf.mxu2 }
 0x18d   : > { %4111 = vmatmul.msk.f32.gmra.mxu1 %vm440_vm1, %v8462_v28  ;;  %v1079_v47 = vadd.f32 %v1029_v53, %v769_v18 }
 0x18e   : > { %4178 = vmatmul.msk.f32.gmra.mxu3 %vm440_vm1, %v8464_v17 }
 0x18f   : > { %4212 = vmatmul.msk.f32.gmra.mxu0 %vm440_vm1, %v8465_v39 }
 0x191   : > { %v1180_v44 = vpop.f32.mrf.mxu3  ;;  %4147 = vmatmul.msk.f32.gmra.mxu2 %vm440_vm1, %v4363_v51  ;;  %v8472_v51 = vld [vmem:[#allocation38_spill] sm:$0xff] }
 0x192   : > { %v1232_v8 = vadd.f32 %v1180_v44, %v1078_v46  ;;  %v771_v58 = vpop.f32.mrf.mxu1 }
 0x193   : > { %v772_v60 = vadd.f32 %v771_v58, %v8469_v9 }
 0x194   : > { %v5461_v6 = vadd.f32 %v1338_v7, %v1232_v8  ;;  %v1341_v43 = vpop.f32.mrf.mxu0  ;;  %v1035_v5 = vpop.f32.mrf.mxu2  ;;  %v8471_v7 = vld [vmem:[#allocation37_spill] sm:$0xff] }
 0x195   : > { %4112 = vmatmul.msk.f32.gmra.mxu1 %vm440_vm1, %v8465_v39  ;;  %v1080_v53 = vadd.f32 %v1032_v33, %v772_v60  ;;  %v4365_v39 = vld [vmem:[%s4457_s14 + $0xb0] sm:$0xff] }
 0x196   : > { %4179 = vmatmul.msk.f32.gmra.mxu3 %vm440_vm1, %v8467_v59  ;;  %v8474_v59 = vld [vmem:[#allocation39_spill] sm:$0xff] }
 0x197   : > { %4213 = vmatmul.msk.f32.gmra.mxu0 %vm440_vm1, %v8468_v13 }
 0x199   : > { %v1183_v21 = vpop.f32.mrf.mxu3  ;;  %4148 = vmatmul.msk.f32.gmra.mxu2 %vm440_vm1, %v4364_v32 }
 0x19a   : > { %v1233_v28 = vadd.f32 %v1183_v21, %v1079_v47  ;;  %v774_v15 = vpop.f32.mrf.mxu1  ;;  %v4366_v47 = vld [vmem:[%s4457_s14 + $0xc0] sm:$0xff] }
 0x19b   : > { %v775_v8 = vadd.f32 %v774_v15, %v8472_v51 }
 0x19c   : > { %v5472_v19 = vadd.f32 %v1341_v43, %v1233_v28  ;;  %v1344_v40 = vpop.f32.mrf.mxu0  ;;  %v1038_v31 = vpop.f32.mrf.mxu2  ;;  %v8473_v43 = vld [vmem:[#allocation18_spill] sm:$0xff]  ;;  %v8475_v28 = vld [vmem:[#allocation40_spill] sm:$0xff] }
 0x19d   : > { %4113 = vmatmul.msk.f32.gmra.mxu1 %vm440_vm1, %v8468_v13  ;;  %v1081_v33 = vadd.f32 %v1035_v5, %v775_v8 }
 0x19e   : > { %4180 = vmatmul.msk.f32.gmra.mxu3 %vm440_vm1, %v8470_v16  ;;  %v8476_v16 = vld [vmem:[#allocation23_spill] sm:$0xff] }
 0x19f   : > { %4214 = vmatmul.msk.f32.gmra.mxu0 %vm440_vm1, %v8471_v7 }
 0x1a1   : > { %v1186_v17 = vpop.f32.mrf.mxu3  ;;  %4149 = vmatmul.msk.f32.gmra.mxu2 %vm440_vm1, %v4365_v39 }
 0x1a2   : > { %v1234_v46 = vadd.f32 %v1186_v17, %v1080_v53  ;;  %v777_v44 = vpop.f32.mrf.mxu1  ;;  %v4367_v17 = vld [vmem:[%s4457_s14 + $0xc8] sm:$0xff] }
 0x1a3   : > { %v778_v15 = vadd.f32 %v777_v44, %v8475_v28  ;;  %v8478_v44 = vld [vmem:[#allocation42_spill] sm:$0xff]  ;;  %v8481_v28 = vld [vmem:[#allocation45_spill] sm:$0xff] }
 0x1a4   : > { %v5483_v58 = vadd.f32 %v1344_v40, %v1234_v46  ;;  %v1347_v10 = vpop.f32.mrf.mxu0  ;;  %v1041_v18 = vpop.f32.mrf.mxu2 }
 0x1a5   : > { %4114 = vmatmul.msk.f32.gmra.mxu1 %vm440_vm1, %v8471_v7  ;;  %v8477_v7 = vld [vmem:[#allocation41_spill] sm:$0xff]  ;;  %v1082_v5 = vadd.f32 %v1038_v31, %v778_v15 }
 0x1a6   : > { %4181 = vmatmul.msk.f32.gmra.mxu3 %vm440_vm1, %v8473_v43 }
 0x1a7   : > { %4215 = vmatmul.msk.f32.gmra.mxu0 %vm440_vm1, %v8474_v59 }
 0x1a9   : > { %v1189_v13 = vpop.f32.mrf.mxu3  ;;  %4150 = vmatmul.msk.f32.gmra.mxu2 %vm440_vm1, %v4366_v47  ;;  %v4368_v47 = vld [vmem:[%s4457_s14 + $0xd8] sm:$0xff] }
 0x1aa   : > { %v1235_v21 = vadd.f32 %v1189_v13, %v1081_v33  ;;  %v780_v32 = vpop.f32.mrf.mxu1  ;;  %v8480_v33 = vld [vmem:[#allocation44_spill] sm:$0xff] }
 0x1ab   : > { %v781_v51 = vadd.f32 %v780_v32, %v8478_v44  ;;  %v8483_v44 = vld [vmem:[#allocation48_spill] sm:$0xff] }
 0x1ac   : > { %v5494_v9 = vadd.f32 %v1347_v10, %v1235_v21  ;;  %v1350_v60 = vpop.f32.mrf.mxu0  ;;  %v1044_v40 = vpop.f32.mrf.mxu2 }
 0x1ad   : > { %4115 = vmatmul.msk.f32.gmra.mxu1 %vm440_vm1, %v8474_v59  ;;  %v8479_v59 = vld [vmem:[#allocation27_spill] sm:$0xff]  ;;  %v1083_v31 = vadd.f32 %v1041_v18, %v781_v51 }
 0x1ae   : > { %4182 = vmatmul.msk.f32.gmra.mxu3 %vm440_vm1, %v8476_v16 }
 0x1af   : > { %4216 = vmatmul.msk.f32.gmra.mxu0 %vm440_vm1, %v8477_v7 }
 0x1b1   : > { %v1192_v53 = vpop.f32.mrf.mxu3  ;;  %4151 = vmatmul.msk.f32.gmra.mxu2 %vm440_vm1, %v4367_v17  ;;  %v4369_v17 = vld [vmem:[%s4457_s14 + $0xe0] sm:$0xff] }
 0x1b2   : > { %v1236_v39 = vadd.f32 %v1192_v53, %v1082_v5  ;;  %v783_v46 = vpop.f32.mrf.mxu1  ;;  %v8482_v5 = vld [vmem:[#allocation47_spill] sm:$0xff] }
 0x1b3   : > { %v784_v15 = vadd.f32 %v783_v46, %v8481_v28 }
 0x1b4   : > { %v5505_v8 = vadd.f32 %v1350_v60, %v1236_v39  ;;  %v1353_v10 = vpop.f32.mrf.mxu0  ;;  %v1047_v43 = vpop.f32.mrf.mxu2 }
 0x1b5   : > { %4116 = vmatmul.msk.f32.gmra.mxu1 %vm440_vm1, %v8477_v7  ;;  %v1084_v18 = vadd.f32 %v1044_v40, %v784_v15 }
 0x1b6   : > { %4183 = vmatmul.msk.f32.gmra.mxu3 %vm440_vm1, %v8479_v59 }
 0x1b7   : > { %4217 = vmatmul.msk.f32.gmra.mxu0 %vm440_vm1, %v8480_v33 }
 0x1b9   : > { %v1195_v13 = vpop.f32.mrf.mxu3  ;;  %4152 = vmatmul.msk.f32.gmra.mxu2 %vm440_vm1, %v4368_v47 }
 0x1ba   : > { %v1237_v21 = vadd.f32 %v1195_v13, %v1083_v31  ;;  %v786_v32 = vpop.f32.mrf.mxu1  ;;  %v4370_v13 = vld [vmem:[%s4457_s14 + $0xf0] sm:$0xff] }
 0x1bb   : > { %v787_v51 = vadd.f32 %v786_v32, %v8483_v44  ;;  %v8485_v32 = vld [vmem:[#allocation50_spill] sm:$0xff]  ;;  %v2233_v44 = vld [vmem:[%s8233_s3 + $0x8] sm:$0xff] }
 0x1bc   : > { %v5516_v60 = vadd.f32 %v1353_v10, %v1237_v21  ;;  %v1356_v16 = vpop.f32.mrf.mxu0  ;;  %v1050_v7 = vpop.f32.mrf.mxu2  ;;  %2274 = vmatpush.msrb.mxu2 %v2233_v44  ;;  %2251 = vmatpush.msrb.mxu1 %v2233_v44 }
 0x1bd   : > { %4117 = vmatmul.msk.f32.gmra.mxu1 %vm440_vm1, %v8480_v33  ;;  %v1085_v40 = vadd.f32 %v1047_v43, %v787_v51  ;;  %v8487_v51 = vld [vmem:[#allocation52_spill] sm:$0xff] }
 0x1be   : > { %4184 = vmatmul.msk.f32.gmra.mxu3 %vm440_vm1, %v4811_v41  ;;  %v8484_v41 = vld [vmem:[#allocation49_spill] sm:$0xff] }
 0x1bf   : > { %4218 = vmatmul.msk.f32.gmra.mxu0 %vm440_vm1, %v8482_v5 }
 0x1c1   : > { %v1198_v53 = vpop.f32.mrf.mxu3  ;;  %4153 = vmatmul.msk.f32.gmra.mxu2 %vm440_vm1, %v4369_v17 }
 0x1c2   : > { %v1238_v39 = vadd.f32 %v1198_v53, %v1084_v18  ;;  %v789_v46 = vpop.f32.mrf.mxu1  ;;  %v4371_v53 = vld [vmem:[%s4457_s14 + $0xf8] sm:$0xff] }
 0x1c3   : > { %v790_v28 = vadd.f32 %v789_v46, %v8485_v32 }
 0x1c4   : > { %v5527_v10 = vadd.f32 %v1356_v16, %v1238_v39  ;;  %v1359_v59 = vpop.f32.mrf.mxu0  ;;  %v1053_v33 = vpop.f32.mrf.mxu2 }
 0x1c5   : > { %4118 = vmatmul.msk.f32.gmra.mxu1 %vm440_vm1, %v8482_v5  ;;  %v1086_v43 = vadd.f32 %v1050_v7, %v790_v28 }
 0x1c6   : > { %4185 = vmatmul.msk.f32.gmra.mxu3 %vm440_vm1, %v4535_v36  ;;  %v8486_v36 = vld [vmem:[#allocation51_spill] sm:$0xff] }
 0x1c7   : > { %4219 = vmatmul.msk.f32.gmra.mxu0 %vm440_vm1, %v8484_v41 }
 0x1c9   : > { %v1201_v31 = vpop.f32.mrf.mxu3  ;;  %4154 = vmatmul.msk.f32.gmra.mxu2 %vm440_vm1, %v4370_v13 }
 0x1ca   : > { %v1239_v47 = vadd.f32 %v1201_v31, %v1085_v40  ;;  %v792_v21 = vpop.f32.mrf.mxu1 }
 0x1cc   : > { %v5538_v15 = vadd.f32 %v1359_v59, %v1239_v47  ;;  %v1362_v16 = vpop.f32.mrf.mxu0  ;;  %v1583_v5 = vpop.f32.mrf.mxu2  ;;  %v793_v59 = vadd.f32 %v792_v21, %v8487_v51  ;;  %v4372_v47 = vld [vmem:[%s4457_s14 + $0x108] sm:$0xff] }
 0x1cd   : > { %4119 = vmatmul.msk.f32.gmra.mxu1 %vm440_vm1, %v8484_v41 }
 0x1ce   : > { %4186 = vmatmul.msk.f32.gmra.mxu3 %vm440_vm1, %v4570_v49  ;;  %v1087_v31 = vadd.f32 %v1053_v33, %v793_v59  ;;  %v4373_v33 = vld [vmem:[%s4457_s14 + $0x110] sm:$0xff] }
 0x1cf   : > { %4220 = vmatmul.msk.f32.gmra.mxu0 %vm440_vm1, %v8486_v36 }
 0x1d1   : > { %v1204_v18 = vpop.f32.mrf.mxu3  ;;  %4155 = vmatmul.msk.f32.gmra.mxu2 %vm440_vm1, %v4371_v53  ;;  %v8490_v53 = vld [vmem:[#allocation2_spill] sm:$0xff] }
 0x1d2   : > { %v1240_v17 = vadd.f32 %v1204_v18, %v1086_v43  ;;  %v1429_v39 = vpop.f32.mrf.mxu1 }
 0x1d3   : > { %v1525_v46 = vadd.f32 %v1429_v39, %v5150_v25  ;;  %v8488_v25 = vld [vmem:[#allocation53_spill] sm:$0xff] }
 0x1d4   : > { %v5553_v49 = vadd.f32 %v1362_v16, %v1240_v17  ;;  %v1365_v41 = vpop.f32.mrf.mxu0  ;;  %v1586_v40 = vpop.f32.mrf.mxu2 }
 0x1d5   : > { %v1679_v7 = vadd.f32 %v1583_v5, %v1525_v46  ;;  %4120 = vmatmul.msk.f32.gmra.mxu1 %vm440_vm1, %v8486_v36 }
 0x1d6   : > { %4187 = vmatmul.msk.f32.gmra.mxu3 %vm440_vm1, %v4622_v4 }
 0x1d7   : > { %4221 = vmatmul.msk.f32.gmra.mxu0 %vm440_vm1, %v8488_v25 }
 0x1d9   : > { %v1207_v13 = vpop.f32.mrf.mxu3  ;;  %4156 = vmatmul.msk.f32.gmra.mxu2 %vm440_vm1, %v4372_v47 }
 0x1da   : > { %v1241_v21 = vadd.f32 %v1207_v13, %v1087_v31  ;;  %v1432_v32 = vpop.f32.mrf.mxu1 }
 0x1db   : > { %v1526_v28 = vadd.f32 %v1432_v32, %v5165_v34 }
 0x1dc   : > { %v5564_v16 = vadd.f32 %v1365_v41, %v1241_v21  ;;  %v1898_v5 = vpop.f32.mrf.mxu0  ;;  %v1589_v36 = vpop.f32.mrf.mxu2  ;;  %v4374_v41 = vld [vmem:[%s4457_s14 + $0x120] sm:$0xff]  ;;  %v8493_v21 = vld [vmem:[#allocation55_spill] sm:$0xff] }
 0x1dd   : > { %v1680_v43 = vadd.f32 %v1586_v40, %v1526_v28  ;;  %4121 = vmatmul.msk.f32.gmra.mxu1 %vm440_vm1, %v8488_v25  ;;  %v4375_v28 = vld [vmem:[%s4457_s14 + $0x128] sm:$0xff] }
 0x1de   : > { %8489 = vst [vmem:[#allocation25_spill] sm:$0xff] %v5564_v16  ;;  %4188 = vmatmul.msk.f32.gmra.mxu3 %vm440_vm1, %v4666_v45  ;;  %v8491_v45 = vld [vmem:[#allocation54_spill] sm:$0xff] }
 0x1df   : > { %4222 = vmatmul.msk.f32.gmra.mxu0 %vm440_vm1, %v5157_v61 }
 0x1e1   : > { %v1741_v4 = vpop.f32.mrf.mxu3  ;;  %4157 = vmatmul.msk.f32.gmra.mxu2 %vm440_vm1, %v4373_v33 }
 0x1e2   : > { %v1837_v34 = vadd.f32 %v1741_v4, %v1679_v7  ;;  %v1435_v18 = vpop.f32.mrf.mxu1 }
 0x1e3   : > { %v1527_v17 = vadd.f32 %v1435_v18, %v8490_v53  ;;  %v8495_v53 = vld [vmem:[#allocation22_spill] sm:$0xff] }
 0x1e4   : > { %v5575_v39 = vadd.f32 %v1898_v5, %v1837_v34  ;;  %v1901_v46 = vpop.f32.mrf.mxu0  ;;  %v1592_v44 = vpop.f32.mrf.mxu2 }
 0x1e5   : > { %v1681_v51 = vadd.f32 %v1589_v36, %v1527_v17  ;;  %4122 = vmatmul.msk.f32.gmra.mxu1 %vm440_vm1, %v5157_v61  ;;  %v8494_v36 = vld [vmem:[#allocation3_spill] sm:$0xff] }
 0x1e6   : > { %4189 = vmatmul.msk.f32.gmra.mxu3 %vm440_vm1, %v8426_v52  ;;  %v8492_v52 = vld [vmem:[#allocation26_spill] sm:$0xff] }
 0x1e7   : > { %4223 = vmatmul.msk.f32.gmra.mxu0 %vm440_vm1, %v8491_v45 }
 0x1e9   : > { %v1744_v59 = vpop.f32.mrf.mxu3  ;;  %4158 = vmatmul.msk.f32.gmra.mxu2 %vm440_vm1, %v4374_v41 }
 0x1ea   : > { %v1838_v40 = vadd.f32 %v1744_v59, %v1680_v43  ;;  %v1438_v7 = vpop.f32.mrf.mxu1 }
 0x1eb   : > { %v1528_v25 = vadd.f32 %v1438_v7, %v5196_v14 }
 0x1ec   : > { %v5586_v31 = vadd.f32 %v1901_v46, %v1838_v40  ;;  %v1904_v13 = vpop.f32.mrf.mxu0  ;;  %v1595_v47 = vpop.f32.mrf.mxu2  ;;  %v4376_v46 = vld [vmem:[%s4457_s14 + $0x138] sm:$0xff] }
 0x1ed   : > { %v1682_v61 = vadd.f32 %v1592_v44, %v1528_v25  ;;  %4123 = vmatmul.msk.f32.gmra.mxu1 %vm440_vm1, %v8491_v45  ;;  %v8496_v45 = vld [vmem:[#allocation6_spill] sm:$0xff] }
 0x1ee   : > { %4190 = vmatmul.msk.f32.gmra.mxu3 %vm440_vm1, %v8492_v52 }
 0x1ef   : > { %4224 = vmatmul.msk.f32.gmra.mxu0 %vm440_vm1, %v8493_v21 }
 0x1f1   : > { %v1747_v32 = vpop.f32.mrf.mxu3  ;;  %4159 = vmatmul.msk.f32.gmra.mxu2 %vm440_vm1, %v4375_v28 }
 0x1f2   : > { %v1839_v14 = vadd.f32 %v1747_v32, %v1681_v51  ;;  %v1441_v5 = vpop.f32.mrf.mxu1  ;;  %v8499_v32 = vld [vmem:[#allocation10_spill] sm:$0xff] }
 0x1f3   : > { %v1529_v43 = vadd.f32 %v1441_v5, %v8494_v36 }
 0x1f4   : > { %v5597_v4 = vadd.f32 %v1904_v13, %v1839_v14  ;;  %v1907_v33 = vpop.f32.mrf.mxu0  ;;  %v1598_v34 = vpop.f32.mrf.mxu2  ;;  %v8498_v13 = vld [vmem:[#allocation5_spill] sm:$0xff] }
 0x1f5   : > { %v1683_v18 = vadd.f32 %v1595_v47, %v1529_v43  ;;  %4124 = vmatmul.msk.f32.gmra.mxu1 %vm440_vm1, %v8493_v21 }
 0x1f6   : > { %4191 = vmatmul.msk.f32.gmra.mxu3 %vm440_vm1, %v8434_v50  ;;  %v8497_v50 = vld [vmem:[#allocation9_spill] sm:$0xff] }
 0x1f7   : > { %4225 = vmatmul.msk.f32.gmra.mxu0 %vm440_vm1, %v8495_v53 }
 0x1f9   : > { %v1750_v17 = vpop.f32.mrf.mxu3  ;;  %4160 = vmatmul.msk.f32.gmra.mxu2 %vm440_vm1, %v4376_v46 }
 0x1fa   : > { %v1840_v44 = vadd.f32 %v1750_v17, %v1682_v61  ;;  %v1444_v51 = vpop.f32.mrf.mxu1  ;;  %v4377_v61 = vld [vmem:[%s4457_s14 + $0x140] sm:$0xff] }
 0x1fb   : > { %v1530_v59 = vadd.f32 %v1444_v51, %v8496_v45 }
 0x1fc   : > { %v5608_v41 = vadd.f32 %v1907_v33, %v1840_v44  ;;  %v1910_v40 = vpop.f32.mrf.mxu0  ;;  %v1601_v7 = vpop.f32.mrf.mxu2  ;;  %v8500_v33 = vld [vmem:[#allocation12_spill] sm:$0xff]  ;;  %v8502_v44 = vld [vmem:[#allocation14_spill] sm:$0xff] }
 0x1fd   : > { %v1684_v25 = vadd.f32 %v1598_v34, %v1530_v59  ;;  %4125 = vmatmul.msk.f32.gmra.mxu1 %vm440_vm1, %v8495_v53  ;;  %v8501_v34 = vld [vmem:[#allocation7_spill] sm:$0xff] }
 0x1fe   : > { %4192 = vmatmul.msk.f32.gmra.mxu3 %vm440_vm1, %v8497_v50  ;;  %v8503_v50 = vld [vmem:[#allocation16_spill] sm:$0xff] }
 0x1ff   : > { %4226 = vmatmul.msk.f32.gmra.mxu0 %vm440_vm1, %v8498_v13 }
 0x201   : > { %v1753_v47 = vpop.f32.mrf.mxu3  ;;  %4161 = vmatmul.msk.f32.gmra.mxu2 %vm440_vm1, %v4377_v61 }
 0x202   : > { %v1841_v52 = vadd.f32 %v1753_v47, %v1683_v18  ;;  %v1447_v21 = vpop.f32.mrf.mxu1  ;;  %v4378_v18 = vld [vmem:[%s4457_s14 + $0x150] sm:$0xff] }
 0x203   : > { %v1531_v28 = vadd.f32 %v1447_v21, %v8499_v32 }
 0x204   : > { %v5619_v14 = vadd.f32 %v1910_v40, %v1841_v52  ;;  %v1913_v5 = vpop.f32.mrf.mxu0  ;;  %v1604_v36 = vpop.f32.mrf.mxu2 }
 0x205   : > { %v1685_v43 = vadd.f32 %v1601_v7, %v1531_v28  ;;  %4126 = vmatmul.msk.f32.gmra.mxu1 %vm440_vm1, %v8498_v13  ;;  %v8504_v13 = vld [vmem:[#allocation13_spill] sm:$0xff] }
 0x206   : > { %4193 = vmatmul.msk.f32.gmra.mxu3 %vm440_vm1, %v8500_v33  ;;  %v4380_v33 = vld [vmem:[%s4457_s14 + $0x168] sm:$0xff] }
 0x207   : > { %4227 = vmatmul.msk.f32.gmra.mxu0 %vm440_vm1, %v8501_v34 }
 0x209   : > { %v1756_v53 = vpop.f32.mrf.mxu3  ;;  %4162 = vmatmul.msk.f32.gmra.mxu2 %vm440_vm1, %v4378_v18  ;;  %v8506_v18 = vld [vmem:[#allocation20_spill] sm:$0xff] }
 0x20a   : > { %v1842_v17 = vadd.f32 %v1756_v53, %v1684_v25  ;;  %v1450_v46 = vpop.f32.mrf.mxu1  ;;  %v4379_v25 = vld [vmem:[%s4457_s14 + $0x158] sm:$0xff] }
 0x20b   : > { %v1532_v51 = vadd.f32 %v1450_v46, %v8502_v44 }
 0x20c   : > { %v5630_v45 = vadd.f32 %v1913_v5, %v1842_v17  ;;  %v1916_v59 = vpop.f32.mrf.mxu0  ;;  %v1607_v40 = vpop.f32.mrf.mxu2  ;;  %v8505_v5 = vld [vmem:[#allocation17_spill] sm:$0xff] }
 0x20d   : > { %v1686_v7 = vadd.f32 %v1604_v36, %v1532_v51  ;;  %4127 = vmatmul.msk.f32.gmra.mxu1 %vm440_vm1, %v8501_v34 }
 0x20e   : > { %4194 = vmatmul.msk.f32.gmra.mxu3 %vm440_vm1, %v8503_v50  ;;  %v4381_v50 = vld [vmem:[%s4457_s14 + $0x170] sm:$0xff] }
 0x20f   : > { %4228 = vmatmul.msk.f32.gmra.mxu0 %vm440_vm1, %v8504_v13 }
 0x211   : > { %v1759_v47 = vpop.f32.mrf.mxu3  ;;  %4163 = vmatmul.msk.f32.gmra.mxu2 %vm440_vm1, %v4379_v25 }
 0x212   : > { %v1843_v61 = vadd.f32 %v1759_v47, %v1685_v43  ;;  %v1453_v52 = vpop.f32.mrf.mxu1 }
 0x213   : > { %v1533_v17 = vadd.f32 %v1453_v52, %v8506_v18 }
 0x214   : > { %v5640_v21 = vadd.f32 %v1916_v59, %v1843_v61  ;;  %v1919_v32 = vpop.f32.mrf.mxu0  ;;  %v1610_v28 = vpop.f32.mrf.mxu2 }
 0x215   : > { %4128 = vmatmul.msk.f32.gmra.mxu1 %vm440_vm1, %v8504_v13 }
 0x216   : > { %4195 = vmatmul.msk.f32.gmra.mxu3 %vm440_vm1, %v8451_v11  ;;  %v1687_v11 = vadd.f32 %v1607_v40, %v1533_v17 }
 0x217   : > { %4229 = vmatmul.msk.f32.gmra.mxu0 %vm440_vm1, %v8505_v5 }
 0x219   : > { %v1762_v36 = vpop.f32.mrf.mxu3  ;;  %4164 = vmatmul.msk.f32.gmra.mxu2 %vm440_vm1, %v4380_v33 }
 0x21a   : > { %v1844_v43 = vadd.f32 %v1762_v36, %v1686_v7  ;;  %v1456_v34 = vpop.f32.mrf.mxu1 }
 0x21b   : > { %v1534_v53 = vadd.f32 %v1456_v34, %v5288_v20 }
 0x21c   : > { %v5652_v46 = vadd.f32 %v1919_v32, %v1844_v43  ;;  %v1922_v44 = vpop.f32.mrf.mxu0  ;;  %v1613_v51 = vpop.f32.mrf.mxu2 }
 0x21d   : > { %v1688_v59 = vadd.f32 %v1610_v28, %v1534_v53  ;;  %4129 = vmatmul.msk.f32.gmra.mxu1 %vm440_vm1, %v8505_v5 }
 0x21e   : > { %4196 = vmatmul.msk.f32.gmra.mxu3 %vm440_vm1, %v8454_v29  ;;  %v8507_v29 = vld [vmem:[#allocation21_spill] sm:$0xff] }
 0x21f   : > { %4230 = vmatmul.msk.f32.gmra.mxu0 %vm440_vm1, %v5280_v37 }
 0x221   : > { %v1765_v7 = vpop.f32.mrf.mxu3  ;;  %4165 = vmatmul.msk.f32.gmra.mxu2 %vm440_vm1, %v4381_v50 }
 0x222   : > { %v1845_v20 = vadd.f32 %v1765_v7, %v1687_v11  ;;  %v1459_v13 = vpop.f32.mrf.mxu1  ;;  %v1400_v11 = vrot.slane %v5343_v12, 2 }
 0x223   : > { %v1535_v47 = vadd.f32 %v1459_v13, %v5304_v57 }
 0x224   : > { %v5663_v25 = vadd.f32 %v1922_v44, %v1845_v20  ;;  %v1925_v61 = vpop.f32.mrf.mxu0  ;;  %v1616_v52 = vpop.f32.mrf.mxu2 }
 0x225   : > { %v1689_v32 = vadd.f32 %v1613_v51, %v1535_v47  ;;  %4130 = vmatmul.msk.f32.gmra.mxu1 %vm440_vm1, %v5280_v37 }
 0x226   : > { %4197 = vmatmul.msk.f32.gmra.mxu3 %vm440_vm1, %v8456_v54 }
 0x227   : > { %4231 = vmatmul.msk.f32.gmra.mxu0 %vm440_vm1, %v8507_v29 }
 0x229   : > { %v1768_v40 = vpop.f32.mrf.mxu3  ;;  %4166 = vmatmul.msk.f32.gmra.mxu2 %vm440_vm1, %v5343_v12  ;;  %v1403_v12 = vrot.slane %v5360_v2, 2 }
 0x22a   : > { %v1846_v28 = vadd.f32 %v1768_v40, %v1688_v59  ;;  %v1462_v57 = vpop.f32.mrf.mxu1  ;;  %v8508_v59 = vld [vmem:[#allocation19_spill] sm:$0xff] }
 0x22b   : > { %v1536_v5 = vadd.f32 %v1462_v57, %v5319_v3 }
 0x22c   : > { %v5674_v36 = vadd.f32 %v1925_v61, %v1846_v28  ;;  %v1928_v33 = vpop.f32.mrf.mxu0  ;;  %v1619_v43 = vpop.f32.mrf.mxu2 }
 0x22d   : > { %v1690_v37 = vadd.f32 %v1616_v52, %v1536_v5  ;;  %4131 = vmatmul.msk.f32.gmra.mxu1 %vm440_vm1, %v8507_v29 }
 0x22e   : > { %4198 = vmatmul.msk.f32.gmra.mxu3 %vm440_vm1, %v4815_v48  ;;  %v303_v48 = vld [vmem:[%s4457_s14 + $0x198] sm:$0xff] }
 0x22f   : > { %4232 = vmatmul.msk.f32.gmra.mxu0 %vm440_vm1, %v5311_v63 }
 0x231   : > { %v1771_v54 = vpop.f32.mrf.mxu3  ;;  %4167 = vmatmul.msk.f32.gmra.mxu2 %vm440_vm1, %v5338_v35 }
 0x232   : > { %v1847_v3 = vadd.f32 %v1771_v54, %v1689_v32  ;;  %v1465_v34 = vpop.f32.mrf.mxu1 }
 0x233   : > { %v1537_v53 = vadd.f32 %v1465_v34, %v5333_v23  ;;  %v1401_v23 = vrot.slane %v5338_v35, 2  ;;  %v304_v35 = vld [vmem:[%s4457_s14 + $0x1a0] sm:$0xff] }
 0x234   : > { %v5685_v18 = vadd.f32 %v1928_v33, %v1847_v3  ;;  %v1931_v17 = vpop.f32.mrf.mxu0  ;;  %v1622_v44 = vpop.f32.mrf.mxu2  ;;  %v1713_v2 = vrot.slane %v304_v35, 1  ;;  %v1870_v54 = vrot.slane %v304_v35, 2 }
 0x235   : > { %v1691_v51 = vadd.f32 %v1619_v43, %v1537_v53  ;;  %4132 = vmatmul.msk.f32.gmra.mxu1 %vm440_vm1, %v5311_v63  ;;  %v1402_v61 = vsel %vm795_vm2, %v1400_v11, %v1401_v23  ;;  %v1404_v33 = vsel %vm795_vm2, %v1401_v23, %v1403_v12  ;;  %v305_v11 = vld [vmem:[%s4457_s14 + $0x1a8] sm:$0x3] }
 0x236   : > { %4199 = vmatmul.msk.f32.gmra.mxu3 %vm440_vm1, %v4839_v30 }
 0x237   : > { %4233 = vmatmul.msk.f32.gmra.mxu0 %vm440_vm1, %v8508_v59 }
 0x239   : > { %v1774_v7 = vpop.f32.mrf.mxu3  ;;  %4168 = vmatmul.msk.f32.gmra.mxu2 %vm440_vm1, %v303_v48 }
 0x23a   : > { %v1848_v50 = vadd.f32 %v1774_v7, %v1690_v37  ;;  %v1468_v20 = vpop.f32.mrf.mxu1  ;;  %v1869_v37 = vrot.slane %v303_v48, 2  ;;  %v1872_v7 = vrot.slane %v305_v11, 2 }
 0x23b   : > { %v1538_v13 = vadd.f32 %v1468_v20, %v5352_v0 }
 0x23c   : > { %v5698_v63 = vadd.f32 %v1931_v17, %v1848_v50  ;;  %v1934_v47 = vpop.f32.mrf.mxu0  ;;  %v1625_v30 = vpop.f32.mrf.mxu2  ;;  %v1873_v12 = vsel %vm795_vm2, %v1870_v54, %v1872_v7 }
 0x23d   : > { %v1692_v52 = vadd.f32 %v1622_v44, %v1538_v13  ;;  %4133 = vmatmul.msk.f32.gmra.mxu1 %vm440_vm1, %v8508_v59 }
 0x23e   : > { %4200 = vmatmul.msk.f32.gmra.mxu3 %vm440_vm1, %v5355_v27  ;;  %v1712_v27 = vrot.slane %v303_v48, 1  ;;  %v1715_v48 = vrot.slane %v305_v11, 1 }
 0x23f   : > { %4234 = vmatmul.msk.f32.gmra.mxu0 %vm440_vm1, %v1402_v61 }
 0x240   : > { %v1714_v17 = vsel %vm356_vm0, %v1712_v27, %v1713_v2 }
 0x241   : > { %v1777_v32 = vpop.f32.mrf.mxu3  ;;  %4169 = vmatmul.msk.f32.gmra.mxu2 %vm440_vm1, %v304_v35 }
 0x242   : > { %v1849_v0 = vadd.f32 %v1777_v32, %v1691_v51  ;;  %v1471_v29 = vpop.f32.mrf.mxu1 }
 0x243   : > { %v1539_v40 = vadd.f32 %v1471_v29, %v5370_v22 }
 0x244   : > { %v5710_v28 = vadd.f32 %v1934_v47, %v1849_v0  ;;  %v1937_v57 = vpop.f32.mrf.mxu0  ;;  %v1628_v5 = vpop.f32.mrf.mxu2  ;;  %v1716_v47 = vsel %vm356_vm0, %v1713_v2, %v1715_v48 }
 0x245   : > { %v1693_v43 = vadd.f32 %v1625_v30, %v1539_v40  ;;  %4134 = vmatmul.msk.f32.gmra.mxu1 %vm440_vm1, %v1402_v61  ;;  %v2232_v30 = vld [vmem:[%s8233_s3] sm:$0xff] }
 0x246   : > { %4201 = vmatmul.msk.f32.gmra.mxu3 %vm440_vm1, %v5373_v62  ;;  %v1871_v62 = vsel %vm795_vm2, %v1869_v37, %v1870_v54  ;;  %2275 = vmatpush.msrb.mxu2 %v2232_v30 }
 0x247   : > { %4235 = vmatmul.msk.f32.gmra.mxu0 %vm440_vm1, %v1404_v33  ;;  %2252 = vmatpush.msrb.mxu1 %v2232_v30 }
 0x249   : > { %v1780_v22 = vpop.f32.mrf.mxu3 }
 0x24a   : > { %v1850_v3 = vadd.f32 %v1780_v22, %v1692_v52  ;;  %v1474_v34 = vpop.f32.mrf.mxu1 }
 0x24b   : > { %v1540_v53 = vadd.f32 %v1474_v34, %v5384_v38 }
 0x24c   : > { %v5719_v44 = vadd.f32 %v1937_v57, %v1850_v3  ;;  %v1940_v51 = vpop.f32.mrf.mxu0  ;;  %v1631_v59 = vpop.f32.mrf.mxu2 }
 0x24d   : > { %v1694_v23 = vadd.f32 %v1628_v5, %v1540_v53  ;;  %4135 = vmatmul.msk.f32.gmra.mxu1 %vm440_vm1, %v1404_v33 }
 0x24e   : > { %4202 = vmatmul.msk.f32.gmra.mxu3 %vm440_vm1, %v1714_v17 }
 0x24f   : > { %4236 = vmatmul.msk.f32.gmra.mxu0 %vm440_vm1, %v1871_v62 }
 0x251   : > { %v1783_v50 = vpop.f32.mrf.mxu3 }
 0x252   : > { %v1851_v38 = vadd.f32 %v1783_v50, %v1693_v43  ;;  %v1477_v20 = vpop.f32.mrf.mxu1 }
 0x253   : > { %v1541_v13 = vadd.f32 %v1477_v20, %v5395_v24 }
 0x254   : > { %v5731_v61 = vadd.f32 %v1940_v51, %v1851_v38  ;;  %v1943_v52 = vpop.f32.mrf.mxu0  ;;  %v1634_v35 = vpop.f32.mrf.mxu2 }
 0x255   : > { %v1695_v32 = vadd.f32 %v1631_v59, %v1541_v13 }
 0x256   : > { %4203 = vmatmul.msk.f32.gmra.mxu3 %vm440_vm1, %v1716_v47 }
 0x257   : > { %4237 = vmatmul.msk.f32.gmra.mxu0 %vm440_vm1, %v1873_v12 }
 0x259   : > { %v1786_v24 = vpop.f32.mrf.mxu3 }
 0x25a   : > { %v1852_v0 = vadd.f32 %v1786_v24, %v1694_v23  ;;  %v1480_v29 = vpop.f32.mrf.mxu1 }
 0x25b   : > { %v1542_v40 = vadd.f32 %v1480_v29, %v5406_v42 }
 0x25c   : > { %v5737_v57 = vadd.f32 %v1943_v52, %v1852_v0  ;;  %v1946_v5 = vpop.f32.mrf.mxu0  ;;  %v1637_v33 = vpop.f32.mrf.mxu2 }
 0x25d   : > { %v1696_v43 = vadd.f32 %v1634_v35, %v1542_v40 }
 0x261   : > { %v1789_v27 = vpop.f32.mrf.mxu3 }
 0x262   : > { %v1853_v2 = vadd.f32 %v1789_v27, %v1695_v32  ;;  %v1483_v37 = vpop.f32.mrf.mxu1 }
 0x263   : > { %v1543_v54 = vadd.f32 %v1483_v37, %v5417_v1 }
 0x264   : > { %v5740_v22 = vadd.f32 %v1946_v5, %v1853_v2  ;;  %v1949_v3 = vpop.f32.mrf.mxu0  ;;  %v1640_v34 = vpop.f32.mrf.mxu2 }
 0x265   : > { %v1697_v53 = vadd.f32 %v1637_v33, %v1543_v54 }
 0x269   : > { %v1792_v17 = vpop.f32.mrf.mxu3 }
 0x26a   : > { %v1854_v51 = vadd.f32 %v1792_v17, %v1696_v43  ;;  %v1486_v59 = vpop.f32.mrf.mxu1 }
 0x26b   : > { %v1544_v42 = vadd.f32 %v1486_v59, %v5428_v26 }
 0x26c   : > { %v5743_v11 = vadd.f32 %v1949_v3, %v1854_v51  ;;  %v1952_v62 = vpop.f32.mrf.mxu0  ;;  %v1643_v23 = vpop.f32.mrf.mxu2  ;;  %v5777_v3 = vld [vmem:[%s8232_s2] ss:$0 sm:$0xff] }
 0x26d   : > { %v1698_v48 = vadd.f32 %v1640_v34, %v1544_v42  ;;  %v5785_v17 = vadd.f32 %v5777_v3, %v5586_v31  ;;  %v5789_v51 = vadd.f32 %v5777_v3, %v5575_v39  ;;  %v5793_v59 = vadd.f32 %v5777_v3, %v5597_v4 }
 0x26f   : > { %8509 = vst [vmem:[#allocation24_spill] sm:$0xff] %v5785_v17  ;;  %v2132_v42 = vmul.f32 %v5785_v17, %v5785_v17  ;;  %v2131_v31 = vmul.f32 %v5789_v51, %v5789_v51  ;;  %v2063_v4 = vsel %vm440_vm1, %v5785_v17, 0.0 }
 0x270   : > { %8510 = vst [vmem:[#allocation29_spill] sm:$0xff] %v5789_v51 }
 0x271   : > { %v1795_v7 = vpop.f32.mrf.mxu3  ;;  %8511 = vst [vmem:[#allocation28_spill] sm:$0xff] %v5793_v59 }
 0x272   : > { %v1855_v50 = vadd.f32 %v1795_v7, %v1697_v53  ;;  %v1489_v38 = vpop.f32.mrf.mxu1  ;;  %v2133_v7 = vmul.f32 %v5793_v59, %v5793_v59 }
 0x273   : > { %v1545_v1 = vadd.f32 %v1489_v38, %v5439_v55 }
 0x274   : > { %v5746_v20 = vadd.f32 %v1952_v62, %v1855_v50  ;;  %v1955_v13 = vpop.f32.mrf.mxu0  ;;  %v5748_v47 = vpop.f32.mrf.mxu2  ;;  %v5799_v62 = vadd.f32 %v5777_v3, %v5608_v41  ;;  %v5815_v50 = vadd.f32 %v5777_v3, %v5619_v14  ;;  %v2062_v41 = vsel %vm440_vm1, %v5789_v51, 0.0 }
 0x275   : > { %v1699_v30 = vadd.f32 %v1643_v23, %v1545_v1  ;;  %v2164_v1 = vsel %vm440_vm1, %v2132_v42, 0.0  ;;  %v2163_v14 = vsel %vm440_vm1, %v2131_v31, 0.0  ;;  %v5838_v42 = vadd.f32 %v5777_v3, %v5640_v21 }
 0x276   : > { %8512 = vst [vmem:[#allocation30_spill] sm:$0xff] %v5799_v62  ;;  %v2069_v31 = vsel %vm440_vm1, %v5815_v50, 0.0 }
 0x277   : > { %8513 = vst [vmem:[#allocation31_spill] sm:$0xff] %v5815_v50 }
 0x278   : > { %8515 = vst [vmem:[#allocation4_spill] sm:$0xff] %v5838_v42 }
 0x279   : > { %v1798_v52 = vpop.f32.mrf.mxu3 }
 0x27a   : > { %v1856_v35 = vadd.f32 %v1798_v52, %v1698_v48  ;;  %v5750_v12 = vpop.f32.mrf.mxu1  ;;  %v5828_v52 = vadd.f32 %v5777_v3, %v5630_v45 }
 0x27c   : > { %v5752_v26 = vadd.f32 %v1955_v13, %v1856_v35  ;;  %v1958_v32 = vpop.f32.mrf.mxu0  ;;  %v5754_v24 = vpop.f32.mrf.mxu2  ;;  %v2065_v13 = vsel %vm440_vm1, %v5793_v59, 0.0  ;;  %8514 = vst [vmem:[#allocation43_spill] sm:$0xff] %v5828_v52  ;;  %v2064_v35 = vadd.f32 %v2063_v4, %v2062_v41  ;;  %v2165_v59 = vadd.f32 %v2164_v1, %v2163_v14 }
 0x27d   : > { %v2136_v4 = vmul.f32 %v5828_v52, %v5828_v52  ;;  %v5860_v14 = vadd.f32 %v5777_v3, %v5663_v25 }
 0x27e   : > { %v2066_v17 = vadd.f32 %v2065_v13, %v2064_v35  ;;  %v2071_v13 = vsel %vm440_vm1, %v5828_v52, 0.0 }
 0x27f   : > { %8516 = vst [vmem:[#allocation32_spill] sm:$0xff] %v5860_v14 }
 0x281   : > { %v1801_v0 = vpop.f32.mrf.mxu3 }
 0x282   : > { %v1857_v29 = vadd.f32 %v1801_v0, %v1699_v30  ;;  %v5756_v40 = vpop.f32.mrf.mxu1  ;;  %v2134_v30 = vmul.f32 %v5799_v62, %v5799_v62  ;;  %v2067_v0 = vsel %vm440_vm1, %v5799_v62, 0.0 }
 0x283   : > { %v2068_v51 = vadd.f32 %v2067_v0, %v2066_v17  ;;  %v2172_v17 = vsel %vm440_vm1, %v2136_v4, 0.0 }
 0x284   : > { %v5758_v55 = vadd.f32 %v1958_v32, %v1857_v29  ;;  %v5760_v5 = vpop.f32.mrf.mxu0  ;;  %v5762_v33 = vpop.f32.mrf.mxu2  ;;  %v2166_v32 = vsel %vm440_vm1, %v2133_v7, 0.0  ;;  %v2135_v29 = vmul.f32 %v5815_v50, %v5815_v50  ;;  %v2168_v45 = vsel %vm440_vm1, %v2134_v30, 0.0 }
 0x285   : > { %v5847_v7 = vadd.f32 %v5777_v3, %v5652_v46  ;;  %v2167_v62 = vadd.f32 %v2166_v32, %v2165_v59  ;;  %v2137_v30 = vmul.f32 %v5838_v42, %v5838_v42  ;;  %v2070_v50 = vadd.f32 %v2069_v31, %v2068_v51 }
 0x286   : > { %v2170_v1 = vsel %vm440_vm1, %v2135_v29, 0.0  ;;  %v2073_v32 = vsel %vm440_vm1, %v5838_v42, 0.0  ;;  %v5873_v29 = vadd.f32 %v5777_v3, %v5674_v36  ;;  %v2077_v36 = vsel %vm440_vm1, %v5860_v14, 0.0 }
 0x287   : > { %v2169_v35 = vadd.f32 %v2168_v45, %v2167_v62  ;;  %v2138_v0 = vmul.f32 %v5847_v7, %v5847_v7  ;;  %v2072_v52 = vadd.f32 %v2071_v13, %v2070_v50  ;;  %v2174_v16 = vsel %vm440_vm1, %v2137_v30, 0.0 }
 0x288   : > { %8517 = vst [vmem:[#allocation46_spill] sm:$0xff] %v5873_v29  ;;  %v2075_v51 = vsel %vm440_vm1, %v5847_v7, 0.0  ;;  %v2139_v62 = vmul.f32 %v5860_v14, %v5860_v14  ;;  %v5882_v45 = vadd.f32 %v5777_v3, %v5685_v18  ;;  %v2140_v50 = vmul.f32 %v5873_v29, %v5873_v29 }
 0x289   : > { %v5764_v43 = vpop.f32.mrf.mxu3  ;;  %v2171_v25 = vadd.f32 %v2170_v1, %v2169_v35  ;;  %v2074_v4 = vadd.f32 %v2073_v32, %v2072_v52  ;;  %v2176_v42 = vsel %vm440_vm1, %v2138_v0, 0.0  ;;  %v5891_v1 = vadd.f32 %v5777_v3, %v5698_v63 }
 0x28a   : > { %v5766_v27 = vpop.f32.mrf.mxu1  ;;  %8518 = vst [vmem:[#allocation8_spill] sm:$0xff] %v5882_v45  ;;  %v2178_v52 = vsel %vm440_vm1, %v2139_v62, 0.0  ;;  %v2141_v32 = vmul.f32 %v5882_v45, %v5882_v45  ;;  %v5904_v0 = vadd.f32 %v5777_v3, %v5710_v28 }
 0x28b   : > { %v2173_v31 = vadd.f32 %v2172_v17, %v2171_v25  ;;  %8519 = vst [vmem:[#allocation33_spill] sm:$0xff] %v5891_v1  ;;  %v2076_v35 = vadd.f32 %v2075_v51, %v2074_v4  ;;  %v2079_v17 = vsel %vm440_vm1, %v5873_v29, 0.0  ;;  %v2081_v51 = vsel %vm440_vm1, %v5882_v45, 0.0 }
 0x28c   : > { %v5768_v2 = vpop.f32.mrf.mxu0  ;;  %v5770_v37 = vpop.f32.mrf.mxu2  ;;  %8520 = vst [vmem:[#allocation34_spill] sm:$0xff] %v5904_v0  ;;  %v2142_v62 = vmul.f32 %v5891_v1, %v5891_v1 }
 0x28d   : > { %v2175_v30 = vadd.f32 %v2174_v16, %v2173_v31  ;;  %v2078_v25 = vadd.f32 %v2077_v36, %v2076_v35  ;;  %v2180_v16 = vsel %vm440_vm1, %v2140_v50, 0.0  ;;  %v5915_v31 = vadd.f32 %v5777_v3, %v5719_v44 }
 0x28e   : > { %v2083_v36 = vsel %vm440_vm1, %v5891_v1, 0.0  ;;  %v2143_v50 = vmul.f32 %v5904_v0, %v5904_v0  ;;  %v2184_v44 = vsel %vm440_vm1, %v2142_v62, 0.0 }
 0x28f   : > { %v2177_v63 = vadd.f32 %v2176_v42, %v2175_v30  ;;  %8521 = vst [vmem:[#allocation11_spill] sm:$0xff] %v5915_v31  ;;  %v2080_v29 = vadd.f32 %v2079_v17, %v2078_v25  ;;  %v2182_v42 = vsel %vm440_vm1, %v2141_v32, 0.0  ;;  %v5926_v30 = vadd.f32 %v5777_v3, %v5731_v61 }
 0x290   : > { %v2144_v17 = vmul.f32 %v5915_v31, %v5915_v31  ;;  %v5935_v32 = vadd.f32 %v5777_v3, %v5737_v57  ;;  %v2186_v61 = vsel %vm440_vm1, %v2143_v50, 0.0  ;;  %v1546_v50 = vadd.f32 %v5750_v12, %v5450_v56 }
 0x291   : > { %v5772_v54 = vpop.f32.mrf.mxu3  ;;  %v2179_v28 = vadd.f32 %v2178_v52, %v2177_v63  ;;  %8522 = vst [vmem:[#allocation35_spill] sm:$0xff] %v5926_v30  ;;  %v2082_v45 = vadd.f32 %v2081_v51, %v2080_v29  ;;  %v2085_v52 = vsel %vm440_vm1, %v5904_v0, 0.0  ;;  %v2087_v29 = vsel %vm440_vm1, %v5915_v31, 0.0 }
 0x292   : > { %v5779_v34 = vpop.f32.mrf.mxu1  ;;  %v5946_v51 = vadd.f32 %v5777_v3, %v5740_v22  ;;  %v1547_v56 = vadd.f32 %v5756_v40, %v5461_v6 }
 0x293   : > { %v2181_v35 = vadd.f32 %v2180_v16, %v2179_v28  ;;  %v2084_v1 = vadd.f32 %v2083_v36, %v2082_v45  ;;  %v2145_v16 = vmul.f32 %v5926_v30, %v5926_v30  ;;  %v2188_v45 = vsel %vm440_vm1, %v2144_v17, 0.0 }
 0x294   : > { %v5781_v53 = vpop.f32.mrf.mxu0  ;;  %v5803_v48 = vpop.f32.mrf.mxu2  ;;  %v2146_v36 = vmul.f32 %v5935_v32, %v5935_v32  ;;  %v1549_v6 = vadd.f32 %v5779_v34, %v5483_v58 }
 0x295   : > { %v2183_v25 = vadd.f32 %v2182_v42, %v2181_v35  ;;  %v2086_v28 = vadd.f32 %v2085_v52, %v2084_v1  ;;  %v2089_v42 = vsel %vm440_vm1, %v5926_v30, 0.0  ;;  %v2190_v31 = vsel %vm440_vm1, %v2145_v16, 0.0 }
 0x296   : > { %v2091_v1 = vsel %vm440_vm1, %v5935_v32, 0.0  ;;  %v5968_v30 = vadd.f32 %v5777_v3, %v5743_v11  ;;  %v2192_v12 = vsel %vm440_vm1, %v2146_v36, 0.0  ;;  %v5993_v36 = vadd.f32 %v5777_v3, %v5752_v26 }
 0x297   : > { %v2185_v57 = vadd.f32 %v2184_v44, %v2183_v25  ;;  %v2088_v22 = vadd.f32 %v2087_v29, %v2086_v28  ;;  %v2147_v44 = vmul.f32 %v5946_v51, %v5946_v51  ;;  %v1548_v29 = vadd.f32 %v5766_v27, %v5472_v19 }
 0x298   : > { %v5986_v19 = vadd.f32 %v5777_v3, %v5746_v20  ;;  %v1701_v27 = vadd.f32 %v5754_v24, %v1547_v56  ;;  %v2095_v20 = vsel %vm440_vm1, %v5968_v30, 0.0 }
 0x299   : > { %v5801_v23 = vpop.f32.mrf.mxu3  ;;  %v2187_v35 = vadd.f32 %v2186_v61, %v2185_v57  ;;  %v2090_v25 = vadd.f32 %v2089_v42, %v2088_v22  ;;  %v1700_v61 = vadd.f32 %v5748_v47, %v1546_v50  ;;  %v2194_v42 = vsel %vm440_vm1, %v2147_v44, 0.0 }
 0x29a   : > { %v5807_v39 = vpop.f32.mrf.mxu1  ;;  %v2148_v47 = vmul.f32 %v5968_v30, %v5968_v30  ;;  %v1859_v22 = vadd.f32 %v5772_v54, %v1701_v27 }
 0x29b   : > { %v2189_v17 = vadd.f32 %v2188_v45, %v2187_v35  ;;  %v2092_v28 = vadd.f32 %v2091_v1, %v2090_v25  ;;  %v2093_v45 = vsel %vm440_vm1, %v5946_v51, 0.0  ;;  %v1858_v11 = vadd.f32 %v5764_v43, %v1700_v61 }
 0x29c   : > { %v5819_v38 = vpop.f32.mrf.mxu0  ;;  %v5862_v46 = vpop.f32.mrf.mxu2  ;;  %v1702_v43 = vadd.f32 %v5762_v33, %v1548_v29  ;;  %v1550_v58 = vadd.f32 %v5807_v39, %v5494_v9  ;;  %v1703_v1 = vadd.f32 %v5770_v37, %v1549_v6  ;;  %v2196_v44 = vsel %vm440_vm1, %v2148_v47, 0.0 }
 0x29d   : > { %v2191_v57 = vadd.f32 %v2190_v31, %v2189_v17  ;;  %v2094_v50 = vadd.f32 %v2093_v45, %v2092_v28  ;;  %v2015_v24 = vadd.f32 %v5760_v5, %v1858_v11  ;;  %v2097_v33 = vsel %vm440_vm1, %v5986_v19, 0.0 }
 0x29e   : > { %v1860_v26 = vadd.f32 %v5801_v23, %v1702_v43  ;;  %v2149_v9 = vmul.f32 %v5986_v19, %v5986_v19  ;;  %v2150_v39 = vmul.f32 %v5993_v36, %v5993_v36  ;;  %v6015_v5 = vadd.f32 %v5777_v3, %v5758_v55 }
 0x29f   : > { %v2193_v40 = vadd.f32 %v2192_v12, %v2191_v57  ;;  %v1704_v37 = vadd.f32 %v5803_v48, %v1550_v58  ;;  %v2096_v56 = vadd.f32 %v2095_v20, %v2094_v50  ;;  %v2016_v12 = vadd.f32 %v5768_v2, %v1859_v22 }
 0x2a0   : > { %v2017_v29 = vadd.f32 %v5781_v53, %v1860_v26  ;;  %v2198_v48 = vsel %vm440_vm1, %v2149_v9, 0.0  ;;  %v2099_v2 = vsel %vm440_vm1, %v5993_v36, 0.0  ;;  %v2101_v27 = vsel %vm440_vm1, %v6015_v5, 0.0 }
 0x2a1   : > { %v5849_v41 = vpop.f32.mrf.mxu3  ;;  %v2195_v35 = vadd.f32 %v2194_v42, %v2193_v40  ;;  %v2098_v57 = vadd.f32 %v2097_v33, %v2096_v56 }
 0x2a2   : > { %v5851_v21 = vpop.f32.mrf.mxu1  ;;  %v1861_v23 = vadd.f32 %v5849_v41, %v1703_v1  ;;  %v6046_v6 = vadd.f32 %v5777_v3, %v2017_v29 }
 0x2a3   : > { %v1551_v54 = vadd.f32 %v5851_v21, %v5505_v8  ;;  %v2197_v8 = vadd.f32 %v2196_v44, %v2195_v35  ;;  %v6023_v21 = vadd.f32 %v5777_v3, %v2015_v24  ;;  %v2100_v47 = vadd.f32 %v2099_v2, %v2098_v57 }
 0x2a4   : > { %v5864_v59 = vpop.f32.mrf.mxu0  ;;  %v5917_v4 = vpop.f32.mrf.mxu2  ;;  %v2018_v53 = vadd.f32 %v5819_v38, %v1861_v23 }
 0x2a5   : > { %v1705_v41 = vadd.f32 %v5862_v46, %v1551_v54  ;;  %v2152_v11 = vmul.f32 %v6023_v21, %v6023_v21  ;;  %v2103_v58 = vsel %vm440_vm1, %v6023_v21, 0.0  ;;  %v2102_v24 = vadd.f32 %v2101_v27, %v2100_v47 }
 0x2a9   : > { %v5893_v13 = vpop.f32.mrf.mxu3 }
 0x2aa   : > { %v5895_v18 = vpop.f32.mrf.mxu1  ;;  %v1862_v55 = vadd.f32 %v5893_v13, %v1704_v37  ;;  %v6038_v13 = vadd.f32 %v5777_v3, %v2016_v12 }
 0x2ab   : > { %v1552_v61 = vadd.f32 %v5895_v18, %v5516_v60  ;;  %v2200_v60 = vsel %vm440_vm1, %v2150_v39, 0.0  ;;  %v2151_v18 = vmul.f32 %v6015_v5, %v6015_v5  ;;  %v2104_v39 = vadd.f32 %v2103_v58, %v2102_v24 }
 0x2ac   : > { %v5906_v14 = vpop.f32.mrf.mxu0  ;;  %v5964_v52 = vpop.f32.mrf.mxu2  ;;  %v2019_v40 = vadd.f32 %v5864_v59, %v1862_v55  ;;  %v2153_v59 = vmul.f32 %v6038_v13, %v6038_v13  ;;  %v2105_v44 = vsel %vm440_vm1, %v6038_v13, 0.0 }
 0x2ad   : > { %v1706_v42 = vadd.f32 %v5917_v4, %v1552_v61 }
 0x2ae   : > { %v6065_v1 = vadd.f32 %v5777_v3, %v2019_v40  ;;  %v2206_v23 = vsel %vm440_vm1, %v2153_v59, 0.0 }
 0x2b0   : > { %v2156_v61 = vmul.f32 %v6065_v1, %v6065_v1 }
 0x2b1   : > { %v5937_v63 = vpop.f32.mrf.mxu3 }
 0x2b2   : > { %v5948_v62 = vpop.f32.mrf.mxu1  ;;  %v1863_v46 = vadd.f32 %v5937_v63, %v1705_v41 }
 0x2b3   : > { %v1553_v28 = vadd.f32 %v5948_v62, %v5527_v10  ;;  %v2199_v62 = vadd.f32 %v2198_v48, %v2197_v8 }
 0x2b4   : > { %v5950_v0 = vpop.f32.mrf.mxu0  ;;  %v1670_v17 = vpop.f32.mrf.mxu2  ;;  %v2020_v35 = vadd.f32 %v5906_v14, %v1863_v46 }
 0x2b5   : > { %v1707_v4 = vadd.f32 %v5964_v52, %v1553_v28  ;;  %v2201_v63 = vadd.f32 %v2200_v60, %v2199_v62  ;;  %v2204_v52 = vsel %vm440_vm1, %v2152_v11, 0.0 }
 0x2b9   : > { %v1822_v16 = vpop.f32.mrf.mxu3 }
 0x2ba   : > { %v1516_v34 = vpop.f32.mrf.mxu1  ;;  %v1864_v43 = vadd.f32 %v1822_v16, %v1706_v42  ;;  %v2154_v16 = vmul.f32 %v6046_v6, %v6046_v6 }
 0x2bb   : > { %v1554_v10 = vadd.f32 %v1516_v34, %v5538_v15  ;;  %v2202_v15 = vsel %vm440_vm1, %v2151_v18, 0.0  ;;  %v6056_v34 = vadd.f32 %v5777_v3, %v2018_v53  ;;  %v2111_v18 = vsel %vm440_vm1, %v6065_v1, 0.0 }
 0x2bc   : > { %v5989_v31 = vpop.f32.mrf.mxu0  ;;  %v1673_v26 = vpop.f32.mrf.mxu2  ;;  %v2021_v33 = vadd.f32 %v5950_v0, %v1864_v43  ;;  %v2203_v54 = vadd.f32 %v2202_v15, %v2201_v63  ;;  %v2106_v0 = vadd.f32 %v2105_v44, %v2104_v39 }
 0x2bd   : > { %v1708_v22 = vadd.f32 %v1670_v17, %v1554_v10  ;;  %v2155_v37 = vmul.f32 %v6056_v34, %v6056_v34  ;;  %v2107_v17 = vsel %vm440_vm1, %v6046_v6, 0.0  ;;  %v2109_v29 = vsel %vm440_vm1, %v6056_v34, 0.0 }
 0x2be   : > { %v2205_v12 = vadd.f32 %v2204_v52, %v2203_v54  ;;  %v6086_v55 = vadd.f32 %v5777_v3, %v2021_v33  ;;  %v2108_v28 = vadd.f32 %v2107_v17, %v2106_v0 }
 0x2c0   : > { %v2207_v41 = vadd.f32 %v2206_v23, %v2205_v12  ;;  %v2110_v62 = vadd.f32 %v2109_v29, %v2108_v28  ;;  %v2158_v40 = vmul.f32 %v6086_v55, %v6086_v55 }
 0x2c1   : > { %v1825_v25 = vpop.f32.mrf.mxu3 }
 0x2c2   : > { %v1519_v38 = vpop.f32.mrf.mxu1  ;;  %v1865_v20 = vadd.f32 %v1825_v25, %v1707_v4  ;;  %v6077_v25 = vadd.f32 %v5777_v3, %v2020_v35  ;;  %v2112_v63 = vadd.f32 %v2111_v18, %v2110_v62  ;;  %v2216_v24 = vsel %vm440_vm1, %v2158_v40, 0.0 }
 0x2c3   : > { %v1555_v9 = vadd.f32 %v1519_v38, %v5553_v49  ;;  %v2208_v49 = vsel %vm440_vm1, %v2154_v16, 0.0  ;;  %v8523_v38 = vld [vmem:[#allocation25_spill] sm:$0xff] }
 0x2c4   : > { %v1985_v45 = vpop.f32.mrf.mxu0  ;;  %v2022_v56 = vadd.f32 %v5989_v31, %v1865_v20  ;;  %v2210_v31 = vsel %vm440_vm1, %v2155_v37, 0.0  ;;  %v2157_v53 = vmul.f32 %v6077_v25, %v6077_v25  ;;  %v2209_v10 = vadd.f32 %v2208_v49, %v2207_v41  ;;  %v1676_v15 = vpop.f32.mrf.mxu2 }
 0x2c5   : > { %v1709_v57 = vadd.f32 %v1673_v26, %v1555_v9  ;;  %v2113_v11 = vsel %vm440_vm1, %v6077_v25, 0.0 }
 0x2c6   : > { %v6094_v42 = vadd.f32 %v5777_v3, %v2022_v56  ;;  %v2211_v43 = vadd.f32 %v2210_v31, %v2209_v10  ;;  %v2214_v58 = vsel %vm440_vm1, %v2157_v53, 0.0  ;;  %v2114_v20 = vadd.f32 %v2113_v11, %v2112_v63 }
 0x2c8   : > { %v2159_v59 = vmul.f32 %v6094_v42, %v6094_v42  ;;  %v2117_v52 = vsel %vm440_vm1, %v6094_v42, 0.0 }
 0x2c9   : > { %v1828_v50 = vpop.f32.mrf.mxu3 }
 0x2ca   : > { %v1866_v14 = vadd.f32 %v1828_v50, %v1708_v22  ;;  %v1522_v2 = vpop.f32.mrf.mxu1  ;;  %v2115_v50 = vsel %vm440_vm1, %v6086_v55, 0.0  ;;  %v2218_v54 = vsel %vm440_vm1, %v2159_v59, 0.0 }
 0x2cb   : > { %v1556_v47 = vadd.f32 %v1522_v2, %v8523_v38  ;;  %v2116_v33 = vadd.f32 %v2115_v50, %v2114_v20 }
 0x2cc   : > { %v1988_v8 = vpop.f32.mrf.mxu0  ;;  %v2023_v48 = vadd.f32 %v1985_v45, %v1866_v14  ;;  %v2212_v45 = vsel %vm440_vm1, %v2156_v61, 0.0 }
 0x2cd   : > { %v2213_v22 = vadd.f32 %v2212_v45, %v2211_v43  ;;  %v1710_v26 = vadd.f32 %v1676_v15, %v1556_v47  ;;  %v2118_v56 = vadd.f32 %v2117_v52, %v2116_v33 }
 0x2ce   : > { %v6103_v27 = vadd.f32 %v5777_v3, %v2023_v48 }
 0x2cf   : > { %v2215_v44 = vadd.f32 %v2214_v58, %v2213_v22 }
 0x2d0   : > { %v2160_v16 = vmul.f32 %v6103_v27, %v6103_v27  ;;  %v2119_v39 = vsel %vm440_vm1, %v6103_v27, 0.0 }
 0x2d1   : > { %v1831_v60 = vpop.f32.mrf.mxu3  ;;  %v2217_v17 = vadd.f32 %v2216_v24, %v2215_v44 }
 0x2d2   : > { %v1867_v46 = vadd.f32 %v1831_v60, %v1709_v57  ;;  %v2220_v12 = vsel %vm440_vm1, %v2160_v16, 0.0 }
 0x2d3   : > { %v2219_v61 = vadd.f32 %v2218_v54, %v2217_v17  ;;  %v8525_v54 = vld [vmem:[#allocation24_spill] sm:$0xff]  ;;  %v8527_v17 = vld [vmem:[#allocation30_spill] sm:$0xff] }
 0x2d4   : > { %v2024_v4 = vadd.f32 %v1988_v8, %v1867_v46  ;;  %v1991_v14 = vpop.f32.mrf.mxu0  ;;  %v2120_v8 = vadd.f32 %v2119_v39, %v2118_v56 }
 0x2d5   : > { %v2221_v48 = vadd.f32 %v2220_v12, %v2219_v61  ;;  %v8531_v61 = vld [vmem:[#allocation43_spill] sm:$0xff] }
 0x2d6   : > { %v6111_v35 = vadd.f32 %v5777_v3, %v2024_v4 }
 0x2d8   : > { %v2161_v37 = vmul.f32 %v6111_v35, %v6111_v35  ;;  %v2121_v0 = vsel %vm440_vm1, %v6111_v35, 0.0 }
 0x2d9   : > { %v1834_v9 = vpop.f32.mrf.mxu3  ;;  %v2122_v41 = vadd.f32 %v2121_v0, %v2120_v8  ;;  %v8530_v0 = vld [vmem:[#allocation31_spill] sm:$0xff] }
 0x2da   : > { %v1868_v23 = vadd.f32 %v1834_v9, %v1710_v26  ;;  %v2222_v29 = vsel %vm440_vm1, %v2161_v37, 0.0  ;;  %v8524_v9 = vld [vmem:[#allocation29_spill] sm:$0xff]  ;;  %v8526_v37 = vld [vmem:[#allocation28_spill] sm:$0xff] }
 0x2db   : > { %v2223_v2 = vadd.f32 %v2222_v29, %v2221_v48  ;;  %v8532_v29 = vld [vmem:[#allocation4_spill] sm:$0xff] }
 0x2dc   : > { %v2025_v49 = vadd.f32 %v1991_v14, %v1868_v23 }
 0x2de   : > { %v6128_v57 = vadd.f32 %v5777_v3, %v2025_v49 }
 0x2e0   : > { %v2123_v28 = vsel %vm440_vm1, %v6128_v57, 0.0  ;;  %v2162_v31 = vmul.f32 %v6128_v57, %v6128_v57 }
 0x2e1   : > { %v2124_v60 = vadd.f32 %v2123_v28, %v2122_v41 }
 0x2e2   : > { %v2224_v18 = vsel %vm440_vm1, %v2162_v31, 0.0  ;;  %v8533_v31 = vld [vmem:[#allocation32_spill] sm:$0xff] }
 0x2e3   : > { %v2125_v53 = vrot.slane %v2124_v60, 4  ;;  %v2225_v46 = vadd.f32 %v2224_v18, %v2223_v2 }
 0x2e5   : > { %v2126_v10 = vadd.f32 %v2125_v53, %v2124_v60  ;;  %v2226_v62 = vrot.slane %v2225_v46, 4  ;;  %v8534_v60 = vld [vmem:[#allocation46_spill] sm:$0xff]  ;;  %v8535_v53 = vld [vmem:[#allocation8_spill] sm:$0xff] }
 0x2e7   : > { %v2127_v45 = vrot.slane %v2126_v10, 2  ;;  %v2227_v11 = vadd.f32 %v2226_v62, %v2225_v46 }
 0x2e9   : > { %v2128_v3 = vadd.f32 %v2127_v45, %v2126_v10  ;;  %v2228_v40 = vrot.slane %v2227_v11, 2  ;;  %v8536_v10 = vld [vmem:[#allocation33_spill] sm:$0xff]  ;;  %v8537_v45 = vld [vmem:[#allocation34_spill] sm:$0xff] }
 0x2eb   : > { %v2129_v38 = vrot.slane %v2128_v3, 1  ;;  %v2229_v47 = vadd.f32 %v2228_v40, %v2227_v11 }
 0x2ed   : > { %v2130_v4 = vadd.f32 %v2129_v38, %v2128_v3  ;;  %v2230_v43 = vrot.slane %v2229_v47, 1  ;;  %v8538_v3 = vld [vmem:[#allocation11_spill] sm:$0xff] }
 0x2ef   : > { %v2231_v63 = vadd.f32 %v2230_v43, %v2229_v47  ;;  %4238 = vmatmul.msk.f32.vlgmr.msrb.gmra.mxu1 %vm440_vm1, %v2130_v4 }
 0x2f1   : > { %4239 = vmatmul.msk.f32.vlgmr.msrb.gmra.mxu2 %vm440_vm1, %v2231_v63 }
 0x36c   : > { %v2254_v15 = vpop.f32.mrf.mxu1 }
 0x36d   : > { %v2280_v50 = vmul.f32 %v2254_v15, %v2254_v15  ;;  %v6137_v44 = vperm.slane %v2254_v15, 0 }
 0x36f   : > { %v2283_v14 = vsub.f32 %v8524_v9, %v6137_v44  ;;  %v2284_v39 = vsub.f32 %v8525_v54, %v6137_v44  ;;  %v2285_v23 = vsub.f32 %v8526_v37, %v6137_v44  ;;  %v2286_v56 = vsub.f32 %v8527_v17, %v6137_v44  ;;  %v6219_v37 = vld [vmem:[%s8235_s5] ss:$0 sm:$0xff] }
 0x370   : > { %v2287_v49 = vsub.f32 %v8530_v0, %v6137_v44  ;;  %v2288_v8 = vsub.f32 %v8531_v61, %v6137_v44  ;;  %v2289_v48 = vsub.f32 %v8532_v29, %v6137_v44  ;;  %v2290_v28 = vsub.f32 %v5847_v7, %v6137_v44  ;;  %v8539_v7 = vld [vmem:[#allocation35_spill] sm:$0xff] }
 0x371   : > { %v2291_v2 = vsub.f32 %v8533_v31, %v6137_v44  ;;  %v2292_v18 = vsub.f32 %v8534_v60, %v6137_v44  ;;  %v2293_v46 = vsub.f32 %v8535_v53, %v6137_v44  ;;  %v2294_v62 = vsub.f32 %v8536_v10, %v6137_v44 }
 0x372   : > { %v2295_v11 = vsub.f32 %v8537_v45, %v6137_v44  ;;  %v2296_v40 = vsub.f32 %v8538_v3, %v6137_v44  ;;  %v2297_v38 = vsub.f32 %v8539_v7, %v6137_v44  ;;  %v2298_v47 = vsub.f32 %v5935_v32, %v6137_v44 }
 0x373   : > { %v2299_v4 = vsub.f32 %v5946_v51, %v6137_v44  ;;  %v2300_v43 = vsub.f32 %v5968_v30, %v6137_v44  ;;  %v2301_v15 = vsub.f32 %v5986_v19, %v6137_v44  ;;  %v2305_v32 = vsub.f32 %v6038_v13, %v6137_v44 }
 0x374   : > { %v2277_v58 = vpop.f32.mrf.mxu2  ;;  %v2306_v51 = vsub.f32 %v6046_v6, %v6137_v44  ;;  %v2307_v30 = vsub.f32 %v6056_v34, %v6137_v44  ;;  %v2308_v19 = vsub.f32 %v6065_v1, %v6137_v44  ;;  %v2312_v13 = vsub.f32 %v6103_v27, %v6137_v44 }
 0x375   : > { %v2281_v59 = vsub.f32 %v2277_v58, %v2280_v50  ;;  %v2302_v58 = vsub.f32 %v5993_v36, %v6137_v44  ;;  %v2303_v50 = vsub.f32 %v6015_v5, %v6137_v44  ;;  %v2309_v36 = vsub.f32 %v6077_v25, %v6137_v44  ;;  %v6212_v25 = vld [vmem:[%s8234_s4] ss:$0 sm:$0xff] }
 0x376   : > { %v2310_v5 = vsub.f32 %v6086_v55, %v6137_v44  ;;  %v2313_v6 = vsub.f32 %v6111_v35, %v6137_v44  ;;  %v2314_v34 = vsub.f32 %v6128_v57, %v6137_v44 }
 0x377   : > { %v2315_v22 = vadd.f32 1e-05, %v2281_v59  ;;  %v2304_v59 = vsub.f32 %v6023_v21, %v6137_v44  ;;  %v2311_v21 = vsub.f32 %v6094_v42, %v6137_v44 }
 0x379   : > { %4293 = vrsqrt.f32 %v2315_v22  ;;  %vm2322_vm4 = vweird.f32 %v2315_v22 }
 0x37f   : > { %v4294_v20 = vpop.eup %4293 }
 0x380   : > { %v2317_v24 = vmul.f32 %v4294_v20, %v2315_v22  ;;  %vm2323_vm3 = vweird.f32 %v4294_v20 }
 0x381   : > { %vm6147_vm5 = vmor %vm2322_vm4, %vm2323_vm3 }
 0x382   : > { %v2318_v52 = vmul.f32 %v4294_v20, %v2317_v24 }
 0x384   : > { %v2319_v16 = vmul.f32 0.5, %v2318_v52 }
 0x386   : > { %v2320_v26 = vsub.f32 1.5, %v2319_v16 }
 0x388   : > { %v2321_v33 = vmul.f32 %v4294_v20, %v2320_v26 }
 0x38a   : > { %v2325_v41 = vsel %vm6147_vm5, %v4294_v20, %v2321_v33 }
 0x38b   : > { %v2326_v63 = vperm.slane %v2325_v41, 0 }
 0x38d   : > { %v2327_v22 = vmul.f32 %v2326_v63, %v2283_v14  ;;  %v2328_v1 = vmul.f32 %v2326_v63, %v2284_v39  ;;  %v2329_v55 = vmul.f32 %v2326_v63, %v2285_v23  ;;  %v2330_v20 = vmul.f32 %v2326_v63, %v2286_v56 }
 0x38e   : > { %v2331_v24 = vmul.f32 %v2326_v63, %v2287_v49  ;;  %v2332_v42 = vmul.f32 %v2326_v63, %v2288_v8  ;;  %v2333_v52 = vmul.f32 %v2326_v63, %v2289_v48  ;;  %v2334_v16 = vmul.f32 %v2326_v63, %v2290_v28 }
 0x38f   : > { %v2335_v27 = vmul.f32 %v2326_v63, %v2291_v2  ;;  %v2336_v26 = vmul.f32 %v2326_v63, %v2292_v18  ;;  %v2337_v33 = vmul.f32 %v2326_v63, %v2293_v46  ;;  %v2338_v35 = vmul.f32 %v2326_v63, %v2294_v62 }
 0x390   : > { %v2339_v9 = vmul.f32 %v2326_v63, %v2295_v11  ;;  %v2340_v54 = vmul.f32 %v2326_v63, %v2296_v40  ;;  %v2341_v57 = vmul.f32 %v2326_v63, %v2297_v38  ;;  %v2342_v44 = vmul.f32 %v2326_v63, %v2298_v47 }
 0x391   : > { %v2363_v14 = vmul.f32 %v6212_v25, %v2327_v22  ;;  %v2364_v39 = vmul.f32 %v6212_v25, %v2328_v1  ;;  %v2343_v23 = vmul.f32 %v2326_v63, %v2299_v4  ;;  %v2344_v17 = vmul.f32 %v2326_v63, %v2300_v43 }
 0x392   : > { %v2345_v56 = vmul.f32 %v2326_v63, %v2301_v15  ;;  %v2365_v12 = vmul.f32 %v6212_v25, %v2329_v55  ;;  %v2346_v0 = vmul.f32 %v2326_v63, %v2302_v58  ;;  %v2347_v49 = vmul.f32 %v2326_v63, %v2303_v50 }
 0x393   : > { %v2348_v61 = vmul.f32 %v2326_v63, %v2304_v59  ;;  %v2349_v8 = vmul.f32 %v2326_v63, %v2305_v32  ;;  %v2350_v29 = vmul.f32 %v2326_v63, %v2306_v51  ;;  %v2351_v48 = vmul.f32 %v2326_v63, %v2307_v30 }
 0x394   : > { %v2352_v41 = vmul.f32 %v2326_v63, %v2308_v19  ;;  %v2366_v28 = vmul.f32 %v6212_v25, %v2330_v20  ;;  %v2353_v31 = vmul.f32 %v2326_v63, %v2309_v36  ;;  %v2354_v2 = vmul.f32 %v2326_v63, %v2310_v5 }
 0x395   : > { %v6224_v60 = vadd.f32 %v6219_v37, %v2363_v14  ;;  %v6227_v18 = vadd.f32 %v6219_v37, %v2364_v39  ;;  %v2355_v53 = vmul.f32 %v2326_v63, %v2311_v21  ;;  %v2356_v46 = vmul.f32 %v2326_v63, %v2312_v13 }
 0x396   : > { %v2357_v10 = vmul.f32 %v2326_v63, %v2313_v6  ;;  %v6230_v62 = vadd.f32 %v6219_v37, %v2365_v12  ;;  %v2358_v45 = vmul.f32 %v2326_v63, %v2314_v34  ;;  %v2367_v11 = vmul.f32 %v6212_v25, %v2331_v24 }
 0x397   : > { %v2368_v3 = vmul.f32 %v6212_v25, %v2332_v42  ;;  %v2369_v40 = vmul.f32 %v6212_v25, %v2333_v52  ;;  %v2370_v7 = vmul.f32 %v6212_v25, %v2334_v16  ;;  %v2371_v38 = vmul.f32 %v6212_v25, %v2335_v27 }
 0x398   : > { %v2372_v47 = vmul.f32 %v6212_v25, %v2336_v26  ;;  %v6239_v4 = vadd.f32 %v6219_v37, %v2366_v28  ;;  %v2373_v43 = vmul.f32 %v6212_v25, %v2337_v33  ;;  %v2374_v15 = vmul.f32 %v6212_v25, %v2338_v35 }
 0x399   : > { %v6244_v63 = vmul.f32 0.70710677, %v6224_v60  ;;  %v6247_v58 = vmul.f32 0.70710677, %v6227_v18  ;;  %v2375_v50 = vmul.f32 %v6212_v25, %v2339_v9  ;;  %v2376_v59 = vmul.f32 %v6212_v25, %v2340_v54 }
 0x39a   : > { %v2377_v32 = vmul.f32 %v6212_v25, %v2341_v57  ;;  %v6253_v51 = vmul.f32 0.70710677, %v6230_v62  ;;  %v2378_v30 = vmul.f32 %v6212_v25, %v2342_v44  ;;  %v2379_v19 = vmul.f32 %v6212_v25, %v2343_v23 }
 0x39b   : > { %v2380_v36 = vmul.f32 %v6212_v25, %v2344_v17  ;;  %v2381_v5 = vmul.f32 %v6212_v25, %v2345_v56  ;;  %v2382_v21 = vmul.f32 %v6212_v25, %v2346_v0  ;;  %v2383_v13 = vmul.f32 %v6212_v25, %v2347_v49 }
 0x39c   : > { %v2384_v6 = vmul.f32 %v6212_v25, %v2348_v61  ;;  %v6263_v34 = vmul.f32 0.70710677, %v6239_v4  ;;  %v2385_v22 = vmul.f32 %v6212_v25, %v2349_v8  ;;  %v2386_v1 = vmul.f32 %v6212_v25, %v2350_v29 }
 0x39d   : > { %v2495_v55 = vmul.f32 %v6244_v63, %v6244_v63  ;;  %v2535_v20 = vmul.f32 %v6247_v58, %v6247_v58  ;;  %v2387_v24 = vmul.f32 %v6212_v25, %v2351_v48  ;;  %v2388_v42 = vmul.f32 %v6212_v25, %v2352_v41 }
 0x39e   : > { %v2389_v52 = vmul.f32 %v6212_v25, %v2353_v31  ;;  %v2575_v16 = vmul.f32 %v6253_v51, %v6253_v51  ;;  %v6277_v27 = vmul.f32 %v6212_v25, %v2354_v2  ;;  %v6280_v26 = vmul.f32 %v6212_v25, %v2355_v53 }
 0x39f   : > { %v6283_v33 = vmul.f32 %v6212_v25, %v2356_v46  ;;  %v6286_v35 = vmul.f32 %v6212_v25, %v2357_v10  ;;  %v6289_v9 = vmul.f32 %v6212_v25, %v2358_v45  ;;  %v6292_v54 = vadd.f32 %v6219_v37, %v2367_v11 }
 0x3a0   : > { %v6295_v57 = vadd.f32 %v6219_v37, %v2368_v3  ;;  %v2615_v44 = vmul.f32 %v6263_v34, %v6263_v34  ;;  %v6300_v14 = vadd.f32 %v6219_v37, %v2369_v40  ;;  %v6303_v39 = vadd.f32 %v6219_v37, %v2370_v7 }
 0x3a1   : > { %v6305_v23 = vmin.f32 %v2495_v55, 16.0  ;;  %v6307_v17 = vmin.f32 %v2535_v20, 16.0  ;;  %v6310_v25 = vadd.f32 %v6219_v37, %v2371_v38  ;;  %v6313_v56 = vadd.f32 %v6219_v37, %v2372_v47 }
 0x3a2   : > { %v6316_v12 = vadd.f32 %v6219_v37, %v2373_v43  ;;  %v6318_v0 = vmin.f32 %v2575_v16, 16.0  ;;  %v6321_v49 = vadd.f32 %v6219_v37, %v2374_v15  ;;  %v6324_v61 = vadd.f32 %v6219_v37, %v2375_v50 }
 0x3a3   : > { %v6327_v8 = vadd.f32 %v6219_v37, %v2376_v59  ;;  %v2508_v29 = vmul.f32 3.8918573e-05, %v6305_v23  ;;  %v6331_v48 = vadd.f32 %v6219_v37, %v2377_v32  ;;  %v2548_v41 = vmul.f32 3.8918573e-05, %v6307_v17 }
 0x3a4   : > { %v2588_v28 = vmul.f32 3.8918573e-05, %v6318_v0  ;;  %v6335_v31 = vmin.f32 %v2615_v44, 16.0  ;;  %v6338_v2 = vadd.f32 %v6219_v37, %v2378_v30  ;;  %v6341_v53 = vadd.f32 %v6219_v37, %v2379_v19 }
 0x3a5   : > { %v6344_v46 = vadd.f32 %v6219_v37, %v2380_v36  ;;  %v2509_v10 = vadd.f32 0.001143296, %v2508_v29  ;;  %v6347_v45 = vadd.f32 %v6219_v37, %v2381_v5  ;;  %v2497_v11 = vmul.f32 2.1237322e-06, %v6305_v23 }
 0x3a6   : > { %v2549_v3 = vadd.f32 0.001143296, %v2548_v41  ;;  %v2589_v40 = vadd.f32 0.001143296, %v2588_v28  ;;  %v6351_v7 = vadd.f32 %v6219_v37, %v2382_v21  ;;  %v6354_v38 = vadd.f32 %v6219_v37, %v2383_v13 }
 0x3a7   : > { %v2510_v47 = vmul.f32 %v2509_v10, %v6305_v23  ;;  %v2537_v43 = vmul.f32 2.1237322e-06, %v6307_v17  ;;  %v6359_v15 = vadd.f32 %v6219_v37, %v2384_v6  ;;  %v6362_v50 = vadd.f32 %v6219_v37, %v2385_v22 }
 0x3a8   : > { %v2550_v59 = vmul.f32 %v2549_v3, %v6307_v17  ;;  %v2628_v32 = vmul.f32 3.8918573e-05, %v6335_v31  ;;  %v6367_v30 = vadd.f32 %v6219_v37, %v2386_v1  ;;  %v6370_v19 = vadd.f32 %v6219_v37, %v2387_v24 }
 0x3a9   : > { %8540 = vst [vmem:[#allocation36_spill] sm:$0xff] %v6362_v50  ;;  %v2577_v36 = vmul.f32 2.1237322e-06, %v6318_v0  ;;  %v2590_v5 = vmul.f32 %v2589_v40, %v6318_v0  ;;  %v6375_v21 = vadd.f32 %v6219_v37, %v2388_v42  ;;  %v6378_v13 = vadd.f32 %v6219_v37, %v2389_v52 }
 0x3aa   : > { %8541 = vst [vmem:[#allocation15_spill] sm:$0xff] %v6367_v30  ;;  %v6381_v6 = vmul.f32 0.5, %v6224_v60  ;;  %v2498_v22 = vadd.f32 0.00028619796, %v2497_v11  ;;  %v6384_v1 = vmul.f32 0.5, %v6227_v18  ;;  %v6387_v55 = vmul.f32 0.5, %v6230_v62 }
 0x3ab   : > { %8542 = vst [vmem:[#allocation37_spill] sm:$0xff] %v6370_v19  ;;  %v2511_v20 = vadd.f32 0.014752088, %v2510_v47  ;;  %v2538_v24 = vadd.f32 0.00028619796, %v2537_v43  ;;  %v6390_v16 = vmul.f32 0.5, %v6239_v4 }
 0x3ac   : > { %8543 = vst [vmem:[#allocation38_spill] sm:$0xff] %v6375_v21  ;;  %v6393_v42 = vmul.f32 0.5, %v6292_v54  ;;  %v2551_v52 = vadd.f32 0.014752088, %v2550_v59  ;;  %v2629_v44 = vadd.f32 0.001143296, %v2628_v32  ;;  %v2499_v10 = vmul.f32 %v2498_v22, %v6305_v23 }
 0x3ad   : > { %8544 = vst [vmem:[#allocation18_spill] sm:$0xff] %v6378_v13  ;;  %v6396_v60 = vmul.f32 0.5, %v6295_v57  ;;  %v6399_v29 = vmul.f32 0.5, %v6300_v14  ;;  %v2578_v18 = vadd.f32 0.00028619796, %v2577_v36  ;;  %v6402_v62 = vmul.f32 0.5, %v6303_v39 }
 0x3ae   : > { %8545 = vst [vmem:[#allocation39_spill] sm:$0xff] %v6381_v6  ;;  %v2591_v41 = vadd.f32 0.014752088, %v2590_v5  ;;  %v6405_v28 = vmul.f32 0.5, %v6310_v25  ;;  %v6408_v4 = vmul.f32 0.5, %v6313_v56  ;;  %v6412_v11 = vmul.f32 0.5, %v6316_v12 }
 0x3af   : > { %8546 = vst [vmem:[#allocation40_spill] sm:$0xff] %v6384_v1  ;;  %v6415_v3 = vmul.f32 0.5, %v6321_v49  ;;  %v2512_v40 = vmul.f32 %v2511_v20, %v6305_v23  ;;  %v2539_v47 = vmul.f32 %v2538_v24, %v6307_v17  ;;  %v6420_v43 = vmul.f32 0.5, %v6324_v61 }
 0x3b0   : > { %8547 = vst [vmem:[#allocation23_spill] sm:$0xff] %v6387_v55  ;;  %v6423_v59 = vmul.f32 0.5, %v6327_v8  ;;  %v2552_v32 = vmul.f32 %v2551_v52, %v6307_v17  ;;  %v2630_v36 = vmul.f32 %v2629_v44, %v6335_v31  ;;  %v6428_v5 = vmul.f32 0.5, %v6331_v48 }
 0x3b1   : > { %8548 = vst [vmem:[#allocation41_spill] sm:$0xff] %v6390_v16  ;;  %v6431_v22 = vmul.f32 0.70710677, %v6292_v54  ;;  %v2579_v20 = vmul.f32 %v2578_v18, %v6318_v0  ;;  %v2592_v24 = vmul.f32 %v2591_v41, %v6318_v0  ;;  %v6442_v52 = vmul.f32 0.5, %v6344_v46 }
 0x3b2   : > { %8549 = vst [vmem:[#allocation42_spill] sm:$0xff] %v6393_v42  ;;  %v2500_v44 = vadd.f32 0.0036580483, %v2499_v10  ;;  %v6448_v54 = vmul.f32 0.5, %v6351_v7  ;;  %v2540_v18 = vadd.f32 0.0036580483, %v2539_v47  ;;  %v6452_v41 = vadd.f32 %v6219_v37, %v6277_v27 }
 0x3b3   : > { %8550 = vst [vmem:[#allocation27_spill] sm:$0xff] %v6396_v60  ;;  %v2617_v10 = vmul.f32 2.1237322e-06, %v6335_v31  ;;  %v6467_v27 = vmul.f32 0.70710677, %v6310_v25 }
 0x3b4   : > { %8551 = vst [vmem:[#allocation44_spill] sm:$0xff] %v6399_v29  ;;  %v6471_v47 = vmul.f32 0.70710677, %v6313_v56 }
 0x3b5   : > { %8552 = vst [vmem:[#allocation45_spill] sm:$0xff] %v6402_v62 }
 0x3b6   : > { %8553 = vst [vmem:[#allocation47_spill] sm:$0xff] %v6405_v28 }
 0x3b7   : > { %8554 = vst [vmem:[#allocation48_spill] sm:$0xff] %v6408_v4  ;;  %v2580_v4 = vadd.f32 0.0036580483, %v2579_v20  ;;  %v2541_v20 = vmul.f32 %v2540_v18, %v6307_v17 }
 0x3b8   : > { %8555 = vst [vmem:[#allocation49_spill] sm:$0xff] %v6412_v11  ;;  %v2631_v11 = vadd.f32 0.014752088, %v2630_v36 }
 0x3b9   : > { %8556 = vst [vmem:[#allocation50_spill] sm:$0xff] %v6415_v3  ;;  %v6436_v3 = vmul.f32 0.5, %v6338_v2  ;;  %v2581_v56 = vmul.f32 %v2580_v4, %v6318_v0  ;;  %v6505_v4 = vmul.f32 0.70710677, %v6338_v2  ;;  %v6517_v2 = vmul.f32 0.70710677, %v6344_v46 }
 0x3ba   : > { %8557 = vst [vmem:[#allocation51_spill] sm:$0xff] %v6420_v43  ;;  %v6439_v43 = vmul.f32 0.5, %v6341_v53 }
 0x3bb   : > { %8558 = vst [vmem:[#allocation52_spill] sm:$0xff] %v6423_v59  ;;  %v6445_v59 = vmul.f32 0.5, %v6347_v45 }
 0x3bc   : > { %8559 = vst [vmem:[#allocation53_spill] sm:$0xff] %v6428_v5  ;;  %v2513_v5 = vadd.f32 0.112945676, %v2512_v40  ;;  %v6464_v40 = vmul.f32 0.70710677, %v6303_v39 }
 0x3bd   : > { %8560 = vst [vmem:[#allocation2_spill] sm:$0xff] %v6436_v3  ;;  %v6455_v3 = vmul.f32 0.70710677, %v6295_v57  ;;  %v2501_v57 = vmul.f32 %v2500_v44, %v6305_v23  ;;  %v6482_v39 = vmul.f32 0.70710677, %v6324_v61 }
 0x3be   : > { %8561 = vst [vmem:[#allocation54_spill] sm:$0xff] %v6439_v43  ;;  %v2553_v43 = vadd.f32 0.112945676, %v2552_v32  ;;  %v6474_v32 = vmul.f32 0.70710677, %v6316_v12  ;;  %v2514_v36 = vmul.f32 %v2513_v5, %v6305_v23  ;;  %v6492_v5 = vadd.f32 %v6219_v37, %v6280_v26 }
 0x3bf   : > { %8562 = vst [vmem:[#allocation26_spill] sm:$0xff] %v6442_v52  ;;  %v2593_v52 = vadd.f32 0.112945676, %v2592_v24  ;;  %v2632_v24 = vmul.f32 %v2631_v11, %v6335_v31  ;;  %v2618_v12 = vadd.f32 0.00028619796, %v2617_v10  ;;  %v6502_v11 = vadd.f32 %v6219_v37, %v6283_v33 }
 0x3c0   : > { %8563 = vst [vmem:[#allocation55_spill] sm:$0xff] %v6445_v59  ;;  %v2655_v59 = vmul.f32 %v6431_v22, %v6431_v22  ;;  %v2554_v25 = vmul.f32 %v2553_v43, %v6307_v17  ;;  %v6498_v61 = vmul.f32 0.70710677, %v6331_v48  ;;  %v2502_v43 = vadd.f32 0.05243302, %v2501_v57 }
 0x3c1   : > { %8564 = vst [vmem:[#allocation3_spill] sm:$0xff] %v6448_v54  ;;  %v6461_v54 = vmul.f32 0.70710677, %v6300_v14  ;;  %v6479_v14 = vmul.f32 0.70710677, %v6321_v49  ;;  %v2594_v44 = vmul.f32 %v2593_v52, %v6318_v0  ;;  %v6509_v26 = vadd.f32 %v6219_v37, %v6286_v35 }
 0x3c2   : > { %8565 = vst [vmem:[#allocation22_spill] sm:$0xff] %v6452_v41  ;;  %v6488_v28 = vmin.f32 %v2655_v59, 16.0  ;;  %v6495_v49 = vmul.f32 0.70710677, %v6327_v8  ;;  %v2515_v59 = vadd.f32 0.4994258, %v2514_v36  ;;  %v2619_v62 = vmul.f32 %v2618_v12, %v6335_v31 }
 0x3c3   : > { %8566 = vst [vmem:[#allocation6_spill] sm:$0xff] %v6492_v5  ;;  %v2542_v52 = vadd.f32 0.05243302, %v2541_v20  ;;  %v6512_v8 = vmul.f32 0.70710677, %v6341_v53  ;;  %v2503_v53 = vmul.f32 %v2502_v43, %v6305_v23 }
 0x3c4   : > { %8567 = vst [vmem:[#allocation9_spill] sm:$0xff] %v6502_v11  ;;  %v2555_v18 = vadd.f32 0.4994258, %v2554_v25  ;;  %v2633_v48 = vadd.f32 0.112945676, %v2632_v24  ;;  %v2516_v24 = vmul.f32 %v2515_v59, %v6305_v23  ;;  %v6545_v59 = vadd.f32 %v6219_v37, %v6289_v9 }
 0x3c5   : > { %8568 = vst [vmem:[#allocation5_spill] sm:$0xff] %v6509_v26  ;;  %v2582_v10 = vadd.f32 0.05243302, %v2581_v56  ;;  %v2595_v57 = vadd.f32 0.4994258, %v2594_v44  ;;  %v2543_v56 = vmul.f32 %v2542_v52, %v6307_v17 }
 0x3c6   : > { %v2668_v33 = vmul.f32 3.8918573e-05, %v6488_v28  ;;  %v6520_v36 = vmul.f32 0.70710677, %v6347_v45  ;;  %v6523_v35 = vmul.f32 0.70710677, %v6351_v7  ;;  %v2556_v46 = vmul.f32 %v2555_v18, %v6307_v17 }
 0x3c7   : > { %v6527_v20 = vmul.f32 0.70710677, %v6354_v38  ;;  %v6530_v25 = vmul.f32 0.70710677, %v6359_v15  ;;  %v2634_v45 = vmul.f32 %v2633_v48, %v6335_v31  ;;  %v2695_v7 = vmul.f32 %v6455_v3, %v6455_v3  ;;  %8569 = vst [vmem:[#allocation10_spill] sm:$0xff] %v6545_v59 }
 0x3c8   : > { %v2669_v44 = vadd.f32 0.001143296, %v2668_v33  ;;  %v6539_v12 = vmul.f32 0.70710677, %v6362_v50  ;;  %v2583_v43 = vmul.f32 %v2582_v10, %v6318_v0  ;;  %v2596_v29 = vmul.f32 %v2595_v57, %v6318_v0 }
 0x3c9   : > { %v2620_v60 = vadd.f32 0.0036580483, %v2619_v62  ;;  %v6548_v52 = vmul.f32 0.70710677, %v6367_v30  ;;  %v6551_v18 = vmul.f32 0.70710677, %v6370_v19 }
 0x3ca   : > { %v2504_v48 = vadd.f32 0.18741608, %v2503_v53  ;;  %v6554_v33 = vmul.f32 0.5, %v6354_v38  ;;  %v6557_v50 = vmul.f32 0.70710677, %v6375_v21  ;;  %v6559_v10 = vadd.f32 1.0, %v2516_v24 }
 0x3cb   : > { %8570 = vst [vmem:[#allocation12_spill] sm:$0xff] %v6548_v52  ;;  %v2544_v62 = vadd.f32 0.18741608, %v2543_v56  ;;  %v6561_v57 = vadd.f32 1.0, %v2556_v46  ;;  %v2635_v37 = vadd.f32 0.4994258, %v2634_v45  ;;  %v2670_v9 = vmul.f32 %v2669_v44, %v6488_v28 }
 0x3cc   : > { %8571 = vst [vmem:[#allocation7_spill] sm:$0xff] %v6551_v18  ;;  %v6564_v30 = vmin.f32 %v2695_v7, 16.0  ;;  %v2584_v42 = vadd.f32 0.18741608, %v2583_v43  ;;  %v6566_v19 = vadd.f32 1.0, %v2596_v29  ;;  %v2621_v53 = vmul.f32 %v2620_v60, %v6335_v31 }
 0x3cd   : > { %8572 = vst [vmem:[#allocation14_spill] sm:$0xff] %v6554_v33  ;;  %v2735_v38 = vmul.f32 %v6461_v54, %v6461_v54  ;;  %v6572_v21 = vmul.f32 0.70710677, %v6378_v13  ;;  %v2505_v24 = vmul.f32 %v2504_v48, %v6305_v23  ;;  %v2657_v56 = vmul.f32 2.1237322e-06, %v6488_v28 }
 0x3ce   : > { %8573 = vst [vmem:[#allocation16_spill] sm:$0xff] %v6557_v50  ;;  %v2671_v46 = vadd.f32 0.014752088, %v2670_v9  ;;  %v6577_v45 = vmul.f32 0.70710677, %v6452_v41  ;;  %4295 = vrcp.f32 %v6559_v10  ;;  %v2545_v60 = vmul.f32 %v2544_v62, %v6307_v17 }
 0x3cf   : > { %8574 = vst [vmem:[#allocation13_spill] sm:$0xff] %v6572_v21  ;;  %v6580_v44 = vmul.f32 0.70710677, %v6492_v5  ;;  %4297 = vrcp.f32 %v6561_v57  ;;  %v2636_v29 = vmul.f32 %v2635_v37, %v6335_v31  ;;  %v2708_v23 = vmul.f32 3.8918573e-05, %v6564_v30 }
 0x3d0   : > { %8575 = vst [vmem:[#allocation17_spill] sm:$0xff] %v6577_v45  ;;  %v2672_v7 = vmul.f32 %v2671_v46, %v6488_v28  ;;  %v2585_v43 = vmul.f32 %v2584_v42, %v6318_v0  ;;  %4299 = vrcp.f32 %v6566_v19  ;;  %v2622_v48 = vadd.f32 0.05243302, %v2621_v53 }
 0x3d1   : > { %8576 = vst [vmem:[#allocation20_spill] sm:$0xff] %v6580_v44  ;;  %v6590_v9 = vmin.f32 %v2735_v38, 16.0  ;;  %v6593_v5 = vmul.f32 0.70710677, %v6502_v11  ;;  %v2506_v41 = vadd.f32 1.1283791, %v2505_v24  ;;  %vm2523_vm6 = vweird.f32 %v6559_v10 }
 0x3d2   : > { %v2658_v17 = vadd.f32 0.00028619796, %v2657_v56  ;;  %v6596_v62 = vmul.f32 0.70710677, %v6509_v26  ;;  %v2546_v37 = vadd.f32 1.1283791, %v2545_v60  ;;  %v2623_v56 = vmul.f32 %v2622_v48, %v6335_v31 }
 0x3d3   : > { %8577 = vst [vmem:[#allocation21_spill] sm:$0xff] %v6593_v5  ;;  %v2697_v46 = vmul.f32 2.1237322e-06, %v6564_v30  ;;  %v6600_v13 = vmul.f32 0.5, %v6359_v15  ;;  %v6602_v0 = vadd.f32 1.0, %v2636_v29  ;;  %v6614_v33 = vmul.f32 %v2506_v41, %v6244_v63 }
 0x3d4   : > { %8578 = vst [vmem:[#allocation19_spill] sm:$0xff] %v6596_v62  ;;  %v2673_v42 = vadd.f32 0.112945676, %v2672_v7  ;;  %v2709_v53 = vadd.f32 0.001143296, %v2708_v23  ;;  %v6604_v38 = vpop.eup %4295  ;;  %v2659_v29 = vmul.f32 %v2658_v17, %v6488_v28  ;;  %v2775_v48 = vmul.f32 %v6464_v40, %v6464_v40 }
 0x3d5   : > { %8579 = vst [vmem:[#allocation25_spill] sm:$0xff] %v6600_v13  ;;  %v6607_v11 = vmul.f32 0.70710677, %v6545_v59  ;;  %v2586_v24 = vadd.f32 1.1283791, %v2585_v43  ;;  %v6611_v60 = vpop.eup %4297  ;;  %v2529_v59 = vand.u32 2147483648, %v6559_v10  ;;  %v6625_v16 = vmul.f32 %v2546_v37, %v6247_v58 }
 0x3d6   : > { %v2748_v26 = vmul.f32 3.8918573e-05, %v6590_v9  ;;  %v2527_v15 = vand.u32 2147483647, %v6559_v10  ;;  %v2710_v7 = vmul.f32 %v2709_v53, %v6564_v30  ;;  %v6619_v23 = vpop.eup %4299  ;;  %v2698_v43 = vadd.f32 0.00028619796, %v2697_v46 }
 0x3d7   : > { %8580 = vst [vmem:[#allocation29_spill] sm:$0xff] %v6607_v11  ;;  %4301 = vrcp.f32 %v6602_v0  ;;  %v2674_v63 = vmul.f32 %v2673_v42, %v6488_v28  ;;  %v2519_v17 = vmul.f32 %v6604_v38, %v6559_v10  ;;  %v2567_v53 = vand.u32 2147483647, %v6561_v57 }
 0x3d8   : > { %v2749_v13 = vadd.f32 0.001143296, %v2748_v26  ;;  %v2711_v41 = vadd.f32 0.014752088, %v2710_v7  ;;  %v2569_v55 = vand.u32 2147483648, %v6561_v57  ;;  %v2559_v46 = vmul.f32 %v6611_v60, %v6561_v57 }
 0x3d9   : > { %v2599_v58 = vmul.f32 %v6619_v23, %v6566_v19  ;;  %v2624_v37 = vadd.f32 0.18741608, %v2623_v56  ;;  %v2660_v1 = vadd.f32 0.0036580483, %v2659_v29  ;;  %v2699_v42 = vmul.f32 %v2698_v43, %v6564_v30 }
 0x3da   : > { %v2750_v26 = vmul.f32 %v2749_v13, %v6590_v9  ;;  %v2737_v7 = vmul.f32 2.1237322e-06, %v6590_v9  ;;  %v6640_v11 = vmin.f32 %v2775_v48, 16.0  ;;  %v6643_v62 = vmul.f32 %v2586_v24, %v6253_v51 }
 0x3db   : > { %v2609_v13 = vand.u32 2147483648, %v6566_v19  ;;  %v2675_v5 = vadd.f32 0.4994258, %v2674_v63  ;;  %v2712_v44 = vmul.f32 %v2711_v41, %v6564_v30  ;;  %v2520_v45 = vsub.f32 1.0, %v2519_v17 }
 0x3dc   : > { %v2751_v6 = vadd.f32 0.014752088, %v2750_v26  ;;  %v6647_v21 = vor.u32 1.1754944e-38, %v2529_v59  ;;  %v6649_v56 = vor.u32 1.1754944e-38, %v2569_v55  ;;  %v2607_v29 = vand.u32 2147483647, %v6566_v19 }
 0x3dd   : > { %v6652_v43 = vpop.eup %4301  ;;  %v2560_v26 = vsub.f32 1.0, %v2559_v46  ;;  %v2600_v48 = vsub.f32 1.0, %v2599_v58  ;;  %v2625_v50 = vmul.f32 %v2624_v37, %v6335_v31  ;;  %v2661_v24 = vmul.f32 %v2660_v1, %v6488_v28 }
 0x3de   : > { %v2752_v51 = vmul.f32 %v2751_v6, %v6590_v9  ;;  %v2700_v63 = vadd.f32 0.0036580483, %v2699_v42  ;;  %v2738_v41 = vadd.f32 0.00028619796, %v2737_v7  ;;  %v2788_v59 = vmul.f32 3.8918573e-05, %v6640_v11 }
 0x3df   : > { %vm2563_vm7 = vweird.f32 %v6561_v57  ;;  %v6660_v55 = vor.u32 1.1754944e-38, %v2609_v13  ;;  %v2676_v17 = vmul.f32 %v2675_v5, %v6488_v28  ;;  %v2713_v46 = vadd.f32 0.112945676, %v2712_v44 }
 0x3e0   : > { %v2815_v31 = vmul.f32 %v6467_v27, %v6467_v27  ;;  %v2521_v6 = vmul.f32 %v6604_v38, %v2520_v45  ;;  %vm2524_vm8 = vweird.f32 %v6604_v38  ;;  %vm2603_vm9 = vweird.f32 %v6566_v19 }
 0x3e1   : > { %v2639_v1 = vmul.f32 %v6652_v43, %v6602_v0  ;;  %v2789_v58 = vadd.f32 0.001143296, %v2788_v59  ;;  %v2561_v37 = vmul.f32 %v6611_v60, %v2560_v26  ;;  %vm2564_vm10 = vweird.f32 %v6611_v60  ;;  %vm6706_vm15 = vmor %vm2523_vm6, %vm2524_vm8 }
 0x3e2   : > { %v2626_v42 = vadd.f32 1.1283791, %v2625_v50  ;;  %v2753_v5 = vadd.f32 0.112945676, %v2752_v51  ;;  %v2601_v44 = vmul.f32 %v6619_v23, %v2600_v48  ;;  %v2662_v7 = vadd.f32 0.05243302, %v2661_v24  ;;  %vm6719_vm0 = vmor %vm2563_vm7, %vm2564_vm10 }
 0x3e3   : > { %v2701_v13 = vmul.f32 %v2700_v63, %v6564_v30  ;;  %v2739_v45 = vmul.f32 %v2738_v41, %v6590_v9  ;;  %vm6675_vm11 = vcmp.eq.f32.partialorder %v2527_v15, 8.507059e+37  ;;  %vm6679_vm12 = vcmp.eq.f32.partialorder %v2567_v53, 8.507059e+37 }
 0x3e4   : > { %v6683_v26 = vadd.f32 1.0, %v2676_v17  ;;  %v2714_v50 = vmul.f32 %v2713_v46, %v6564_v30  ;;  %v2790_v51 = vmul.f32 %v2789_v58, %v6640_v11  ;;  %v6687_v48 = vmin.f32 %v2815_v31, 16.0 }
 0x3e5   : > { %v2522_v24 = vadd.f32 %v6604_v38, %v2521_v6  ;;  %vm2604_vm13 = vweird.f32 %v6619_v23  ;;  %vm6691_vm14 = vcmp.eq.f32.partialorder %v2607_v29, 8.507059e+37  ;;  %v2640_v53 = vsub.f32 1.0, %v2639_v1 }
 0x3e6   : > { %v2647_v63 = vand.u32 2147483647, %v6602_v0  ;;  %v2562_v41 = vadd.f32 %v6611_v60, %v2561_v37  ;;  %v2754_v59 = vmul.f32 %v2753_v5, %v6590_v9  ;;  %v2777_v17 = vmul.f32 2.1237322e-06, %v6640_v11  ;;  %vm6733_vm3 = vmor %vm2603_vm9, %vm2604_vm13 }
 0x3e7   : > { %v2791_v46 = vadd.f32 0.014752088, %v2790_v51  ;;  %v2602_v31 = vadd.f32 %v6619_v23, %v2601_v44  ;;  %v2649_v6 = vand.u32 2147483648, %v6602_v0  ;;  %v2663_v58 = vmul.f32 %v2662_v7, %v6488_v28 }
 0x3e8   : > { %v2702_v29 = vadd.f32 0.05243302, %v2701_v13  ;;  %4303 = vrcp.f32 %v6683_v26  ;;  %v2715_v37 = vadd.f32 0.4994258, %v2714_v50  ;;  %v2740_v5 = vadd.f32 0.0036580483, %v2739_v45 }
 0x3e9   : > { %v2828_v51 = vmul.f32 3.8918573e-05, %v6687_v48  ;;  %v2526_v44 = vsel %vm6706_vm15, %v6604_v38, %v2522_v24  ;;  %v2627_v7 = vmul.f32 %v2626_v42, %v6263_v34  ;;  %v2641_v13 = vmul.f32 %v6652_v43, %v2640_v53 }
 0x3ea   : > { %vm2643_vm2 = vweird.f32 %v6602_v0  ;;  %v2566_v45 = vsel %vm6719_vm0, %v6611_v60, %v2562_v41  ;;  %v2755_v38 = vadd.f32 0.4994258, %v2754_v59  ;;  %v2778_v50 = vadd.f32 0.00028619796, %v2777_v17 }
 0x3eb   : > { %v2792_v34 = vmul.f32 %v2791_v46, %v6640_v11  ;;  %v2606_v42 = vsel %vm6733_vm3, %v6619_v23, %v2602_v31  ;;  %vm6741_vm4 = vcmp.eq.f32.partialorder %v2647_v63, 8.507059e+37  ;;  %v2664_v60 = vadd.f32 0.18741608, %v2663_v58 }
 0x3ec   : > { %v2703_v53 = vmul.f32 %v2702_v29, %v6564_v30  ;;  %v2855_v19 = vmul.f32 %v6471_v47, %v6471_v47  ;;  %v2650_v41 = vor.u32 1.1754944e-38, %v2649_v6  ;;  %v2716_v59 = vmul.f32 %v2715_v37, %v6564_v30 }
 0x3ed   : > { %v2741_v17 = vmul.f32 %v2740_v5, %v6590_v9  ;;  %v2829_v46 = vadd.f32 0.001143296, %v2828_v51  ;;  %v2531_v23 = vsel %vm6675_vm11, %v6647_v21, %v2526_v44  ;;  %v2571_v63 = vsel %vm6679_vm12, %v6649_v56, %v2566_v45 }
 0x3ee   : > { %v2642_v31 = vadd.f32 %v6652_v43, %v2641_v13  ;;  %vm2644_vm5 = vweird.f32 %v6652_v43  ;;  %v6758_v58 = vpop.eup %4303  ;;  %v2611_v6 = vsel %vm6691_vm14, %v6660_v55, %v2606_v42  ;;  %v2756_v29 = vmul.f32 %v2755_v38, %v6590_v9 }
 0x3ef   : > { %v2779_v1 = vmul.f32 %v2778_v50, %v6640_v11  ;;  %v2793_v18 = vadd.f32 0.112945676, %v2792_v34  ;;  %v2665_v21 = vmul.f32 %v2664_v60, %v6488_v28  ;;  %v2704_v37 = vadd.f32 0.18741608, %v2703_v53  ;;  %vm6777_vm6 = vmor %vm2643_vm2, %vm2644_vm5 }
 0x3f0   : > { %v2830_v52 = vmul.f32 %v2829_v46, %v6687_v48  ;;  %v6767_v56 = vmin.f32 %v2855_v19, 16.0  ;;  %v6770_v5 = vmul.f32 %v2531_v23, %v6614_v33  ;;  %v6773_v51 = vmul.f32 %v2571_v63, %v6625_v16 }
 0x3f1   : > { %v6781_v15 = vadd.f32 1.0, %v2716_v59  ;;  %v2742_v28 = vadd.f32 0.05243302, %v2741_v17  ;;  %v6784_v44 = vmul.f32 %v2611_v6, %v6643_v62  ;;  %v2646_v33 = vsel %vm6777_vm6, %v6652_v43, %v2642_v31 }
 0x3f2   : > { %v2679_v16 = vmul.f32 %v6758_v58, %v6683_v26  ;;  %v2831_v10 = vadd.f32 0.014752088, %v2830_v52  ;;  %v6791_v13 = vadd.f32 1.0, %v2756_v29  ;;  %v2780_v0 = vadd.f32 0.0036580483, %v2779_v1 }
 0x3f3   : > { %v2794_v45 = vmul.f32 %v2793_v18, %v6640_v11  ;;  %v2817_v57 = vmul.f32 2.1237322e-06, %v6687_v48  ;;  %v2666_v38 = vadd.f32 1.1283791, %v2665_v21  ;;  %v2705_v50 = vmul.f32 %v2704_v37, %v6564_v30 }
 0x3f4   : > { %v2832_v62 = vmul.f32 %v2831_v10, %v6687_v48  ;;  %v2868_v34 = vmul.f32 3.8918573e-05, %v6767_v56  ;;  %v2651_v43 = vsel %vm6741_vm4, %v2650_v41, %v2646_v33  ;;  %4305 = vrcp.f32 %v6781_v15 }
 0x3f5   : > { %v2743_v42 = vmul.f32 %v2742_v28, %v6590_v9  ;;  %v2895_v60 = vmul.f32 %v6474_v32, %v6474_v32  ;;  %v2680_v19 = vsub.f32 1.0, %v2679_v16  ;;  %4307 = vrcp.f32 %v6791_v13 }
 0x3f6   : > { %v2833_v59 = vadd.f32 0.112945676, %v2832_v62  ;;  %v2869_v17 = vadd.f32 0.001143296, %v2868_v34  ;;  %v2781_v30 = vmul.f32 %v2780_v0, %v6640_v11  ;;  %v2795_v46 = vadd.f32 0.4994258, %v2794_v45 }
 0x3f7   : > { %v2818_v23 = vadd.f32 0.00028619796, %v2817_v57  ;;  %v6809_v63 = vmul.f32 %v2651_v43, %v2627_v7  ;;  %v2706_v31 = vadd.f32 1.1283791, %v2705_v50  ;;  %v6812_v6 = vmul.f32 %v2666_v38, %v6431_v22 }
 0x3f8   : > { %v2744_v29 = vadd.f32 0.18741608, %v2743_v42  ;;  %v2834_v1 = vmul.f32 %v2833_v59, %v6687_v48  ;;  %v6815_v18 = vmin.f32 %v2895_v60, 16.0  ;;  %v2681_v21 = vmul.f32 %v6758_v58, %v2680_v19 }
 0x3f9   : > { %vm2683_vm7 = vweird.f32 %v6683_v26  ;;  %v2687_v37 = vand.u32 2147483647, %v6683_v26  ;;  %v2870_v52 = vmul.f32 %v2869_v17, %v6767_v56  ;;  %v2689_v7 = vand.u32 2147483648, %v6683_v26 }
 0x3fa   : > { %v6821_v55 = vpop.eup %4305  ;;  %v2782_v28 = vadd.f32 0.05243302, %v2781_v30  ;;  %v2796_v22 = vmul.f32 %v2795_v46, %v6640_v11  ;;  %v2819_v33 = vmul.f32 %v2818_v23, %v6687_v48  ;;  %v6828_v10 = vmul.f32 %v2706_v31, %v6455_v3 }
 0x3fb   : > { %v2857_v0 = vmul.f32 2.1237322e-06, %v6767_v56  ;;  %v2871_v45 = vadd.f32 0.014752088, %v2870_v52  ;;  %v6831_v57 = vpop.eup %4307  ;;  %v2745_v38 = vmul.f32 %v2744_v29, %v6590_v9  ;;  %v2835_v50 = vadd.f32 0.4994258, %v2834_v1 }
 0x3fc   : > { %v2908_v62 = vmul.f32 3.8918573e-05, %v6815_v18  ;;  %v2935_v34 = vmul.f32 %v6479_v14, %v6479_v14  ;;  %v2682_v43 = vadd.f32 %v6758_v58, %v2681_v21  ;;  %vm2684_vm8 = vweird.f32 %v6758_v58 }
 0x3fd   : > { %v2719_v3 = vmul.f32 %v6821_v55, %v6781_v15  ;;  %v2872_v42 = vmul.f32 %v2871_v45, %v6767_v56  ;;  %v2783_v60 = vmul.f32 %v2782_v28, %v6640_v11  ;;  %v6843_v19 = vadd.f32 1.0, %v2796_v22  ;;  %vm6854_vm10 = vmor %vm2683_vm7, %vm2684_vm8 }
 0x3fe   : > { %v2820_v9 = vadd.f32 0.0036580483, %v2819_v33  ;;  %v2909_v59 = vadd.f32 0.001143296, %v2908_v62  ;;  %vm6845_vm9 = vcmp.eq.f32.partialorder %v2687_v37, 8.507059e+37  ;;  %v2729_v30 = vand.u32 2147483648, %v6781_v15 }
 0x3ff   : > { %v2759_v46 = vmul.f32 %v6831_v57, %v6791_v13  ;;  %v2858_v23 = vadd.f32 0.00028619796, %v2857_v0  ;;  %v2690_v29 = vor.u32 1.1754944e-38, %v2689_v7  ;;  %v2746_v1 = vadd.f32 1.1283791, %v2745_v38 }
 0x400   : > { %v2836_v21 = vmul.f32 %v2835_v50, %v6687_v48  ;;  %v6859_v37 = vmin.f32 %v2935_v34, 16.0  ;;  %v2686_v52 = vsel %vm6854_vm10, %v6758_v58, %v2682_v43  ;;  %v2720_v28 = vsub.f32 1.0, %v2719_v3 }
 0x401   : > { %v2727_v22 = vand.u32 2147483647, %v6781_v15  ;;  %v2873_v33 = vadd.f32 0.112945676, %v2872_v42  ;;  %v2784_v0 = vadd.f32 0.18741608, %v2783_v60  ;;  %4309 = vrcp.f32 %v6843_v19 }
 0x402   : > { %v2821_v26 = vmul.f32 %v2820_v9, %v6687_v48  ;;  %v2910_v7 = vmul.f32 %v2909_v59, %v6815_v18  ;;  %vm2723_vm11 = vweird.f32 %v6781_v15  ;;  %v2730_v45 = vor.u32 1.1754944e-38, %v2729_v30 }
 0x403   : > { %v2760_v38 = vsub.f32 1.0, %v2759_v46  ;;  %v2859_v50 = vmul.f32 %v2858_v23, %v6767_v56  ;;  %v2897_v62 = vmul.f32 2.1237322e-06, %v6815_v18  ;;  %v6872_v58 = vmul.f32 %v2746_v1, %v6461_v54 }
 0x404   : > { %v6874_v34 = vadd.f32 1.0, %v2836_v21  ;;  %v2911_v43 = vadd.f32 0.014752088, %v2910_v7  ;;  %v2948_v3 = vmul.f32 3.8918573e-05, %v6859_v37  ;;  %v2691_v42 = vsel %vm6845_vm9, %v2690_v29, %v2686_v52 }
 0x405   : > { %v2721_v60 = vmul.f32 %v6821_v55, %v2720_v28  ;;  %vm2763_vm12 = vweird.f32 %v6791_v13  ;;  %v2767_v9 = vand.u32 2147483647, %v6791_v13  ;;  %v2874_v59 = vmul.f32 %v2873_v33, %v6767_v56 }
 0x406   : > { %v2785_v30 = vmul.f32 %v2784_v0, %v6640_v11  ;;  %v2822_v54 = vadd.f32 0.05243302, %v2821_v26  ;;  %v2949_v46 = vadd.f32 0.001143296, %v2948_v3  ;;  %v2975_v23 = vmul.f32 %v6482_v39, %v6482_v39 }
 0x407   : > { %vm6886_vm13 = vcmp.eq.f32.partialorder %v2727_v22, 8.507059e+37  ;;  %v2761_v17 = vmul.f32 %v6831_v57, %v2760_v38  ;;  %v2769_v29 = vand.u32 2147483648, %v6791_v13  ;;  %v2860_v1 = vadd.f32 0.0036580483, %v2859_v50  ;;  %v6892_v52 = vpop.eup %4309 }
 0x408   : > { %v2898_v21 = vadd.f32 0.00028619796, %v2897_v62  ;;  %v6895_v28 = vmul.f32 %v2691_v42, %v6812_v6  ;;  %vm2724_vm14 = vweird.f32 %v6821_v55  ;;  %4311 = vrcp.f32 %v6874_v34 }
 0x409   : > { %v2912_v11 = vmul.f32 %v2911_v43, %v6815_v18  ;;  %v2722_v22 = vadd.f32 %v6821_v55, %v2721_v60  ;;  %v2875_v33 = vadd.f32 0.4994258, %v2874_v59  ;;  %v2937_v0 = vmul.f32 2.1237322e-06, %v6859_v37  ;;  %vm6916_vm0 = vmor %vm2723_vm11, %vm2724_vm14 }
 0x40a   : > { %v2950_v26 = vmul.f32 %v2949_v46, %v6859_v37  ;;  %vm2764_vm15 = vweird.f32 %v6831_v57  ;;  %v2786_v7 = vadd.f32 1.1283791, %v2785_v30  ;;  %v2823_v38 = vmul.f32 %v2822_v54, %v6687_v48 }
 0x40b   : > { %v6905_v6 = vmin.f32 %v2975_v23, 16.0  ;;  %v2762_v50 = vadd.f32 %v6831_v57, %v2761_v17  ;;  %v2799_v62 = vmul.f32 %v6892_v52, %v6843_v19  ;;  %v2861_v43 = vmul.f32 %v2860_v1, %v6767_v56  ;;  %vm6935_vm3 = vmor %vm2763_vm12, %vm2764_vm15 }
 0x40c   : > { %v2899_v3 = vmul.f32 %v2898_v21, %v6815_v18  ;;  %vm6920_vm2 = vcmp.eq.f32.partialorder %v2767_v9, 8.507059e+37  ;;  %v2770_v59 = vor.u32 1.1754944e-38, %v2769_v29  ;;  %v2913_v30 = vadd.f32 0.112945676, %v2912_v11 }
 0x40d   : > { %v2951_v54 = vadd.f32 0.014752088, %v2950_v26  ;;  %v2726_v23 = vsel %vm6916_vm0, %v6821_v55, %v2722_v22  ;;  %v2876_v17 = vmul.f32 %v2875_v33, %v6767_v56  ;;  %v2938_v15 = vadd.f32 0.00028619796, %v2937_v0 }
 0x40e   : > { %v6929_v1 = vpop.eup %4311  ;;  %v6940_v29 = vmul.f32 %v2786_v7, %v6464_v40  ;;  %v2824_v21 = vadd.f32 0.18741608, %v2823_v38  ;;  %v2988_v55 = vmul.f32 3.8918573e-05, %v6905_v6  ;;  %v2766_v22 = vsel %vm6935_vm3, %v6831_v57, %v2762_v50 }
 0x40f   : > { %v2952_v11 = vmul.f32 %v2951_v54, %v6859_v37  ;;  %v2800_v33 = vsub.f32 1.0, %v2799_v62  ;;  %v2862_v0 = vadd.f32 0.05243302, %v2861_v43  ;;  %v2900_v26 = vadd.f32 0.0036580483, %v2899_v3 }
 0x410   : > { %v2731_v13 = vsel %vm6886_vm13, %v2730_v45, %v2726_v23  ;;  %v2914_v42 = vmul.f32 %v2913_v30, %v6815_v18  ;;  %v2989_v46 = vadd.f32 0.001143296, %v2988_v55  ;;  %v3015_v40 = vmul.f32 %v6495_v49, %v6495_v49 }
 0x411   : > { %v2839_v7 = vmul.f32 %v6929_v1, %v6874_v34  ;;  %v6954_v38 = vadd.f32 1.0, %v2876_v17  ;;  %v2939_v54 = vmul.f32 %v2938_v15, %v6859_v37  ;;  %v2953_v57 = vadd.f32 0.112945676, %v2952_v11 }
 0x412   : > { %v2771_v50 = vsel %vm6920_vm2, %v2770_v59, %v2766_v22  ;;  %vm2803_vm4 = vweird.f32 %v6843_v19  ;;  %v2807_v45 = vand.u32 2147483647, %v6843_v19  ;;  %v2825_v31 = vmul.f32 %v2824_v21, %v6687_v48 }
 0x413   : > { %v2801_v62 = vmul.f32 %v6892_v52, %v2800_v33  ;;  %v2863_v43 = vmul.f32 %v2862_v0, %v6767_v56  ;;  %v2901_v3 = vmul.f32 %v2900_v26, %v6815_v18  ;;  %v2990_v30 = vmul.f32 %v2989_v46, %v6905_v6 }
 0x414   : > { %v6967_v23 = vmul.f32 %v2731_v13, %v6828_v10  ;;  %v2809_v60 = vand.u32 2147483648, %v6843_v19  ;;  %v2915_v59 = vadd.f32 0.4994258, %v2914_v42  ;;  %v6970_v17 = vmin.f32 %v3015_v40, 16.0 }
 0x415   : > { %v2840_v15 = vsub.f32 1.0, %v2839_v7  ;;  %4313 = vrcp.f32 %v6954_v38  ;;  %v2940_v48 = vadd.f32 0.0036580483, %v2939_v54  ;;  %v2954_v9 = vmul.f32 %v2953_v57, %v6859_v37 }
 0x416   : > { %v6975_v21 = vmul.f32 %v2771_v50, %v6872_v58  ;;  %vm6977_vm5 = vcmp.eq.f32.partialorder %v2807_v45, 8.507059e+37  ;;  %v2826_v10 = vadd.f32 1.1283791, %v2825_v31  ;;  %v2991_v46 = vadd.f32 0.014752088, %v2990_v30 }
 0x417   : > { %v2802_v55 = vadd.f32 %v6892_v52, %v2801_v62  ;;  %vm2804_vm6 = vweird.f32 %v6892_v52  ;;  %v2864_v22 = vadd.f32 0.18741608, %v2863_v43  ;;  %v2902_v33 = vadd.f32 0.05243302, %v2901_v3 }
 0x418   : > { %v2916_v0 = vmul.f32 %v2915_v59, %v6815_v18  ;;  %v2977_v26 = vmul.f32 2.1237322e-06, %v6905_v6  ;;  %v2992_v13 = vmul.f32 %v2991_v46, %v6905_v6  ;;  %v3028_v58 = vmul.f32 3.8918573e-05, %v6970_v17  ;;  %vm6993_vm7 = vmor %vm2803_vm4, %vm2804_vm6 }
 0x419   : > { %v2810_v42 = vor.u32 1.1754944e-38, %v2809_v60  ;;  %v2841_v40 = vmul.f32 %v6929_v1, %v2840_v15  ;;  %v2941_v7 = vmul.f32 %v2940_v48, %v6859_v37  ;;  %v2955_v54 = vadd.f32 0.4994258, %v2954_v9 }
 0x41a   : > { %v2827_v31 = vmul.f32 %v2826_v10, %v6467_v27  ;;  %v3029_v62 = vadd.f32 0.001143296, %v3028_v58  ;;  %v2806_v3 = vsel %vm6993_vm7, %v6892_v52, %v2802_v55  ;;  %v2865_v30 = vmul.f32 %v2864_v22, %v6767_v56 }
 0x41b   : > { %v6998_v43 = vpop.eup %4313  ;;  %v2993_v60 = vadd.f32 0.112945676, %v2992_v13  ;;  %v3055_v59 = vmul.f32 %v6498_v61, %v6498_v61  ;;  %vm2843_vm8 = vweird.f32 %v6874_v34  ;;  %v2903_v19 = vmul.f32 %v2902_v33, %v6815_v18 }
 0x41c   : > { %v7008_v15 = vadd.f32 1.0, %v2916_v0  ;;  %v2978_v27 = vadd.f32 0.00028619796, %v2977_v26  ;;  %v2842_v48 = vadd.f32 %v6929_v1, %v2841_v40  ;;  %vm2844_vm9 = vweird.f32 %v6929_v1 }
 0x41d   : > { %v2942_v9 = vadd.f32 0.05243302, %v2941_v7  ;;  %v2956_v52 = vmul.f32 %v2955_v54, %v6859_v37  ;;  %v2811_v56 = vsel %vm6977_vm5, %v2810_v42, %v2806_v3  ;;  %v2847_v10 = vand.u32 2147483647, %v6874_v34  ;;  %vm7025_vm10 = vmor %vm2843_vm8, %vm2844_vm9 }
 0x41e   : > { %v2879_v46 = vmul.f32 %v6998_v43, %v6954_v38  ;;  %v3030_v55 = vmul.f32 %v3029_v62, %v6970_v17  ;;  %v2849_v22 = vand.u32 2147483648, %v6874_v34  ;;  %v2866_v33 = vadd.f32 1.1283791, %v2865_v30 }
 0x41f   : > { %v2994_v0 = vmul.f32 %v2993_v60, %v6905_v6  ;;  %v7021_v26 = vmin.f32 %v3055_v59, 16.0  ;;  %v2904_v11 = vadd.f32 0.18741608, %v2903_v19  ;;  %4315 = vrcp.f32 %v7008_v15 }
 0x420   : > { %v2979_v58 = vmul.f32 %v2978_v27, %v6905_v6  ;;  %v3031_v42 = vadd.f32 0.014752088, %v3030_v55  ;;  %v7032_v40 = vmul.f32 %v2811_v56, %v6940_v29  ;;  %v2846_v7 = vsel %vm7025_vm10, %v6929_v1, %v2842_v48 }
 0x421   : > { %v2943_v54 = vmul.f32 %v2942_v9, %v6859_v37  ;;  %v7038_v34 = vadd.f32 1.0, %v2956_v52  ;;  %v2880_v45 = vsub.f32 1.0, %v2879_v46  ;;  %v3068_v3 = vmul.f32 3.8918573e-05, %v7021_v26 }
 0x422   : > { %v3032_v62 = vmul.f32 %v3031_v42, %v6970_v17  ;;  %v3095_v30 = vmul.f32 %v6505_v4, %v6505_v4  ;;  %vm2848_vm11 = vcmp.eq.f32.partialorder %v2847_v10, 8.507059e+37  ;;  %v2850_v60 = vor.u32 1.1754944e-38, %v2849_v22 }
 0x423   : > { %v7045_v29 = vmul.f32 %v2866_v33, %v6471_v47  ;;  %v2995_v59 = vadd.f32 0.4994258, %v2994_v0  ;;  %v2905_v1 = vmul.f32 %v2904_v11, %v6815_v18  ;;  %v2980_v19 = vadd.f32 0.0036580483, %v2979_v58 }
 0x424   : > { %v3033_v27 = vadd.f32 0.112945676, %v3032_v62  ;;  %v3069_v48 = vadd.f32 0.001143296, %v3068_v3  ;;  %v2851_v9 = vsel %vm2848_vm11, %v2850_v60, %v2846_v7  ;;  %v2944_v52 = vadd.f32 0.18741608, %v2943_v54 }
 0x425   : > { %4317 = vrcp.f32 %v7038_v34  ;;  %v3017_v56 = vmul.f32 2.1237322e-06, %v6970_v17  ;;  %v7050_v46 = vpop.eup %4315  ;;  %v2881_v55 = vmul.f32 %v6998_v43, %v2880_v45  ;;  %v2887_v47 = vand.u32 2147483647, %v6954_v38 }
 0x426   : > { %v7055_v22 = vmin.f32 %v3095_v30, 16.0  ;;  %vm2883_vm12 = vweird.f32 %v6954_v38  ;;  %v2996_v18 = vmul.f32 %v2995_v59, %v6905_v6  ;;  %v3034_v33 = vmul.f32 %v3033_v27, %v6970_v17 }
 0x427   : > { %v3070_v0 = vmul.f32 %v3069_v48, %v7021_v26  ;;  %v7061_v13 = vmul.f32 %v2851_v9, %v2827_v31  ;;  %v2889_v11 = vand.u32 2147483648, %v6954_v38  ;;  %v2906_v58 = vadd.f32 1.1283791, %v2905_v1 }
 0x428   : > { %v2981_v42 = vmul.f32 %v2980_v19, %v6905_v6  ;;  %v2919_v7 = vmul.f32 %v7050_v46, %v7008_v15  ;;  %v2945_v54 = vmul.f32 %v2944_v52, %v6859_v37  ;;  %v3018_v45 = vadd.f32 0.00028619796, %v3017_v56 }
 0x429   : > { %v3071_v62 = vadd.f32 0.014752088, %v3070_v0  ;;  %v2882_v3 = vadd.f32 %v6998_v43, %v2881_v55  ;;  %vm2884_vm13 = vweird.f32 %v6998_v43  ;;  %vm7070_vm14 = vcmp.eq.f32.partialorder %v2887_v47, 8.507059e+37 }
 0x42a   : > { %v3108_v31 = vmul.f32 3.8918573e-05, %v7055_v22  ;;  %v7077_v59 = vadd.f32 1.0, %v2996_v18  ;;  %v3035_v1 = vadd.f32 0.4994258, %v3034_v33  ;;  %v3135_v37 = vmul.f32 %v6512_v8, %v6512_v8  ;;  %vm7089_vm15 = vmor %vm2883_vm12, %vm2884_vm13 }
 0x42b   : > { %v7075_v60 = vpop.eup %4317  ;;  %v3072_v19 = vmul.f32 %v3071_v62, %v7021_v26  ;;  %v2890_v27 = vor.u32 1.1754944e-38, %v2889_v11  ;;  %v7083_v48 = vmul.f32 %v2906_v58, %v6474_v32  ;;  %v2929_v9 = vand.u32 2147483648, %v7008_v15 }
 0x42c   : > { %v2982_v52 = vadd.f32 0.05243302, %v2981_v42  ;;  %v2920_v47 = vsub.f32 1.0, %v2919_v7  ;;  %v2946_v18 = vadd.f32 1.1283791, %v2945_v54  ;;  %v3019_v33 = vmul.f32 %v3018_v45, %v6970_v17 }
 0x42d   : > { %v2886_v32 = vsel %vm7089_vm15, %v6998_v43, %v2882_v3  ;;  %v2959_v0 = vmul.f32 %v7075_v60, %v7038_v34  ;;  %v3057_v11 = vmul.f32 2.1237322e-06, %v7021_v26  ;;  %v3109_v58 = vadd.f32 0.001143296, %v3108_v31 }
 0x42e   : > { %4319 = vrcp.f32 %v7077_v59  ;;  %v3036_v38 = vmul.f32 %v3035_v1, %v6970_v17  ;;  %v3073_v42 = vadd.f32 0.112945676, %v3072_v19  ;;  %v7102_v62 = vmin.f32 %v3135_v37, 16.0 }
 0x42f   : > { %vm2923_vm0 = vweird.f32 %v7008_v15  ;;  %v2927_v7 = vand.u32 2147483647, %v7008_v15  ;;  %v2930_v54 = vor.u32 1.1754944e-38, %v2929_v9  ;;  %v2983_v43 = vmul.f32 %v2982_v52, %v6905_v6 }
 0x430   : > { %v2891_v45 = vsel %vm7070_vm14, %v2890_v27, %v2886_v32  ;;  %v2921_v3 = vmul.f32 %v7050_v46, %v2920_v47  ;;  %v3020_v31 = vadd.f32 0.0036580483, %v3019_v33  ;;  %v3110_v55 = vmul.f32 %v3109_v58, %v7055_v22 }
 0x431   : > { %v7112_v1 = vmul.f32 %v2946_v18, %v6479_v14  ;;  %v2960_v19 = vsub.f32 1.0, %v2959_v0  ;;  %v3058_v37 = vadd.f32 0.00028619796, %v3057_v11  ;;  %v3097_v56 = vmul.f32 2.1237322e-06, %v7055_v22 }
 0x432   : > { %v7115_v10 = vadd.f32 1.0, %v3036_v38  ;;  %v3074_v9 = vmul.f32 %v3073_v42, %v7021_v26  ;;  %v3111_v52 = vadd.f32 0.014752088, %v3110_v55  ;;  %v3148_v30 = vmul.f32 3.8918573e-05, %v7102_v62 }
 0x433   : > { %v7120_v27 = vmul.f32 %v2891_v45, %v7045_v29  ;;  %vm2924_vm2 = vweird.f32 %v7050_v46  ;;  %vm7123_vm3 = vcmp.eq.f32.partialorder %v2927_v7, 8.507059e+37  ;;  %vm2963_vm4 = vweird.f32 %v7038_v34 }
 0x434   : > { %v2984_v14 = vadd.f32 0.18741608, %v2983_v43  ;;  %v7128_v18 = vpop.eup %4319  ;;  %v2922_v33 = vadd.f32 %v7050_v46, %v2921_v3  ;;  %v3021_v32 = vmul.f32 %v3020_v31, %v6970_v17  ;;  %v3112_v0 = vmul.f32 %v3111_v52, %v7055_v22  ;;  %vm7144_vm5 = vmor %vm2923_vm0, %vm2924_vm2 }
 0x435   : > { %v3149_v11 = vadd.f32 0.001143296, %v3148_v30  ;;  %v2961_v29 = vmul.f32 %v7075_v60, %v2960_v19  ;;  %v2967_v58 = vand.u32 2147483647, %v7038_v34  ;;  %v3059_v38 = vmul.f32 %v3058_v37, %v7021_v26 }
 0x436   : > { %v3098_v42 = vadd.f32 0.00028619796, %v3097_v56  ;;  %v2969_v7 = vand.u32 2147483648, %v7038_v34  ;;  %4321 = vrcp.f32 %v7115_v10  ;;  %v3075_v43 = vadd.f32 0.4994258, %v3074_v9 }
 0x437   : > { %v3175_v45 = vmul.f32 %v6517_v2, %v6517_v2  ;;  %v2985_v31 = vmul.f32 %v2984_v14, %v6905_v6  ;;  %v2999_v56 = vmul.f32 %v7128_v18, %v7077_v59  ;;  %v3113_v55 = vadd.f32 0.112945676, %v3112_v0 }
 0x438   : > { %v3150_v19 = vmul.f32 %v3149_v11, %v7102_v62  ;;  %v2926_v9 = vsel %vm7144_vm5, %v7050_v46, %v2922_v33  ;;  %vm2964_vm6 = vweird.f32 %v7075_v60  ;;  %v3022_v15 = vadd.f32 0.05243302, %v3021_v32 }
 0x439   : > { %v2962_v52 = vadd.f32 %v7075_v60, %v2961_v29  ;;  %v3060_v30 = vadd.f32 0.0036580483, %v3059_v38  ;;  %v3099_v6 = vmul.f32 %v3098_v42, %v7055_v22  ;;  %v3137_v14 = vmul.f32 2.1237322e-06, %v7102_v62  ;;  %vm7176_vm8 = vmor %vm2963_vm4, %vm2964_vm6 }
 0x43a   : > { %vm7160_vm7 = vcmp.eq.f32.partialorder %v2967_v58, 8.507059e+37  ;;  %v3076_v11 = vmul.f32 %v3075_v43, %v7021_v26  ;;  %v3151_v37 = vadd.f32 0.014752088, %v3150_v19  ;;  %v7165_v50 = vmin.f32 %v3175_v45, 16.0 }
 0x43b   : > { %v2970_v46 = vor.u32 1.1754944e-38, %v2969_v7  ;;  %v2986_v33 = vadd.f32 1.1283791, %v2985_v31  ;;  %v3000_v3 = vsub.f32 1.0, %v2999_v56  ;;  %v3114_v32 = vmul.f32 %v3113_v55, %v7055_v22 }
 0x43c   : > { %v7168_v29 = vpop.eup %4321  ;;  %v2931_v38 = vsel %vm7123_vm3, %v2930_v54, %v2926_v9  ;;  %v3023_v42 = vmul.f32 %v3022_v15, %v6970_v17  ;;  %v3152_v7 = vmul.f32 %v3151_v37, %v7102_v62  ;;  %v3188_v43 = vmul.f32 3.8918573e-05, %v7165_v50 }
 0x43d   : > { %v2966_v45 = vsel %vm7176_vm8, %v7075_v60, %v2962_v52  ;;  %v3061_v54 = vmul.f32 %v3060_v30, %v7021_v26  ;;  %v3100_v47 = vadd.f32 0.0036580483, %v3099_v6  ;;  %v3138_v31 = vadd.f32 0.00028619796, %v3137_v14 }
 0x43e   : > { %v7187_v56 = vadd.f32 1.0, %v3076_v11  ;;  %v3153_v34 = vadd.f32 0.112945676, %v3152_v7  ;;  %v3189_v55 = vadd.f32 0.001143296, %v3188_v43  ;;  %v3215_v19 = vmul.f32 %v6520_v36, %v6520_v36 }
 0x43f   : > { %v7192_v9 = vmul.f32 %v2931_v38, %v7083_v48  ;;  %v3001_v37 = vmul.f32 %v7128_v18, %v3000_v3  ;;  %v3039_v15 = vmul.f32 %v7168_v29, %v7115_v10  ;;  %v3115_v60 = vadd.f32 0.4994258, %v3114_v32 }
 0x440   : > { %vm3003_vm9 = vweird.f32 %v7077_v59  ;;  %v3007_v52 = vand.u32 2147483647, %v7077_v59  ;;  %v3024_v30 = vadd.f32 0.18741608, %v3023_v42  ;;  %v3154_v6 = vmul.f32 %v3153_v34, %v7102_v62 }
 0x441   : > { %v2971_v14 = vsel %vm7160_vm7, %v2970_v46, %v2966_v45  ;;  %v3009_v11 = vand.u32 2147483648, %v7077_v59  ;;  %v3062_v48 = vadd.f32 0.05243302, %v3061_v54  ;;  %v3190_v38 = vmul.f32 %v3189_v55, %v7165_v50 }
 0x442   : > { %4323 = vrcp.f32 %v7187_v56  ;;  %v3101_v3 = vmul.f32 %v3100_v47, %v7055_v22  ;;  %v3139_v32 = vmul.f32 %v3138_v31, %v7102_v62  ;;  %v7207_v58 = vmin.f32 %v3215_v19, 16.0 }
 0x443   : > { %v3002_v42 = vadd.f32 %v7128_v18, %v3001_v37  ;;  %vm3004_vm10 = vweird.f32 %v7128_v18  ;;  %v3040_v7 = vsub.f32 1.0, %v3039_v15  ;;  %v3116_v0 = vmul.f32 %v3115_v60, %v7055_v22 }
 0x444   : > { %v3025_v43 = vmul.f32 %v3024_v30, %v6970_v17  ;;  %v3155_v45 = vadd.f32 0.4994258, %v3154_v6  ;;  %v3191_v54 = vadd.f32 0.014752088, %v3190_v38  ;;  %v7215_v34 = vmul.f32 %v2971_v14, %v7112_v1  ;;  %vm7225_vm12 = vmor %vm3003_vm9, %vm3004_vm10 }
 0x445   : > { %vm7217_vm11 = vcmp.eq.f32.partialorder %v3007_v52, 8.507059e+37  ;;  %v3010_v31 = vor.u32 1.1754944e-38, %v3009_v11  ;;  %v3063_v55 = vmul.f32 %v3062_v48, %v7021_v26  ;;  %v2987_v19 = vmul.f32 %v2986_v33, %v6482_v39 }
 0x446   : > { %v3102_v17 = vadd.f32 0.05243302, %v3101_v3  ;;  %v3140_v15 = vadd.f32 0.0036580483, %v3139_v32  ;;  %v3228_v1 = vmul.f32 3.8918573e-05, %v7207_v58  ;;  %v3006_v60 = vsel %vm7225_vm12, %v7128_v18, %v3002_v42 }
 0x447   : > { %v3041_v52 = vmul.f32 %v7168_v29, %v3040_v7  ;;  %v7234_v30 = vadd.f32 1.0, %v3116_v0  ;;  %v3177_v39 = vmul.f32 2.1237322e-06, %v7165_v50  ;;  %v3026_v59 = vadd.f32 1.1283791, %v3025_v43 }
 0x448   : > { %v7237_v33 = vpop.eup %4323  ;;  %v3156_v6 = vmul.f32 %v3155_v45, %v7102_v62  ;;  %v3192_v14 = vmul.f32 %v3191_v54, %v7165_v50  ;;  %v3229_v11 = vadd.f32 0.001143296, %v3228_v1  ;;  %vm3043_vm13 = vweird.f32 %v7115_v10 }
 0x449   : > { %v3047_v18 = vand.u32 2147483647, %v7115_v10  ;;  %v3064_v38 = vadd.f32 0.18741608, %v3063_v55  ;;  %v3011_v3 = vsel %vm7217_vm11, %v3010_v31, %v3006_v60  ;;  %vm3044_vm14 = vweird.f32 %v7168_v29 }
 0x44a   : > { %v3103_v32 = vmul.f32 %v3102_v17, %v7055_v22  ;;  %v3141_v42 = vmul.f32 %v3140_v15, %v7102_v62  ;;  %v3042_v7 = vadd.f32 %v7168_v29, %v3041_v52  ;;  %v3079_v0 = vmul.f32 %v7237_v33, %v7187_v56  ;;  %vm7270_vm0 = vmor %vm3043_vm13, %vm3044_vm14 }
 0x44b   : > { %4325 = vrcp.f32 %v7234_v30  ;;  %v3178_v43 = vadd.f32 0.00028619796, %v3177_v39  ;;  %v7253_v45 = vadd.f32 1.0, %v3156_v6  ;;  %v3193_v54 = vadd.f32 0.112945676, %v3192_v14 }
 0x44c   : > { %v3217_v47 = vmul.f32 2.1237322e-06, %v7207_v58  ;;  %v3230_v31 = vmul.f32 %v3229_v11, %v7207_v58  ;;  %vm7257_vm15 = vcmp.eq.f32.partialorder %v3047_v18, 8.507059e+37  ;;  %v3049_v37 = vand.u32 2147483648, %v7115_v10 }
 0x44d   : > { %v3065_v17 = vmul.f32 %v3064_v38, %v7021_v26  ;;  %v3255_v15 = vmul.f32 %v6523_v35, %v6523_v35  ;;  %v3027_v1 = vmul.f32 %v3026_v59, %v6495_v49  ;;  %v3104_v52 = vadd.f32 0.18741608, %v3103_v32 }
 0x44e   : > { %v3142_v39 = vadd.f32 0.05243302, %v3141_v42  ;;  %v3231_v6 = vadd.f32 0.014752088, %v3230_v31  ;;  %v7274_v14 = vmul.f32 %v3011_v3, %v2987_v19  ;;  %v3046_v26 = vsel %vm7270_vm0, %v7168_v29, %v3042_v7 }
 0x44f   : > { %v3080_v11 = vsub.f32 1.0, %v3079_v0  ;;  %v3179_v49 = vmul.f32 %v3178_v43, %v7165_v50  ;;  %4327 = vrcp.f32 %v7253_v45  ;;  %v3194_v10 = vmul.f32 %v3193_v54, %v7165_v50 }
 0x450   : > { %v3218_v59 = vadd.f32 0.00028619796, %v3217_v47  ;;  %v3232_v18 = vmul.f32 %v3231_v6, %v7207_v58  ;;  %v3050_v32 = vor.u32 1.1754944e-38, %v3049_v37  ;;  %v3066_v42 = vadd.f32 1.1283791, %v3065_v17 }
 0x451   : > { %v7283_v38 = vpop.eup %4325  ;;  %v3089_v19 = vand.u32 2147483648, %v7187_v56  ;;  %v7286_v3 = vmin.f32 %v3255_v15, 16.0  ;;  %v3087_v29 = vand.u32 2147483647, %v7187_v56  ;;  %v3105_v7 = vmul.f32 %v3104_v52, %v7055_v22 }
 0x452   : > { %v3143_v0 = vmul.f32 %v3142_v39, %v7102_v62  ;;  %v3233_v43 = vadd.f32 0.112945676, %v3232_v18  ;;  %v3051_v47 = vsel %vm7257_vm15, %v3050_v32, %v3046_v26  ;;  %v3081_v31 = vmul.f32 %v7237_v33, %v3080_v11 }
 0x453   : > { %v3180_v37 = vadd.f32 0.0036580483, %v3179_v49  ;;  %v3119_v17 = vmul.f32 %v7283_v38, %v7234_v30  ;;  %v3195_v15 = vadd.f32 0.4994258, %v3194_v10  ;;  %v3219_v60 = vmul.f32 %v3218_v59, %v7207_v58 }
 0x454   : > { %v3234_v6 = vmul.f32 %v3233_v43, %v7207_v58  ;;  %v3067_v22 = vmul.f32 %v3066_v42, %v6498_v61  ;;  %vm3083_vm2 = vweird.f32 %v7187_v56  ;;  %v3090_v52 = vor.u32 1.1754944e-38, %v3089_v19 }
 0x455   : > { %v3268_v39 = vmul.f32 3.8918573e-05, %v7286_v3  ;;  %v7302_v55 = vpop.eup %4327  ;;  %v7304_v26 = vmul.f32 %v3051_v47, %v3027_v1  ;;  %vm7306_vm3 = vcmp.eq.f32.partialorder %v3087_v29, 8.507059e+37  ;;  %v3106_v49 = vadd.f32 1.1283791, %v3105_v7 }
 0x456   : > { %v3144_v10 = vadd.f32 0.18741608, %v3143_v0  ;;  %v3295_v59 = vmul.f32 %v6527_v20, %v6527_v20  ;;  %vm3084_vm4 = vweird.f32 %v7237_v33  ;;  %v3181_v61 = vmul.f32 %v3180_v37, %v7165_v50 }
 0x457   : > { %v3235_v18 = vadd.f32 0.4994258, %v3234_v6  ;;  %v3269_v32 = vadd.f32 0.001143296, %v3268_v39  ;;  %v3082_v42 = vadd.f32 %v7237_v33, %v3081_v31  ;;  %v3120_v19 = vsub.f32 1.0, %v3119_v17  ;;  %vm7333_vm5 = vmor %vm3083_vm2, %vm3084_vm4 }
 0x458   : > { %v3196_v1 = vmul.f32 %v3195_v15, %v7165_v50  ;;  %v3220_v29 = vadd.f32 0.0036580483, %v3219_v60  ;;  %v3159_v43 = vmul.f32 %v7302_v55, %v7253_v45  ;;  %v3257_v7 = vmul.f32 2.1237322e-06, %v7286_v3 }
 0x459   : > { %v3270_v0 = vmul.f32 %v3269_v32, %v7286_v3  ;;  %v3335_v47 = vmul.f32 %v6530_v25, %v6530_v25  ;;  %v7324_v6 = vmul.f32 %v3106_v49, %v6505_v4  ;;  %v3145_v31 = vmul.f32 %v3144_v10, %v7102_v62 }
 0x45a   : > { %v7327_v17 = vmin.f32 %v3295_v59, 16.0  ;;  %v3127_v60 = vand.u32 2147483647, %v7234_v30  ;;  %v3182_v39 = vadd.f32 0.05243302, %v3181_v61  ;;  %v3236_v32 = vmul.f32 %v3235_v18, %v7207_v58 }
 0x45b   : > { %v3271_v37 = vadd.f32 0.014752088, %v3270_v0  ;;  %v3086_v4 = vsel %vm7333_vm5, %v7237_v33, %v3082_v42  ;;  %v3121_v62 = vmul.f32 %v7283_v38, %v3120_v19  ;;  %v7343_v49 = vadd.f32 1.0, %v3196_v1 }
 0x45c   : > { %v3221_v56 = vmul.f32 %v3220_v29, %v7207_v58  ;;  %v3129_v10 = vand.u32 2147483648, %v7234_v30  ;;  %v3160_v59 = vsub.f32 1.0, %v3159_v43  ;;  %v3258_v54 = vadd.f32 0.00028619796, %v3257_v7 }
 0x45d   : > { %v7347_v48 = vmin.f32 %v3335_v47, 16.0  ;;  %vm3123_vm6 = vweird.f32 %v7234_v30  ;;  %v3146_v61 = vadd.f32 1.1283791, %v3145_v31  ;;  %v3272_v18 = vmul.f32 %v3271_v37, %v7286_v3 }
 0x45e   : > { %v3308_v0 = vmul.f32 3.8918573e-05, %v7327_v17  ;;  %v3091_v33 = vsel %vm7306_vm3, %v3090_v52, %v3086_v4  ;;  %vm3124_vm7 = vweird.f32 %v7283_v38  ;;  %vm7355_vm8 = vcmp.eq.f32.partialorder %v3127_v60, 8.507059e+37 }
 0x45f   : > { %v3183_v19 = vmul.f32 %v3182_v39, %v7165_v50  ;;  %v7360_v1 = vadd.f32 1.0, %v3236_v32  ;;  %v3122_v29 = vadd.f32 %v7283_v38, %v3121_v62  ;;  %4329 = vrcp.f32 %v7343_v49  ;;  %vm7378_vm9 = vmor %vm3123_vm6, %vm3124_vm7 }
 0x460   : > { %v3222_v43 = vadd.f32 0.05243302, %v3221_v56  ;;  %v3309_v7 = vadd.f32 0.001143296, %v3308_v0  ;;  %v3130_v47 = vor.u32 1.1754944e-38, %v3129_v10  ;;  %v3161_v11 = vmul.f32 %v7302_v55, %v3160_v59 }
 0x461   : > { %v3259_v52 = vmul.f32 %v3258_v54, %v7286_v3  ;;  %v3348_v37 = vmul.f32 3.8918573e-05, %v7347_v48  ;;  %v7368_v31 = vmul.f32 %v3146_v61, %v6512_v8  ;;  %v3273_v15 = vadd.f32 0.112945676, %v3272_v18 }
 0x462   : > { %v3297_v60 = vmul.f32 2.1237322e-06, %v7327_v17  ;;  %v3310_v39 = vmul.f32 %v3309_v7, %v7327_v17  ;;  %v7372_v32 = vmul.f32 %v3091_v33, %v3067_v22  ;;  %vm3163_vm10 = vweird.f32 %v7253_v45 }
 0x463   : > { %v3184_v54 = vadd.f32 0.18741608, %v3183_v19  ;;  %4331 = vrcp.f32 %v7360_v1  ;;  %v3126_v8 = vsel %vm7378_vm9, %v7283_v38, %v3122_v29  ;;  %vm3164_vm11 = vweird.f32 %v7302_v55 }
 0x464   : > { %v3223_v22 = vmul.f32 %v3222_v43, %v7207_v58  ;;  %v3311_v62 = vadd.f32 0.014752088, %v3310_v39  ;;  %v3162_v30 = vadd.f32 %v7302_v55, %v3161_v11  ;;  %v3260_v56 = vadd.f32 0.0036580483, %v3259_v52  ;;  %vm7408_vm12 = vmor %vm3163_vm10, %vm3164_vm11 }
 0x465   : > { %v3349_v10 = vadd.f32 0.001143296, %v3348_v37  ;;  %v3375_v59 = vmul.f32 %v6539_v12, %v6539_v12  ;;  %v7392_v61 = vpop.eup %4329  ;;  %v3274_v18 = vmul.f32 %v3273_v15, %v7286_v3  ;;  %v3298_v0 = vadd.f32 0.00028619796, %v3297_v60 }
 0x466   : > { %v3312_v33 = vmul.f32 %v3311_v62, %v7327_v17  ;;  %v3337_v38 = vmul.f32 2.1237322e-06, %v7347_v48  ;;  %v3167_v19 = vand.u32 2147483647, %v7253_v45  ;;  %v3169_v29 = vand.u32 2147483648, %v7253_v45 }
 0x467   : > { %v3185_v43 = vmul.f32 %v3184_v54, %v7165_v50  ;;  %v3350_v7 = vmul.f32 %v3349_v10, %v7347_v48  ;;  %v3131_v52 = vsel %vm7355_vm8, %v3130_v47, %v3126_v8  ;;  %v3224_v15 = vadd.f32 0.18741608, %v3223_v22 }
 0x468   : > { %v3313_v60 = vadd.f32 0.112945676, %v3312_v33  ;;  %v3166_v50 = vsel %vm7408_vm12, %v7302_v55, %v3162_v30  ;;  %v3199_v42 = vmul.f32 %v7392_v61, %v7343_v49  ;;  %v3261_v47 = vmul.f32 %v3260_v56, %v7286_v3 }
 0x469   : > { %v7412_v39 = vpop.eup %4331  ;;  %v3351_v4 = vadd.f32 0.014752088, %v3350_v7  ;;  %v3275_v54 = vadd.f32 0.4994258, %v3274_v18  ;;  %v3299_v45 = vmul.f32 %v3298_v0, %v7327_v17  ;;  %v3338_v8 = vadd.f32 0.00028619796, %v3337_v38 }
 0x46a   : > { %v7421_v62 = vmin.f32 %v3375_v59, 16.0  ;;  %vm3168_vm13 = vcmp.eq.f32.partialorder %v3167_v19, 8.507059e+37  ;;  %v3170_v22 = vor.u32 1.1754944e-38, %v3169_v29  ;;  %v3186_v10 = vadd.f32 1.1283791, %v3185_v43 }
 0x46b   : > { %v3314_v33 = vmul.f32 %v3313_v60, %v7327_v17  ;;  %v7425_v37 = vmul.f32 %v3131_v52, %v7324_v6  ;;  %v3225_v55 = vmul.f32 %v3224_v15, %v7207_v58  ;;  %v3239_v30 = vmul.f32 %v7412_v39, %v7360_v1 }
 0x46c   : > { %v3352_v56 = vmul.f32 %v3351_v4, %v7347_v48  ;;  %v3171_v18 = vsel %vm3168_vm13, %v3170_v22, %v3166_v50  ;;  %v3200_v0 = vsub.f32 1.0, %v3199_v42  ;;  %v3207_v59 = vand.u32 2147483647, %v7343_v49 }
 0x46d   : > { %v3262_v38 = vadd.f32 0.05243302, %v3261_v47  ;;  %v3276_v19 = vmul.f32 %v3275_v54, %v7286_v3  ;;  %v3300_v29 = vadd.f32 0.0036580483, %v3299_v45  ;;  %v3339_v43 = vmul.f32 %v3338_v8, %v7347_v48  ;;  %v8645_v47 = vld [vmem:[#allocation12_spill] sm:$0xff] }
 0x46e   : > { %v3388_v6 = vmul.f32 3.8918573e-05, %v7421_v62  ;;  %v7436_v7 = vmul.f32 %v3186_v10, %v6517_v2  ;;  %v3209_v58 = vand.u32 2147483648, %v7343_v49  ;;  %v3315_v52 = vadd.f32 0.4994258, %v3314_v33 }
 0x46f   : > { %v3353_v15 = vadd.f32 0.112945676, %v3352_v56  ;;  %vm3203_vm14 = vweird.f32 %v7343_v49  ;;  %v3226_v60 = vadd.f32 1.1283791, %v3225_v55  ;;  %v3240_v50 = vsub.f32 1.0, %v3239_v30 }
 0x470   : > { %v3389_v42 = vadd.f32 0.001143296, %v3388_v6  ;;  %v3415_v4 = vmul.f32 %v8645_v47, %v8645_v47  ;;  %v7444_v45 = vmul.f32 %v3171_v18, %v7368_v31  ;;  %v3201_v2 = vmul.f32 %v7392_v61, %v3200_v0 }
 0x471   : > { %v3263_v8 = vmul.f32 %v3262_v38, %v7286_v3  ;;  %v7448_v22 = vadd.f32 1.0, %v3276_v19  ;;  %v3301_v10 = vmul.f32 %v3300_v29, %v7327_v17  ;;  %v3340_v33 = vadd.f32 0.0036580483, %v3339_v43 }
 0x472   : > { %v3390_v55 = vmul.f32 %v3389_v42, %v7421_v62  ;;  %v3210_v30 = vor.u32 1.1754944e-38, %v3209_v58  ;;  %v3316_v56 = vmul.f32 %v3315_v52, %v7327_v17  ;;  %v3354_v6 = vmul.f32 %v3353_v15, %v7347_v48 }
 0x473   : > { %v3377_v54 = vmul.f32 2.1237322e-06, %v7421_v62  ;;  %vm3204_vm15 = vweird.f32 %v7392_v61  ;;  %v7457_v31 = vmul.f32 %v3226_v60, %v6520_v36  ;;  %v3241_v18 = vmul.f32 %v7412_v39, %v3240_v50 }
 0x474   : > { %v7460_v0 = vmin.f32 %v3415_v4, 16.0  ;;  %v3202_v19 = vadd.f32 %v7392_v61, %v3201_v2  ;;  %vm7464_vm0 = vcmp.eq.f32.partialorder %v3207_v59, 8.507059e+37  ;;  %v3264_v43 = vadd.f32 0.18741608, %v3263_v8  ;;  %v8648_v8 = vld [vmem:[#allocation7_spill] sm:$0xff]  ;;  %vm7483_vm3 = vmor %vm3203_vm14, %vm3204_vm15 }
 0x475   : > { %v3391_v58 = vadd.f32 0.014752088, %v3390_v55  ;;  %vm3244_vm2 = vweird.f32 %v7412_v39  ;;  %4333 = vrcp.f32 %v7448_v22  ;;  %v3302_v36 = vadd.f32 0.05243302, %v3301_v10 }
 0x476   : > { %v3341_v52 = vmul.f32 %v3340_v33, %v7347_v48  ;;  %v7471_v15 = vadd.f32 1.0, %v3316_v56  ;;  %v3355_v60 = vadd.f32 0.4994258, %v3354_v6  ;;  %v3378_v50 = vadd.f32 0.00028619796, %v3377_v54 }
 0x477   : > { %v3392_v42 = vmul.f32 %v3391_v58, %v7421_v62  ;;  %v3242_v59 = vadd.f32 %v7412_v39, %v3241_v18  ;;  %v3417_v4 = vmul.f32 2.1237322e-06, %v7460_v0  ;;  %v3428_v2 = vmul.f32 3.8918573e-05, %v7460_v0 }
 0x478   : > { %v3455_v55 = vmul.f32 %v8648_v8, %v8648_v8  ;;  %v3247_v54 = vand.u32 2147483647, %v7360_v1  ;;  %v3249_v33 = vand.u32 2147483648, %v7360_v1  ;;  %v3265_v56 = vmul.f32 %v3264_v43, %v7286_v3 }
 0x479   : > { %v3393_v6 = vadd.f32 0.112945676, %v3392_v42  ;;  %v3206_v18 = vsel %vm7483_vm3, %v7392_v61, %v3202_v19  ;;  %vm3243_vm4 = vweird.f32 %v7360_v1  ;;  %v3303_v58 = vmul.f32 %v3302_v36, %v7327_v17 }
 0x47a   : > { %v3342_v49 = vadd.f32 0.05243302, %v3341_v52  ;;  %vm7497_vm5 = vmor %vm3243_vm4, %vm3244_vm2  ;;  %4335 = vrcp.f32 %v7471_v15  ;;  %v3356_v3 = vmul.f32 %v3355_v60, %v7347_v48  ;;  %v3379_v43 = vmul.f32 %v3378_v50, %v7421_v62 }
 0x47b   : > { %v3394_v42 = vmul.f32 %v3393_v6, %v7421_v62  ;;  %v7505_v61 = vpop.eup %4333  ;;  %v3246_v1 = vsel %vm7497_vm5, %v7412_v39, %v3242_v59  ;;  %v3418_v19 = vadd.f32 0.00028619796, %v3417_v4  ;;  %v3429_v36 = vadd.f32 0.001143296, %v3428_v2 }
 0x47c   : > { %v7510_v52 = vmin.f32 %v3455_v55, 16.0  ;;  %vm3248_vm6 = vcmp.eq.f32.partialorder %v3247_v54, 8.507059e+37  ;;  %v3250_v10 = vor.u32 1.1754944e-38, %v3249_v33  ;;  %v3266_v11 = vadd.f32 1.1283791, %v3265_v56  ;;  %v8653_v54 = vld [vmem:[#allocation16_spill] sm:$0xff] }
 0x47d   : > { %v3395_v46 = vadd.f32 0.4994258, %v3394_v42  ;;  %v3211_v60 = vsel %vm7464_vm0, %v3210_v30, %v3206_v18  ;;  %v3304_v50 = vadd.f32 0.18741608, %v3303_v58  ;;  %v3343_v6 = vmul.f32 %v3342_v49, %v7347_v48 }
 0x47e   : > { %v3430_v57 = vmul.f32 %v3429_v36, %v7460_v0  ;;  %v3251_v16 = vsel %vm3248_vm6, %v3250_v10, %v3246_v1  ;;  %v3279_v39 = vmul.f32 %v7505_v61, %v7448_v22  ;;  %v7518_v38 = vadd.f32 1.0, %v3356_v3 }
 0x47f   : > { %v3380_v59 = vadd.f32 0.0036580483, %v3379_v43  ;;  %v3419_v4 = vmul.f32 %v3418_v19, %v7460_v0  ;;  %v3457_v55 = vmul.f32 2.1237322e-06, %v7510_v52  ;;  %v3495_v30 = vmul.f32 %v8653_v54, %v8653_v54 }
 0x480   : > { %v3431_v2 = vadd.f32 0.014752088, %v3430_v57  ;;  %v7524_v29 = vpop.eup %4335  ;;  %v7527_v33 = vmul.f32 %v3211_v60, %v7436_v7  ;;  %v7530_v56 = vmul.f32 %v3266_v11, %v6523_v35  ;;  %v3396_v18 = vmul.f32 %v3395_v46, %v7421_v62 }
 0x481   : > { %v3468_v58 = vmul.f32 3.8918573e-05, %v7510_v52  ;;  %v3289_v49 = vand.u32 2147483648, %v7448_v22  ;;  %v3305_v57 = vmul.f32 %v3304_v50, %v7327_v17  ;;  %v3344_v3 = vadd.f32 0.18741608, %v3343_v6 }
 0x482   : > { %8654 = vst [vmem:[#allocation24_spill] sm:$0xff] %v7527_v33  ;;  %v3432_v43 = vmul.f32 %v3431_v2, %v7460_v0  ;;  %v7538_v42 = vmul.f32 %v3251_v16, %v7457_v31  ;;  %v3280_v1 = vsub.f32 1.0, %v3279_v39  ;;  %4337 = vrcp.f32 %v7518_v38 }
 0x483   : > { %v3381_v35 = vmul.f32 %v3380_v59, %v7421_v62  ;;  %v3319_v46 = vmul.f32 %v7524_v29, %v7471_v15  ;;  %v3420_v11 = vadd.f32 0.0036580483, %v3419_v4  ;;  %v3458_v7 = vadd.f32 0.00028619796, %v3457_v55 }
 0x484   : > { %8655 = vst [vmem:[#allocation28_spill] sm:$0xff] %v7538_v42  ;;  %v7544_v19 = vmin.f32 %v3495_v30, 16.0  ;;  %v7547_v36 = vadd.f32 1.0, %v3396_v18  ;;  %v3433_v10 = vadd.f32 0.112945676, %v3432_v43  ;;  %vm3283_vm7 = vweird.f32 %v7448_v22 }
 0x485   : > { %v3469_v60 = vadd.f32 0.001143296, %v3468_v58  ;;  %v3287_v16 = vand.u32 2147483647, %v7448_v22  ;;  %v3290_v31 = vor.u32 1.1754944e-38, %v3289_v49  ;;  %v3345_v50 = vmul.f32 %v3344_v3, %v7347_v48 }
 0x486   : > { %v3281_v6 = vmul.f32 %v7505_v61, %v3280_v1  ;;  %v3306_v39 = vadd.f32 1.1283791, %v3305_v57  ;;  %v3382_v59 = vadd.f32 0.05243302, %v3381_v35  ;;  %v3320_v55 = vsub.f32 1.0, %v3319_v46 }
 0x487   : > { %v3470_v4 = vmul.f32 %v3469_v60, %v7510_v52  ;;  %v3421_v30 = vmul.f32 %v3420_v11, %v7460_v0  ;;  %v3508_v18 = vmul.f32 3.8918573e-05, %v7544_v19  ;;  %4339 = vrcp.f32 %v7547_v36 }
 0x488   : > { %v7557_v58 = vpop.eup %4337  ;;  %v3434_v49 = vmul.f32 %v3433_v10, %v7460_v0  ;;  %v3459_v48 = vmul.f32 %v3458_v7, %v7510_v52  ;;  %vm3284_vm8 = vweird.f32 %v7505_v61  ;;  %vm7563_vm9 = vcmp.eq.f32.partialorder %v3287_v16, 8.507059e+37  ;;  %v8658_v10 = vld [vmem:[#allocation13_spill] sm:$0xff] }
 0x489   : > { %v3471_v3 = vadd.f32 0.014752088, %v3470_v4  ;;  %v3346_v43 = vadd.f32 1.1283791, %v3345_v50  ;;  %v3497_v1 = vmul.f32 2.1237322e-06, %v7544_v19  ;;  %v3282_v46 = vadd.f32 %v7505_v61, %v3281_v6  ;;  %vm7585_vm10 = vmor %vm3283_vm7, %vm3284_vm8 }
 0x48a   : > { %v3509_v35 = vadd.f32 0.001143296, %v3508_v18  ;;  %v3383_v11 = vmul.f32 %v3382_v59, %v7421_v62  ;;  %v3535_v7 = vmul.f32 %v8658_v10, %v8658_v10  ;;  %v3321_v4 = vmul.f32 %v7524_v29, %v3320_v55 }
 0x48b   : > { %v3472_v60 = vmul.f32 %v3471_v3, %v7510_v52  ;;  %v3359_v16 = vmul.f32 %v7557_v58, %v7518_v38  ;;  %v3422_v2 = vadd.f32 0.05243302, %v3421_v30  ;;  %v7578_v17 = vmul.f32 %v3306_v39, %v6527_v20 }
 0x48c   : > { %v3510_v50 = vmul.f32 %v3509_v35, %v7544_v19  ;;  %v3327_v6 = vand.u32 2147483647, %v7471_v15  ;;  %v3435_v18 = vadd.f32 0.4994258, %v3434_v49  ;;  %v3460_v59 = vadd.f32 0.0036580483, %v3459_v48 }
 0x48d   : > { %vm3323_vm11 = vweird.f32 %v7471_v15  ;;  %v3329_v55 = vand.u32 2147483648, %v7471_v15  ;;  %v3473_v30 = vadd.f32 0.112945676, %v3472_v60  ;;  %v3498_v35 = vadd.f32 0.00028619796, %v3497_v1  ;;  %v7591_v20 = vpop.eup %4339 }
 0x48e   : > { %v3286_v39 = vsel %vm7585_vm10, %v7505_v61, %v3282_v46  ;;  %v3384_v49 = vadd.f32 0.18741608, %v3383_v11  ;;  %v3511_v48 = vadd.f32 0.014752088, %v3510_v50  ;;  %v7596_v41 = vmin.f32 %v3535_v7, 16.0 }
 0x48f   : > { %v3322_v22 = vadd.f32 %v7524_v29, %v3321_v4  ;;  %vm3324_vm12 = vweird.f32 %v7524_v29  ;;  %v3360_v24 = vsub.f32 1.0, %v3359_v16  ;;  %v3423_v53 = vmul.f32 %v3422_v2, %v7460_v0 }
 0x490   : > { %vm7601_vm13 = vcmp.eq.f32.partialorder %v3327_v6, 8.507059e+37  ;;  %v7606_v1 = vmul.f32 %v3346_v43, %v6530_v25  ;;  %v3436_v61 = vmul.f32 %v3435_v18, %v7460_v0  ;;  %v3461_v46 = vmul.f32 %v3460_v59, %v7510_v52  ;;  %vm7618_vm14 = vmor %vm3323_vm11, %vm3324_vm12 }
 0x491   : > { %v3330_v11 = vor.u32 1.1754944e-38, %v3329_v55  ;;  %v3399_v7 = vmul.f32 %v7591_v20, %v7547_v36  ;;  %v3474_v4 = vmul.f32 %v3473_v30, %v7510_v52  ;;  %v3499_v16 = vmul.f32 %v3498_v35, %v7544_v19  ;;  %v8665_v30 = vld [vmem:[#allocation17_spill] sm:$0xff] }
 0x492   : > { %v3291_v2 = vsel %vm7563_vm9, %v3290_v31, %v3286_v39  ;;  %vm3363_vm15 = vweird.f32 %v7518_v38  ;;  %v3367_v43 = vand.u32 2147483647, %v7518_v38  ;;  %v3512_v50 = vmul.f32 %v3511_v48, %v7544_v19 }
 0x493   : > { %v3548_v6 = vmul.f32 3.8918573e-05, %v7596_v41  ;;  %v3326_v18 = vsel %vm7618_vm14, %v7524_v29, %v3322_v22  ;;  %v3361_v31 = vmul.f32 %v7557_v58, %v3360_v24  ;;  %v3385_v15 = vmul.f32 %v3384_v49, %v7421_v62 }
 0x494   : > { %v3424_v57 = vadd.f32 0.18741608, %v3423_v53  ;;  %v7631_v59 = vadd.f32 1.0, %v3436_v61  ;;  %v3462_v3 = vadd.f32 0.05243302, %v3461_v46  ;;  %v3575_v35 = vmul.f32 %v8665_v30, %v8665_v30 }
 0x495   : > { %v3549_v55 = vadd.f32 0.001143296, %v3548_v6  ;;  %v3369_v39 = vand.u32 2147483648, %v7518_v38  ;;  %v3400_v48 = vsub.f32 1.0, %v3399_v7  ;;  %v3475_v42 = vadd.f32 0.4994258, %v3474_v4 }
 0x496   : > { %v3500_v33 = vadd.f32 0.0036580483, %v3499_v16  ;;  %v7637_v25 = vmul.f32 %v3291_v2, %v7530_v56  ;;  %v3513_v29 = vadd.f32 0.112945676, %v3512_v50  ;;  %v3537_v24 = vmul.f32 2.1237322e-06, %v7596_v41 }
 0x497   : > { %v3550_v53 = vmul.f32 %v3549_v55, %v7596_v41  ;;  %v3331_v62 = vsel %vm7601_vm13, %v3330_v11, %v3326_v18  ;;  %vm3364_vm0 = vweird.f32 %v7557_v58  ;;  %v3386_v49 = vadd.f32 1.1283791, %v3385_v15 }
 0x498   : > { %v3425_v22 = vmul.f32 %v3424_v57, %v7460_v0  ;;  %v3362_v61 = vadd.f32 %v7557_v58, %v3361_v31  ;;  %4341 = vrcp.f32 %v7631_v59  ;;  %v3463_v56 = vmul.f32 %v3462_v3, %v7510_v52  ;;  %vm7666_vm3 = vmor %vm3363_vm15, %vm3364_vm0 }
 0x499   : > { %v7648_v46 = vmin.f32 %v3575_v35, 16.0  ;;  %v3401_v7 = vmul.f32 %v7591_v20, %v3400_v48  ;;  %v3476_v4 = vmul.f32 %v3475_v42, %v7510_v52  ;;  %v3501_v60 = vmul.f32 %v3500_v33, %v7544_v19 }
 0x49a   : > { %v3551_v11 = vadd.f32 0.014752088, %v3550_v53  ;;  %vm7653_vm2 = vcmp.eq.f32.partialorder %v3367_v43, 8.507059e+37  ;;  %v3370_v0 = vor.u32 1.1754944e-38, %v3369_v39  ;;  %v3514_v2 = vmul.f32 %v3513_v29, %v7544_v19 }
 0x49b   : > { %v3538_v50 = vadd.f32 0.00028619796, %v3537_v24  ;;  %v7660_v18 = vmul.f32 %v3331_v62, %v7578_v17  ;;  %v3426_v42 = vadd.f32 1.1283791, %v3425_v22  ;;  %v3366_v31 = vsel %vm7666_vm3, %v7557_v58, %v3362_v61 }
 0x49c   : > { %v3552_v43 = vmul.f32 %v3551_v11, %v7596_v41  ;;  %v3387_v15 = vmul.f32 %v3386_v49, %v6539_v12  ;;  %v3464_v57 = vadd.f32 0.18741608, %v3463_v56  ;;  %v3588_v17 = vmul.f32 3.8918573e-05, %v7648_v46  ;;  %v8672_v56 = vld [vmem:[#allocation20_spill] sm:$0xff] }
 0x49d   : > { %v3402_v3 = vadd.f32 %v7591_v20, %v3401_v7  ;;  %vm3404_vm4 = vweird.f32 %v7591_v20  ;;  %v7678_v38 = vadd.f32 1.0, %v3476_v4  ;;  %v3502_v55 = vadd.f32 0.05243302, %v3501_v60 }
 0x49e   : > { %v7680_v35 = vpop.eup %4341  ;;  %vm3403_vm5 = vweird.f32 %v7547_v36  ;;  %v3407_v39 = vand.u32 2147483647, %v7547_v36  ;;  %v3515_v48 = vadd.f32 0.4994258, %v3514_v2  ;;  %v3539_v58 = vmul.f32 %v3538_v50, %v7596_v41 }
 0x49f   : > { %v3409_v29 = vand.u32 2147483648, %v7547_v36  ;;  %v7688_v24 = vmul.f32 %v3426_v42, %v8645_v47  ;;  %v3553_v53 = vadd.f32 0.112945676, %v3552_v43  ;;  %v3371_v62 = vsel %vm7653_vm2, %v3370_v0, %v3366_v31  ;;  %vm7692_vm6 = vmor %vm3403_vm5, %vm3404_vm4  ;;  %v8674_v43 = vld [vmem:[#allocation21_spill] sm:$0xff] }
 0x4a0   : > { %v3465_v22 = vmul.f32 %v3464_v57, %v7510_v52  ;;  %v3589_v61 = vadd.f32 0.001143296, %v3588_v17  ;;  %v3615_v7 = vmul.f32 %v8672_v56, %v8672_v56  ;;  %v3406_v36 = vsel %vm7692_vm6, %v7591_v20, %v3402_v3 }
 0x4a1   : > { %v3439_v47 = vmul.f32 %v7680_v35, %v7631_v59  ;;  %4343 = vrcp.f32 %v7678_v38  ;;  %v3503_v4 = vmul.f32 %v3502_v55, %v7544_v19  ;;  %v3516_v60 = vmul.f32 %v3515_v48, %v7544_v19 }
 0x4a2   : > { %v3540_v11 = vadd.f32 0.0036580483, %v3539_v58  ;;  %v3590_v52 = vmul.f32 %v3589_v61, %v7648_v46  ;;  %v7708_v16 = vmin.f32 %v3615_v7, 16.0  ;;  %v7711_v0 = vmul.f32 %v3371_v62, %v7606_v1 }
 0x4a3   : > { %vm3408_vm7 = vcmp.eq.f32.partialorder %v3407_v39, 8.507059e+37  ;;  %v3410_v2 = vor.u32 1.1754944e-38, %v3409_v29  ;;  %v3554_v20 = vmul.f32 %v3553_v53, %v7596_v41  ;;  %v3449_v50 = vand.u32 2147483648, %v7631_v59 }
 0x4a4   : > { %8673 = vst [vmem:[#allocation30_spill] sm:$0xff] %v7711_v0  ;;  %v3466_v33 = vadd.f32 1.1283791, %v3465_v22  ;;  %v3591_v42 = vadd.f32 0.014752088, %v3590_v52  ;;  %v3655_v31 = vmul.f32 %v8674_v43, %v8674_v43  ;;  %v3440_v17 = vsub.f32 1.0, %v3439_v47 }
 0x4a5   : > { %v3411_v57 = vsel %vm3408_vm7, %v3410_v2, %v3406_v36  ;;  %v3504_v3 = vadd.f32 0.18741608, %v3503_v4  ;;  %v3628_v55 = vmul.f32 3.8918573e-05, %v7708_v16  ;;  %v7718_v48 = vadd.f32 1.0, %v3516_v60 }
 0x4a6   : > { %v3541_v1 = vmul.f32 %v3540_v11, %v7596_v41  ;;  %v3577_v39 = vmul.f32 2.1237322e-06, %v7648_v46  ;;  %v3592_v58 = vmul.f32 %v3591_v42, %v7648_v46  ;;  %vm3443_vm8 = vweird.f32 %v7631_v59 }
 0x4a7   : > { %v7723_v29 = vpop.eup %4343  ;;  %v3447_v62 = vand.u32 2147483647, %v7631_v59  ;;  %v3555_v49 = vadd.f32 0.4994258, %v3554_v20  ;;  %v7728_v22 = vmul.f32 %v3411_v57, %v3387_v15  ;;  %v3450_v61 = vor.u32 1.1754944e-38, %v3449_v50 }
 0x4a8   : > { %v7731_v7 = vmul.f32 %v3466_v33, %v8648_v8  ;;  %v7733_v36 = vmin.f32 %v3655_v31, 16.0  ;;  %v3441_v47 = vmul.f32 %v7680_v35, %v3440_v17  ;;  %v3505_v4 = vmul.f32 %v3504_v3, %v7544_v19 }
 0x4a9   : > { %8675 = vst [vmem:[#allocation31_spill] sm:$0xff] %v7728_v22  ;;  %v3593_v60 = vadd.f32 0.112945676, %v3592_v58  ;;  %v3629_v11 = vadd.f32 0.001143296, %v3628_v55  ;;  %v3479_v52 = vmul.f32 %v7723_v29, %v7678_v38  ;;  %4345 = vrcp.f32 %v7718_v48 }
 0x4aa   : > { %v3542_v2 = vadd.f32 0.05243302, %v3541_v1  ;;  %v3578_v15 = vadd.f32 0.00028619796, %v3577_v39  ;;  %v3556_v20 = vmul.f32 %v3555_v49, %v7596_v41  ;;  %v3617_v50 = vmul.f32 2.1237322e-06, %v7708_v16 }
 0x4ab   : > { %v3594_v8 = vmul.f32 %v3593_v60, %v7648_v46  ;;  %v3630_v33 = vmul.f32 %v3629_v11, %v7708_v16  ;;  %vm3444_vm9 = vweird.f32 %v7680_v35  ;;  %vm7745_vm10 = vcmp.eq.f32.partialorder %v3447_v62, 8.507059e+37 }
 0x4ac   : > { %v3489_v42 = vand.u32 2147483648, %v7678_v38  ;;  %v3657_v31 = vmul.f32 2.1237322e-06, %v7733_v36  ;;  %v3668_v57 = vmul.f32 3.8918573e-05, %v7733_v36  ;;  %v3442_v17 = vadd.f32 %v7680_v35, %v3441_v47  ;;  %vm7766_vm11 = vmor %vm3443_vm8, %vm3444_vm9 }
 0x4ad   : > { %v3506_v3 = vadd.f32 1.1283791, %v3505_v4  ;;  %v3595_v55 = vadd.f32 0.4994258, %v3594_v8  ;;  %v3631_v1 = vadd.f32 0.014752088, %v3630_v33  ;;  %v3579_v62 = vmul.f32 %v3578_v15, %v7648_v46 }
 0x4ae   : > { %v3480_v58 = vsub.f32 1.0, %v3479_v52  ;;  %v3487_v49 = vand.u32 2147483647, %v7678_v38  ;;  %v3543_v60 = vmul.f32 %v3542_v2, %v7596_v41  ;;  %v7757_v11 = vadd.f32 1.0, %v3556_v20  ;;  %v8680_v15 = vld [vmem:[#allocation19_spill] sm:$0xff] }
 0x4af   : > { %v3618_v53 = vadd.f32 0.00028619796, %v3617_v50  ;;  %v3632_v12 = vmul.f32 %v3631_v1, %v7708_v16  ;;  %v7760_v6 = vpop.eup %4345  ;;  %vm3483_vm12 = vweird.f32 %v7678_v38  ;;  %v3596_v4 = vmul.f32 %v3595_v55, %v7648_v46 }
 0x4b0   : > { %v3658_v52 = vadd.f32 0.00028619796, %v3657_v31  ;;  %v3669_v2 = vadd.f32 0.001143296, %v3668_v57  ;;  %v3695_v20 = vmul.f32 %v8680_v15, %v8680_v15  ;;  %v3446_v8 = vsel %vm7766_vm11, %v7680_v35, %v3442_v17 }
 0x4b1   : > { %v3490_v50 = vor.u32 1.1754944e-38, %v3489_v42  ;;  %v7778_v59 = vmul.f32 %v3506_v3, %v8653_v54  ;;  %v3633_v33 = vadd.f32 0.112945676, %v3632_v12  ;;  %v3481_v1 = vmul.f32 %v7723_v29, %v3480_v58 }
 0x4b2   : > { %v3580_v39 = vadd.f32 0.0036580483, %v3579_v62  ;;  %v3670_v22 = vmul.f32 %v3669_v2, %v7733_v36  ;;  %v7782_v55 = vmin.f32 %v3695_v20, 16.0  ;;  %v3519_v31 = vmul.f32 %v7760_v6, %v7718_v48 }
 0x4b3   : > { %v3529_v57 = vand.u32 2147483648, %v7718_v48  ;;  %v3544_v0 = vadd.f32 0.18741608, %v3543_v60  ;;  %4347 = vrcp.f32 %v7757_v11  ;;  %vm7788_vm13 = vcmp.eq.f32.partialorder %v3487_v49, 8.507059e+37  ;;  %v8683_v60 = vld [vmem:[#allocation29_spill] sm:$0xff] }
 0x4b4   : > { %v7792_v54 = vadd.f32 1.0, %v3596_v4  ;;  %v3619_v12 = vmul.f32 %v3618_v53, %v7708_v16  ;;  %v3634_v42 = vmul.f32 %v3633_v33, %v7708_v16  ;;  %v3659_v17 = vmul.f32 %v3658_v52, %v7733_v36 }
 0x4b5   : > { %v3451_v3 = vsel %vm7745_vm10, %v3450_v61, %v3446_v8  ;;  %v3671_v58 = vadd.f32 0.014752088, %v3670_v22  ;;  %v3697_v62 = vmul.f32 2.1237322e-06, %v7782_v55  ;;  %v3735_v49 = vmul.f32 %v8683_v60, %v8683_v60 }
 0x4b6   : > { %v3482_v47 = vadd.f32 %v7723_v29, %v3481_v1  ;;  %vm3484_vm14 = vweird.f32 %v7723_v29  ;;  %v3581_v4 = vmul.f32 %v3580_v39, %v7648_v46  ;;  %v3635_v53 = vadd.f32 0.4994258, %v3634_v42 }
 0x4b7   : > { %v3520_v2 = vsub.f32 1.0, %v3519_v31  ;;  %v3672_v20 = vmul.f32 %v3671_v58, %v7733_v36  ;;  %v3698_v52 = vadd.f32 0.00028619796, %v3697_v62  ;;  %v3708_v19 = vmul.f32 3.8918573e-05, %v7782_v55  ;;  %vm7813_vm15 = vmor %vm3483_vm12, %vm3484_vm14 }
 0x4b8   : > { %4349 = vrcp.f32 %v7792_v54  ;;  %v3620_v22 = vadd.f32 0.0036580483, %v3619_v12  ;;  %v3636_v61 = vmul.f32 %v3635_v53, %v7708_v16  ;;  %v3660_v8 = vadd.f32 0.0036580483, %v3659_v17 }
 0x4b9   : > { %v7809_v33 = vpop.eup %4347  ;;  %v3545_v39 = vmul.f32 %v3544_v0, %v7596_v41  ;;  %v3673_v31 = vadd.f32 0.112945676, %v3672_v20  ;;  %v3709_v42 = vadd.f32 0.001143296, %v3708_v19  ;;  %v7818_v58 = vmin.f32 %v3735_v49, 16.0 }
 0x4ba   : > { %v7821_v62 = vmul.f32 %v3451_v3, %v7688_v24  ;;  %v3486_v12 = vsel %vm7813_vm15, %v7723_v29, %v3482_v47  ;;  %v3527_v17 = vand.u32 2147483647, %v7718_v48  ;;  %v3699_v38 = vmul.f32 %v3698_v52, %v7782_v55 }
 0x4bb   : > { %vm3523_vm0 = vweird.f32 %v7718_v48  ;;  %v3530_v53 = vor.u32 1.1754944e-38, %v3529_v57  ;;  %v3582_v60 = vadd.f32 0.05243302, %v3581_v4  ;;  %v7829_v41 = vadd.f32 1.0, %v3636_v61 }
 0x4bc   : > { %8686 = vst [vmem:[#allocation43_spill] sm:$0xff] %v7821_v62  ;;  %v3674_v0 = vmul.f32 %v3673_v31, %v7733_v36  ;;  %v3521_v49 = vmul.f32 %v7760_v6, %v3520_v2  ;;  %v3559_v24 = vmul.f32 %v7809_v33, %v7757_v11  ;;  %v3621_v3 = vmul.f32 %v3620_v22, %v7708_v16 }
 0x4bd   : > { %v3710_v29 = vmul.f32 %v3709_v42, %v7782_v55  ;;  %v3491_v47 = vsel %vm7788_vm13, %v3490_v50, %v3486_v12  ;;  %v3546_v20 = vadd.f32 1.1283791, %v3545_v39  ;;  %v3661_v57 = vmul.f32 %v3660_v8, %v7733_v36 }
 0x4be   : > { %v3748_v4 = vmul.f32 3.8918573e-05, %v7818_v58  ;;  %v7841_v52 = vpop.eup %4349  ;;  %4351 = vrcp.f32 %v7829_v41  ;;  %v3675_v2 = vadd.f32 0.4994258, %v3674_v0  ;;  %v3700_v19 = vadd.f32 0.0036580483, %v3699_v38 }
 0x4bf   : > { %v3737_v61 = vmul.f32 2.1237322e-06, %v7818_v58  ;;  %vm3524_vm2 = vweird.f32 %v7760_v6  ;;  %vm7847_vm3 = vcmp.eq.f32.partialorder %v3527_v17, 8.507059e+37  ;;  %v3583_v50 = vmul.f32 %v3582_v60, %v7648_v46 }
 0x4c0   : > { %v3711_v8 = vadd.f32 0.014752088, %v3710_v29  ;;  %v7853_v1 = vmul.f32 %v3491_v47, %v7731_v7  ;;  %v3522_v39 = vadd.f32 %v7760_v6, %v3521_v49  ;;  %v3560_v31 = vsub.f32 1.0, %v3559_v24  ;;  %vm7873_vm4 = vmor %vm3523_vm0, %vm3524_vm2 }
 0x4c1   : > { %v3622_v42 = vadd.f32 0.05243302, %v3621_v3  ;;  %v3599_v12 = vmul.f32 %v7841_v52, %v7792_v54  ;;  %v3662_v38 = vadd.f32 0.05243302, %v3661_v57  ;;  %v3749_v17 = vadd.f32 0.001143296, %v3748_v4 }
 0x4c2   : > { %8689 = vst [vmem:[#allocation4_spill] sm:$0xff] %v7853_v1  ;;  %v3712_v0 = vmul.f32 %v3711_v8, %v7782_v55  ;;  %v7860_v22 = vmul.f32 %v3546_v20, %v8658_v10  ;;  %v3676_v60 = vmul.f32 %v3675_v2, %v7733_v36  ;;  %v3701_v29 = vmul.f32 %v3700_v19, %v7782_v55 }
 0x4c3   : > { %v3738_v7 = vadd.f32 0.00028619796, %v3737_v61  ;;  %v3569_v47 = vand.u32 2147483648, %v7757_v11  ;;  %v3584_v49 = vadd.f32 0.18741608, %v3583_v50  ;;  %v3750_v3 = vmul.f32 %v3749_v17, %v7818_v58 }
 0x4c4   : > { %v3713_v24 = vadd.f32 0.112945676, %v3712_v0  ;;  %v7866_v62 = vpop.eup %4351  ;;  %vm3563_vm5 = vweird.f32 %v7757_v11  ;;  %v3567_v20 = vand.u32 2147483647, %v7757_v11  ;;  %v3623_v4 = vmul.f32 %v3622_v42, %v7708_v16 }
 0x4c5   : > { %v3526_v2 = vsel %vm7873_vm4, %v7760_v6, %v3522_v39  ;;  %v3561_v19 = vmul.f32 %v7809_v33, %v3560_v31  ;;  %v3600_v61 = vsub.f32 1.0, %v3599_v12  ;;  %v3663_v50 = vmul.f32 %v3662_v38, %v7733_v36 }
 0x4c6   : > { %v7885_v48 = vadd.f32 1.0, %v3676_v60  ;;  %v3702_v8 = vadd.f32 0.05243302, %v3701_v29  ;;  %v3714_v0 = vmul.f32 %v3713_v24, %v7782_v55  ;;  %v3739_v17 = vmul.f32 %v3738_v7, %v7818_v58 }
 0x4c7   : > { %v3570_v57 = vor.u32 1.1754944e-38, %v3569_v47  ;;  %v3585_v1 = vmul.f32 %v3584_v49, %v7648_v46  ;;  %v3639_v42 = vmul.f32 %v7866_v62, %v7829_v41  ;;  %v3751_v10 = vadd.f32 0.014752088, %v3750_v3 }
 0x4c8   : > { %v3531_v6 = vsel %vm7847_vm3, %v3530_v53, %v3526_v2  ;;  %vm3564_vm6 = vweird.f32 %v7809_v33  ;;  %vm7895_vm7 = vcmp.eq.f32.partialorder %v3567_v20, 8.507059e+37  ;;  %v3624_v31 = vadd.f32 0.18741608, %v3623_v4 }
 0x4c9   : > { %v3715_v12 = vadd.f32 0.4994258, %v3714_v0  ;;  %v3562_v38 = vadd.f32 %v7809_v33, %v3561_v19  ;;  %v3601_v60 = vmul.f32 %v7841_v52, %v3600_v61  ;;  %v3664_v46 = vadd.f32 0.18741608, %v3663_v50  ;;  %vm7912_vm8 = vmor %vm3563_vm5, %vm3564_vm6 }
 0x4ca   : > { %v3752_v29 = vmul.f32 %v3751_v10, %v7818_v58  ;;  %4353 = vrcp.f32 %v7885_v48  ;;  %v3703_v35 = vmul.f32 %v3702_v8, %v7782_v55  ;;  %v3740_v7 = vadd.f32 0.0036580483, %v3739_v17 }
 0x4cb   : > { %v3716_v53 = vmul.f32 %v3715_v12, %v7782_v55  ;;  %v7906_v47 = vmul.f32 %v3531_v6, %v7778_v59  ;;  %v3586_v49 = vadd.f32 1.1283791, %v3585_v1  ;;  %v3640_v24 = vsub.f32 1.0, %v3639_v42 }
 0x4cc   : > { %v3753_v3 = vadd.f32 0.112945676, %v3752_v29  ;;  %v3607_v4 = vand.u32 2147483647, %v7792_v54  ;;  %v3609_v2 = vand.u32 2147483648, %v7792_v54  ;;  %v3625_v19 = vmul.f32 %v3624_v31, %v7708_v16 }
 0x4cd   : > { %v7919_v61 = vadd.f32 1.0, %v3716_v53  ;;  %v3566_v59 = vsel %vm7912_vm8, %v7809_v33, %v3562_v38  ;;  %v3602_v1 = vadd.f32 %v7841_v52, %v3601_v60  ;;  %vm3604_vm9 = vweird.f32 %v7841_v52 }
 0x4ce   : > { %v3754_v11 = vmul.f32 %v3753_v3, %v7818_v58  ;;  %v3665_v50 = vmul.f32 %v3664_v46, %v7733_v36  ;;  %v3704_v8 = vadd.f32 0.18741608, %v3703_v35  ;;  %v3741_v0 = vmul.f32 %v3740_v7, %v7818_v58 }
 0x4cf   : > { %4355 = vrcp.f32 %v7919_v61  ;;  %v3587_v16 = vmul.f32 %v3586_v49, %v8665_v30  ;;  %vm3603_vm10 = vweird.f32 %v7792_v54  ;;  %v3641_v17 = vmul.f32 %v7866_v62, %v3640_v24 }
 0x4d0   : > { %v3755_v33 = vadd.f32 0.4994258, %v3754_v11  ;;  %v7933_v42 = vpop.eup %4353  ;;  %v4265_v10 = vclamps-f32 %v7906_v47, 1.0  ;;  %vm7936_vm11 = vmor %vm3603_vm10, %vm3604_vm9  ;;  %vm7940_vm12 = vcmp.eq.f32.partialorder %v3607_v4, 8.507059e+37  ;;  %v3610_v31 = vor.u32 1.1754944e-38, %v3609_v2 }
 0x4d1   : > { %v3626_v12 = vadd.f32 1.1283791, %v3625_v19  ;;  %v3571_v30 = vsel %vm7895_vm7, %v3570_v57, %v3566_v59  ;;  %v3606_v54 = vsel %vm7936_vm11, %v7841_v52, %v3602_v1  ;;  %v3647_v38 = vand.u32 2147483647, %v7829_v41 }
 0x4d2   : > { %v3756_v60 = vmul.f32 %v3755_v33, %v7818_v58  ;;  %v3649_v46 = vand.u32 2147483648, %v7829_v41  ;;  %v3666_v29 = vadd.f32 1.1283791, %v3665_v50  ;;  %v3705_v35 = vmul.f32 %v3704_v8, %v7782_v55 }
 0x4d3   : > { %v3742_v53 = vadd.f32 0.05243302, %v3741_v0  ;;  %v3642_v7 = vadd.f32 %v7866_v62, %v3641_v17  ;;  %vm3644_vm13 = vweird.f32 %v7866_v62  ;;  %v3679_v57 = vmul.f32 %v7933_v42, %v7885_v48 }
 0x4d4   : > { %v7957_v39 = vadd.f32 1.0, %v3756_v60  ;;  %v7962_v49 = vmul.f32 %v3571_v30, %v7860_v22  ;;  %v3611_v24 = vsel %vm7940_vm12, %v3610_v31, %v3606_v54  ;;  %v7967_v55 = vmul.f32 %v3626_v12, %v8672_v56 }
 0x4d5   : > { %v7959_v52 = vpop.eup %4355  ;;  %v3689_v3 = vand.u32 2147483648, %v7885_v48  ;;  %vm3643_vm14 = vweird.f32 %v7829_v41  ;;  %vm7971_vm15 = vcmp.eq.f32.partialorder %v3647_v38, 8.507059e+37  ;;  %v3650_v2 = vor.u32 1.1754944e-38, %v3649_v46 }
 0x4d6   : > { %v3719_v4 = vmul.f32 %v7959_v52, %v7919_v61  ;;  %4357 = vrcp.f32 %v7957_v39  ;;  %vm7978_vm0 = vmor %vm3643_vm14, %vm3644_vm13  ;;  %v7983_v56 = vmul.f32 %v3666_v29, %v8674_v43  ;;  %v3706_v19 = vadd.f32 1.1283791, %v3705_v35  ;;  %v8711_v35 = vld [vmem:[#allocation39_spill] sm:$0xff] }
 0x4d7   : > { %v3743_v41 = vmul.f32 %v3742_v53, %v7818_v58  ;;  %v7987_v59 = vmul.f32 %v3611_v24, %v3587_v16  ;;  %v3646_v1 = vsel %vm7978_vm0, %v7866_v62, %v3642_v7  ;;  %v3680_v11 = vsub.f32 1.0, %v3679_v57  ;;  %v8713_v57 = vld [vmem:[#allocation40_spill] sm:$0xff] }
 0x4d8   : > { %v8704_v50 = vclamps-f32 %v6770_v5, 1.0  ;;  %v3687_v0 = vand.u32 2147483647, %v7885_v48  ;;  %v7995_v17 = vor.u32 1.1754944e-38, %v3689_v3  ;;  %v8705_v43 = vclamps-f32 %v6773_v51, 1.0  ;;  %v8714_v3 = vld [vmem:[#allocation23_spill] sm:$0xff] }
 0x4d9   : > { %v8706_v6 = vclamps-f32 %v6784_v44, 1.0  ;;  %vm3683_vm2 = vweird.f32 %v7885_v48  ;;  %vm3684_vm3 = vweird.f32 %v7933_v42  ;;  %v3720_v16 = vsub.f32 1.0, %v3719_v4 }
 0x4da   : > { %v3775_v8 = vadd.f32 1.0, %v8704_v50  ;;  %v3776_v33 = vadd.f32 1.0, %v8705_v43  ;;  %v8707_v62 = vclamps-f32 %v6809_v63, 1.0  ;;  %v8708_v5 = vclamps-f32 %v6895_v28, 1.0  ;;  %vm8080_vm8 = vmor %vm3683_vm2, %vm3684_vm3 }
 0x4db   : > { %v3777_v36 = vadd.f32 1.0, %v8706_v6  ;;  %v8014_v51 = vsel %vm7971_vm15, %v3650_v2, %v3646_v1  ;;  %v8017_v44 = vmul.f32 %v3706_v19, %v8680_v15  ;;  %v3744_v30 = vadd.f32 0.18741608, %v3743_v41  ;;  %v8716_v2 = vld [vmem:[#allocation41_spill] sm:$0xff]  ;;  %v8717_v41 = vld [vmem:[#allocation42_spill] sm:$0xff] }
 0x4dc   : > { %v3778_v31 = vadd.f32 1.0, %v8707_v62  ;;  %v3779_v12 = vadd.f32 1.0, %v8708_v5  ;;  %v8709_v54 = vclamps-f32 %v6967_v23, 1.0  ;;  %v8021_v38 = vpop.eup %4357  ;;  %v3681_v28 = vmul.f32 %v7933_v42, %v3680_v11  ;;  %v8723_v62 = vld [vmem:[#allocation44_spill] sm:$0xff] }
 0x4dd   : > { %vm3723_vm4 = vweird.f32 %v7919_v61  ;;  %v3727_v60 = vand.u32 2147483647, %v7919_v61  ;;  %v8710_v46 = vclamps-f32 %v6975_v21, 1.0  ;;  %v3807_v15 = vmul.f32 %v3775_v8, %v8711_v35 }
 0x4de   : > { %v3780_v63 = vadd.f32 1.0, %v8709_v54  ;;  %v3759_v53 = vmul.f32 %v8021_v38, %v7957_v39  ;;  %v8712_v23 = vclamps-f32 %v7032_v40, 1.0  ;;  %v3808_v24 = vmul.f32 %v3776_v33, %v8713_v57  ;;  %v8721_v33 = vld [vmem:[#allocation27_spill] sm:$0xff] }
 0x4df   : > { %v3781_v29 = vadd.f32 1.0, %v8710_v46  ;;  %v3809_v20 = vmul.f32 %v3777_v36, %v8714_v3  ;;  %v3721_v4 = vmul.f32 %v7959_v52, %v3720_v16  ;;  %v8715_v22 = vclamps-f32 %v7061_v13, 1.0  ;;  %3839 = vst.msk [vmem:[%s8010_s7] sm:$0xff] %vm440_vm1, %v3807_v15  ;;  %v8733_v15 = vld [vmem:[#allocation48_spill] sm:$0xff] }
 0x4e0   : > { %v3782_v7 = vadd.f32 1.0, %v8712_v23  ;;  %v3810_v19 = vmul.f32 %v3778_v31, %v8716_v2  ;;  %v3811_v1 = vmul.f32 %v3779_v12, %v8717_v41  ;;  %vm8042_vm5 = vcmp.eq.f32.partialorder %v3687_v0, 8.507059e+37  ;;  %3840 = vst.msk [vmem:[%s8010_s7 + $0x8] sm:$0xff] %vm440_vm1, %v3808_v24  ;;  %v8735_v24 = vld [vmem:[#allocation49_spill] sm:$0xff] }
 0x4e1   : > { %v3783_v21 = vadd.f32 1.0, %v8715_v22  ;;  %v3729_v11 = vand.u32 2147483648, %v7919_v61  ;;  %v3760_v50 = vsub.f32 1.0, %v3759_v53  ;;  %v8720_v8 = vclamps-f32 %v7120_v27, 1.0  ;;  %3841 = vst.msk [vmem:[%s8010_s7 + $0x10] sm:$0xff] %vm440_vm1, %v3809_v20  ;;  %v8754_v27 = vld [vmem:[#allocation29_spill] sm:$0xff] }
 0x4e2   : > { %v3812_v13 = vmul.f32 %v3780_v63, %v8721_v33  ;;  %v3682_v6 = vadd.f32 %v7933_v42, %v3681_v28  ;;  %v3745_v36 = vmul.f32 %v3744_v30, %v7818_v58  ;;  %v8722_v0 = vclamps-f32 %v7192_v9, 1.0  ;;  %v8727_v63 = vld [vmem:[#allocation45_spill] sm:$0xff]  ;;  %3842 = vst.msk [vmem:[%s8010_s7 + $0x18] sm:$0xff] %vm440_vm1, %v3810_v19  ;;  %v8743_v19 = vld [vmem:[#allocation51_spill] sm:$0xff] }
 0x4e3   : > { %v3784_v43 = vadd.f32 1.0, %v8720_v8  ;;  %v3813_v31 = vmul.f32 %v3781_v29, %v8723_v62  ;;  %vm8059_vm6 = vcmp.eq.f32.partialorder %v3727_v60, 8.507059e+37  ;;  %v3761_v5 = vmul.f32 %v8021_v38, %v3760_v50  ;;  %v8729_v60 = vld [vmem:[#allocation47_spill] sm:$0xff]  ;;  %3843 = vst.msk [vmem:[%s8010_s7 + $0x20] sm:$0xff] %vm440_vm1, %v3811_v1 }
 0x4e4   : > { %v3785_v16 = vadd.f32 1.0, %v8722_v0  ;;  %v8726_v12 = vclamps-f32 %v7215_v34, 1.0  ;;  %v3814_v28 = vmul.f32 %v3782_v7, %v8727_v63  ;;  %v3722_v9 = vadd.f32 %v7959_v52, %v3721_v4  ;;  %3844 = vst.msk [vmem:[%s8010_s7 + $0x28] sm:$0xff] %vm440_vm1, %v3812_v13  ;;  %v8739_v4 = vld [vmem:[#allocation50_spill] sm:$0xff] }
 0x4e5   : > { %vm3724_vm7 = vweird.f32 %v7959_v52  ;;  %v8728_v58 = vclamps-f32 %v7274_v14, 1.0  ;;  %v3815_v46 = vmul.f32 %v3783_v21, %v8729_v60  ;;  %v3762_v29 = vadd.f32 %v8021_v38, %v3761_v5  ;;  %3845 = vst.msk [vmem:[%s8010_s7 + $0x30] sm:$0xff] %vm440_vm1, %v3813_v31  ;;  %v8755_v60 = vld [vmem:[#allocation30_spill] sm:$0xff] }
 0x4e6   : > { %v3786_v54 = vadd.f32 1.0, %v8726_v12  ;;  %vm3764_vm9 = vweird.f32 %v8021_v38  ;;  %v8732_v14 = vclamps-f32 %v7304_v26, 1.0  ;;  %v3816_v53 = vmul.f32 %v3784_v43, %v8733_v15  ;;  %vm8104_vm10 = vmor %vm3723_vm4, %vm3724_vm7  ;;  %3846 = vst.msk [vmem:[%s8010_s7 + $0x38] sm:$0xff] %vm440_vm1, %v3814_v28  ;;  %v8746_v43 = vld [vmem:[#allocation52_spill] sm:$0xff]  ;;  %v8751_v12 = vld [vmem:[#allocation2_spill] sm:$0xff] }
 0x4e7   : > { %v3787_v30 = vadd.f32 1.0, %v8728_v58  ;;  %v3686_v48 = vsel %vm8080_vm8, %v7933_v42, %v3682_v6  ;;  %v3769_v23 = vand.u32 2147483648, %v7957_v39  ;;  %v8734_v7 = vclamps-f32 %v7372_v32, 1.0  ;;  %3847 = vst.msk [vmem:[%s8010_s7 + $0x40] sm:$0xff] %vm440_vm1, %v3815_v46  ;;  %v8747_v6 = vld [vmem:[#allocation28_spill] sm:$0xff] }
 0x4e8   : > { %v3788_v35 = vadd.f32 1.0, %v8732_v14  ;;  %v3817_v3 = vmul.f32 %v3785_v16, %v8735_v24  ;;  %vm3763_vm11 = vweird.f32 %v7957_v39  ;;  %v3767_v42 = vand.u32 2147483647, %v7957_v39  ;;  %3848 = vst.msk [vmem:[%s8010_s7 + $0x48] sm:$0xff] %vm440_vm1, %v3816_v53  ;;  %v8749_v16 = vld [vmem:[#allocation53_spill] sm:$0xff]  ;;  %v8760_v53 = vld [vmem:[#allocation55_spill] sm:$0xff] }
 0x4e9   : > { %v3789_v57 = vadd.f32 1.0, %v8734_v7  ;;  %v8738_v32 = vclamps-f32 %v7425_v37, 1.0  ;;  %v3818_v22 = vmul.f32 %v3786_v54, %v8739_v4  ;;  %v3726_v61 = vsel %vm8104_vm10, %v7959_v52, %v3722_v9  ;;  %vm8120_vm12 = vmor %vm3763_vm11, %vm3764_vm9  ;;  %v8753_v9 = vld [vmem:[#allocation54_spill] sm:$0xff]  ;;  %v8761_v7 = vld [vmem:[#allocation43_spill] sm:$0xff] }
 0x4ea   : > { %v3730_v21 = vor.u32 1.1754944e-38, %v3729_v11  ;;  %v8742_v39 = vclamps-f32 %v7444_v45, 1.0  ;;  %v3819_v41 = vmul.f32 %v3787_v30, %v8743_v19  ;;  %v3746_v1 = vadd.f32 1.1283791, %v3745_v36  ;;  %v8744_v11 = vld [vmem:[#allocation24_spill] sm:$0xff]  ;;  %3849 = vst.msk [vmem:[%s8010_s7 + $0x50] sm:$0xff] %vm440_vm1, %v3817_v3 }
 0x4eb   : > { %v3790_v20 = vadd.f32 1.0, %v8738_v32  ;;  %v3766_v52 = vsel %vm8120_vm12, %v8021_v38, %v3762_v29  ;;  %v8745_v50 = vclamps-f32 %v8744_v11, 1.0  ;;  %v3820_v33 = vmul.f32 %v3788_v35, %v8746_v43  ;;  %3850 = vst.msk [vmem:[%s8010_s7 + $0x58] sm:$0xff] %vm440_vm1, %v3818_v22  ;;  %v8757_v29 = vld [vmem:[#allocation26_spill] sm:$0xff]  ;;  %v8763_v3 = vld [vmem:[#allocation3_spill] sm:$0xff]  ;;  %v8765_v32 = vld [vmem:[#allocation4_spill] sm:$0xff] }
 0x4ec   : > { %v3791_v37 = vadd.f32 1.0, %v8742_v39  ;;  %v3691_v45 = vsel %vm8042_vm5, %v7995_v17, %v3686_v48  ;;  %v3770_v13 = vor.u32 1.1754944e-38, %v3769_v23  ;;  %v8748_v0 = vclamps-f32 %v8747_v6, 1.0  ;;  %3851 = vst.msk [vmem:[%s8010_s7 + $0x60] sm:$0xff] %vm440_vm1, %v3819_v41  ;;  %v8767_v22 = vld [vmem:[#allocation14_spill] sm:$0xff]  ;;  %v8770_v41 = vld [vmem:[#allocation37_spill] sm:$0xff] }
 0x4ed   : > { %v3792_v8 = vadd.f32 1.0, %v8745_v50  ;;  %v3821_v62 = vmul.f32 %v3789_v57, %v8749_v16  ;;  %v3731_v38 = vsel %vm8059_vm6, %v3730_v21, %v3726_v61  ;;  %vm3768_vm13 = vcmp.eq.f32.partialorder %v3767_v42, 8.507059e+37  ;;  %3852 = vst.msk [vmem:[%s8010_s7 + $0x68] sm:$0xff] %vm440_vm1, %v3820_v33 }
 0x4ee   : > { %v3793_v36 = vadd.f32 1.0, %v8748_v0  ;;  %v8750_v31 = vclamps-f32 %v7637_v25, 1.0  ;;  %v3822_v54 = vmul.f32 %v3790_v20, %v8751_v12  ;;  %v3652_v17 = vmul.f32 %v8014_v51, %v7967_v55  ;;  %v8758_v51 = vld [vmem:[#allocation31_spill] sm:$0xff] }
 0x4ef   : > { %v3771_v40 = vsel %vm3768_vm13, %v3770_v13, %v3766_v52  ;;  %v8752_v63 = vclamps-f32 %v7660_v18, 1.0  ;;  %v3823_v58 = vmul.f32 %v3791_v37, %v8753_v9  ;;  %v3692_v25 = vmul.f32 %v3691_v45, %v7983_v56  ;;  %3853 = vst.msk [vmem:[%s8010_s7 + $0x70] sm:$0xff] %vm440_vm1, %v3821_v62  ;;  %v8769_v37 = vld [vmem:[#allocation25_spill] sm:$0xff] }
 0x4f0   : > { %v3794_v5 = vadd.f32 1.0, %v8750_v31  ;;  %v3747_v30 = vmul.f32 %v3746_v1, %v8754_v27  ;;  %v8756_v46 = vclamps-f32 %v8755_v60, 1.0  ;;  %v3824_v14 = vmul.f32 %v3792_v8, %v8757_v29  ;;  %3854 = vst.msk [vmem:[%s8010_s7 + $0x78] sm:$0xff] %vm440_vm1, %v3822_v54  ;;  %v8771_v8 = vld [vmem:[#allocation38_spill] sm:$0xff]  ;;  %v8776_v9 = vld [vmem:[#allocation5_spill] sm:$0xff] }
 0x4f1   : > { %v3795_v28 = vadd.f32 1.0, %v8752_v63  ;;  %v4266_v18 = vclamps-f32 %v7962_v49, 1.0  ;;  %v3732_v55 = vmul.f32 %v3731_v38, %v8017_v44  ;;  %v8759_v35 = vclamps-f32 %v8758_v51, 1.0  ;;  %v8764_v49 = vld [vmem:[#allocation36_spill] sm:$0xff]  ;;  %3855 = vst.msk [vmem:[%s8010_s7 + $0x80] sm:$0xff] %vm440_vm1, %v3823_v58  ;;  %v8774_v31 = vld [vmem:[#allocation6_spill] sm:$0xff] }
 0x4f2   : > { %v3796_v34 = vadd.f32 1.0, %v8756_v46  ;;  %v3825_v48 = vmul.f32 %v3793_v36, %v8760_v53  ;;  %v4267_v56 = vclamps-f32 %v7987_v59, 1.0  ;;  %v3772_v23 = vmul.f32 %v3771_v40, %v3747_v30  ;;  %v8768_v59 = vld [vmem:[#allocation15_spill] sm:$0xff]  ;;  %3856 = vst.msk [vmem:[%s8010_s7 + $0x88] sm:$0xff] %vm440_vm1, %v3824_v14  ;;  %v8773_v36 = vld [vmem:[#allocation22_spill] sm:$0xff] }
 0x4f3   : > { %v3797_v15 = vadd.f32 1.0, %v8759_v35  ;;  %v8762_v57 = vclamps-f32 %v8761_v7, 1.0  ;;  %v3826_v26 = vmul.f32 %v3794_v5, %v8763_v3  ;;  %v2453_v44 = vmul.f32 0.5, %v8764_v49  ;;  %v8777_v27 = vld [vmem:[#allocation10_spill] sm:$0xff] }
 0x4f4   : > { %v4268_v42 = vclamps-f32 %v3652_v17, 1.0  ;;  %v8766_v20 = vclamps-f32 %v8765_v32, 1.0  ;;  %v3827_v61 = vmul.f32 %v3795_v28, %v8767_v22  ;;  %v2454_v21 = vmul.f32 0.5, %v8768_v59  ;;  %3857 = vst.msk [vmem:[%s8010_s7 + $0x90] sm:$0xff] %vm440_vm1, %v3825_v48  ;;  %v8775_v17 = vld [vmem:[#allocation9_spill] sm:$0xff] }
 0x4f5   : > { %v3798_v24 = vadd.f32 1.0, %v8762_v57  ;;  %v4269_v2 = vclamps-f32 %v3692_v25, 1.0  ;;  %v3800_v39 = vadd.f32 1.0, %v4265_v10  ;;  %v3828_v19 = vmul.f32 %v3796_v34, %v8769_v37  ;;  %3858 = vst.msk [vmem:[%s8010_s7 + $0x98] sm:$0xff] %vm440_vm1, %v3826_v26  ;;  %v8772_v10 = vld [vmem:[#allocation18_spill] sm:$0xff] }
 0x4f6   : > { %v3799_v4 = vadd.f32 1.0, %v8766_v20  ;;  %v2455_v1 = vmul.f32 0.5, %v8770_v41  ;;  %v4270_v52 = vclamps-f32 %v3732_v55, 1.0  ;;  %v3801_v11 = vadd.f32 1.0, %v4266_v18  ;;  %3859 = vst.msk [vmem:[%s8010_s7 + $0xa0] sm:$0xff] %vm440_vm1, %v3827_v61 }
 0x4f7   : > { %v3829_v50 = vmul.f32 %v3797_v15, %v2453_v44  ;;  %v2456_v43 = vmul.f32 0.5, %v8771_v8  ;;  %v4271_v33 = vclamps-f32 %v3772_v23, 1.0  ;;  %v3802_v45 = vadd.f32 1.0, %v4267_v56  ;;  %3860 = vst.msk [vmem:[%s8010_s7 + $0xa8] sm:$0xff] %vm440_vm1, %v3828_v19 }
 0x4f8   : > { %v3830_v47 = vmul.f32 %v3798_v24, %v2454_v21  ;;  %v2457_v13 = vmul.f32 0.5, %v8772_v10  ;;  %v3803_v6 = vadd.f32 1.0, %v4268_v42  ;;  %v3831_v0 = vmul.f32 %v3799_v4, %v2455_v1 }
 0x4f9   : > { %v2458_v16 = vmul.f32 0.5, %v8773_v36  ;;  %v3804_v62 = vadd.f32 1.0, %v4269_v2  ;;  %v3832_v38 = vmul.f32 %v3800_v39, %v2456_v43  ;;  %v2459_v5 = vmul.f32 0.5, %v8774_v31  ;;  %3861 = vst.msk [vmem:[%s8010_s7 + $0xb0] sm:$0xff] %vm440_vm1, %v3829_v50 }
 0x4fa   : > { %v3805_v12 = vadd.f32 1.0, %v4270_v52  ;;  %v3833_v54 = vmul.f32 %v3801_v11, %v2457_v13  ;;  %v2460_v40 = vmul.f32 0.5, %v8775_v17  ;;  %v3806_v63 = vadd.f32 1.0, %v4271_v33  ;;  %3862 = vst.msk [vmem:[%s8010_s7 + $0xb8] sm:$0xff] %vm440_vm1, %v3830_v47 }
 0x4fb   : > { %v3834_v28 = vmul.f32 %v3802_v45, %v2458_v16  ;;  %v2461_v58 = vmul.f32 0.5, %v8776_v9  ;;  %v3835_v25 = vmul.f32 %v3803_v6, %v2459_v5  ;;  %3863 = vst.msk [vmem:[%s8010_s7 + $0xc0] sm:$0xff] %vm440_vm1, %v3831_v0  ;;  %v2462_v30 = vmul.f32 0.5, %v8777_v27 }
 0x4fc   : > { %v3836_v60 = vmul.f32 %v3804_v62, %v2460_v40  ;;  %3864 = vst.msk [vmem:[%s8010_s7 + $0xc8] sm:$0xff] %vm440_vm1, %v3832_v38 }
 0x4fd   : > { %v3837_v46 = vmul.f32 %v3805_v12, %v2461_v58  ;;  %3865 = vst.msk [vmem:[%s8010_s7 + $0xd0] sm:$0xff] %vm440_vm1, %v3833_v54  ;;  %v3838_v34 = vmul.f32 %v3806_v63, %v2462_v30 }
 0x4fe   : > { %3866 = vst.msk [vmem:[%s8010_s7 + $0xd8] sm:$0xff] %vm440_vm1, %v3834_v28 }
 0x4ff   : > { %3867 = vst.msk [vmem:[%s8010_s7 + $0xe0] sm:$0xff] %vm440_vm1, %v3835_v25 }
 0x500   : > { %3868 = vst.msk [vmem:[%s8010_s7 + $0xe8] sm:$0xff] %vm440_vm1, %v3836_v60 }
 0x501   : > { %3869 = vst.msk [vmem:[%s8010_s7 + $0xf0] sm:$0xff] %vm440_vm1, %v3837_v46 }
 0x502   : > { %3870 = vst.msk [vmem:[%s8010_s7 + $0xf8] sm:$0xff] %vm440_vm1, %v3838_v34 }
 0x503 PF: > { %s16_s21 = sadd.s32 1, %s4388_s21  }
 0x504   : > { %p13_p4 = scmp.ge.s32.totalorder %s16_s21, 4  }
 0x506   :  { %15 = sbr.rel (!%p13_p4) target bundleno = 1 (0x1), region = 82 }

</bundles_post_ra>
